<compile_context>
chip_gen: v6e
topology: v6e:2x2x1
jax: 0.10.0
libtpu: 0.0.40
codegen_flags: <defaults>
</compile_context>

<pallas_src>
import functools

import jax
import jax.numpy as jnp
from jax.experimental import pallas as pl
from jax.experimental.pallas import tpu as pltpu


def _round_up(x, m):
    return (x + m - 1) // m * m


def _vmem_limit_bytes():
    try:
        cap = int(pltpu.get_tpu_info().vmem_capacity_bytes)
    except Exception:
        cap = 64 * 1024 * 1024          # conservative fallback (v7x per-core VMEM)
    return (cap * 3) // 4               # ~48 MiB on v7x, ~96 MiB on v5e/v6e


def _pick_cout_tile(cout_p, cin_p, lx, l, budget):
    """Largest Cout tile whose double-buffered footprint fits the VMEM budget."""
    def footprint(tc):
        x_b = 2 * cin_p * lx * 2              # double-buffered bf16 input slab
        w_b = 2 * 16 * tc * cin_p * 2         # double-buffered bf16 tap weights
        o_b = 2 * 4 * tc * l * 4              # double-buffered f32 output block
        tmp = 3 * tc * l * 4 + cin_p * l * 2  # live dot results + one tap slice
        return x_b + w_b + o_b + tmp

    tc = cout_p
    while footprint(tc) > budget and tc % 16 == 0 and tc > 8:
        tc //= 2
    return tc


# ---------------------------------------------------------------------------
# Fused kernel: transposed conv (4 output phases, 2x2 taps each) + InstanceNorm
# (biased var, one-pass stats) + ReLU, per (batch sample, Cout tile).
#
#   x_ref:    (Cin_p, Lx)        bf16   flat zero-padded input, Lx >= (H+2)*Wp+2
#   w_ref:    (4, 4, tc, Cin_p)  bf16   w_taps[2py+px, 2dy+dx, co, ci]
#   mask_ref: (1, L)             f32    1 on valid columns (n < W), 0 on junk
#   o_ref:    (4, tc, L)         f32    per-phase normalized output, L = H*Wp
# ---------------------------------------------------------------------------
def _fused_tconv_in_relu_kernel(x_ref, w_ref, mask_ref, o_ref, *, h, wd, wp, eps):
    l = h * wp
    inv_n = 1.0 / (4 * h * wd)

    # --- transposed conv: 9 shifted tap views, 16 small MXU dots --------------
    written = [False] * 4
    for oy in range(3):
        ys = [(py, oy - py) for py in (0, 1) if 0 <= oy - py <= 1]
        for ox in range(3):
            xs = [(px, ox - px) for px in (0, 1) if 0 <= ox - px <= 1]
            start = oy * wp + ox
            tap = x_ref[:, start:start + l]                 # (Cin_p, L) bf16
            for py, dy in ys:
                for px, dx in xs:
                    ph = 2 * py + px
                    t = 2 * dy + dx
                    contrib = jnp.dot(w_ref[ph, t], tap,
                                      preferred_element_type=jnp.float32)
                    if written[ph]:
                        o_ref[ph] += contrib
                    else:
                        o_ref[ph] = contrib
                        written[ph] = True

    # --- InstanceNorm stats over the 4*H*W valid output pixels (one pass) -----
    maskf = mask_ref[...]                                   # (1, L)
    s = None
    q = None
    for ph in range(4):
        ym = o_ref[ph] * maskf                              # junk columns -> 0
        sp = jnp.sum(ym, axis=1, keepdims=True)
        qp = jnp.sum(ym * ym, axis=1, keepdims=True)
        s = sp if s is None else s + sp
        q = qp if q is None else q + qp
    mean = s * inv_n
    var = jnp.maximum(q * inv_n - mean * mean, 0.0)
    rstd = jax.lax.rsqrt(var + eps)

    # --- normalize + ReLU, written back in place -------------------------------
    for ph in range(4):
        o_ref[ph] = jnp.maximum((o_ref[ph] - mean) * rstd, 0.0)


# ---------------------------------------------------------------------------
# TransposeConvBlock forward
# ---------------------------------------------------------------------------
def transpose_conv_block(x, w, *, dropout=False, eps=1e-5):
    """ConvTranspose2d(k=4,s=2,p=1,bias=False) + InstanceNorm2d + [Dropout] + ReLU.

    x: (N, Cin, H, W) f32;  w: (Cin, Cout, 4, 4) f32 (PyTorch ConvTranspose2d layout).
    Returns (N, Cout, 2H, 2W) f32.
    """
    n, cin, h, wd = x.shape
    cin2, cout, kh, kw = w.shape
    assert cin == cin2 and kh == 4 and kw == 4

    # TODO(synk): Dropout(0.5) (when dropout=True) is treated as identity (eval
    # mode); train-mode stochastic masking is not reproduced.
    del dropout

    wp = wd + 2                       # padded row width
    l = h * wp                        # per-phase flat output length (with junk cols)
    cin_p = _round_up(cin, 128)       # bf16 lane dim of the LHS / K of the dot
    cout_p = _round_up(cout, 128)     # MXU output rows
    lx = (h + 3) * wp                 # flat padded input length (>= (h+2)*wp + 2)

    # --- padded, flattened bf16 input: one XLA pad pass + free reshape ---------
    xp = jnp.pad(x.astype(jnp.bfloat16),
                 ((0, 0), (0, cin_p - cin), (1, 2), (1, 1)))
    x_flat = xp.reshape(n, cin_p, lx)

    # --- per-(phase, tap) weight matrices: w_taps[2py+px, 2dy+dx, co, ci] ------
    # out[2m+py, 2n+px] = sum_{ci,dy,dx} xpad[ci, m+py+dy, n+px+dx]
    #                                    * w[ci, co, 3-py-2dy, 3-px-2dx]
    wb = w.astype(jnp.bfloat16)
    rows = []
    for py in (0, 1):
        for px in (0, 1):
            taps = [wb[:, :, 3 - py - 2 * dy, 3 - px - 2 * dx].T
                    for dy in (0, 1) for dx in (0, 1)]      # each (Cout, Cin)
            rows.append(jnp.stack(taps, axis=0))            # (4, Cout, Cin)
    w_taps = jnp.stack(rows, axis=0)                         # (4, 4, Cout, Cin)
    w_taps = jnp.pad(w_taps,
                     ((0, 0), (0, 0), (0, cout_p - cout), (0, cin_p - cin)))

    # --- validity mask over the flat spatial axis (junk cols n >= W) -----------
    col = jnp.arange(l, dtype=jnp.int32) % wp
    mask = (col < wd).astype(jnp.float32).reshape(1, l)

    # --- tiling / grid ordering -------------------------------------------------
    vmem_limit = _vmem_limit_bytes()
    tc = _pick_cout_tile(cout_p, cin_p, lx, l, int(vmem_limit * 0.9))
    n_ct = cout_p // tc

    w_block = 16 * tc * cin_p * 2
    x_samp = cin_p * lx * 2
    traffic_b_outer = n * x_samp + w_block * (n * n_ct if n_ct > 1 else 1)
    traffic_c_outer = n_ct * w_block + x_samp * (n * n_ct if n > 1 else 1)
    c_outer = traffic_c_outer < traffic_b_outer   # keep the bigger operand resident

    kernel = functools.partial(_fused_tconv_in_relu_kernel,
                               h=h, wd=wd, wp=wp, eps=eps)

    if c_outer:
        grid = (n_ct, n)
        x_map = lambda c, b: (b, 0, 0)
        w_map = lambda c, b: (0, 0, c, 0)
        m_map = lambda c, b: (0, 0)
        o_map = lambda c, b: (b, 0, c, 0)
    else:
        grid = (n, n_ct)
        x_map = lambda b, c: (b, 0, 0)
        w_map = lambda b, c: (0, 0, c, 0)
        m_map = lambda b, c: (0, 0)
        o_map = lambda b, c: (b, 0, c, 0)

    y = pl.pallas_call(
        kernel,
        out_shape=jax.ShapeDtypeStruct((n, 4, cout_p, l), jnp.float32),
        grid_spec=pltpu.PrefetchScalarGridSpec(
            num_scalar_prefetch=0,
            grid=grid,
            in_specs=[
                pl.BlockSpec((None, cin_p, lx), x_map),
                pl.BlockSpec((4, 4, tc, cin_p), w_map),
                pl.BlockSpec((1, l), m_map),
            ],
            out_specs=pl.BlockSpec((None, 4, tc, l), o_map),
        ),
        compiler_params=pltpu.CompilerParams(
            dimension_semantics=("parallel", "parallel"),
            vmem_limit_bytes=int(vmem_limit)),
    )(x_flat, w_taps, mask)

    # --- interleave the 4 phases back into (N, Cout, 2H, 2W): one XLA copy pass -
    y = y[:, :, :cout, :].reshape(n, 2, 2, cout, h, wp)      # (b, py, px, co, m, n)
    y = jnp.transpose(y, (0, 3, 4, 1, 5, 2))                 # (b, co, m, py, n, px)
    return y[:, :, :, :, :wd, :].reshape(n, cout, 2 * h, 2 * wd)


if __name__ == "__main__":
    key = jax.random.PRNGKey(0)
    kx, kw2 = jax.random.split(key)
    N, Cin, Cout, H, W = 2, 4, 8, 16, 16
    x = jax.random.normal(kx, (N, Cin, H, W), jnp.float32)
    w = 0.1 * jax.random.normal(kw2, (Cin, Cout, 4, 4), jnp.float32)

    y = transpose_conv_block(x, w, dropout=True)
    y = jax.block_until_ready(y)
    assert y.shape == (N, Cout, 2 * H, 2 * W)
    assert bool(jnp.all(jnp.isfinite(y)))

    # f32 XLA reference: ConvTranspose2d == lhs-dilated conv with flipped kernel.
    ref_conv = jax.lax.conv_general_dilated(
        x, jnp.flip(w, (2, 3)).transpose(1, 0, 2, 3),
        window_strides=(1, 1), padding=((2, 2), (2, 2)), lhs_dilation=(2, 2),
        dimension_numbers=("NCHW", "OIHW", "NCHW"))
    mean = ref_conv.mean(axis=(2, 3), keepdims=True)
    var = ref_conv.var(axis=(2, 3), keepdims=True)
    ref = jnp.maximum((ref_conv - mean) * jax.lax.rsqrt(var + 1e-5), 0.0)
    err = float(jnp.max(jnp.abs(y - ref)))
    assert err < 0.1, f"max abs err {err}"
    print("KERNEL_OK")
</pallas_src>

<mosaic_0001>
module attributes {stable_mosaic.version = 11 : i64} {
  func.func @_fused_tconv_in_relu_kernel(%arg0: i32, %arg1: i32, %arg2: memref<1x128x342xbf16, #tpu.memory_space<vmem>>, %arg3: memref<4x4x128x128xbf16, #tpu.memory_space<vmem>>, %arg4: memref<1x288xf32, #tpu.memory_space<vmem>>, %arg5: memref<1x4x128x288xf32, #tpu.memory_space<vmem>>) attributes {dimension_semantics = [#tpu.dimension_semantics<parallel>, #tpu.dimension_semantics<parallel>], iteration_bounds = array<i64: 2, 1>, scalar_prefetch = 0 : i64, scratch_operands = 0 : i64, tpu.core_type = #tpu.core_type<tc>, window_params = [{transform_indices = @transform_0, window_bounds = array<i64: 1, 128, 342>}, {transform_indices = @transform_1, window_bounds = array<i64: 4, 4, 128, 128>}, {pipeline_mode = #tpu.pipeline_mode<synchronous>, transform_indices = @transform_2, window_bounds = array<i64: 1, 288>}, {transform_indices = @transform_3, window_bounds = array<i64: 1, 4, 128, 288>}]} {
    %c0 = arith.constant 0 : index
    %c0_0 = arith.constant 0 : index
    %c0_1 = arith.constant 0 : index
    %0 = vector.load %arg2[%c0, %c0_0, %c0_1] : memref<1x128x342xbf16, #tpu.memory_space<vmem>>, vector<1x128x288xbf16>
    %1 = vector.shape_cast %0 : vector<1x128x288xbf16> to vector<128x288xbf16>
    %c0_2 = arith.constant 0 : index
    %c0_3 = arith.constant 0 : index
    %c0_4 = arith.constant 0 : index
    %c0_5 = arith.constant 0 : index
    %2 = vector.load %arg3[%c0_2, %c0_3, %c0_4, %c0_5] : memref<4x4x128x128xbf16, #tpu.memory_space<vmem>>, vector<1x1x128x128xbf16>
    %3 = vector.shape_cast %2 : vector<1x1x128x128xbf16> to vector<128x128xbf16>
    %cst = arith.constant dense<0.000000e+00> : vector<128x288xf32>
    %4 = tpu.matmul %3, %1, %cst {dimension_numbers = #tpu.dot_dimension_numbers<[1], [0], [0], [1], [0, 0, 1, 1], [], []>} : vector<128x128xbf16>, vector<128x288xbf16>, vector<128x288xf32> -> vector<128x288xf32>
    %c0_6 = arith.constant 0 : index
    %c0_7 = arith.constant 0 : index
    %c0_8 = arith.constant 0 : index
    %c0_9 = arith.constant 0 : index
    %5 = vector.load %arg5[%c0_6, %c0_7, %c0_8, %c0_9] : memref<1x4x128x288xf32, #tpu.memory_space<vmem>>, vector<1x1x128x288xf32>
    %6 = vector.shape_cast %5 : vector<1x1x128x288xf32> to vector<128x288xf32>
    %7 = vector.shape_cast %4 : vector<128x288xf32> to vector<1x1x128x288xf32>
    tpu.vector_store %arg5[%c0_6, %c0_7, %c0_8, %c0_9], %7 {strides = array<i32>} : memref<1x4x128x288xf32, #tpu.memory_space<vmem>>, vector<1x1x128x288xf32>,
    %c0_10 = arith.constant 0 : index
    %c0_11 = arith.constant 0 : index
    %c1 = arith.constant 1 : index
    %8 = vector.load %arg2[%c0_10, %c0_11, %c1] : memref<1x128x342xbf16, #tpu.memory_space<vmem>>, vector<1x128x288xbf16>
    %9 = vector.shape_cast %8 : vector<1x128x288xbf16> to vector<128x288xbf16>
    %c0_12 = arith.constant 0 : index
    %c1_13 = arith.constant 1 : index
    %c0_14 = arith.constant 0 : index
    %c0_15 = arith.constant 0 : index
    %10 = vector.load %arg3[%c0_12, %c1_13, %c0_14, %c0_15] : memref<4x4x128x128xbf16, #tpu.memory_space<vmem>>, vector<1x1x128x128xbf16>
    %11 = vector.shape_cast %10 : vector<1x1x128x128xbf16> to vector<128x128xbf16>
    %cst_16 = arith.constant dense<0.000000e+00> : vector<128x288xf32>
    %12 = tpu.matmul %11, %9, %cst_16 {dimension_numbers = #tpu.dot_dimension_numbers<[1], [0], [0], [1], [0, 0, 1, 1], [], []>} : vector<128x128xbf16>, vector<128x288xbf16>, vector<128x288xf32> -> vector<128x288xf32>
    %c0_17 = arith.constant 0 : index
    %c0_18 = arith.constant 0 : index
    %c0_19 = arith.constant 0 : index
    %c0_20 = arith.constant 0 : index
    %13 = vector.load %arg5[%c0_17, %c0_18, %c0_19, %c0_20] : memref<1x4x128x288xf32, #tpu.memory_space<vmem>>, vector<1x1x128x288xf32>
    %14 = vector.shape_cast %13 : vector<1x1x128x288xf32> to vector<128x288xf32>
    %15 = arith.addf %14, %12 : vector<128x288xf32>
    %c0_21 = arith.constant 0 : index
    %c0_22 = arith.constant 0 : index
    %c0_23 = arith.constant 0 : index
    %c0_24 = arith.constant 0 : index
    %16 = vector.load %arg5[%c0_21, %c0_22, %c0_23, %c0_24] : memref<1x4x128x288xf32, #tpu.memory_space<vmem>>, vector<1x1x128x288xf32>
    %17 = vector.shape_cast %16 : vector<1x1x128x288xf32> to vector<128x288xf32>
    %18 = vector.shape_cast %15 : vector<128x288xf32> to vector<1x1x128x288xf32>
    tpu.vector_store %arg5[%c0_21, %c0_22, %c0_23, %c0_24], %18 {strides = array<i32>} : memref<1x4x128x288xf32, #tpu.memory_space<vmem>>, vector<1x1x128x288xf32>,
    %c1_25 = arith.constant 1 : index
    %c0_26 = arith.constant 0 : index
    %c0_27 = arith.constant 0 : index
    %c0_28 = arith.constant 0 : index
    %19 = vector.load %arg3[%c1_25, %c0_26, %c0_27, %c0_28] : memref<4x4x128x128xbf16, #tpu.memory_space<vmem>>, vector<1x1x128x128xbf16>
    %20 = vector.shape_cast %19 : vector<1x1x128x128xbf16> to vector<128x128xbf16>
    %cst_29 = arith.constant dense<0.000000e+00> : vector<128x288xf32>
    %21 = tpu.matmul %20, %9, %cst_29 {dimension_numbers = #tpu.dot_dimension_numbers<[1], [0], [0], [1], [0, 0, 1, 1], [], []>} : vector<128x128xbf16>, vector<128x288xbf16>, vector<128x288xf32> -> vector<128x288xf32>
    %c0_30 = arith.constant 0 : index
    %c1_31 = arith.constant 1 : index
    %c0_32 = arith.constant 0 : index
    %c0_33 = arith.constant 0 : index
    %22 = vector.load %arg5[%c0_30, %c1_31, %c0_32, %c0_33] : memref<1x4x128x288xf32, #tpu.memory_space<vmem>>, vector<1x1x128x288xf32>
    %23 = vector.shape_cast %22 : vector<1x1x128x288xf32> to vector<128x288xf32>
    %24 = vector.shape_cast %21 : vector<128x288xf32> to vector<1x1x128x288xf32>
    tpu.vector_store %arg5[%c0_30, %c1_31, %c0_32, %c0_33], %24 {strides = array<i32>} : memref<1x4x128x288xf32, #tpu.memory_space<vmem>>, vector<1x1x128x288xf32>,
    %c0_34 = arith.constant 0 : index
    %c0_35 = arith.constant 0 : index
    %c2 = arith.constant 2 : index
    %25 = vector.load %arg2[%c0_34, %c0_35, %c2] : memref<1x128x342xbf16, #tpu.memory_space<vmem>>, vector<1x128x288xbf16>
    %26 = vector.shape_cast %25 : vector<1x128x288xbf16> to vector<128x288xbf16>
    %c1_36 = arith.constant 1 : index
    %c1_37 = arith.constant 1 : index
    %c0_38 = arith.constant 0 : index
    %c0_39 = arith.constant 0 : index
    %27 = vector.load %arg3[%c1_36, %c1_37, %c0_38, %c0_39] : memref<4x4x128x128xbf16, #tpu.memory_space<vmem>>, vector<1x1x128x128xbf16>
    %28 = vector.shape_cast %27 : vector<1x1x128x128xbf16> to vector<128x128xbf16>
    %cst_40 = arith.constant dense<0.000000e+00> : vector<128x288xf32>
    %29 = tpu.matmul %28, %26, %cst_40 {dimension_numbers = #tpu.dot_dimension_numbers<[1], [0], [0], [1], [0, 0, 1, 1], [], []>} : vector<128x128xbf16>, vector<128x288xbf16>, vector<128x288xf32> -> vector<128x288xf32>
    %c0_41 = arith.constant 0 : index
    %c1_42 = arith.constant 1 : index
    %c0_43 = arith.constant 0 : index
    %c0_44 = arith.constant 0 : index
    %30 = vector.load %arg5[%c0_41, %c1_42, %c0_43, %c0_44] : memref<1x4x128x288xf32, #tpu.memory_space<vmem>>, vector<1x1x128x288xf32>
    %31 = vector.shape_cast %30 : vector<1x1x128x288xf32> to vector<128x288xf32>
    %32 = arith.addf %31, %29 : vector<128x288xf32>
    %c0_45 = arith.constant 0 : index
    %c1_46 = arith.constant 1 : index
    %c0_47 = arith.constant 0 : index
    %c0_48 = arith.constant 0 : index
    %33 = vector.load %arg5[%c0_45, %c1_46, %c0_47, %c0_48] : memref<1x4x128x288xf32, #tpu.memory_space<vmem>>, vector<1x1x128x288xf32>
    %34 = vector.shape_cast %33 : vector<1x1x128x288xf32> to vector<128x288xf32>
    %35 = vector.shape_cast %32 : vector<128x288xf32> to vector<1x1x128x288xf32>
    tpu.vector_store %arg5[%c0_45, %c1_46, %c0_47, %c0_48], %35 {strides = array<i32>} : memref<1x4x128x288xf32, #tpu.memory_space<vmem>>, vector<1x1x128x288xf32>,
    %c0_49 = arith.constant 0 : index
    %c0_50 = arith.constant 0 : index
    %c18 = arith.constant 18 : index
    %36 = vector.load %arg2[%c0_49, %c0_50, %c18] : memref<1x128x342xbf16, #tpu.memory_space<vmem>>, vector<1x128x288xbf16>
    %37 = vector.shape_cast %36 : vector<1x128x288xbf16> to vector<128x288xbf16>
    %c0_51 = arith.constant 0 : index
    %c2_52 = arith.constant 2 : index
    %c0_53 = arith.constant 0 : index
    %c0_54 = arith.constant 0 : index
    %38 = vector.load %arg3[%c0_51, %c2_52, %c0_53, %c0_54] : memref<4x4x128x128xbf16, #tpu.memory_space<vmem>>, vector<1x1x128x128xbf16>
    %39 = vector.shape_cast %38 : vector<1x1x128x128xbf16> to vector<128x128xbf16>
    %cst_55 = arith.constant dense<0.000000e+00> : vector<128x288xf32>
    %40 = tpu.matmul %39, %37, %cst_55 {dimension_numbers = #tpu.dot_dimension_numbers<[1], [0], [0], [1], [0, 0, 1, 1], [], []>} : vector<128x128xbf16>, vector<128x288xbf16>, vector<128x288xf32> -> vector<128x288xf32>
    %c0_56 = arith.constant 0 : index
    %c0_57 = arith.constant 0 : index
    %c0_58 = arith.constant 0 : index
    %c0_59 = arith.constant 0 : index
    %41 = vector.load %arg5[%c0_56, %c0_57, %c0_58, %c0_59] : memref<1x4x128x288xf32, #tpu.memory_space<vmem>>, vector<1x1x128x288xf32>
    %42 = vector.shape_cast %41 : vector<1x1x128x288xf32> to vector<128x288xf32>
    %43 = arith.addf %42, %40 : vector<128x288xf32>
    %c0_60 = arith.constant 0 : index
    %c0_61 = arith.constant 0 : index
    %c0_62 = arith.constant 0 : index
    %c0_63 = arith.constant 0 : index
    %44 = vector.load %arg5[%c0_60, %c0_61, %c0_62, %c0_63] : memref<1x4x128x288xf32, #tpu.memory_space<vmem>>, vector<1x1x128x288xf32>
    %45 = vector.shape_cast %44 : vector<1x1x128x288xf32> to vector<128x288xf32>
    %46 = vector.shape_cast %43 : vector<128x288xf32> to vector<1x1x128x288xf32>
    tpu.vector_store %arg5[%c0_60, %c0_61, %c0_62, %c0_63], %46 {strides = array<i32>} : memref<1x4x128x288xf32, #tpu.memory_space<vmem>>, vector<1x1x128x288xf32>,
    %c2_64 = arith.constant 2 : index
    %c0_65 = arith.constant 0 : index
    %c0_66 = arith.constant 0 : index
    %c0_67 = arith.constant 0 : index
    %47 = vector.load %arg3[%c2_64, %c0_65, %c0_66, %c0_67] : memref<4x4x128x128xbf16, #tpu.memory_space<vmem>>, vector<1x1x128x128xbf16>
    %48 = vector.shape_cast %47 : vector<1x1x128x128xbf16> to vector<128x128xbf16>
    %cst_68 = arith.constant dense<0.000000e+00> : vector<128x288xf32>
    %49 = tpu.matmul %48, %37, %cst_68 {dimension_numbers = #tpu.dot_dimension_numbers<[1], [0], [0], [1], [0, 0, 1, 1], [], []>} : vector<128x128xbf16>, vector<128x288xbf16>, vector<128x288xf32> -> vector<128x288xf32>
    %c0_69 = arith.constant 0 : index
    %c2_70 = arith.constant 2 : index
    %c0_71 = arith.constant 0 : index
    %c0_72 = arith.constant 0 : index
    %50 = vector.load %arg5[%c0_69, %c2_70, %c0_71, %c0_72] : memref<1x4x128x288xf32, #tpu.memory_space<vmem>>, vector<1x1x128x288xf32>
    %51 = vector.shape_cast %50 : vector<1x1x128x288xf32> to vector<128x288xf32>
    %52 = vector.shape_cast %49 : vector<128x288xf32> to vector<1x1x128x288xf32>
    tpu.vector_store %arg5[%c0_69, %c2_70, %c0_71, %c0_72], %52 {strides = array<i32>} : memref<1x4x128x288xf32, #tpu.memory_space<vmem>>, vector<1x1x128x288xf32>,
    %c0_73 = arith.constant 0 : index
    %c0_74 = arith.constant 0 : index
    %c19 = arith.constant 19 : index
    %53 = vector.load %arg2[%c0_73, %c0_74, %c19] : memref<1x128x342xbf16, #tpu.memory_space<vmem>>, vector<1x128x288xbf16>
    %54 = vector.shape_cast %53 : vector<1x128x288xbf16> to vector<128x288xbf16>
    %c0_75 = arith.constant 0 : index
    %c3 = arith.constant 3 : index
    %c0_76 = arith.constant 0 : index
    %c0_77 = arith.constant 0 : index
    %55 = vector.load %arg3[%c0_75, %c3, %c0_76, %c0_77] : memref<4x4x128x128xbf16, #tpu.memory_space<vmem>>, vector<1x1x128x128xbf16>
    %56 = vector.shape_cast %55 : vector<1x1x128x128xbf16> to vector<128x128xbf16>
    %cst_78 = arith.constant dense<0.000000e+00> : vector<128x288xf32>
    %57 = tpu.matmul %56, %54, %cst_78 {dimension_numbers = #tpu.dot_dimension_numbers<[1], [0], [0], [1], [0, 0, 1, 1], [], []>} : vector<128x128xbf16>, vector<128x288xbf16>, vector<128x288xf32> -> vector<128x288xf32>
    %c0_79 = arith.constant 0 : index
    %c0_80 = arith.constant 0 : index
    %c0_81 = arith.constant 0 : index
    %c0_82 = arith.constant 0 : index
    %58 = vector.load %arg5[%c0_79, %c0_80, %c0_81, %c0_82] : memref<1x4x128x288xf32, #tpu.memory_space<vmem>>, vector<1x1x128x288xf32>
    %59 = vector.shape_cast %58 : vector<1x1x128x288xf32> to vector<128x288xf32>
    %60 = arith.addf %59, %57 : vector<128x288xf32>
    %c0_83 = arith.constant 0 : index
    %c0_84 = arith.constant 0 : index
    %c0_85 = arith.constant 0 : index
    %c0_86 = arith.constant 0 : index
    %61 = vector.load %arg5[%c0_83, %c0_84, %c0_85, %c0_86] : memref<1x4x128x288xf32, #tpu.memory_space<vmem>>, vector<1x1x128x288xf32>
    %62 = vector.shape_cast %61 : vector<1x1x128x288xf32> to vector<128x288xf32>
    %63 = vector.shape_cast %60 : vector<128x288xf32> to vector<1x1x128x288xf32>
    tpu.vector_store %arg5[%c0_83, %c0_84, %c0_85, %c0_86], %63 {strides = array<i32>} : memref<1x4x128x288xf32, #tpu.memory_space<vmem>>, vector<1x1x128x288xf32>,
    %c1_87 = arith.constant 1 : index
    %c2_88 = arith.constant 2 : index
    %c0_89 = arith.constant 0 : index
    %c0_90 = arith.constant 0 : index
    %64 = vector.load %arg3[%c1_87, %c2_88, %c0_89, %c0_90] : memref<4x4x128x128xbf16, #tpu.memory_space<vmem>>, vector<1x1x128x128xbf16>
    %65 = vector.shape_cast %64 : vector<1x1x128x128xbf16> to vector<128x128xbf16>
    %cst_91 = arith.constant dense<0.000000e+00> : vector<128x288xf32>
    %66 = tpu.matmul %65, %54, %cst_91 {dimension_numbers = #tpu.dot_dimension_numbers<[1], [0], [0], [1], [0, 0, 1, 1], [], []>} : vector<128x128xbf16>, vector<128x288xbf16>, vector<128x288xf32> -> vector<128x288xf32>
    %c0_92 = arith.constant 0 : index
    %c1_93 = arith.constant 1 : index
    %c0_94 = arith.constant 0 : index
    %c0_95 = arith.constant 0 : index
    %67 = vector.load %arg5[%c0_92, %c1_93, %c0_94, %c0_95] : memref<1x4x128x288xf32, #tpu.memory_space<vmem>>, vector<1x1x128x288xf32>
    %68 = vector.shape_cast %67 : vector<1x1x128x288xf32> to vector<128x288xf32>
    %69 = arith.addf %68, %66 : vector<128x288xf32>
    %c0_96 = arith.constant 0 : index
    %c1_97 = arith.constant 1 : index
    %c0_98 = arith.constant 0 : index
    %c0_99 = arith.constant 0 : index
    %70 = vector.load %arg5[%c0_96, %c1_97, %c0_98, %c0_99] : memref<1x4x128x288xf32, #tpu.memory_space<vmem>>, vector<1x1x128x288xf32>
    %71 = vector.shape_cast %70 : vector<1x1x128x288xf32> to vector<128x288xf32>
    %72 = vector.shape_cast %69 : vector<128x288xf32> to vector<1x1x128x288xf32>
    tpu.vector_store %arg5[%c0_96, %c1_97, %c0_98, %c0_99], %72 {strides = array<i32>} : memref<1x4x128x288xf32, #tpu.memory_space<vmem>>, vector<1x1x128x288xf32>,
    %c2_100 = arith.constant 2 : index
    %c1_101 = arith.constant 1 : index
    %c0_102 = arith.constant 0 : index
    %c0_103 = arith.constant 0 : index
    %73 = vector.load %arg3[%c2_100, %c1_101, %c0_102, %c0_103] : memref<4x4x128x128xbf16, #tpu.memory_space<vmem>>, vector<1x1x128x128xbf16>
    %74 = vector.shape_cast %73 : vector<1x1x128x128xbf16> to vector<128x128xbf16>
    %cst_104 = arith.constant dense<0.000000e+00> : vector<128x288xf32>
    %75 = tpu.matmul %74, %54, %cst_104 {dimension_numbers = #tpu.dot_dimension_numbers<[1], [0], [0], [1], [0, 0, 1, 1], [], []>} : vector<128x128xbf16>, vector<128x288xbf16>, vector<128x288xf32> -> vector<128x288xf32>
    %c0_105 = arith.constant 0 : index
    %c2_106 = arith.constant 2 : index
    %c0_107 = arith.constant 0 : index
    %c0_108 = arith.constant 0 : index
    %76 = vector.load %arg5[%c0_105, %c2_106, %c0_107, %c0_108] : memref<1x4x128x288xf32, #tpu.memory_space<vmem>>, vector<1x1x128x288xf32>
    %77 = vector.shape_cast %76 : vector<1x1x128x288xf32> to vector<128x288xf32>
    %78 = arith.addf %77, %75 : vector<128x288xf32>
    %c0_109 = arith.constant 0 : index
    %c2_110 = arith.constant 2 : index
    %c0_111 = arith.constant 0 : index
    %c0_112 = arith.constant 0 : index
    %79 = vector.load %arg5[%c0_109, %c2_110, %c0_111, %c0_112] : memref<1x4x128x288xf32, #tpu.memory_space<vmem>>, vector<1x1x128x288xf32>
    %80 = vector.shape_cast %79 : vector<1x1x128x288xf32> to vector<128x288xf32>
    %81 = vector.shape_cast %78 : vector<128x288xf32> to vector<1x1x128x288xf32>
    tpu.vector_store %arg5[%c0_109, %c2_110, %c0_111, %c0_112], %81 {strides = array<i32>} : memref<1x4x128x288xf32, #tpu.memory_space<vmem>>, vector<1x1x128x288xf32>,
    %c3_113 = arith.constant 3 : index
    %c0_114 = arith.constant 0 : index
    %c0_115 = arith.constant 0 : index
    %c0_116 = arith.constant 0 : index
    %82 = vector.load %arg3[%c3_113, %c0_114, %c0_115, %c0_116] : memref<4x4x128x128xbf16, #tpu.memory_space<vmem>>, vector<1x1x128x128xbf16>
    %83 = vector.shape_cast %82 : vector<1x1x128x128xbf16> to vector<128x128xbf16>
    %cst_117 = arith.constant dense<0.000000e+00> : vector<128x288xf32>
    %84 = tpu.matmul %83, %54, %cst_117 {dimension_numbers = #tpu.dot_dimension_numbers<[1], [0], [0], [1], [0, 0, 1, 1], [], []>} : vector<128x128xbf16>, vector<128x288xbf16>, vector<128x288xf32> -> vector<128x288xf32>
    %c0_118 = arith.constant 0 : index
    %c3_119 = arith.constant 3 : index
    %c0_120 = arith.constant 0 : index
    %c0_121 = arith.constant 0 : index
    %85 = vector.load %arg5[%c0_118, %c3_119, %c0_120, %c0_121] : memref<1x4x128x288xf32, #tpu.memory_space<vmem>>, vector<1x1x128x288xf32>
    %86 = vector.shape_cast %85 : vector<1x1x128x288xf32> to vector<128x288xf32>
    %87 = vector.shape_cast %84 : vector<128x288xf32> to vector<1x1x128x288xf32>
    tpu.vector_store %arg5[%c0_118, %c3_119, %c0_120, %c0_121], %87 {strides = array<i32>} : memref<1x4x128x288xf32, #tpu.memory_space<vmem>>, vector<1x1x128x288xf32>,
    %c0_122 = arith.constant 0 : index
    %c0_123 = arith.constant 0 : index
    %c20 = arith.constant 20 : index
    %88 = vector.load %arg2[%c0_122, %c0_123, %c20] : memref<1x128x342xbf16, #tpu.memory_space<vmem>>, vector<1x128x288xbf16>
    %89 = vector.shape_cast %88 : vector<1x128x288xbf16> to vector<128x288xbf16>
    %c1_124 = arith.constant 1 : index
    %c3_125 = arith.constant 3 : index
    %c0_126 = arith.constant 0 : index
    %c0_127 = arith.constant 0 : index
    %90 = vector.load %arg3[%c1_124, %c3_125, %c0_126, %c0_127] : memref<4x4x128x128xbf16, #tpu.memory_space<vmem>>, vector<1x1x128x128xbf16>
    %91 = vector.shape_cast %90 : vector<1x1x128x128xbf16> to vector<128x128xbf16>
    %cst_128 = arith.constant dense<0.000000e+00> : vector<128x288xf32>
    %92 = tpu.matmul %91, %89, %cst_128 {dimension_numbers = #tpu.dot_dimension_numbers<[1], [0], [0], [1], [0, 0, 1, 1], [], []>} : vector<128x128xbf16>, vector<128x288xbf16>, vector<128x288xf32> -> vector<128x288xf32>
    %c0_129 = arith.constant 0 : index
    %c1_130 = arith.constant 1 : index
    %c0_131 = arith.constant 0 : index
    %c0_132 = arith.constant 0 : index
    %93 = vector.load %arg5[%c0_129, %c1_130, %c0_131, %c0_132] : memref<1x4x128x288xf32, #tpu.memory_space<vmem>>, vector<1x1x128x288xf32>
    %94 = vector.shape_cast %93 : vector<1x1x128x288xf32> to vector<128x288xf32>
    %95 = arith.addf %94, %92 : vector<128x288xf32>
    %c0_133 = arith.constant 0 : index
    %c1_134 = arith.constant 1 : index
    %c0_135 = arith.constant 0 : index
    %c0_136 = arith.constant 0 : index
    %96 = vector.load %arg5[%c0_133, %c1_134, %c0_135, %c0_136] : memref<1x4x128x288xf32, #tpu.memory_space<vmem>>, vector<1x1x128x288xf32>
    %97 = vector.shape_cast %96 : vector<1x1x128x288xf32> to vector<128x288xf32>
    %98 = vector.shape_cast %95 : vector<128x288xf32> to vector<1x1x128x288xf32>
    tpu.vector_store %arg5[%c0_133, %c1_134, %c0_135, %c0_136], %98 {strides = array<i32>} : memref<1x4x128x288xf32, #tpu.memory_space<vmem>>, vector<1x1x128x288xf32>,
    %c3_137 = arith.constant 3 : index
    %c1_138 = arith.constant 1 : index
    %c0_139 = arith.constant 0 : index
    %c0_140 = arith.constant 0 : index
    %99 = vector.load %arg3[%c3_137, %c1_138, %c0_139, %c0_140] : memref<4x4x128x128xbf16, #tpu.memory_space<vmem>>, vector<1x1x128x128xbf16>
    %100 = vector.shape_cast %99 : vector<1x1x128x128xbf16> to vector<128x128xbf16>
    %cst_141 = arith.constant dense<0.000000e+00> : vector<128x288xf32>
    %101 = tpu.matmul %100, %89, %cst_141 {dimension_numbers = #tpu.dot_dimension_numbers<[1], [0], [0], [1], [0, 0, 1, 1], [], []>} : vector<128x128xbf16>, vector<128x288xbf16>, vector<128x288xf32> -> vector<128x288xf32>
    %c0_142 = arith.constant 0 : index
    %c3_143 = arith.constant 3 : index
    %c0_144 = arith.constant 0 : index
    %c0_145 = arith.constant 0 : index
    %102 = vector.load %arg5[%c0_142, %c3_143, %c0_144, %c0_145] : memref<1x4x128x288xf32, #tpu.memory_space<vmem>>, vector<1x1x128x288xf32>
    %103 = vector.shape_cast %102 : vector<1x1x128x288xf32> to vector<128x288xf32>
    %104 = arith.addf %103, %101 : vector<128x288xf32>
    %c0_146 = arith.constant 0 : index
    %c3_147 = arith.constant 3 : index
    %c0_148 = arith.constant 0 : index
    %c0_149 = arith.constant 0 : index
    %105 = vector.load %arg5[%c0_146, %c3_147, %c0_148, %c0_149] : memref<1x4x128x288xf32, #tpu.memory_space<vmem>>, vector<1x1x128x288xf32>
    %106 = vector.shape_cast %105 : vector<1x1x128x288xf32> to vector<128x288xf32>
    %107 = vector.shape_cast %104 : vector<128x288xf32> to vector<1x1x128x288xf32>
    tpu.vector_store %arg5[%c0_146, %c3_147, %c0_148, %c0_149], %107 {strides = array<i32>} : memref<1x4x128x288xf32, #tpu.memory_space<vmem>>, vector<1x1x128x288xf32>,
    %c0_150 = arith.constant 0 : index
    %c0_151 = arith.constant 0 : index
    %c36 = arith.constant 36 : index
    %108 = vector.load %arg2[%c0_150, %c0_151, %c36] : memref<1x128x342xbf16, #tpu.memory_space<vmem>>, vector<1x128x288xbf16>
    %109 = vector.shape_cast %108 : vector<1x128x288xbf16> to vector<128x288xbf16>
    %c2_152 = arith.constant 2 : index
    %c2_153 = arith.constant 2 : index
    %c0_154 = arith.constant 0 : index
    %c0_155 = arith.constant 0 : index
    %110 = vector.load %arg3[%c2_152, %c2_153, %c0_154, %c0_155] : memref<4x4x128x128xbf16, #tpu.memory_space<vmem>>, vector<1x1x128x128xbf16>
    %111 = vector.shape_cast %110 : vector<1x1x128x128xbf16> to vector<128x128xbf16>
    %cst_156 = arith.constant dense<0.000000e+00> : vector<128x288xf32>
    %112 = tpu.matmul %111, %109, %cst_156 {dimension_numbers = #tpu.dot_dimension_numbers<[1], [0], [0], [1], [0, 0, 1, 1], [], []>} : vector<128x128xbf16>, vector<128x288xbf16>, vector<128x288xf32> -> vector<128x288xf32>
    %c0_157 = arith.constant 0 : index
    %c2_158 = arith.constant 2 : index
    %c0_159 = arith.constant 0 : index
    %c0_160 = arith.constant 0 : index
    %113 = vector.load %arg5[%c0_157, %c2_158, %c0_159, %c0_160] : memref<1x4x128x288xf32, #tpu.memory_space<vmem>>, vector<1x1x128x288xf32>
    %114 = vector.shape_cast %113 : vector<1x1x128x288xf32> to vector<128x288xf32>
    %115 = arith.addf %114, %112 : vector<128x288xf32>
    %c0_161 = arith.constant 0 : index
    %c2_162 = arith.constant 2 : index
    %c0_163 = arith.constant 0 : index
    %c0_164 = arith.constant 0 : index
    %116 = vector.load %arg5[%c0_161, %c2_162, %c0_163, %c0_164] : memref<1x4x128x288xf32, #tpu.memory_space<vmem>>, vector<1x1x128x288xf32>
    %117 = vector.shape_cast %116 : vector<1x1x128x288xf32> to vector<128x288xf32>
    %118 = vector.shape_cast %115 : vector<128x288xf32> to vector<1x1x128x288xf32>
    tpu.vector_store %arg5[%c0_161, %c2_162, %c0_163, %c0_164], %118 {strides = array<i32>} : memref<1x4x128x288xf32, #tpu.memory_space<vmem>>, vector<1x1x128x288xf32>,
    %c0_165 = arith.constant 0 : index
    %c0_166 = arith.constant 0 : index
    %c37 = arith.constant 37 : index
    %119 = vector.load %arg2[%c0_165, %c0_166, %c37] : memref<1x128x342xbf16, #tpu.memory_space<vmem>>, vector<1x128x288xbf16>
    %120 = vector.shape_cast %119 : vector<1x128x288xbf16> to vector<128x288xbf16>
    %c2_167 = arith.constant 2 : index
    %c3_168 = arith.constant 3 : index
    %c0_169 = arith.constant 0 : index
    %c0_170 = arith.constant 0 : index
    %121 = vector.load %arg3[%c2_167, %c3_168, %c0_169, %c0_170] : memref<4x4x128x128xbf16, #tpu.memory_space<vmem>>, vector<1x1x128x128xbf16>
    %122 = vector.shape_cast %121 : vector<1x1x128x128xbf16> to vector<128x128xbf16>
    %cst_171 = arith.constant dense<0.000000e+00> : vector<128x288xf32>
    %123 = tpu.matmul %122, %120, %cst_171 {dimension_numbers = #tpu.dot_dimension_numbers<[1], [0], [0], [1], [0, 0, 1, 1], [], []>} : vector<128x128xbf16>, vector<128x288xbf16>, vector<128x288xf32> -> vector<128x288xf32>
    %c0_172 = arith.constant 0 : index
    %c2_173 = arith.constant 2 : index
    %c0_174 = arith.constant 0 : index
    %c0_175 = arith.constant 0 : index
    %124 = vector.load %arg5[%c0_172, %c2_173, %c0_174, %c0_175] : memref<1x4x128x288xf32, #tpu.memory_space<vmem>>, vector<1x1x128x288xf32>
    %125 = vector.shape_cast %124 : vector<1x1x128x288xf32> to vector<128x288xf32>
    %126 = arith.addf %125, %123 : vector<128x288xf32>
    %c0_176 = arith.constant 0 : index
    %c2_177 = arith.constant 2 : index
    %c0_178 = arith.constant 0 : index
    %c0_179 = arith.constant 0 : index
    %127 = vector.load %arg5[%c0_176, %c2_177, %c0_178, %c0_179] : memref<1x4x128x288xf32, #tpu.memory_space<vmem>>, vector<1x1x128x288xf32>
    %128 = vector.shape_cast %127 : vector<1x1x128x288xf32> to vector<128x288xf32>
    %129 = vector.shape_cast %126 : vector<128x288xf32> to vector<1x1x128x288xf32>
    tpu.vector_store %arg5[%c0_176, %c2_177, %c0_178, %c0_179], %129 {strides = array<i32>} : memref<1x4x128x288xf32, #tpu.memory_space<vmem>>, vector<1x1x128x288xf32>,
    %c3_180 = arith.constant 3 : index
    %c2_181 = arith.constant 2 : index
    %c0_182 = arith.constant 0 : index
    %c0_183 = arith.constant 0 : index
    %130 = vector.load %arg3[%c3_180, %c2_181, %c0_182, %c0_183] : memref<4x4x128x128xbf16, #tpu.memory_space<vmem>>, vector<1x1x128x128xbf16>
    %131 = vector.shape_cast %130 : vector<1x1x128x128xbf16> to vector<128x128xbf16>
    %cst_184 = arith.constant dense<0.000000e+00> : vector<128x288xf32>
    %132 = tpu.matmul %131, %120, %cst_184 {dimension_numbers = #tpu.dot_dimension_numbers<[1], [0], [0], [1], [0, 0, 1, 1], [], []>} : vector<128x128xbf16>, vector<128x288xbf16>, vector<128x288xf32> -> vector<128x288xf32>
    %c0_185 = arith.constant 0 : index
    %c3_186 = arith.constant 3 : index
    %c0_187 = arith.constant 0 : index
    %c0_188 = arith.constant 0 : index
    %133 = vector.load %arg5[%c0_185, %c3_186, %c0_187, %c0_188] : memref<1x4x128x288xf32, #tpu.memory_space<vmem>>, vector<1x1x128x288xf32>
    %134 = vector.shape_cast %133 : vector<1x1x128x288xf32> to vector<128x288xf32>
    %135 = arith.addf %134, %132 : vector<128x288xf32>
    %c0_189 = arith.constant 0 : index
    %c3_190 = arith.constant 3 : index
    %c0_191 = arith.constant 0 : index
    %c0_192 = arith.constant 0 : index
    %136 = vector.load %arg5[%c0_189, %c3_190, %c0_191, %c0_192] : memref<1x4x128x288xf32, #tpu.memory_space<vmem>>, vector<1x1x128x288xf32>
    %137 = vector.shape_cast %136 : vector<1x1x128x288xf32> to vector<128x288xf32>
    %138 = vector.shape_cast %135 : vector<128x288xf32> to vector<1x1x128x288xf32>
    tpu.vector_store %arg5[%c0_189, %c3_190, %c0_191, %c0_192], %138 {strides = array<i32>} : memref<1x4x128x288xf32, #tpu.memory_space<vmem>>, vector<1x1x128x288xf32>,
    %c0_193 = arith.constant 0 : index
    %c0_194 = arith.constant 0 : index
    %c38 = arith.constant 38 : index
    %139 = vector.load %arg2[%c0_193, %c0_194, %c38] : memref<1x128x342xbf16, #tpu.memory_space<vmem>>, vector<1x128x288xbf16>
    %140 = vector.shape_cast %139 : vector<1x128x288xbf16> to vector<128x288xbf16>
    %c3_195 = arith.constant 3 : index
    %c3_196 = arith.constant 3 : index
    %c0_197 = arith.constant 0 : index
    %c0_198 = arith.constant 0 : index
    %141 = vector.load %arg3[%c3_195, %c3_196, %c0_197, %c0_198] : memref<4x4x128x128xbf16, #tpu.memory_space<vmem>>, vector<1x1x128x128xbf16>
    %142 = vector.shape_cast %141 : vector<1x1x128x128xbf16> to vector<128x128xbf16>
    %cst_199 = arith.constant dense<0.000000e+00> : vector<128x288xf32>
    %143 = tpu.matmul %142, %140, %cst_199 {dimension_numbers = #tpu.dot_dimension_numbers<[1], [0], [0], [1], [0, 0, 1, 1], [], []>} : vector<128x128xbf16>, vector<128x288xbf16>, vector<128x288xf32> -> vector<128x288xf32>
    %c0_200 = arith.constant 0 : index
    %c3_201 = arith.constant 3 : index
    %c0_202 = arith.constant 0 : index
    %c0_203 = arith.constant 0 : index
    %144 = vector.load %arg5[%c0_200, %c3_201, %c0_202, %c0_203] : memref<1x4x128x288xf32, #tpu.memory_space<vmem>>, vector<1x1x128x288xf32>
    %145 = vector.shape_cast %144 : vector<1x1x128x288xf32> to vector<128x288xf32>
    %146 = arith.addf %145, %143 : vector<128x288xf32>
    %c0_204 = arith.constant 0 : index
    %c3_205 = arith.constant 3 : index
    %c0_206 = arith.constant 0 : index
    %c0_207 = arith.constant 0 : index
    %147 = vector.load %arg5[%c0_204, %c3_205, %c0_206, %c0_207] : memref<1x4x128x288xf32, #tpu.memory_space<vmem>>, vector<1x1x128x288xf32>
    %148 = vector.shape_cast %147 : vector<1x1x128x288xf32> to vector<128x288xf32>
    %149 = vector.shape_cast %146 : vector<128x288xf32> to vector<1x1x128x288xf32>
    tpu.vector_store %arg5[%c0_204, %c3_205, %c0_206, %c0_207], %149 {strides = array<i32>} : memref<1x4x128x288xf32, #tpu.memory_space<vmem>>, vector<1x1x128x288xf32>,
    %c0_208 = arith.constant 0 : index
    %c0_209 = arith.constant 0 : index
    %150 = vector.load %arg4[%c0_208, %c0_209] : memref<1x288xf32, #tpu.memory_space<vmem>>, vector<1x288xf32>
    %c0_210 = arith.constant 0 : index
    %c0_211 = arith.constant 0 : index
    %c0_212 = arith.constant 0 : index
    %c0_213 = arith.constant 0 : index
    %151 = vector.load %arg5[%c0_210, %c0_211, %c0_212, %c0_213] : memref<1x4x128x288xf32, #tpu.memory_space<vmem>>, vector<1x1x128x288xf32>
    %152 = vector.shape_cast %151 : vector<1x1x128x288xf32> to vector<128x288xf32>
    %153 = vector.broadcast %150 : vector<1x288xf32> to vector<128x288xf32>
    %154 = arith.mulf %152, %153 : vector<128x288xf32>
    %cst_214 = arith.constant dense<0.000000e+00> : vector<128xf32>
    %155 = vector.multi_reduction <add>, %154, %cst_214 [1] : vector<128x288xf32> to vector<128xf32>
    %156 = vector.shape_cast %155 : vector<128xf32> to vector<128x1xf32>
    %157 = arith.mulf %154, %154 : vector<128x288xf32>
    %cst_215 = arith.constant dense<0.000000e+00> : vector<128xf32>
    %158 = vector.multi_reduction <add>, %157, %cst_215 [1] : vector<128x288xf32> to vector<128xf32>
    %159 = vector.shape_cast %158 : vector<128xf32> to vector<128x1xf32>
    %c0_216 = arith.constant 0 : index
    %c1_217 = arith.constant 1 : index
    %c0_218 = arith.constant 0 : index
    %c0_219 = arith.constant 0 : index
    %160 = vector.load %arg5[%c0_216, %c1_217, %c0_218, %c0_219] : memref<1x4x128x288xf32, #tpu.memory_space<vmem>>, vector<1x1x128x288xf32>
    %161 = vector.shape_cast %160 : vector<1x1x128x288xf32> to vector<128x288xf32>
    %162 = vector.broadcast %150 : vector<1x288xf32> to vector<128x288xf32>
    %163 = arith.mulf %161, %162 : vector<128x288xf32>
    %cst_220 = arith.constant dense<0.000000e+00> : vector<128xf32>
    %164 = vector.multi_reduction <add>, %163, %cst_220 [1] : vector<128x288xf32> to vector<128xf32>
    %165 = vector.shape_cast %164 : vector<128xf32> to vector<128x1xf32>
    %166 = arith.mulf %163, %163 : vector<128x288xf32>
    %cst_221 = arith.constant dense<0.000000e+00> : vector<128xf32>
    %167 = vector.multi_reduction <add>, %166, %cst_221 [1] : vector<128x288xf32> to vector<128xf32>
    %168 = vector.shape_cast %167 : vector<128xf32> to vector<128x1xf32>
    %169 = arith.addf %156, %165 : vector<128x1xf32>
    %170 = arith.addf %159, %168 : vector<128x1xf32>
    %c0_222 = arith.constant 0 : index
    %c2_223 = arith.constant 2 : index
    %c0_224 = arith.constant 0 : index
    %c0_225 = arith.constant 0 : index
    %171 = vector.load %arg5[%c0_222, %c2_223, %c0_224, %c0_225] : memref<1x4x128x288xf32, #tpu.memory_space<vmem>>, vector<1x1x128x288xf32>
    %172 = vector.shape_cast %171 : vector<1x1x128x288xf32> to vector<128x288xf32>
    %173 = vector.broadcast %150 : vector<1x288xf32> to vector<128x288xf32>
    %174 = arith.mulf %172, %173 : vector<128x288xf32>
    %cst_226 = arith.constant dense<0.000000e+00> : vector<128xf32>
    %175 = vector.multi_reduction <add>, %174, %cst_226 [1] : vector<128x288xf32> to vector<128xf32>
    %176 = vector.shape_cast %175 : vector<128xf32> to vector<128x1xf32>
    %177 = arith.mulf %174, %174 : vector<128x288xf32>
    %cst_227 = arith.constant dense<0.000000e+00> : vector<128xf32>
    %178 = vector.multi_reduction <add>, %177, %cst_227 [1] : vector<128x288xf32> to vector<128xf32>
    %179 = vector.shape_cast %178 : vector<128xf32> to vector<128x1xf32>
    %180 = arith.addf %169, %176 : vector<128x1xf32>
    %181 = arith.addf %170, %179 : vector<128x1xf32>
    %c0_228 = arith.constant 0 : index
    %c3_229 = arith.constant 3 : index
    %c0_230 = arith.constant 0 : index
    %c0_231 = arith.constant 0 : index
    %182 = vector.load %arg5[%c0_228, %c3_229, %c0_230, %c0_231] : memref<1x4x128x288xf32, #tpu.memory_space<vmem>>, vector<1x1x128x288xf32>
    %183 = vector.shape_cast %182 : vector<1x1x128x288xf32> to vector<128x288xf32>
    %184 = vector.broadcast %150 : vector<1x288xf32> to vector<128x288xf32>
    %185 = arith.mulf %183, %184 : vector<128x288xf32>
    %cst_232 = arith.constant dense<0.000000e+00> : vector<128xf32>
    %186 = vector.multi_reduction <add>, %185, %cst_232 [1] : vector<128x288xf32> to vector<128xf32>
    %187 = vector.shape_cast %186 : vector<128xf32> to vector<128x1xf32>
    %188 = arith.mulf %185, %185 : vector<128x288xf32>
    %cst_233 = arith.constant dense<0.000000e+00> : vector<128xf32>
    %189 = vector.multi_reduction <add>, %188, %cst_233 [1] : vector<128x288xf32> to vector<128xf32>
    %190 = vector.shape_cast %189 : vector<128xf32> to vector<128x1xf32>
    %191 = arith.addf %180, %187 : vector<128x1xf32>
    %192 = arith.addf %181, %190 : vector<128x1xf32>
    %cst_234 = arith.constant 9.765625E-4 : f32
    %193 = vector.broadcast %cst_234 : f32 to vector<128x1xf32>
    %194 = arith.mulf %191, %193 : vector<128x1xf32>
    %cst_235 = arith.constant 9.765625E-4 : f32
    %195 = vector.broadcast %cst_235 : f32 to vector<128x1xf32>
    %196 = arith.mulf %192, %195 : vector<128x1xf32>
    %197 = arith.mulf %194, %194 : vector<128x1xf32>
    %198 = arith.subf %196, %197 : vector<128x1xf32>
    %cst_236 = arith.constant 0.000000e+00 : f32
    %199 = vector.broadcast %cst_236 : f32 to vector<128x1xf32>
    %200 = arith.maximumf %198, %199 : vector<128x1xf32>
    %cst_237 = arith.constant 9.99999974E-6 : f32
    %201 = vector.broadcast %cst_237 : f32 to vector<128x1xf32>
    %202 = arith.addf %200, %201 : vector<128x1xf32>
    %203 = math.rsqrt %202 : vector<128x1xf32>
    %c0_238 = arith.constant 0 : index
    %c0_239 = arith.constant 0 : index
    %c0_240 = arith.constant 0 : index
    %c0_241 = arith.constant 0 : index
    %204 = vector.load %arg5[%c0_238, %c0_239, %c0_240, %c0_241] : memref<1x4x128x288xf32, #tpu.memory_space<vmem>>, vector<1x1x128x288xf32>
    %205 = vector.shape_cast %204 : vector<1x1x128x288xf32> to vector<128x288xf32>
    %206 = vector.broadcast %194 : vector<128x1xf32> to vector<128x288xf32>
    %207 = arith.subf %205, %206 : vector<128x288xf32>
    %208 = vector.broadcast %203 : vector<128x1xf32> to vector<128x288xf32>
    %209 = arith.mulf %207, %208 : vector<128x288xf32>
    %cst_242 = arith.constant 0.000000e+00 : f32
    %210 = vector.broadcast %cst_242 : f32 to vector<128x288xf32>
    %211 = arith.maximumf %209, %210 : vector<128x288xf32>
    %c0_243 = arith.constant 0 : index
    %c0_244 = arith.constant 0 : index
    %c0_245 = arith.constant 0 : index
    %c0_246 = arith.constant 0 : index
    %212 = vector.load %arg5[%c0_243, %c0_244, %c0_245, %c0_246] : memref<1x4x128x288xf32, #tpu.memory_space<vmem>>, vector<1x1x128x288xf32>
    %213 = vector.shape_cast %212 : vector<1x1x128x288xf32> to vector<128x288xf32>
    %214 = vector.shape_cast %211 : vector<128x288xf32> to vector<1x1x128x288xf32>
    tpu.vector_store %arg5[%c0_243, %c0_244, %c0_245, %c0_246], %214 {strides = array<i32>} : memref<1x4x128x288xf32, #tpu.memory_space<vmem>>, vector<1x1x128x288xf32>,
    %c0_247 = arith.constant 0 : index
    %c1_248 = arith.constant 1 : index
    %c0_249 = arith.constant 0 : index
    %c0_250 = arith.constant 0 : index
    %215 = vector.load %arg5[%c0_247, %c1_248, %c0_249, %c0_250] : memref<1x4x128x288xf32, #tpu.memory_space<vmem>>, vector<1x1x128x288xf32>
    %216 = vector.shape_cast %215 : vector<1x1x128x288xf32> to vector<128x288xf32>
    %217 = vector.broadcast %194 : vector<128x1xf32> to vector<128x288xf32>
    %218 = arith.subf %216, %217 : vector<128x288xf32>
    %219 = vector.broadcast %203 : vector<128x1xf32> to vector<128x288xf32>
    %220 = arith.mulf %218, %219 : vector<128x288xf32>
    %cst_251 = arith.constant 0.000000e+00 : f32
    %221 = vector.broadcast %cst_251 : f32 to vector<128x288xf32>
    %222 = arith.maximumf %220, %221 : vector<128x288xf32>
    %c0_252 = arith.constant 0 : index
    %c1_253 = arith.constant 1 : index
    %c0_254 = arith.constant 0 : index
    %c0_255 = arith.constant 0 : index
    %223 = vector.load %arg5[%c0_252, %c1_253, %c0_254, %c0_255] : memref<1x4x128x288xf32, #tpu.memory_space<vmem>>, vector<1x1x128x288xf32>
    %224 = vector.shape_cast %223 : vector<1x1x128x288xf32> to vector<128x288xf32>
    %225 = vector.shape_cast %222 : vector<128x288xf32> to vector<1x1x128x288xf32>
    tpu.vector_store %arg5[%c0_252, %c1_253, %c0_254, %c0_255], %225 {strides = array<i32>} : memref<1x4x128x288xf32, #tpu.memory_space<vmem>>, vector<1x1x128x288xf32>,
    %c0_256 = arith.constant 0 : index
    %c2_257 = arith.constant 2 : index
    %c0_258 = arith.constant 0 : index
    %c0_259 = arith.constant 0 : index
    %226 = vector.load %arg5[%c0_256, %c2_257, %c0_258, %c0_259] : memref<1x4x128x288xf32, #tpu.memory_space<vmem>>, vector<1x1x128x288xf32>
    %227 = vector.shape_cast %226 : vector<1x1x128x288xf32> to vector<128x288xf32>
    %228 = vector.broadcast %194 : vector<128x1xf32> to vector<128x288xf32>
    %229 = arith.subf %227, %228 : vector<128x288xf32>
    %230 = vector.broadcast %203 : vector<128x1xf32> to vector<128x288xf32>
    %231 = arith.mulf %229, %230 : vector<128x288xf32>
    %cst_260 = arith.constant 0.000000e+00 : f32
    %232 = vector.broadcast %cst_260 : f32 to vector<128x288xf32>
    %233 = arith.maximumf %231, %232 : vector<128x288xf32>
    %c0_261 = arith.constant 0 : index
    %c2_262 = arith.constant 2 : index
    %c0_263 = arith.constant 0 : index
    %c0_264 = arith.constant 0 : index
    %234 = vector.load %arg5[%c0_261, %c2_262, %c0_263, %c0_264] : memref<1x4x128x288xf32, #tpu.memory_space<vmem>>, vector<1x1x128x288xf32>
    %235 = vector.shape_cast %234 : vector<1x1x128x288xf32> to vector<128x288xf32>
    %236 = vector.shape_cast %233 : vector<128x288xf32> to vector<1x1x128x288xf32>
    tpu.vector_store %arg5[%c0_261, %c2_262, %c0_263, %c0_264], %236 {strides = array<i32>} : memref<1x4x128x288xf32, #tpu.memory_space<vmem>>, vector<1x1x128x288xf32>,
    %c0_265 = arith.constant 0 : index
    %c3_266 = arith.constant 3 : index
    %c0_267 = arith.constant 0 : index
    %c0_268 = arith.constant 0 : index
    %237 = vector.load %arg5[%c0_265, %c3_266, %c0_267, %c0_268] : memref<1x4x128x288xf32, #tpu.memory_space<vmem>>, vector<1x1x128x288xf32>
    %238 = vector.shape_cast %237 : vector<1x1x128x288xf32> to vector<128x288xf32>
    %239 = vector.broadcast %194 : vector<128x1xf32> to vector<128x288xf32>
    %240 = arith.subf %238, %239 : vector<128x288xf32>
    %241 = vector.broadcast %203 : vector<128x1xf32> to vector<128x288xf32>
    %242 = arith.mulf %240, %241 : vector<128x288xf32>
    %cst_269 = arith.constant 0.000000e+00 : f32
    %243 = vector.broadcast %cst_269 : f32 to vector<128x288xf32>
    %244 = arith.maximumf %242, %243 : vector<128x288xf32>
    %c0_270 = arith.constant 0 : index
    %c3_271 = arith.constant 3 : index
    %c0_272 = arith.constant 0 : index
    %c0_273 = arith.constant 0 : index
    %245 = vector.load %arg5[%c0_270, %c3_271, %c0_272, %c0_273] : memref<1x4x128x288xf32, #tpu.memory_space<vmem>>, vector<1x1x128x288xf32>
    %246 = vector.shape_cast %245 : vector<1x1x128x288xf32> to vector<128x288xf32>
    %247 = vector.shape_cast %244 : vector<128x288xf32> to vector<1x1x128x288xf32>
    tpu.vector_store %arg5[%c0_270, %c3_271, %c0_272, %c0_273], %247 {strides = array<i32>} : memref<1x4x128x288xf32, #tpu.memory_space<vmem>>, vector<1x1x128x288xf32>,
    return
  }
  func.func @transform_0(%arg0: i32, %arg1: i32) -> (i32, i32, i32) {
    %c0_i32 = arith.constant 0 : i32
    %c0_i32_0 = arith.constant 0 : i32
    %c0_i32_1 = arith.constant 0 : i32
    return %arg0, %c0_i32, %c0_i32_0 : i32, i32, i32
  }
  func.func @transform_1(%arg0: i32, %arg1: i32) -> (i32, i32, i32, i32) {
    %c0_i32 = arith.constant 0 : i32
    %c0_i32_0 = arith.constant 0 : i32
    %c0_i32_1 = arith.constant 0 : i32
    %c0_i32_2 = arith.constant 0 : i32
    return %c0_i32, %c0_i32_0, %arg1, %c0_i32_1 : i32, i32, i32, i32
  }
  func.func @transform_2(%arg0: i32, %arg1: i32) -> (i32, i32) {
    %c0_i32 = arith.constant 0 : i32
    %c0_i32_0 = arith.constant 0 : i32
    %c0_i32_1 = arith.constant 0 : i32
    return %c0_i32, %c0_i32_0 : i32, i32
  }
  func.func @transform_3(%arg0: i32, %arg1: i32) -> (i32, i32, i32, i32) {
    %c0_i32 = arith.constant 0 : i32
    %c0_i32_0 = arith.constant 0 : i32
    %c0_i32_1 = arith.constant 0 : i32
    return %arg0, %c0_i32, %arg1, %c0_i32_0 : i32, i32, i32, i32
  }
}

</mosaic_0001>

<bundles_post_ra>
// kernel: tpu_custom_call.1
= control target key start
LH: loop header
LB: loop body
LE: loop exit
PB: predicated region body
PF: predicated region fallthrough
CT: control target
= control target key end

     0   :  { %8 = vsyncpa [#allocation3], 0  ;;  %s21319_s0 = inlined_call_operand.vmem [shape: bf16[2,128,342], index: 0, kind: input, shape index: {}]   ;;  %s21320_s1 = inlined_call_operand.hbm [shape: bf16[4,4,128,128], index: 1, kind: input, shape index: {}]   ;;  %s21321_s2 = inlined_call_operand.hbm [shape: f32[1,288], index: 2, kind: input, shape index: {}]   ;;  %s21322_s3 = inlined_call_operand.vmem [shape: f32[2,4,128,288], index: 3, kind: output, shape index: {}]  }
   0x1   :  { %9 = vsyncpa [#allocation5], 0  ;;  %s14105_s12 = smov 0   ;;  %s14107_s13 = smov 0  }
   0x2   :  { %s14109_s14 = smov 0  }
   0x3 LB: > { %s10981_s15 = sadd.s32 4294967295, %s14070_s14   ;;  %s27_s16 = sadd.s32 1, %s14066_s13  ;;  %s14070_s14 = sphi %s14109_s14, %s15_s14   ;;  %s14066_s13 = sphi %s14107_s13, %s22221_s13   ;;  %s14062_s12 = sphi %s14105_s12, %s22220_s12  }
   0x4   : > { %p29_p0 = scmp.ge.s32.totalorder %s27_s16, 2  ;;  %p10983_p1 = scmp.ge.s32.totalorder %s14070_s14, 1 }
   0x5   : > { %p133_p2 = scmp.lt.s32.totalorder %s14070_s14, 3  ;;  %p14130_p4 = scmp.eq.s32.totalorder %s10981_s15, 0 }
   0x6   : > { %s22223_s16 = smov (%p29_p0, %s27_s16), 0  ;;  %s14072_s19 = smov [#allocation2]  }
   0x7   : > { %p14126_p3 = pnand %p10983_p1, %p133_p2  ;;  %s148_s20 = sshll.u32 %s14072_s19, 4  ;;  %s149_s20 = int_to_ptr.vmem [resolvable:$true] %s148_s20 }
   0x8   : > { %s14073_s22 = smov [#allocation4]   ;;  %s13999_s24 = scalar_lea.vmem %s149_s20, 16384 }
   0x9   : > { %p13556_p5 = pneg %p14126_p3  ;;  %s162_s23 = sshll.u32 %s14073_s22, 4  ;;  %s163_s23 = int_to_ptr.vmem [resolvable:$true] %s162_s23 }
   0xa   : > { %p14000_p8 = scmp.ne.s32.totalorder %s149_s20, %s13999_s24  ;;  %p14007_p11 = scmp.lt.s32.totalorder %s149_s20, %s149_s20 }
   0xb   : > { %p14138_p6 = pnand %p14130_p4, %p13556_p5  ;;  %p14008_p12 = scmp.lt.s32.totalorder %s13999_s24, %s13999_s24 }
   0xd   : > { %p13990_p7 = pneg %p14138_p6  ;;  %p14009_p13 = por %p14008_p12, %p14007_p11 }
   0xf   : > { %p14002_p9 = pnand %p14000_p8, %p13990_p7 }
  0x11   : > { %p14003_p10 = pneg %p14002_p9 }
  0x13   : > { %p14010_p0 = pnand %p14009_p13, %p14003_p10 }
  0x15   : > { %14013 = shalt.err (!%p14010_p0)
}
  0x16   : > { %s14074_s25 = smov 64   ;;  %s14075_s26 = smov 4  }
  0x17   : > { %13559 = dma.hbm_to_vmem [thread:$0]  (!%p14138_p6), %s21320_s1, 16384, %s149_s20, [#allocation3], %s14074_s25, %s14074_s25, %s14075_s26  }
  0x18   : > { %s14025_s29 = scalar_lea.vmem %s163_s23, 48  ;;  %s14032_s30 = scalar_lea.vmem %s163_s23, 64 }
  0x19   : > { %p14026_p1 = scmp.ne.s32.totalorder %s163_s23, %s14025_s29  ;;  %p14033_p8 = scmp.lt.s32.totalorder %s163_s23, %s163_s23 }
  0x1a   : > { %p14034_p9 = scmp.lt.s32.totalorder %s14032_s30, %s14025_s29 }
  0x1b   : > { %p14028_p2 = pnand %p14026_p1, %p13990_p7 }
  0x1c   : > { %p14035_p10 = por %p14034_p9, %p14033_p8 }
  0x1d   : > { %p14029_p5 = pneg %p14028_p2 }
  0x1f   : > { %p14036_p11 = pnand %p14035_p10, %p14029_p5 }
  0x21   : > { %14039 = shalt.err (!%p14036_p11)
}
  0x22   : > { %13562 = dma.hbm_to_vmem [thread:$0]  (!%p14138_p6), %s21321_s2, 48, %s163_s23, [#allocation5]  }
  0x23   : > { %183 = sbr.rel (%p14126_p3) target bundleno = 1479 (0x5c7), region = 32 }
  0x28   : > { %14053 = dma.done.wait (%p14130_p4), [#allocation3], 16384  }
  0x29   : > { %14055 = vsyncadd (%p14130_p4), [#allocation3], 4294950912 }
  0x2a   : > { %14057 = dma.done.wait (%p14130_p4), [#allocation5], 48  }
  0x2b   : > { %14059 = vsyncadd (%p14130_p4), [#allocation5], 4294967248  ;;  %p216_p7 = scmp.lt.s32.totalorder %s14062_s12, 1  ;;  %v21323_v0 = vmov 0   ;;  %s14077_s10 = smov 127   ;;  %v13643_v24 = vld [vmem:[#allocation2] sm:$0xff]  }
  0x2c   : > { %490 = vmatprep.mubr.bf16.mxu0 %v21323_v0  ;;  %13050 = vmatprep.mubr.bf16.mxu1 %v13643_v24  ;;  %v13647_v30 = vld [vmem:[#allocation2 + $0x8] sm:$0xff]   ;;  %v13652_v35 = vld [vmem:[#allocation2 + $0x10] sm:$0xff]   ;;  %s14078_s11 = smov 126   ;;  %v13655_v38 = vld [vmem:[#allocation2 + $0x18] sm:$0xff]   ;;  %s14079_s15 = smov 110   ;;  %vm966_vm0 = vcmask 1039360  }
  0x2d   : > { %s22225_s12 = smov (!%p216_p7, %s14062_s12), 1  ;;  %v13657_v40 = vld [vmem:[#allocation2 + $0x20] sm:$0xff]   ;;  %v13660_v42 = vld [vmem:[#allocation2 + $0x28] sm:$0xff]   ;;  %v13662_v44 = vld [vmem:[#allocation2 + $0x30] sm:$0xff]   ;;  %s14080_s17 = smov 109   ;;  %vm1934_vm1 = vcmask 1031168  }
  0x2e   : > { %s13546_s6 = smul.u32 192, %s22225_s12  ;;  %v13664_v46 = vld [vmem:[#allocation2 + $0x38] sm:$0xff]   ;;  %v14349_v48 = vld [vmem:[#allocation2 + $0x40] sm:$0xff]   ;;  %vm2578_vm2 = vcmask 900096   ;;  %vm670_vm3 = vcmask 261120   ;;  %s14081_s21 = smov 108  }
  0x2f   : > { %s13547_s18 = smul.u32 1536, %s22225_s12  ;;  %vm3546_vm4 = vcmask 891904   ;;  %s14082_s22 = smov 92   ;;  %vm5352_vm5 = vcmask 883712   ;;  %vm6415_vm6 = vcmask 752640   ;;  %vm7059_vm7 = vcmask 744448  }
  0x30   : > { %s14179_s9 = scalar_lea.vmem %s21319_s0, %s13546_s6  ;;  %s14083_s23 = smov 91   ;;  %vm8122_vm8 = vcmask 736256  }
  0x31   : > { %v14182_v1 = vld [vmem:[%s14179_s9 + $0xac] ss:$12 sps:$4 sm:$0xff]   ;;  %v14185_v2 = vld [vmem:[%s14179_s9 + $0xa8] ss:$12 sps:$4 sm:$0xff]   ;;  %v13607_v3 = vld [vmem:[%s14179_s9 + $0xb0] ss:$12 sps:$4 sm:$0xff]   ;;  %s14758_s12 = scalar_lea.vmem %s21322_s3, %s13547_s18 }
  0x32   : > { %962 = vrot.lane.b32.xlu0 %v14182_v1, %s14077_s10  ;;  %458 = vmatprep.subr.bf16.mxu0 %v14182_v1  ;;  %v14194_v4 = vld [vmem:[%s14179_s9 + $0x94] ss:$12 sps:$4 sm:$0xff]   ;;  %v14198_v5 = vld [vmem:[%s14179_s9 + $0x90] ss:$12 sps:$4 sm:$0xff]   ;;  %v13610_v6 = vld [vmem:[%s14179_s9 + $0x98] ss:$12 sps:$4 sm:$0xff]  }
  0x33   : > { %960 = vrot.lane.b32.xlu1 %v14185_v2, %s14077_s10  ;;  %459 = vmatpush1.bf16.msra.mxu0 %v14185_v2  ;;  %v14204_v7 = vld [vmem:[%s14179_s9 + $0x7c] ss:$12 sps:$4 sm:$0xff]   ;;  %v14211_v8 = vld [vmem:[%s14179_s9 + $0x78] ss:$12 sps:$4 sm:$0xff]   ;;  %v13614_v10 = vld [vmem:[%s14179_s9 + $0x80] ss:$12 sps:$4 sm:$0xff]  }
  0x34   : > { %460 = vmatprep.subr.bf16.mxu0 %v14194_v4  ;;  %v14215_v9 = vld [vmem:[%s14179_s9 + $0x64] ss:$12 sps:$4 sm:$0xff]   ;;  %v14223_v11 = vld [vmem:[%s14179_s9 + $0x60] ss:$12 sps:$4 sm:$0xff]   ;;  %v14234_v13 = vld [vmem:[%s14179_s9 + $0x48] ss:$12 sps:$4 sm:$0xff]  }
  0x35   : > { %v14228_v12 = vld [vmem:[%s14179_s9 + $0x4c] ss:$12 sps:$4 sm:$0xff]   ;;  %v13618_v14 = vld [vmem:[%s14179_s9 + $0x68] ss:$12 sps:$4 sm:$0xff]   ;;  %v14246_v16 = vld [vmem:[%s14179_s9 + $0x30] ss:$12 sps:$4 sm:$0xff]  }
  0x36   : > { %964 = vrot.lane.b32.xlu0 %v13607_v3, %s14077_s10  ;;  %v14240_v15 = vld [vmem:[%s14179_s9 + $0x34] ss:$12 sps:$4 sm:$0xff]   ;;  %v13622_v17 = vld [vmem:[%s14179_s9 + $0x50] ss:$12 sps:$4 sm:$0xff]   ;;  %v14258_v20 = vld [vmem:[%s14179_s9 + $0x18] ss:$12 sps:$4 sm:$0xff]  }
  0x37   : > { %956 = vrot.lane.b32.xlu1 %v14194_v4, %s14077_s10  ;;  %461 = vmatpush1.bf16.msra.mxu0 %v14198_v5  ;;  %v13638_v18 = vld [vmem:[%s14179_s9 + $0xb0] ss:$12 sps:$4 sm:$0xff]   ;;  %v13640_v21 = vld [vmem:[%s14179_s9 + $0x98] ss:$12 sps:$4 sm:$0xff]   ;;  %v13641_v23 = vld [vmem:[%s14179_s9 + $0x80] ss:$12 sps:$4 sm:$0xff]  }
  0x38   : > { %462 = vmatprep.subr.bf16.mxu0 %v14204_v7  ;;  %v14253_v19 = vld [vmem:[%s14179_s9 + $0x1c] ss:$12 sps:$4 sm:$0xff]   ;;  %v14263_v22 = vld [vmem:[%s14179_s9 + $0x4] ss:$12 sps:$4 sm:$0xff]   ;;  %13034 = vmatprep.subr.bf16.mxu1 %v13638_v18  ;;  %v14273_v25 = vld [vmem:[%s14179_s9] ss:$12 sps:$4 sm:$0xff]  }
  0x39   : > { %13035 = vmatpush3.bf16.msra.mxu1 %v13638_v18  ;;  %v13626_v26 = vld [vmem:[%s14179_s9 + $0x38] ss:$12 sps:$4 sm:$0xff]   ;;  %v13644_v27 = vld [vmem:[%s14179_s9 + $0x68] ss:$12 sps:$4 sm:$0xff]   ;;  %v13646_v28 = vld [vmem:[%s14179_s9 + $0x50] ss:$12 sps:$4 sm:$0xff]  }
  0x3a   : > { %958 = vrot.lane.b32.xlu0 %v13610_v6, %s14077_s10  ;;  %13036 = vmatprep.subr.bf16.mxu1 %v13640_v21  ;;  %v13630_v29 = vld [vmem:[%s14179_s9 + $0x20] ss:$12 sps:$4 sm:$0xff]   ;;  %v13648_v31 = vld [vmem:[%s14179_s9 + $0x38] ss:$12 sps:$4 sm:$0xff]   ;;  %v13634_v32 = vld [vmem:[%s14179_s9 + $0x8] ss:$12 sps:$4 sm:$0xff]  }
  0x3b   : > { %954 = vrot.lane.b32.xlu1 %v14198_v5, %s14077_s10  ;;  %463 = vmatpush1.bf16.msra.mxu0 %v14211_v8  ;;  %v13650_v33 = vld [vmem:[%s14179_s9 + $0x20] ss:$12 sps:$4 sm:$0xff]   ;;  %v13636_v34 = vld [vmem:[%s14179_s9 + $0xb0] ss:$12 sps:$4 sm:$0xff]   ;;  %v13653_v36 = vld [vmem:[%s14179_s9 + $0x8] ss:$12 sps:$4 sm:$0xff]  }
  0x3c   : > { %464 = vmatprep.subr.bf16.mxu0 %v14215_v9  ;;  %v13637_v37 = vld [vmem:[%s14179_s9 + $0x98] ss:$12 sps:$4 sm:$0xff]   ;;  %v13639_v39 = vld [vmem:[%s14179_s9 + $0x80] ss:$12 sps:$4 sm:$0xff]   ;;  %v13642_v41 = vld [vmem:[%s14179_s9 + $0x68] ss:$12 sps:$4 sm:$0xff]  }
  0x3d   : > { %13037 = vmatpush3.bf16.msra.mxu1 %v13640_v21  ;;  %v13645_v43 = vld [vmem:[%s14179_s9 + $0x50] ss:$12 sps:$4 sm:$0xff]   ;;  %v13649_v45 = vld [vmem:[%s14179_s9 + $0x38] ss:$12 sps:$4 sm:$0xff]   ;;  %v13651_v47 = vld [vmem:[%s14179_s9 + $0x20] ss:$12 sps:$4 sm:$0xff]  }
  0x3e   : > { %950 = vrot.lane.b32.xlu0 %v14204_v7, %s14077_s10  ;;  %13038 = vmatprep.subr.bf16.mxu1 %v13641_v23  ;;  %v13654_v49 = vld [vmem:[%s14179_s9 + $0x8] ss:$12 sps:$4 sm:$0xff]   ;;  %v13656_v50 = vld [vmem:[%s14179_s9 + $0xb0] ss:$12 sps:$4 sm:$0xff]   ;;  %v13658_v51 = vld [vmem:[%s14179_s9 + $0x98] ss:$12 sps:$4 sm:$0xff]  }
  0x3f   : > { %952 = vrot.lane.b32.xlu1 %v13614_v10, %s14077_s10  ;;  %465 = vmatpush1.bf16.msra.mxu0 %v14223_v11  ;;  %v13659_v52 = vld [vmem:[%s14179_s9 + $0x80] ss:$12 sps:$4 sm:$0xff]   ;;  %v13661_v53 = vld [vmem:[%s14179_s9 + $0x68] ss:$12 sps:$4 sm:$0xff]   ;;  %v13663_v57 = vld [vmem:[%s14179_s9 + $0x50] ss:$12 sps:$4 sm:$0xff]  }
  0x40   : > { %466 = vmatprep.subr.bf16.mxu0 %v14228_v12  ;;  %v13665_v3 = vld [vmem:[%s14179_s9 + $0x38] ss:$12 sps:$4 sm:$0xff]   ;;  %s14084_s24 = smov 90  }
  0x41   : > { %13039 = vmatpush3.bf16.msra.mxu1 %v13641_v23  ;;  %v13680_v18 = vld [vmem:[%s14179_s9 + $0xac] ss:$12 sps:$4 sm:$0xff]   ;;  %v13683_v23 = vld [vmem:[%s14179_s9 + $0xa8] ss:$12 sps:$4 sm:$0xff]  }
  0x42   : > { %948 = vrot.lane.b32.xlu0 %v14211_v8, %s14077_s10  ;;  %13040 = vmatprep.subr.bf16.mxu1 %v13644_v27 }
  0x43   : > { %944 = vrot.lane.b32.xlu1 %v14215_v9, %s14077_s10  ;;  %467 = vmatpush1.bf16.msra.mxu0 %v14234_v13 }
  0x44   : > { %468 = vmatprep.subr.bf16.mxu0 %v14240_v15 }
  0x45   : > { %13041 = vmatpush3.bf16.msra.mxu1 %v13644_v27 }
  0x46   : > { %946 = vrot.lane.b32.xlu0 %v13618_v14, %s14077_s10  ;;  %13042 = vmatprep.subr.bf16.mxu1 %v13646_v28  ;;  %v13669_v14 = vld [vmem:[%s14179_s9 + $0x8] ss:$12 sps:$4 sm:$0xff]  }
  0x47   : > { %942 = vrot.lane.b32.xlu1 %v14223_v11, %s14077_s10  ;;  %469 = vmatpush1.bf16.msra.mxu0 %v14246_v16 }
  0x48   : > { %470 = vmatprep.subr.bf16.mxu0 %v14253_v19 }
  0x49   : > { %13043 = vmatpush3.bf16.msra.mxu1 %v13646_v28 }
  0x4a   : > { %938 = vrot.lane.b32.xlu0 %v14228_v12, %s14077_s10  ;;  %13044 = vmatprep.subr.bf16.mxu1 %v13648_v31 }
  0x4b   : > { %940 = vrot.lane.b32.xlu1 %v13622_v17, %s14077_s10  ;;  %471 = vmatpush1.bf16.msra.mxu0 %v14258_v20 }
  0x4c   : > { %472 = vmatprep.subr.bf16.mxu0 %v14263_v22 }
  0x4d   : > { %13045 = vmatpush3.bf16.msra.mxu1 %v13648_v31 }
  0x4e   : > { %936 = vrot.lane.b32.xlu0 %v14234_v13, %s14077_s10  ;;  %13046 = vmatprep.subr.bf16.mxu1 %v13650_v33 }
  0x4f   : > { %932 = vrot.lane.b32.xlu1 %v14240_v15, %s14077_s10  ;;  %473 = vmatpush1.bf16.msra.mxu0 %v14273_v25 }
  0x51   : > { %13047 = vmatpush3.bf16.msra.mxu1 %v13650_v33 }
  0x52   : > { %934 = vrot.lane.b32.xlu0 %v13626_v26, %s14077_s10  ;;  %491 = vmatmul.mubr.bf16.vlgmr.msra.gmra.mxu0 %v13643_v24  ;;  %v13684_v24 = vld [vmem:[%s14179_s9 + $0x94] ss:$12 sps:$4 sm:$0xff]  }
  0x53   : > { %930 = vrot.lane.b32.xlu1 %v14246_v16, %s14077_s10  ;;  %500 = vmatprep.mubr.bf16.mxu0 %v21323_v0 }
  0x54   : > { %13048 = vmatprep.subr.bf16.mxu1 %v13653_v36 }
  0x55   : > { %13049 = vmatpush3.bf16.msra.mxu1 %v13653_v36 }
  0x56   : > { %926 = vrot.lane.b32.xlu0 %v14253_v19, %s14077_s10 }
  0x57   : > { %928 = vrot.lane.b32.xlu1 %v13630_v29, %s14077_s10  ;;  %v13687_v29 = vld [vmem:[%s14179_s9 + $0x98] ss:$12 sps:$4 sm:$0xff]  }
  0x58   : > { %13051 = vmatmul.mubr.bf16.vlgmr.msra.gmra.mxu1 %v13647_v30 }
  0x59   : > { %13054 = vmatprep.mubr.bf16.mxu1 %v13652_v35 }
  0x5a   : > { %924 = vrot.lane.b32.xlu0 %v14258_v20, %s14077_s10  ;;  %501 = vmatmul.mubr.bf16.gmra.mxu0 %v13647_v30  ;;  %v13688_v30 = vld [vmem:[%s14179_s9 + $0x90] ss:$12 sps:$4 sm:$0xff]  }
  0x5b   : > { %920 = vrot.lane.b32.xlu1 %v14263_v22, %s14077_s10  ;;  %510 = vmatprep.mubr.bf16.mxu0 %v21323_v0 }
  0x5e   : > { %922 = vrot.lane.b32.xlu0 %v13634_v32, %s14077_s10 }
  0x5f   : > { %918 = vrot.lane.b32.xlu1 %v14273_v25, %s14077_s10 }
  0x60   : > { %13055 = vmatmul.mubr.bf16.gmra.mxu1 %v13655_v38 }
  0x61   : > { %13058 = vmatprep.mubr.bf16.mxu1 %v13657_v40 }
  0x62   : > { %1930 = vrot.lane.b32.xlu0 %v14182_v1, %s14078_s11  ;;  %511 = vmatmul.mubr.bf16.gmra.mxu0 %v13652_v35  ;;  %v13691_v35 = vld [vmem:[%s14179_s9 + $0x80] ss:$12 sps:$4 sm:$0xff]  }
  0x63   : > { %1932 = vrot.lane.b32.xlu1 %v13636_v34, %s14078_s11  ;;  %520 = vmatprep.mubr.bf16.mxu0 %v21323_v0  ;;  %v13689_v34 = vld [vmem:[%s14179_s9 + $0x7c] ss:$12 sps:$4 sm:$0xff]  }
  0x66   : > { %1928 = vrot.lane.b32.xlu0 %v14185_v2, %s14078_s11 }
  0x67   : > { %1924 = vrot.lane.b32.xlu1 %v14194_v4, %s14078_s11 }
  0x68   : > { %13059 = vmatmul.mubr.bf16.gmra.mxu1 %v13660_v42 }
  0x69   : > { %13062 = vmatprep.mubr.bf16.mxu1 %v13662_v44 }
  0x6a   : > { %1926 = vrot.lane.b32.xlu0 %v13637_v37, %s14078_s11  ;;  %521 = vmatmul.mubr.bf16.gmra.mxu0 %v13655_v38 }
  0x6b   : > { %1922 = vrot.lane.b32.xlu1 %v14198_v5, %s14078_s11  ;;  %530 = vmatprep.mubr.bf16.mxu0 %v21323_v0 }
  0x6e   : > { %1918 = vrot.lane.b32.xlu0 %v14204_v7, %s14078_s11 }
  0x6f   : > { %1920 = vrot.lane.b32.xlu1 %v13639_v39, %s14078_s11  ;;  %v13693_v39 = vld [vmem:[%s14179_s9 + $0x78] ss:$12 sps:$4 sm:$0xff]  }
  0x70   : > { %13063 = vmatmul.mubr.bf16.gmra.mxu1 %v13664_v46 }
  0x71   : > { %1039 = vmatprep.mubr.bf16.mxu1 %v21323_v0 }
  0x72   : > { %1916 = vrot.lane.b32.xlu0 %v14211_v8, %s14078_s11  ;;  %531 = vmatmul.mubr.bf16.gmra.mxu0 %v13657_v40  ;;  %v13668_v40 = vld [vmem:[#allocation2 + $0x48] sm:$0xff]  }
  0x73   : > { %1912 = vrot.lane.b32.xlu1 %v14215_v9, %s14078_s11  ;;  %540 = vmatprep.mubr.bf16.mxu0 %v21323_v0 }
  0x76   : > { %1914 = vrot.lane.b32.xlu0 %v13642_v41, %s14078_s11  ;;  %v13694_v41 = vld [vmem:[%s14179_s9 + $0x64] ss:$12 sps:$4 sm:$0xff]  }
  0x77   : > { %1910 = vrot.lane.b32.xlu1 %v14223_v11, %s14078_s11 }
  0x7a   : > { %1906 = vrot.lane.b32.xlu0 %v14228_v12, %s14078_s11  ;;  %541 = vmatmul.mubr.bf16.gmra.mxu0 %v13660_v42 }
  0x7b   : > { %1908 = vrot.lane.b32.xlu1 %v13645_v43, %s14078_s11  ;;  %550 = vmatprep.mubr.bf16.mxu0 %v21323_v0 }
  0x7e   : > { %1904 = vrot.lane.b32.xlu0 %v14234_v13, %s14078_s11 }
  0x7f   : > { %1900 = vrot.lane.b32.xlu1 %v14240_v15, %s14078_s11 }
  0x82   : > { %1902 = vrot.lane.b32.xlu0 %v13649_v45, %s14078_s11  ;;  %551 = vmatmul.mubr.bf16.gmra.mxu0 %v13662_v44 }
  0x83   : > { %1898 = vrot.lane.b32.xlu1 %v14246_v16, %s14078_s11  ;;  %560 = vmatprep.mubr.bf16.mxu0 %v21323_v0 }
  0x86   : > { %1894 = vrot.lane.b32.xlu0 %v14253_v19, %s14078_s11 }
  0x87   : > { %1896 = vrot.lane.b32.xlu1 %v13651_v47, %s14078_s11  ;;  %v13696_v47 = vld [vmem:[%s14179_s9 + $0x68] ss:$12 sps:$4 sm:$0xff]  }
  0x8a   : > { %1892 = vrot.lane.b32.xlu0 %v14258_v20, %s14078_s11  ;;  %561 = vmatmul.mubr.bf16.gmra.mxu0 %v13664_v46  ;;  %v13670_v46 = vld [vmem:[#allocation2 + $0x50] sm:$0xff]  }
  0x8b   : > { %1888 = vrot.lane.b32.xlu1 %v14263_v22, %s14078_s11  ;;  %13082 = vmatprep.mubr.bf16.mxu0 %v14349_v48 }
  0x8e   : > { %1890 = vrot.lane.b32.xlu0 %v13654_v49, %s14078_s11 }
  0x8f   : > { %1886 = vrot.lane.b32.xlu1 %v14273_v25, %s14078_s11 }
  0x92   : > { %2574 = vrot.lane.b32.xlu0 %v14182_v1, %s14079_s15 }
  0x93   : > { %2576 = vrot.lane.b32.xlu1 %v13656_v50, %s14079_s15  ;;  %v13697_v50 = vld [vmem:[%s14179_s9 + $0x60] ss:$12 sps:$4 sm:$0xff]  }
  0x96   : > { %2572 = vrot.lane.b32.xlu0 %v14185_v2, %s14079_s15 }
  0x97   : > { %2568 = vrot.lane.b32.xlu1 %v14194_v4, %s14079_s15 }
  0x9a   : > { %2570 = vrot.lane.b32.xlu0 %v13658_v51, %s14079_s15 }
  0x9b   : > { %2566 = vrot.lane.b32.xlu1 %v14198_v5, %s14079_s15 }
  0x9e   : > { %2562 = vrot.lane.b32.xlu0 %v14204_v7, %s14079_s15  ;;  %v13667_v7 = vld [vmem:[%s14179_s9 + $0x20] ss:$12 sps:$4 sm:$0xff]  }
  0x9f   : > { %2564 = vrot.lane.b32.xlu1 %v13659_v52, %s14079_s15  ;;  %v14544_v52 = vld [vmem:[#allocation2 + $0x58] sm:$0xff]  }
  0xa2   : > { %2560 = vrot.lane.b32.xlu0 %v14211_v8, %s14079_s15 }
  0xa3   : > { %2556 = vrot.lane.b32.xlu1 %v14215_v9, %s14079_s15 }
  0xa4   : > { %v963_v54 = vpop.permute.xlu0 %962 }
  0xa5   : > { %v961_v55 = vpop.permute.xlu1 %960 }
  0xa6   : > { %2558 = vrot.lane.b32.xlu0 %v13661_v53, %s14079_s15  ;;  %v14393_v60 = vsel %vm966_vm0, %v961_v55, %v963_v54  ;;  %v13699_v53 = vld [vmem:[%s14179_s9 + $0x4c] ss:$12 sps:$4 sm:$0xff]  }
  0xa7   : > { %2554 = vrot.lane.b32.xlu1 %v14223_v11, %s14079_s15 }
  0xa8   : > { %v14384_v56 = vpop.permute.xlu0 %964 }
  0xa9   : > { %v957_v58 = vpop.permute.xlu1 %956  ;;  %13066 = vmatprep.subr.bf16.mxu0 %v14384_v56  ;;  %v14390_v59 = vsel %vm966_vm0, %v963_v54, %v14384_v56 }
  0xaa   : > { %1007 = vmatprep.subr.bf16.mxu1 %v14390_v59  ;;  %13067 = vmatpush3.bf16.msra.mxu0 %v14384_v56 }
  0xab   : > { %1008 = vmatpush1.bf16.msra.mxu1 %v14393_v60  ;;  %2550 = vrot.lane.b32.xlu0 %v14228_v12, %s14079_s15 }
  0xac   : > { %v14400_v61 = vpop.permute.xlu0 %958  ;;  %2552 = vrot.lane.b32.xlu1 %v13663_v57, %s14079_s15 }
  0xad   : > { %v955_v62 = vpop.permute.xlu1 %954  ;;  %13068 = vmatprep.subr.bf16.mxu0 %v14400_v61  ;;  %v14406_v63 = vsel %vm966_vm0, %v957_v58, %v14400_v61 }
  0xae   : > { %v14409_v1 = vsel %vm966_vm0, %v955_v62, %v957_v58  ;;  %1009 = vmatprep.subr.bf16.mxu1 %v14406_v63  ;;  %13069 = vmatpush3.bf16.msra.mxu0 %v14400_v61  ;;  %v13702_v58 = vld [vmem:[%s14179_s9 + $0x48] ss:$12 sps:$4 sm:$0xff]  }
  0xaf   : > { %1010 = vmatpush1.bf16.msra.mxu1 %v14409_v1  ;;  %2548 = vrot.lane.b32.xlu0 %v14234_v13, %s14079_s15 }
  0xb0   : > { %v951_v2 = vpop.permute.xlu0 %950  ;;  %2544 = vrot.lane.b32.xlu1 %v14240_v15, %s14079_s15 }
  0xb1   : > { %v14419_v4 = vpop.permute.xlu1 %952 }
  0xb2   : > { %13070 = vmatprep.subr.bf16.mxu0 %v14419_v4  ;;  %v14424_v5 = vsel %vm966_vm0, %v951_v2, %v14419_v4 }
  0xb3   : > { %1011 = vmatprep.subr.bf16.mxu1 %v14424_v5  ;;  %13071 = vmatpush3.bf16.msra.mxu0 %v14419_v4 }
  0xb4   : > { %v949_v6 = vpop.permute.xlu0 %948  ;;  %2546 = vrot.lane.b32.xlu0 %v13665_v3, %s14079_s15  ;;  %2542 = vrot.lane.b32.xlu1 %v14246_v16, %s14079_s15 }
  0xb5   : > { %v14433_v8 = vsel %vm966_vm0, %v949_v6, %v951_v2  ;;  %v945_v9 = vpop.permute.xlu1 %944  ;;  %v13706_v2 = vld [vmem:[%s14179_s9 + $0x38] ss:$12 sps:$4 sm:$0xff]  }
  0xb6   : > { %1012 = vmatpush1.bf16.msra.mxu1 %v14433_v8 }
  0xb8   : > { %v14436_v10 = vpop.permute.xlu0 %946  ;;  %2538 = vrot.lane.b32.xlu0 %v14253_v19, %s14079_s15  ;;  %2540 = vrot.lane.b32.xlu1 %v13667_v7, %s14079_s15  ;;  %v13682_v19 = vld [vmem:[%s14179_s9 + $0xb0] ss:$12 sps:$4 sm:$0xff]  }
  0xb9   : > { %v943_v11 = vpop.permute.xlu1 %942  ;;  %13072 = vmatprep.subr.bf16.mxu0 %v14436_v10  ;;  %v14444_v12 = vsel %vm966_vm0, %v945_v9, %v14436_v10  ;;  %v14606_v7 = vld [vmem:[#allocation2 + $0x78] sm:$0xff]  }
  0xba   : > { %v14447_v13 = vsel %vm966_vm0, %v943_v11, %v945_v9  ;;  %1013 = vmatprep.subr.bf16.mxu1 %v14444_v12  ;;  %13073 = vmatpush3.bf16.msra.mxu0 %v14436_v10  ;;  %v13708_v9 = vld [vmem:[%s14179_s9 + $0x1c] ss:$12 sps:$4 sm:$0xff]  }
  0xbb   : > { %1014 = vmatpush1.bf16.msra.mxu1 %v14447_v13 }
  0xbc   : > { %v939_v15 = vpop.permute.xlu0 %938  ;;  %2536 = vrot.lane.b32.xlu0 %v14258_v20, %s14079_s15  ;;  %2532 = vrot.lane.b32.xlu1 %v14263_v22, %s14079_s15 }
  0xbd   : > { %v14457_v16 = vpop.permute.xlu1 %940 }
  0xbe   : > { %13074 = vmatprep.subr.bf16.mxu0 %v14457_v16  ;;  %v14462_v17 = vsel %vm966_vm0, %v939_v15, %v14457_v16 }
  0xbf   : > { %1015 = vmatprep.subr.bf16.mxu1 %v14462_v17  ;;  %13075 = vmatpush3.bf16.msra.mxu0 %v14457_v16 }
  0xc0   : > { %v937_v21 = vpop.permute.xlu0 %936  ;;  %2534 = vrot.lane.b32.xlu0 %v13669_v14, %s14079_s15  ;;  %2530 = vrot.lane.b32.xlu1 %v14273_v25, %s14079_s15 }
  0xc1   : > { %v14472_v20 = vsel %vm966_vm0, %v937_v21, %v939_v15  ;;  %v933_v22 = vpop.permute.xlu1 %932  ;;  %v13676_v15 = vld [vmem:[#allocation2 + $0x100] sm:$0xff]   ;;  %v13716_v21 = vld [vmem:[%s14179_s9 + $0x8] ss:$12 sps:$4 sm:$0xff]  }
  0xc2   : > { %1016 = vmatpush1.bf16.msra.mxu1 %v14472_v20 }
  0xc4   : > { %v14477_v26 = vpop.permute.xlu0 %934  ;;  %3542 = vrot.lane.b32.xlu0 %v13680_v18, %s14080_s17  ;;  %3544 = vrot.lane.b32.xlu1 %v13682_v19, %s14080_s17  ;;  %v13714_v18 = vld [vmem:[%s14179_s9 + $0x4] ss:$12 sps:$4 sm:$0xff]  }
  0xc5   : > { %v931_v27 = vpop.permute.xlu1 %930  ;;  %13076 = vmatprep.subr.bf16.mxu0 %v14477_v26  ;;  %v14484_v25 = vsel %vm966_vm0, %v933_v22, %v14477_v26 }
  0xc6   : > { %v14487_v28 = vsel %vm966_vm0, %v931_v27, %v933_v22  ;;  %1017 = vmatprep.subr.bf16.mxu1 %v14484_v25  ;;  %13077 = vmatpush3.bf16.msra.mxu0 %v14477_v26  ;;  %v13718_v22 = vld [vmem:[%s14179_s9] ss:$12 sps:$4 sm:$0xff]  }
  0xc7   : > { %1018 = vmatpush1.bf16.msra.mxu1 %v14487_v28 }
  0xc8   : > { %v927_v31 = vpop.permute.xlu0 %926  ;;  %3540 = vrot.lane.b32.xlu0 %v13683_v23, %s14080_s17  ;;  %3536 = vrot.lane.b32.xlu1 %v13684_v24, %s14080_s17  ;;  %v13677_v24 = vld [vmem:[#allocation2 + $0x108] sm:$0xff]  }
  0xc9   : > { %v14496_v32 = vpop.permute.xlu1 %928 }
  0xca   : > { %13078 = vmatprep.subr.bf16.mxu0 %v14496_v32  ;;  %v14501_v33 = vsel %vm966_vm0, %v927_v31, %v14496_v32 }
  0xcb   : > { %1019 = vmatprep.subr.bf16.mxu1 %v14501_v33  ;;  %13079 = vmatpush3.bf16.msra.mxu0 %v14496_v32 }
  0xcc   : > { %v925_v36 = vpop.permute.xlu0 %924  ;;  %3538 = vrot.lane.b32.xlu0 %v13687_v29, %s14080_s17  ;;  %3534 = vrot.lane.b32.xlu1 %v13688_v30, %s14080_s17 }
  0xcd   : > { %v14510_v37 = vsel %vm966_vm0, %v925_v36, %v927_v31  ;;  %v921_v38 = vpop.permute.xlu1 %920 }
  0xce   : > { %1020 = vmatpush1.bf16.msra.mxu1 %v14510_v37 }
  0xd0   : > { %v14515_v42 = vpop.permute.xlu0 %922  ;;  %3530 = vrot.lane.b32.xlu0 %v13689_v34, %s14080_s17  ;;  %3532 = vrot.lane.b32.xlu1 %v13691_v35, %s14080_s17  ;;  %v13686_v35 = vld [vmem:[#allocation2 + $0x120] sm:$0xff]  }
  0xd1   : > { %v919_v43 = vpop.permute.xlu1 %918  ;;  %13080 = vmatprep.subr.bf16.mxu0 %v14515_v42  ;;  %v14522_v44 = vsel %vm966_vm0, %v921_v38, %v14515_v42 }
  0xd2   : > { %v14525_v45 = vsel %vm966_vm0, %v919_v43, %v921_v38  ;;  %1021 = vmatprep.subr.bf16.mxu1 %v14522_v44  ;;  %13081 = vmatpush3.bf16.msra.mxu0 %v14515_v42  ;;  %v13692_v43 = vld [vmem:[#allocation2 + $0x128] sm:$0xff]  }
  0xd3   : > { %1022 = vmatpush1.bf16.msra.mxu1 %v14525_v45  ;;  %1426 = vmatprep.subr.bf16.mxu0 %v14390_v59 }
  0xd4   : > { %13098 = vmatprep.subr.bf16.mxu1 %v14384_v56  ;;  %v14533_v49 = vpop.permute.xlu0 %1930  ;;  %3528 = vrot.lane.b32.xlu0 %v13693_v39, %s14080_s17 }
  0xd5   : > { %13083 = vmatmul.mubr.bf16.vlgmr.msra.gmra.mxu0 %v13668_v40  ;;  %v14537_v51 = vpop.permute.xlu1 %1932  ;;  %3524 = vrot.lane.b32.xlu1 %v13694_v41, %s14080_s17 }
  0xd6   : > { %1040 = vmatmul.mubr.bf16.vlgmr.msra.gmra.mxu1 %v14349_v48  ;;  %1427 = vmatpush1.bf16.msra.mxu0 %v14393_v60  ;;  %v14555_v48 = vld [vmem:[#allocation2 + $0x60] sm:$0xff]   ;;  %v14572_v60 = vld [vmem:[#allocation2 + $0x68] sm:$0xff]  }
  0xd7   : > { %1428 = vmatprep.subr.bf16.mxu0 %v14406_v63  ;;  %13099 = vmatpush3.bf16.msra.mxu1 %v14384_v56  ;;  %v13701_v56 = vld [vmem:[%s14179_s9 + $0x50] ss:$12 sps:$4 sm:$0xff]  }
  0xd8   : > { %13100 = vmatprep.subr.bf16.mxu1 %v14400_v61  ;;  %13086 = vmatprep.mubr.bf16.mxu0 %v13670_v46  ;;  %v14548_v54 = vpop.permute.xlu0 %1928 }
  0xd9   : > { %1049 = vmatprep.mubr.bf16.mxu1 %v21323_v0  ;;  %v14551_v55 = vpop.permute.xlu1 %1924  ;;  %3526 = vrot.lane.b32.xlu0 %v13696_v47, %s14080_s17  ;;  %v1949_v39 = vsel %vm1934_vm1, %v14548_v54, %v14533_v49  ;;  %v13698_v54 = vld [vmem:[#allocation2 + $0x130] sm:$0xff]  }
  0xda   : > { %1429 = vmatpush1.bf16.msra.mxu0 %v14409_v1  ;;  %3522 = vrot.lane.b32.xlu1 %v13697_v50, %s14080_s17  ;;  %v14584_v1 = vld [vmem:[#allocation2 + $0x70] sm:$0xff]  }
  0xdb   : > { %1430 = vmatprep.subr.bf16.mxu0 %v14424_v5  ;;  %13101 = vmatpush3.bf16.msra.mxu1 %v14400_v61  ;;  %v13703_v61 = vld [vmem:[%s14179_s9 + $0x34] ss:$12 sps:$4 sm:$0xff]   ;;  %v13707_v5 = vld [vmem:[%s14179_s9 + $0x30] ss:$12 sps:$4 sm:$0xff]  }
  0xdc   : > { %13102 = vmatprep.subr.bf16.mxu1 %v14419_v4  ;;  %v14562_v57 = vpop.permute.xlu0 %1926 }
  0xdd   : > { %13087 = vmatmul.mubr.bf16.gmra.mxu0 %v14544_v52  ;;  %v14566_v59 = vpop.permute.xlu1 %1922  ;;  %3518 = vrot.lane.b32.xlu0 %v13699_v53, %s14080_s17  ;;  %v1948_v41 = vsel %vm1934_vm1, %v14551_v55, %v14562_v57 }
  0xde   : > { %1050 = vmatmul.mubr.bf16.gmra.mxu1 %v13668_v40  ;;  %1431 = vmatpush1.bf16.msra.mxu0 %v14433_v8 }
  0xdf   : > { %1432 = vmatprep.subr.bf16.mxu0 %v14444_v12  ;;  %13103 = vmatpush3.bf16.msra.mxu1 %v14419_v4  ;;  %v13711_v12 = vld [vmem:[%s14179_s9 + $0x20] ss:$12 sps:$4 sm:$0xff]  }
  0xe0   : > { %13104 = vmatprep.subr.bf16.mxu1 %v14436_v10  ;;  %13090 = vmatprep.mubr.bf16.mxu0 %v14555_v48  ;;  %v14577_v62 = vpop.permute.xlu0 %1918 }
  0xe1   : > { %1059 = vmatprep.mubr.bf16.mxu1 %v21323_v0  ;;  %v14580_v63 = vpop.permute.xlu1 %1920  ;;  %3520 = vrot.lane.b32.xlu1 %v13701_v56, %s14080_s17 }
  0xe2   : > { %1433 = vmatpush1.bf16.msra.mxu0 %v14447_v13  ;;  %3516 = vrot.lane.b32.xlu0 %v13702_v58, %s14080_s17  ;;  %v13713_v13 = vld [vmem:[%s14179_s9 + $0x18] ss:$12 sps:$4 sm:$0xff]   ;;  %v1946_v47 = vsel %vm1934_vm1, %v14577_v62, %v14580_v63 }
  0xe3   : > { %1434 = vmatprep.subr.bf16.mxu0 %v14462_v17  ;;  %13105 = vmatpush3.bf16.msra.mxu1 %v14436_v10 }
  0xe4   : > { %13106 = vmatprep.subr.bf16.mxu1 %v14457_v16  ;;  %v14591_v3 = vpop.permute.xlu0 %1916 }
  0xe5   : > { %13091 = vmatmul.mubr.bf16.gmra.mxu0 %v14572_v60  ;;  %v14594_v4 = vpop.permute.xlu1 %1912  ;;  %3512 = vrot.lane.b32.xlu1 %v13703_v61, %s14080_s17 }
  0xe6   : > { %1060 = vmatmul.mubr.bf16.gmra.mxu1 %v13670_v46  ;;  %1435 = vmatpush1.bf16.msra.mxu0 %v14472_v20 }
  0xe7   : > { %1436 = vmatprep.subr.bf16.mxu0 %v14484_v25  ;;  %13107 = vmatpush3.bf16.msra.mxu1 %v14457_v16  ;;  %v1950_v16 = vsel %vm1934_vm1, %v14533_v49, %v14537_v51  ;;  %v1945_v49 = vsel %vm1934_vm1, %v14591_v3, %v14577_v62 }
  0xe8   : > { %13108 = vmatprep.subr.bf16.mxu1 %v14477_v26  ;;  %13094 = vmatprep.mubr.bf16.mxu0 %v14584_v1  ;;  %v14603_v6 = vpop.permute.xlu0 %1914 }
  0xe9   : > { %1069 = vmatprep.mubr.bf16.mxu1 %v21323_v0  ;;  %v14608_v8 = vpop.permute.xlu1 %1910  ;;  %3514 = vrot.lane.b32.xlu0 %v13706_v2, %s14080_s17  ;;  %v13710_v2 = vld [vmem:[#allocation2 + $0x140] sm:$0xff]  }
  0xea   : > { %1437 = vmatpush1.bf16.msra.mxu0 %v14487_v28  ;;  %3510 = vrot.lane.b32.xlu1 %v13707_v5, %s14080_s17  ;;  %v13678_v28 = vld [vmem:[#allocation2 + $0x110] sm:$0xff]  }
  0xeb   : > { %1438 = vmatprep.subr.bf16.mxu0 %v14501_v33  ;;  %13109 = vmatpush3.bf16.msra.mxu1 %v14477_v26 }
  0xec   : > { %13110 = vmatprep.subr.bf16.mxu1 %v14496_v32  ;;  %v14617_v10 = vpop.permute.xlu0 %1906 }
  0xed   : > { %13095 = vmatmul.mubr.bf16.gmra.mxu0 %v14606_v7  ;;  %v14620_v11 = vpop.permute.xlu1 %1908  ;;  %3506 = vrot.lane.b32.xlu0 %v13708_v9, %s14080_s17 }
  0xee   : > { %1070 = vmatmul.mubr.bf16.gmra.mxu1 %v14544_v52  ;;  %1439 = vmatpush1.bf16.msra.mxu0 %v14510_v37  ;;  %v1944_v52 = vsel %vm1934_vm1, %v14594_v4, %v14603_v6  ;;  %v1942_v56 = vsel %vm1934_vm1, %v14617_v10, %v14620_v11 }
  0xef   : > { %1440 = vmatprep.subr.bf16.mxu0 %v14522_v44  ;;  %13111 = vmatpush3.bf16.msra.mxu1 %v14496_v32  ;;  %v13679_v32 = vld [vmem:[#allocation2 + $0x118] sm:$0xff]  }
  0xf0   : > { %13112 = vmatprep.subr.bf16.mxu1 %v14515_v42  ;;  %1458 = vmatprep.mubr.bf16.mxu0 %v21323_v0  ;;  %v14631_v14 = vpop.permute.xlu0 %1904 }
  0xf1   : > { %1079 = vmatprep.mubr.bf16.mxu1 %v21323_v0  ;;  %v14637_v17 = vpop.permute.xlu1 %1900  ;;  %3508 = vrot.lane.b32.xlu1 %v13711_v12, %s14080_s17 }
  0xf2   : > { %1441 = vmatpush1.bf16.msra.mxu0 %v14525_v45  ;;  %3504 = vrot.lane.b32.xlu0 %v13713_v13, %s14080_s17  ;;  %v1947_v45 = vsel %vm1934_vm1, %v14566_v59, %v14551_v55  ;;  %v1943_v55 = vsel %vm1934_vm1, %v14608_v8, %v14594_v4  ;;  %v1941_v59 = vsel %vm1934_vm1, %v14631_v14, %v14617_v10  ;;  %v13712_v14 = vld [vmem:[#allocation2 + $0x148] sm:$0xff]  }
  0xf3   : > { %13113 = vmatpush3.bf16.msra.mxu1 %v14515_v42  ;;  %13130 = vmatprep.subr.bf16.mxu0 %v14537_v51 }
  0xf4   : > { %1975 = vmatprep.subr.bf16.mxu1 %v1950_v16  ;;  %v14645_v19 = vpop.permute.xlu0 %1902 }
  0xf5   : > { %1459 = vmatmul.mubr.bf16.vlgmr.msra.gmra.mxu0 %v13676_v15  ;;  %v14648_v20 = vpop.permute.xlu1 %1898  ;;  %3500 = vrot.lane.b32.xlu1 %v13714_v18, %s14080_s17  ;;  %v1940_v61 = vsel %vm1934_vm1, %v14637_v17, %v14645_v19 }
  0xf6   : > { %1080 = vmatmul.mubr.bf16.gmra.mxu1 %v14555_v48  ;;  %1468 = vmatprep.mubr.bf16.mxu0 %v21323_v0 }
  0xf7   : > { %1089 = vmatprep.mubr.bf16.mxu1 %v21323_v0  ;;  %13131 = vmatpush3.bf16.msra.mxu0 %v14537_v51 }
  0xf8   : > { %13132 = vmatprep.subr.bf16.mxu0 %v14562_v57  ;;  %v14657_v23 = vpop.permute.xlu0 %1894  ;;  %3502 = vrot.lane.b32.xlu0 %v13716_v21, %s14080_s17  ;;  %v14810_v21 = vld [vmem:[#allocation2 + $0x150] sm:$0xff]  }
  0xf9   : > { %3498 = vrot.lane.b32.xlu1 %v13718_v22, %s14080_s17  ;;  %v14661_v26 = vpop.permute.xlu1 %1896 }
  0xfa   : > { %v1938_v5 = vsel %vm1934_vm1, %v14657_v23, %v14661_v26 }
  0xfb   : > { %13133 = vmatpush3.bf16.msra.mxu0 %v14562_v57 }
  0xfc   : > { %13134 = vmatprep.subr.bf16.mxu0 %v14580_v63  ;;  %v14665_v27 = vpop.permute.xlu0 %1892 }
  0xfd   : > { %1469 = vmatmul.mubr.bf16.gmra.mxu0 %v13677_v24  ;;  %v14671_v25 = vpop.permute.xlu1 %1888  ;;  %v1937_v9 = vsel %vm1934_vm1, %v14665_v27, %v14657_v23 }
  0xfe   : > { %1090 = vmatmul.mubr.bf16.gmra.mxu1 %v14572_v60  ;;  %1478 = vmatprep.mubr.bf16.mxu0 %v21323_v0 }
  0xff   : > { %1099 = vmatprep.mubr.bf16.mxu1 %v21323_v0  ;;  %13135 = vmatpush3.bf16.msra.mxu0 %v14580_v63  ;;  %v13705_v63 = vld [vmem:[#allocation2 + $0x138] sm:$0xff]  }
 0x100   : > { %13136 = vmatprep.subr.bf16.mxu0 %v14603_v6  ;;  %v14674_v29 = vpop.permute.xlu0 %1890 }
 0x101   : > { %v14680_v30 = vpop.permute.xlu1 %1886 }
 0x103   : > { %13137 = vmatpush3.bf16.msra.mxu0 %v14603_v6 }
 0x104   : > { %13138 = vmatprep.subr.bf16.mxu0 %v14620_v11  ;;  %v14684_v31 = vpop.permute.xlu0 %2574 }
 0x105   : > { %1479 = vmatmul.mubr.bf16.gmra.mxu0 %v13678_v28  ;;  %v14688_v33 = vpop.permute.xlu1 %2576 }
 0x106   : > { %1100 = vmatmul.mubr.bf16.gmra.mxu1 %v14584_v1  ;;  %1488 = vmatprep.mubr.bf16.mxu0 %v21323_v0  ;;  %v14700_v36 = vsel %vm2578_vm2, %v14684_v31, %v14688_v33  ;;  %v1939_v1 = vsel %vm1934_vm1, %v14648_v20, %v14637_v17  ;;  %v1935_v17 = vsel %vm1934_vm1, %v14680_v30, %v14671_v25 }
 0x107   : > { %1109 = vmatprep.mubr.bf16.mxu1 %v21323_v0  ;;  %13139 = vmatpush3.bf16.msra.mxu0 %v14620_v11  ;;  %v1936_v11 = vsel %vm1934_vm1, %v14671_v25, %v14674_v29 }
 0x108   : > { %13140 = vmatprep.subr.bf16.mxu0 %v14645_v19  ;;  %v14691_v34 = vpop.permute.xlu0 %2572 }
 0x109   : > { %v14702_v37 = vpop.permute.xlu1 %2568  ;;  %v14817_v20 = vsel %vm2578_vm2, %v14691_v34, %v14684_v31 }
 0x10b   : > { %13141 = vmatpush3.bf16.msra.mxu0 %v14645_v19 }
 0x10c   : > { %13142 = vmatprep.subr.bf16.mxu0 %v14661_v26  ;;  %v14704_v38 = vpop.permute.xlu0 %2570 }
 0x10d   : > { %1489 = vmatmul.mubr.bf16.gmra.mxu0 %v13679_v32  ;;  %v14717_v42 = vpop.permute.xlu1 %2566  ;;  %v14823_v23 = vsel %vm2578_vm2, %v14702_v37, %v14704_v38 }
 0x10e   : > { %1110 = vmatmul.mubr.bf16.gmra.mxu1 %v14606_v7  ;;  %1498 = vmatprep.mubr.bf16.mxu0 %v21323_v0 }
 0x10f   : > { %13114 = vmatprep.mubr.bf16.mxu1 %v13676_v15  ;;  %13143 = vmatpush3.bf16.msra.mxu0 %v14661_v26 }
 0x110   : > { %13144 = vmatprep.subr.bf16.mxu0 %v14674_v29  ;;  %v14719_v44 = vpop.permute.xlu0 %2562 }
 0x111   : > { %v14733_v50 = vpop.permute.xlu1 %2564 }
 0x112   : > { %v14712_v40 = vpop.f32.mrf.mxu0  ;;  %v14851_v31 = vsel %vm2578_vm2, %v14719_v44, %v14733_v50 }
 0x113   : > { %13145 = vmatpush3.bf16.msra.mxu0 %v14674_v29  ;;  %v14845_v29 = vld [vmem:[#allocation2 + $0x158] sm:$0xff]  }
 0x114   : > { %2619 = vmatprep.subr.bf16.mxu0 %v14700_v36  ;;  %v14724_v46 = vpop.f32.mrf.mxu0  ;;  %v14740_v53 = vpop.permute.xlu0 %2560 }
 0x115   : > { %1499 = vmatmul.mubr.bf16.gmra.mxu0 %v13686_v35  ;;  %v14751_v57 = vpop.permute.xlu1 %2556 }
 0x116   : > { %13115 = vmatmul.mubr.bf16.vlgmr.msra.gmra.mxu1 %v13677_v24  ;;  %1508 = vmatprep.mubr.bf16.mxu0 %v21323_v0  ;;  %v14735_v51 = vpop.f32.mrf.mxu0 }
 0x117   : > { %1976 = vmatpush1.bf16.msra.mxu1 %v1949_v39  ;;  %13118 = vmatprep.mubr.bf16.mxu1 %v13678_v28  ;;  %v14842_v28 = vsel %vm2578_vm2, %v14717_v42, %v14702_v37  ;;  %v14860_v37 = vld [vmem:[#allocation2 + $0x160] sm:$0xff]   ;;  %v14867_v39 = vsel %vm2578_vm2, %v14740_v53, %v14719_v44 }
 0x118   : > { %1977 = vmatprep.subr.bf16.mxu1 %v1948_v41  ;;  %v14746_v48 = vpop.f32.mrf.mxu0  ;;  %v14753_v58 = vpop.permute.xlu0 %2558 }
 0x119   : > { %v13052_v62 = vpop.f32.mrf.mxu1  ;;  %v14774_v3 = vpop.permute.xlu1 %2554 }
 0x11a   : > { %v14764_v60 = vpop.f32.mrf.mxu0  ;;  %677 = vst.msk [vmem:[%s14758_s12 + $0x40] sm:$0xff] %vm670_vm3, %v13052_v62 }
 0x11b   : > { %1978 = vmatpush1.bf16.msra.mxu1 %v1947_v45  ;;  %v605_v7 = vpop.f32.mrf.mxu1 }
 0x11c   : > { %1979 = vmatprep.subr.bf16.mxu1 %v1946_v47  ;;  %v14776_v4 = vpop.f32.mrf.mxu0  ;;  %671 = vst.msk [vmem:[%s14758_s12 + $0x10] sm:$0xff] %vm670_vm3, %v605_v7  ;;  %v14889_v47 = vsel %vm2578_vm2, %v14774_v3, %v14751_v57 }
 0x11d   : > { %1509 = vmatmul.mubr.bf16.gmra.mxu0 %v13692_v43  ;;  %v14781_v6 = vpop.permute.xlu0 %2550  ;;  %v13053_v8 = vpop.f32.mrf.mxu1 }
 0x11e   : > { %13119 = vmatmul.mubr.bf16.gmra.mxu1 %v13679_v32  ;;  %1518 = vmatprep.mubr.bf16.mxu0 %v21323_v0  ;;  %v14788_v10 = vpop.f32.mrf.mxu0  ;;  %680 = vst.msk [vmem:[%s14758_s12 + $0x58] sm:$0xff] %vm670_vm3, %v13053_v8  ;;  %v14796_v13 = vpop.permute.xlu1 %2552  ;;  %v14944_v8 = vld [vmem:[#allocation2 + $0x178] sm:$0xff]  }
 0x11f   : > { %1980 = vmatpush1.bf16.msra.mxu1 %v1945_v49  ;;  %13122 = vmatprep.mubr.bf16.mxu1 %v13686_v35  ;;  %v608_v12 = vpop.f32.mrf.mxu1  ;;  %v14892_v49 = vld [vmem:[#allocation2 + $0x168] sm:$0xff]   ;;  %v14898_v53 = vsel %vm2578_vm2, %v14781_v6, %v14796_v13 }
 0x120   : > { %1981 = vmatprep.subr.bf16.mxu1 %v1944_v52  ;;  %674 = vst.msk [vmem:[%s14758_s12 + $0x28] sm:$0xff] %vm670_vm3, %v608_v12  ;;  %v14805_v18 = vpop.f32.mrf.mxu0 }
 0x121   : > { %v14800_v15 = vpop.permute.xlu0 %2548  ;;  %v13056_v16 = vpop.f32.mrf.mxu1 }
 0x122   : > { %689 = vst.msk [vmem:[%s14758_s12 + $0xa0] sm:$0xff] %vm670_vm3, %v13056_v16  ;;  %v14825_v24 = vpop.permute.xlu1 %2544  ;;  %v14827_v26 = vpop.f32.mrf.mxu0 }
 0x123   : > { %1982 = vmatpush1.bf16.msra.mxu1 %v1943_v55  ;;  %v621_v19 = vpop.f32.mrf.mxu1 }
 0x124   : > { %1983 = vmatprep.subr.bf16.mxu1 %v1942_v56  ;;  %683 = vst.msk [vmem:[%s14758_s12 + $0x70] sm:$0xff] %vm670_vm3, %v621_v19  ;;  %v14853_v32 = vpop.f32.mrf.mxu0 }
 0x125   : > { %1519 = vmatmul.mubr.bf16.gmra.mxu0 %v13698_v54  ;;  %v13057_v22 = vpop.f32.mrf.mxu1 }
 0x126   : > { %13123 = vmatmul.mubr.bf16.gmra.mxu1 %v13692_v43  ;;  %1528 = vmatprep.mubr.bf16.mxu0 %v21323_v0  ;;  %692 = vst.msk [vmem:[%s14758_s12 + $0xb8] sm:$0xff] %vm670_vm3, %v13057_v22  ;;  %v14833_v27 = vpop.permute.xlu0 %2546  ;;  %v2543_v35 = vpop.permute.xlu1 %2542  ;;  %v14874_v43 = vsel %vm2578_vm2, %v14751_v57, %v14753_v58  ;;  %v14985_v22 = vld [vmem:[%s14179_s9 + $0x90] ss:$12 sps:$4 sm:$0xff]  }
 0x127   : > { %1984 = vmatpush1.bf16.msra.mxu1 %v1941_v59  ;;  %13126 = vmatprep.mubr.bf16.mxu1 %v13698_v54  ;;  %v624_v25 = vpop.f32.mrf.mxu1  ;;  %v14876_v45 = vpop.f32.mrf.mxu0  ;;  %v14909_v59 = vld [vmem:[#allocation2 + $0x170] sm:$0xff]   ;;  %v14941_v7 = vsel %vm2578_vm2, %v2543_v35, %v14825_v24  ;;  %v15012_v35 = vld [vmem:[%s14179_s9 + $0x7c] ss:$12 sps:$4 sm:$0xff]  }
 0x128   : > { %1985 = vmatprep.subr.bf16.mxu1 %v1940_v61  ;;  %686 = vst.msk [vmem:[%s14758_s12 + $0x88] sm:$0xff] %vm670_vm3, %v624_v25  ;;  %v14916_v61 = vsel %vm2578_vm2, %v14800_v15, %v14781_v6  ;;  %v14993_v25 = vld [vmem:[#allocation2 + $0x80] sm:$0xff]  }
 0x129   : > { %v13060_v30 = vpop.f32.mrf.mxu1  ;;  %v14902_v55 = vpop.f32.mrf.mxu0 }
 0x12a   : > { %701 = vst.msk [vmem:[%s14758_s12 + $0x100] sm:$0xff] %vm670_vm3, %v13060_v30  ;;  %v2539_v41 = vpop.permute.xlu0 %2538  ;;  %v14900_v54 = vpop.permute.xlu1 %2540 }
 0x12b   : > { %1986 = vmatpush1.bf16.msra.mxu1 %v1939_v1  ;;  %v637_v34 = vpop.f32.mrf.mxu1  ;;  %v14930_v1 = vpop.f32.mrf.mxu0 }
 0x12c   : > { %1987 = vmatprep.subr.bf16.mxu1 %v1938_v5  ;;  %695 = vst.msk [vmem:[%s14758_s12 + $0xd0] sm:$0xff] %vm670_vm3, %v637_v34  ;;  %v14937_v5 = vsel %vm2578_vm2, %v2539_v41, %v14900_v54  ;;  %v13752_v34 = vld [vmem:[%s14179_s9 + $0x80] ss:$12 sps:$4 sm:$0xff]  }
 0x12d   : > { %1529 = vmatmul.mubr.bf16.gmra.mxu0 %v13705_v63  ;;  %v13061_v42 = vpop.f32.mrf.mxu1  ;;  %v14957_v12 = vpop.f32.mrf.mxu0 }
 0x12e   : > { %13127 = vmatmul.mubr.bf16.gmra.mxu1 %v13705_v63  ;;  %13146 = vmatprep.mubr.bf16.mxu0 %v13710_v2  ;;  %704 = vst.msk [vmem:[%s14758_s12 + $0x118] sm:$0xff] %vm670_vm3, %v13061_v42  ;;  %v2537_v56 = vpop.permute.xlu0 %2536  ;;  %v14924_v63 = vsel %vm2578_vm2, %v14825_v24, %v14833_v27  ;;  %v2533_v3 = vpop.permute.xlu1 %2532  ;;  %v5125_v42 = vld [vmem:[%s14179_s9 + $0x84] sm:$0xff] }
 0x12f   : > { %1988 = vmatpush1.bf16.msra.mxu1 %v1937_v9  ;;  %2007 = vmatprep.mubr.bf16.mxu1 %v21323_v0  ;;  %v640_v44 = vpop.f32.mrf.mxu1  ;;  %v14970_v16 = vsel %vm2578_vm2, %v2537_v56, %v2539_v41 }
 0x130   : > { %1989 = vmatprep.subr.bf16.mxu1 %v1936_v11  ;;  %698 = vst.msk [vmem:[%s14758_s12 + $0xe8] sm:$0xff] %vm670_vm3, %v640_v44  ;;  %v14953_v11 = vld [vmem:[%s14179_s9 + $0xac] ss:$12 sps:$4 sm:$0xff]   ;;  %v15023_v44 = vld [vmem:[%s14179_s9 + $0x64] ss:$12 sps:$4 sm:$0xff]  }
 0x131   : > { %v13064_v52 = vpop.f32.mrf.mxu1  ;;  %5348 = vrot.lane.b32.xlu0 %v14953_v11, %s14081_s21 }
 0x132   : > { %713 = vst.msk [vmem:[%s14758_s12 + $0x160] sm:$0xff] %vm670_vm3, %v13064_v52  ;;  %v14946_v9 = vpop.permute.xlu0 %2534  ;;  %v2531_v19 = vpop.permute.xlu1 %2530  ;;  %v5121_v52 = vld [vmem:[%s14179_s9 + $0x6c] sm:$0xff] }
 0x133   : > { %1990 = vmatpush1.bf16.msra.mxu1 %v1935_v17  ;;  %v653_v57 = vpop.f32.mrf.mxu1  ;;  %v14965_v15 = vsel %vm2578_vm2, %v2533_v3, %v14946_v9  ;;  %v14974_v17 = vld [vmem:[%s14179_s9 + $0xa8] ss:$12 sps:$4 sm:$0xff]   ;;  %v14990_v24 = vsel %vm2578_vm2, %v2531_v19, %v2533_v3  ;;  %v13760_v3 = vld [vmem:[%s14179_s9 + $0x50] ss:$12 sps:$4 sm:$0xff]  }
 0x134   : > { %13162 = vmatprep.subr.bf16.mxu1 %v14688_v33  ;;  %707 = vst.msk [vmem:[%s14758_s12 + $0x130] sm:$0xff] %vm670_vm3, %v653_v57  ;;  %v5115_v19 = vld [vmem:[%s14179_s9 + $0x48] sm:$0xff] }
 0x135   : > { %13147 = vmatmul.mubr.bf16.vlgmr.msra.gmra.mxu0 %v13712_v14  ;;  %v13065_v62 = vpop.f32.mrf.mxu1  ;;  %5346 = vrot.lane.b32.xlu0 %v14974_v17, %s14081_s21 }
 0x136   : > { %2620 = vmatpush1.bf16.msra.mxu0 %v14817_v20  ;;  %2008 = vmatmul.mubr.bf16.vlgmr.msra.gmra.mxu1 %v13710_v2  ;;  %716 = vst.msk [vmem:[%s14758_s12 + $0x178] sm:$0xff] %vm670_vm3, %v13065_v62  ;;  %v13743_v2 = vld [vmem:[%s14179_s9 + $0xb0] ss:$12 sps:$4 sm:$0xff]  }
 0x137   : > { %13163 = vmatpush3.bf16.msra.mxu1 %v14688_v33  ;;  %2621 = vmatprep.subr.bf16.mxu0 %v14823_v23  ;;  %v656_v6 = vpop.f32.mrf.mxu1 }
 0x138   : > { %13164 = vmatprep.subr.bf16.mxu1 %v14704_v38  ;;  %13150 = vmatprep.mubr.bf16.mxu0 %v14810_v21  ;;  %710 = vst.msk [vmem:[%s14758_s12 + $0x148] sm:$0xff] %vm670_vm3, %v656_v6 }
 0x139   : > { %2017 = vmatprep.mubr.bf16.mxu1 %v21323_v0  ;;  %5350 = vrot.lane.b32.xlu1 %v13743_v2, %s14081_s21 }
 0x13a   : > { %2622 = vmatpush1.bf16.msra.mxu0 %v14842_v28 }
 0x13b   : > { %13165 = vmatpush3.bf16.msra.mxu1 %v14704_v38  ;;  %2623 = vmatprep.subr.bf16.mxu0 %v14851_v31 }
 0x13c   : > { %13166 = vmatprep.subr.bf16.mxu1 %v14733_v50 }
 0x13d   : > { %13151 = vmatmul.mubr.bf16.gmra.mxu0 %v14845_v29 }
 0x13e   : > { %2624 = vmatpush1.bf16.msra.mxu0 %v14867_v39  ;;  %2018 = vmatmul.mubr.bf16.gmra.mxu1 %v13712_v14  ;;  %v14960_v14 = vld [vmem:[%s14179_s9 + $0x94] ss:$12 sps:$4 sm:$0xff]  }
 0x13f   : > { %13167 = vmatpush3.bf16.msra.mxu1 %v14733_v50  ;;  %2625 = vmatprep.subr.bf16.mxu0 %v14874_v43 }
 0x140   : > { %13168 = vmatprep.subr.bf16.mxu1 %v14753_v58  ;;  %13154 = vmatprep.mubr.bf16.mxu0 %v14860_v37 }
 0x141   : > { %2027 = vmatprep.mubr.bf16.mxu1 %v21323_v0  ;;  %5342 = vrot.lane.b32.xlu1 %v14960_v14, %s14081_s21 }
 0x142   : > { %2626 = vmatpush1.bf16.msra.mxu0 %v14889_v47 }
 0x143   : > { %13169 = vmatpush3.bf16.msra.mxu1 %v14753_v58  ;;  %2627 = vmatprep.subr.bf16.mxu0 %v14898_v53 }
 0x144   : > { %13170 = vmatprep.subr.bf16.mxu1 %v14796_v13 }
 0x145   : > { %13155 = vmatmul.mubr.bf16.gmra.mxu0 %v14892_v49  ;;  %5340 = vrot.lane.b32.xlu1 %v14985_v22, %s14081_s21 }
 0x146   : > { %2628 = vmatpush1.bf16.msra.mxu0 %v14916_v61  ;;  %2028 = vmatmul.mubr.bf16.gmra.mxu1 %v14810_v21  ;;  %v14982_v21 = vpop.f32.mrf.mxu0 }
 0x147   : > { %13171 = vmatpush3.bf16.msra.mxu1 %v14796_v13  ;;  %2629 = vmatprep.subr.bf16.mxu0 %v14924_v63 }
 0x148   : > { %13172 = vmatprep.subr.bf16.mxu1 %v14833_v27  ;;  %13158 = vmatprep.mubr.bf16.mxu0 %v14909_v59  ;;  %v15003_v30 = vpop.f32.mrf.mxu0 }
 0x149   : > { %2037 = vmatprep.mubr.bf16.mxu1 %v21323_v0  ;;  %5338 = vrot.lane.b32.xlu1 %v13752_v34, %s14081_s21  ;;  %v15069_v34 = vld [vmem:[%s14179_s9 + $0x34] ss:$12 sps:$4 sm:$0xff]  }
 0x14a   : > { %2630 = vmatpush1.bf16.msra.mxu0 %v14941_v7  ;;  %v15016_v41 = vpop.f32.mrf.mxu0 }
 0x14b   : > { %13173 = vmatpush3.bf16.msra.mxu1 %v14833_v27  ;;  %2631 = vmatprep.subr.bf16.mxu0 %v14937_v5  ;;  %21587 = vst [vmem:[#allocation8_spill] sm:$0xff] %v15016_v41 }
 0x14c   : > { %13174 = vmatprep.subr.bf16.mxu1 %v14900_v54  ;;  %v15035_v57 = vpop.f32.mrf.mxu0 }
 0x14d   : > { %13159 = vmatmul.mubr.bf16.gmra.mxu0 %v14944_v8  ;;  %21588 = vst [vmem:[#allocation9_spill] sm:$0xff] %v15035_v57  ;;  %5330 = vrot.lane.b32.xlu1 %v15023_v44, %s14081_s21 }
 0x14e   : > { %2632 = vmatpush1.bf16.msra.mxu0 %v14970_v16  ;;  %2038 = vmatmul.mubr.bf16.gmra.mxu1 %v14845_v29  ;;  %v13751_v29 = vld [vmem:[%s14179_s9 + $0x98] ss:$12 sps:$4 sm:$0xff]   ;;  %v15049_v2 = vpop.f32.mrf.mxu0 }
 0x14f   : > { %13175 = vmatpush3.bf16.msra.mxu1 %v14900_v54  ;;  %2633 = vmatprep.subr.bf16.mxu0 %v14965_v15  ;;  %21589 = vst [vmem:[#allocation10_spill] sm:$0xff] %v15049_v2 }
 0x150   : > { %13176 = vmatprep.subr.bf16.mxu1 %v14946_v9  ;;  %2651 = vmatprep.mubr.bf16.mxu0 %v21323_v0  ;;  %v15063_v6 = vpop.f32.mrf.mxu0 }
 0x151   : > { %2047 = vmatprep.mubr.bf16.mxu1 %v21323_v0  ;;  %5344 = vrot.lane.b32.xlu0 %v13751_v29, %s14081_s21  ;;  %21590 = vst [vmem:[#allocation11_spill] sm:$0xff] %v15063_v6  ;;  %v5117_v29 = vld [vmem:[%s14179_s9 + $0x54] sm:$0xff] }
 0x152   : > { %2634 = vmatpush1.bf16.msra.mxu0 %v14990_v24 }
 0x153   : > { %13177 = vmatpush3.bf16.msra.mxu1 %v14946_v9  ;;  %13194 = vmatprep.subr.bf16.mxu0 %v14688_v33 }
 0x154   : > { %3038 = vmatprep.subr.bf16.mxu1 %v14700_v36  ;;  %v5123_v36 = vld [vmem:[%s14179_s9 + $0x78] sm:$0xff] }
 0x155   : > { %2652 = vmatmul.mubr.bf16.vlgmr.msra.gmra.mxu0 %v14993_v25  ;;  %5336 = vrot.lane.b32.xlu0 %v15012_v35, %s14081_s21  ;;  %v15032_v56 = vcombine.low %v5123_v36, %v5125_v42  ;;  %v5111_v36 = vld [vmem:[%s14179_s9 + $0x30] sm:$0xff]  ;;  %v15078_v42 = vcombine.low %v5115_v19, %v5117_v29  ;;  %v15098_v19 = vpop.permute.xlu1 %3544  ;;  %v13767_v29 = vld [vmem:[%s14179_s9 + $0x20] ss:$12 sps:$4 sm:$0xff]  }
 0x156   : > { %13195 = vmatpush3.bf16.msra.mxu0 %v14688_v33  ;;  %2048 = vmatmul.mubr.bf16.gmra.mxu1 %v14860_v37  ;;  %v15025_v33 = vld [vmem:[#allocation2 + $0x88] sm:$0xff]   ;;  %v5119_v37 = vld [vmem:[%s14179_s9 + $0x60] sm:$0xff] }
 0x157   : > { %13196 = vmatprep.subr.bf16.mxu0 %v14704_v38  ;;  %2661 = vmatprep.mubr.bf16.mxu0 %v21323_v0  ;;  %v15039_v62 = vcombine.low %v5119_v37, %v5121_v52  ;;  %v15082_v37 = vpop.f32.mrf.mxu0  ;;  %v15084_v52 = vpop.permute.xlu0 %3542 }
 0x158   : > { %2057 = vmatprep.mubr.bf16.mxu1 %v21323_v0  ;;  %21591 = vst [vmem:[#allocation12_spill] sm:$0xff] %v15082_v37  ;;  %v5109_v37 = vld [vmem:[%s14179_s9 + $0x24] sm:$0xff] }
 0x159   : > { %5334 = vrot.lane.b32.xlu0 %v15032_v56, %s14081_s21  ;;  %5328 = vrot.lane.b32.xlu1 %v15039_v62, %s14081_s21  ;;  %v15132_v6 = vpop.permute.xlu1 %3536 }
 0x15a   : > { %13197 = vmatpush3.bf16.msra.mxu0 %v14704_v38  ;;  %v13759_v38 = vld [vmem:[%s14179_s9 + $0x68] ss:$12 sps:$4 sm:$0xff]  }
 0x15b   : > { %13198 = vmatprep.subr.bf16.mxu0 %v14733_v50 }
 0x15d   : > { %2662 = vmatmul.mubr.bf16.gmra.mxu0 %v15025_v33  ;;  %5332 = vrot.lane.b32.xlu0 %v13759_v38, %s14081_s21 }
 0x15e   : > { %13199 = vmatpush3.bf16.msra.mxu0 %v14733_v50  ;;  %2058 = vmatmul.mubr.bf16.gmra.mxu1 %v14892_v49  ;;  %v15055_v50 = vld [vmem:[#allocation2 + $0x90] sm:$0xff]   ;;  %v15060_v49 = vld [vmem:[%s14179_s9 + $0x4c] ss:$12 sps:$4 sm:$0xff]  }
 0x15f   : > { %13200 = vmatprep.subr.bf16.mxu0 %v14753_v58  ;;  %2671 = vmatprep.mubr.bf16.mxu0 %v21323_v0 }
 0x160   : > { %2067 = vmatprep.mubr.bf16.mxu1 %v21323_v0  ;;  %5326 = vrot.lane.b32.xlu1 %v13760_v3, %s14081_s21  ;;  %v15096_v3 = vpop.f32.mrf.mxu0 }
 0x161   : > { %5324 = vrot.lane.b32.xlu0 %v15060_v49, %s14081_s21  ;;  %21592 = vst [vmem:[#allocation13_spill] sm:$0xff] %v15096_v3  ;;  %v5107_v3 = vld [vmem:[%s14179_s9 + $0x18] sm:$0xff] }
 0x162   : > { %13201 = vmatpush3.bf16.msra.mxu0 %v14753_v58  ;;  %v5113_v58 = vld [vmem:[%s14179_s9 + $0x3c] sm:$0xff] }
 0x163   : > { %13202 = vmatprep.subr.bf16.mxu0 %v14796_v13  ;;  %v15089_v38 = vcombine.low %v5111_v36, %v5113_v58  ;;  %v15103_v36 = vpop.permute.xlu0 %3540  ;;  %v15113_v58 = vpop.f32.mrf.mxu0 }
 0x164   : > { %5318 = vrot.lane.b32.xlu1 %v15069_v34, %s14081_s21  ;;  %21593 = vst [vmem:[#allocation14_spill] sm:$0xff] %v15113_v58  ;;  %v5105_v58 = vld [vmem:[%s14179_s9 + $0xc] sm:$0xff] }
 0x165   : > { %2672 = vmatmul.mubr.bf16.gmra.mxu0 %v15055_v50  ;;  %5322 = vrot.lane.b32.xlu0 %v15078_v42, %s14081_s21  ;;  %v15136_v2 = vpop.f32.mrf.mxu0 }
 0x166   : > { %13203 = vmatpush3.bf16.msra.mxu0 %v14796_v13  ;;  %2068 = vmatmul.mubr.bf16.gmra.mxu1 %v14909_v59  ;;  %v13727_v13 = vld [vmem:[#allocation2 + $0x98] sm:$0xff]   ;;  %21594 = vst [vmem:[#allocation15_spill] sm:$0xff] %v15136_v2  ;;  %v15155_v2 = vpop.permute.xlu1 %3534 }
 0x167   : > { %13204 = vmatprep.subr.bf16.mxu0 %v14833_v27  ;;  %2681 = vmatprep.mubr.bf16.mxu0 %v21323_v0  ;;  %v13766_v59 = vld [vmem:[%s14179_s9 + $0x38] ss:$12 sps:$4 sm:$0xff]   ;;  %v15138_v57 = vpop.permute.xlu0 %3538 }
 0x168   : > { %2077 = vmatprep.mubr.bf16.mxu1 %v21323_v0  ;;  %5316 = vrot.lane.b32.xlu1 %v15089_v38, %s14081_s21 }
 0x169   : > { %5320 = vrot.lane.b32.xlu0 %v13766_v59, %s14081_s21  ;;  %v15121_v59 = vsel %vm3546_vm4, %v15084_v52, %v15098_v19 }
 0x16a   : > { %13205 = vmatpush3.bf16.msra.mxu0 %v14833_v27  ;;  %v15109_v27 = vld [vmem:[%s14179_s9 + $0x1c] ss:$12 sps:$4 sm:$0xff]  }
 0x16b   : > { %13206 = vmatprep.subr.bf16.mxu0 %v14900_v54  ;;  %v15160_v41 = vpop.permute.xlu0 %3530 }
 0x16c   : > { %5314 = vrot.lane.b32.xlu1 %v13767_v29, %s14081_s21 }
 0x16d   : > { %2682 = vmatmul.mubr.bf16.gmra.mxu0 %v13727_v13  ;;  %5312 = vrot.lane.b32.xlu0 %v15109_v27, %s14081_s21 }
 0x16e   : > { %13207 = vmatpush3.bf16.msra.mxu0 %v14900_v54  ;;  %2078 = vmatmul.mubr.bf16.gmra.mxu1 %v14944_v8  ;;  %v15125_v54 = vld [vmem:[%s14179_s9 + $0x4] ss:$12 sps:$4 sm:$0xff]  }
 0x16f   : > { %13208 = vmatprep.subr.bf16.mxu0 %v14946_v9  ;;  %2691 = vmatprep.mubr.bf16.mxu0 %v21323_v0  ;;  %v13728_v8 = vld [vmem:[#allocation2 + $0xa0] sm:$0xff]  }
 0x170   : > { %13178 = vmatprep.mubr.bf16.mxu1 %v14993_v25  ;;  %v5103_v0 = vld [vmem:[%s14179_s9] sm:$0xff]  ;;  %v15134_v25 = vcombine.low %v5107_v3, %v5109_v37  ;;  %5306 = vrot.lane.b32.xlu1 %v15125_v54, %s14081_s21  ;;  %v13775_v37 = vld [vmem:[%s14179_s9 + $0x8] ss:$12 sps:$4 sm:$0xff]   ;;  %v15152_v3 = vpop.f32.mrf.mxu0 }
 0x171   : > { %v15143_v29 = vcombine.low %v5103_v0, %v5105_v58  ;;  %v13776_v0 = vld [vmem:[%s14179_s9 + $0xb0] ss:$12 sps:$4 sm:$0xff]   ;;  %v13729_v58 = vld [vmem:[#allocation2 + $0xa8] sm:$0xff]  }
 0x172   : > { %13209 = vmatpush3.bf16.msra.mxu0 %v14946_v9  ;;  %5310 = vrot.lane.b32.xlu0 %v15134_v25, %s14081_s21  ;;  %v21595_v9 = vmov 0  }
 0x173   : > { %3587 = vmatprep.subr.bf16.mxu0 %v15121_v59 }
 0x174   : > { %5304 = vrot.lane.b32.xlu1 %v15143_v29, %s14081_s21 }
 0x175   : > { %2692 = vmatmul.mubr.bf16.gmra.mxu0 %v13728_v8 }
 0x176   : > { %13179 = vmatmul.mubr.bf16.vlgmr.msra.gmra.mxu1 %v15025_v33  ;;  %2701 = vmatprep.mubr.bf16.mxu0 %v21595_v9  ;;  %v13730_v33 = vld [vmem:[#allocation2 + $0xb0] sm:$0xff]  }
 0x177   : > { %3039 = vmatpush1.bf16.msra.mxu1 %v14817_v20  ;;  %13182 = vmatprep.mubr.bf16.mxu1 %v15055_v50  ;;  %v15164_v20 = vpop.f32.mrf.mxu0 }
 0x178   : > { %3040 = vmatprep.subr.bf16.mxu1 %v14823_v23  ;;  %5308 = vrot.lane.b32.xlu0 %v13775_v37, %s14081_s21  ;;  %v15171_v23 = vpop.permute.xlu1 %3532  ;;  %v1225_v37 = vld [vmem:[%s14758_s12 + $0x40] sm:$0xff] }
 0x179   : > { %6413 = vrot.lane.b32.xlu1 %v13776_v0, %s14082_s22 }
 0x17b   : > { %3041 = vmatpush1.bf16.msra.mxu1 %v14842_v28  ;;  %v15174_v28 = vpop.f32.mrf.mxu0 }
 0x17c   : > { %3042 = vmatprep.subr.bf16.mxu1 %v14851_v31  ;;  %6411 = vrot.lane.b32.xlu0 %v14953_v11, %s14082_s22  ;;  %v15176_v31 = vpop.permute.xlu0 %3528  ;;  %v13779_v11 = vld [vmem:[%s14179_s9 + $0x98] ss:$12 sps:$4 sm:$0xff]  }
 0x17d   : > { %2702 = vmatmul.mubr.bf16.gmra.mxu0 %v13729_v58  ;;  %6405 = vrot.lane.b32.xlu1 %v14960_v14, %s14082_s22  ;;  %v15185_v50 = vpop.f32.mrf.mxu0  ;;  %v13732_v14 = vld [vmem:[#allocation2 + $0x200] sm:$0xff]  }
 0x17e   : > { %13183 = vmatmul.mubr.bf16.gmra.mxu1 %v13727_v13  ;;  %2711 = vmatprep.mubr.bf16.mxu0 %v21595_v9 }
 0x17f   : > { %3043 = vmatpush1.bf16.msra.mxu1 %v14867_v39  ;;  %13186 = vmatprep.mubr.bf16.mxu1 %v13728_v8  ;;  %v15188_v39 = vpop.permute.xlu1 %3524  ;;  %v15236_v8 = vld [vmem:[#allocation2 + $0x210] sm:$0xff]  }
 0x180   : > { %3044 = vmatprep.subr.bf16.mxu1 %v14874_v43  ;;  %6409 = vrot.lane.b32.xlu0 %v14974_v17, %s14082_s22  ;;  %v13780_v43 = vld [vmem:[%s14179_s9 + $0x80] ss:$12 sps:$4 sm:$0xff]   ;;  %v15193_v13 = vpop.permute.xlu0 %3526 }
 0x181   : > { %6403 = vrot.lane.b32.xlu1 %v14985_v22, %s14082_s22 }
 0x183   : > { %3045 = vmatpush1.bf16.msra.mxu1 %v14889_v47  ;;  %v15198_v47 = vpop.f32.mrf.mxu0  ;;  %v15204_v17 = vpop.permute.xlu1 %3522 }
 0x184   : > { %3046 = vmatprep.subr.bf16.mxu1 %v14898_v53  ;;  %6407 = vrot.lane.b32.xlu0 %v13779_v11, %s14082_s22  ;;  %v13731_v53 = vld [vmem:[#allocation2 + $0xb8] sm:$0xff]  }
 0x185   : > { %2712 = vmatmul.mubr.bf16.gmra.mxu0 %v13730_v33  ;;  %6401 = vrot.lane.b32.xlu1 %v13780_v43, %s14082_s22  ;;  %v15207_v22 = vpop.f32.mrf.mxu0 }
 0x186   : > { %13187 = vmatmul.mubr.bf16.gmra.mxu1 %v13729_v58  ;;  %2721 = vmatprep.mubr.bf16.mxu0 %v21595_v9  ;;  %v15252_v58 = vsel %vm3546_vm4, %v15132_v6, %v15138_v57 }
 0x187   : > { %3047 = vmatpush1.bf16.msra.mxu1 %v14916_v61  ;;  %13190 = vmatprep.mubr.bf16.mxu1 %v13730_v33  ;;  %v15209_v61 = vpop.permute.xlu0 %3518 }
 0x188   : > { %3048 = vmatprep.subr.bf16.mxu1 %v14924_v63  ;;  %6399 = vrot.lane.b32.xlu0 %v15012_v35, %s14082_s22  ;;  %v13785_v63 = vld [vmem:[%s14179_s9 + $0x68] ss:$12 sps:$4 sm:$0xff]   ;;  %v13786_v35 = vld [vmem:[%s14179_s9 + $0x50] ss:$12 sps:$4 sm:$0xff]  }
 0x189   : > { %6393 = vrot.lane.b32.xlu1 %v15023_v44, %s14082_s22  ;;  %v15227_v44 = vld [vmem:[#allocation2 + $0x208] sm:$0xff]  }
 0x18b   : > { %3049 = vmatpush1.bf16.msra.mxu1 %v14941_v7  ;;  %v15218_v7 = vpop.f32.mrf.mxu0 }
 0x18c   : > { %3050 = vmatprep.subr.bf16.mxu1 %v14937_v5  ;;  %6397 = vrot.lane.b32.xlu0 %v15032_v56, %s14082_s22  ;;  %v15222_v5 = vpop.permute.xlu1 %3520  ;;  %v15229_v56 = vpop.permute.xlu0 %3516 }
 0x18d   : > { %2722 = vmatmul.mubr.bf16.gmra.mxu0 %v13731_v53  ;;  %6391 = vrot.lane.b32.xlu1 %v15039_v62, %s14082_s22 }
 0x18e   : > { %13191 = vmatmul.mubr.bf16.gmra.mxu1 %v13731_v53  ;;  %13210 = vmatprep.mubr.bf16.mxu0 %v13732_v14 }
 0x18f   : > { %3051 = vmatpush1.bf16.msra.mxu1 %v14970_v16  ;;  %3070 = vmatprep.mubr.bf16.mxu1 %v21595_v9  ;;  %v15233_v16 = vpop.f32.mrf.mxu0 }
 0x190   : > { %3052 = vmatprep.subr.bf16.mxu1 %v14965_v15  ;;  %6395 = vrot.lane.b32.xlu0 %v13785_v63, %s14082_s22  ;;  %v15242_v15 = vsel %vm3546_vm4, %v15103_v36, %v15084_v52  ;;  %v15254_v52 = vpop.permute.xlu1 %3512  ;;  %v15260_v11 = vpop.permute.xlu0 %3514 }
 0x191   : > { %6389 = vrot.lane.b32.xlu1 %v13786_v35, %s14082_s22  ;;  %21596 = vst [vmem:[#allocation16_spill] sm:$0xff] %v15260_v11  ;;  %v1228_v35 = vld [vmem:[%s14758_s12 + $0x58] sm:$0xff] }
 0x193   : > { %3053 = vmatpush1.bf16.msra.mxu1 %v14990_v24 }
 0x194   : > { %13226 = vmatprep.subr.bf16.mxu1 %v15098_v19  ;;  %6387 = vrot.lane.b32.xlu0 %v15060_v49, %s14082_s22  ;;  %v1219_v49 = vld [vmem:[%s14758_s12 + $0x10] sm:$0xff] }
 0x195   : > { %v13084_v62 = vpop.f32.mrf.mxu0  ;;  %13211 = vmatmul.mubr.bf16.vlgmr.msra.gmra.mxu0 %v15227_v44  ;;  %6381 = vrot.lane.b32.xlu1 %v15069_v34, %s14082_s22 }
 0x196   : > { %v1273_v24 = vadd.f32 %v13084_v62, %v1225_v37  ;;  %3588 = vmatpush1.bf16.msra.mxu0 %v15242_v15  ;;  %v1041_v0 = vpop.f32.mrf.mxu1  ;;  %3071 = vmatmul.mubr.bf16.vlgmr.msra.gmra.mxu1 %v13732_v14  ;;  %v15275_v62 = vld [vmem:[#allocation2 + $0x218] sm:$0xff]  }
 0x197   : > { %v1265_v36 = vadd.f32 %v1041_v0, %v14712_v40  ;;  %13227 = vmatpush3.bf16.msra.mxu1 %v15098_v19  ;;  %v1154_v33 = vpop.f32.mrf.mxu0  ;;  %3589 = vmatprep.subr.bf16.mxu0 %v15252_v58  ;;  %v15269_v40 = vsel %vm3546_vm4, %v15155_v2, %v15132_v6 }
 0x198   : > { %1321 = vst.msk [vmem:[%s14758_s12 + $0x40] sm:$0xff] %vm670_vm3, %v1273_v24  ;;  %v1267_v43 = vadd.f32 %v1219_v49, %v1154_v33  ;;  %v1043_v53 = vpop.f32.mrf.mxu1  ;;  %13228 = vmatprep.subr.bf16.mxu1 %v15138_v57  ;;  %13214 = vmatprep.mubr.bf16.mxu0 %v15236_v8  ;;  %v1222_v24 = vld [vmem:[%s14758_s12 + $0x28] sm:$0xff]  ;;  %v15297_v33 = vpop.permute.xlu1 %3510 }
 0x199   : > { %1313 = vst [vmem:[%s14758_s12] sm:$0xff] %v1265_v36  ;;  %v1266_v14 = vadd.f32 %v1043_v53, %v14724_v46  ;;  %v13085_v63 = vpop.f32.mrf.mxu0  ;;  %3080 = vmatprep.mubr.bf16.mxu1 %v21595_v9  ;;  %v15285_v46 = vsel %vm3546_vm4, %v15160_v41, %v15171_v23  ;;  %6385 = vrot.lane.b32.xlu0 %v15078_v42, %s14082_s22  ;;  %v15299_v42 = vld [vmem:[#allocation2 + $0x220] sm:$0xff]  }
 0x19a   : > { %1315 = vst.msk [vmem:[%s14758_s12 + $0x10] sm:$0xff] %vm670_vm3, %v1267_v43  ;;  %v1276_v37 = vadd.f32 %v13085_v63, %v1228_v35  ;;  %3590 = vmatpush1.bf16.msra.mxu0 %v15269_v40  ;;  %v1045_v2 = vpop.f32.mrf.mxu1  ;;  %v1237_v53 = vld [vmem:[%s14758_s12 + $0xa0] sm:$0xff]  ;;  %6379 = vrot.lane.b32.xlu1 %v15089_v38, %s14082_s22 }
 0x19b   : > { %1314 = vst [vmem:[%s14758_s12 + $0x8] sm:$0xff] %v1266_v14  ;;  %v1268_v6 = vadd.f32 %v1045_v2, %v14735_v51  ;;  %13229 = vmatpush3.bf16.msra.mxu1 %v15138_v57  ;;  %v1157_v34 = vpop.f32.mrf.mxu0  ;;  %3591 = vmatprep.subr.bf16.mxu0 %v15285_v46  ;;  %v15304_v51 = vsel %vm3546_vm4, %v15176_v31, %v15160_v41  ;;  %v15310_v14 = vpop.permute.xlu0 %3506  ;;  %v13788_v63 = vld [vmem:[%s14179_s9 + $0x38] ss:$12 sps:$4 sm:$0xff]   ;;  %v13789_v35 = vld [vmem:[%s14179_s9 + $0x20] ss:$12 sps:$4 sm:$0xff]   ;;  %v1231_v2 = vld [vmem:[%s14758_s12 + $0x70] sm:$0xff] }
 0x19c   : > { %1324 = vst.msk [vmem:[%s14758_s12 + $0x58] sm:$0xff] %vm670_vm3, %v1276_v37  ;;  %v1270_v0 = vadd.f32 %v1222_v24, %v1157_v34  ;;  %v1047_v36 = vpop.f32.mrf.mxu1  ;;  %13230 = vmatprep.subr.bf16.mxu1 %v15171_v23 }
 0x19d   : > { %1316 = vst [vmem:[%s14758_s12 + $0x18] sm:$0xff] %v1268_v6  ;;  %v1269_v49 = vadd.f32 %v1047_v36, %v14746_v48  ;;  %v13088_v43 = vpop.f32.mrf.mxu0  ;;  %13215 = vmatmul.mubr.bf16.gmra.mxu0 %v15275_v62  ;;  %v15322_v48 = vsel %vm3546_vm4, %v15188_v39, %v15193_v13  ;;  %v15343_v36 = vld [vmem:[#allocation2 + $0x228] sm:$0xff]   ;;  %6383 = vrot.lane.b32.xlu0 %v13788_v63, %s14082_s22 }
 0x19e   : > { %1318 = vst.msk [vmem:[%s14758_s12 + $0x28] sm:$0xff] %vm670_vm3, %v1270_v0  ;;  %v1285_v41 = vadd.f32 %v13088_v43, %v1237_v53  ;;  %3592 = vmatpush1.bf16.msra.mxu0 %v15304_v51  ;;  %v1051_v31 = vpop.f32.mrf.mxu1  ;;  %3081 = vmatmul.mubr.bf16.gmra.mxu1 %v15227_v44  ;;  %v1240_v0 = vld [vmem:[%s14758_s12 + $0xb8] sm:$0xff]  ;;  %v1234_v63 = vld [vmem:[%s14758_s12 + $0x88] sm:$0xff] }
 0x19f   : > { %1317 = vst [vmem:[%s14758_s12 + $0x20] sm:$0xff] %v1269_v49  ;;  %v1271_v38 = vadd.f32 %v1051_v31, %v14764_v60  ;;  %13231 = vmatpush3.bf16.msra.mxu1 %v15171_v23  ;;  %v1170_v37 = vpop.f32.mrf.mxu0  ;;  %3593 = vmatprep.subr.bf16.mxu0 %v15322_v48  ;;  %v15337_v60 = vsel %vm3546_vm4, %v15204_v17, %v15188_v39  ;;  %v15354_v17 = vpop.permute.xlu1 %3508 }
 0x1a0   : > { %1333 = vst.msk [vmem:[%s14758_s12 + $0xa0] sm:$0xff] %vm670_vm3, %v1285_v41  ;;  %v1279_v44 = vadd.f32 %v1231_v2, %v1170_v37  ;;  %v1053_v6 = vpop.f32.mrf.mxu1  ;;  %13232 = vmatprep.subr.bf16.mxu1 %v15193_v13  ;;  %13218 = vmatprep.mubr.bf16.mxu0 %v15299_v42  ;;  %v3505_v41 = vpop.permute.xlu0 %3504 }
 0x1a1   : > { %1319 = vst [vmem:[%s14758_s12 + $0x30] sm:$0xff] %v1271_v38  ;;  %v1272_v34 = vadd.f32 %v1053_v6, %v14776_v4  ;;  %v13089_v24 = vpop.f32.mrf.mxu0  ;;  %3090 = vmatprep.mubr.bf16.mxu1 %v21595_v9  ;;  %v15352_v4 = vsel %vm3546_vm4, %v15209_v61, %v15222_v5  ;;  %6377 = vrot.lane.b32.xlu1 %v13789_v35, %s14082_s22  ;;  %v15365_v35 = vld [vmem:[#allocation2 + $0x230] sm:$0xff]  }
 0x1a2   : > { %1327 = vst.msk [vmem:[%s14758_s12 + $0x70] sm:$0xff] %vm670_vm3, %v1279_v44  ;;  %v1288_v49 = vadd.f32 %v13089_v24, %v1240_v0  ;;  %3594 = vmatpush1.bf16.msra.mxu0 %v15337_v60  ;;  %v1055_v39 = vpop.f32.mrf.mxu1  ;;  %v1249_v44 = vld [vmem:[%s14758_s12 + $0x100] sm:$0xff]  ;;  %6375 = vrot.lane.b32.xlu0 %v15109_v27, %s14082_s22 }
 0x1a3   : > { %1320 = vst [vmem:[%s14758_s12 + $0x38] sm:$0xff] %v1272_v34  ;;  %v1274_v43 = vadd.f32 %v1055_v39, %v14788_v10  ;;  %13233 = vmatpush3.bf16.msra.mxu1 %v15193_v13  ;;  %v1173_v53 = vpop.f32.mrf.mxu0  ;;  %3595 = vmatprep.subr.bf16.mxu0 %v15352_v4  ;;  %v15370_v10 = vsel %vm3546_vm4, %v15229_v56, %v15209_v61  ;;  %v1243_v56 = vld [vmem:[%s14758_s12 + $0xd0] sm:$0xff]  ;;  %v3501_v0 = vpop.permute.xlu1 %3500 }
 0x1a4   : > { %1336 = vst.msk [vmem:[%s14758_s12 + $0xb8] sm:$0xff] %vm670_vm3, %v1288_v49  ;;  %v1282_v31 = vadd.f32 %v1234_v63, %v1173_v53  ;;  %v1057_v38 = vpop.f32.mrf.mxu1  ;;  %13234 = vmatprep.subr.bf16.mxu1 %v15222_v5  ;;  %v15404_v49 = vsel %vm3546_vm4, %v15297_v33, %v15254_v52  ;;  %v1252_v53 = vld [vmem:[%s14758_s12 + $0x118] sm:$0xff] }
 0x1a5   : > { %1322 = vst [vmem:[%s14758_s12 + $0x48] sm:$0xff] %v1274_v43  ;;  %v1275_v37 = vadd.f32 %v1057_v38, %v14805_v18  ;;  %v13092_v2 = vpop.f32.mrf.mxu0  ;;  %13219 = vmatmul.mubr.bf16.gmra.mxu0 %v15343_v36  ;;  %v15385_v18 = vsel %vm3546_vm4, %v15254_v52, %v15260_v11  ;;  %v15410_v63 = vld [vmem:[#allocation2 + $0x238] sm:$0xff]   ;;  %6369 = vrot.lane.b32.xlu1 %v15125_v54, %s14082_s22  ;;  %v1246_v54 = vld [vmem:[%s14758_s12 + $0xe8] sm:$0xff] }
 0x1a6   : > { %1330 = vst.msk [vmem:[%s14758_s12 + $0x88] sm:$0xff] %vm670_vm3, %v1282_v31  ;;  %v1297_v6 = vadd.f32 %v13092_v2, %v1249_v44  ;;  %3596 = vmatpush1.bf16.msra.mxu0 %v15370_v10  ;;  %v1061_v34 = vpop.f32.mrf.mxu1  ;;  %3091 = vmatmul.mubr.bf16.gmra.mxu1 %v15236_v8  ;;  %v15412_v31 = vpop.permute.xlu0 %3502 }
 0x1a7   : > { %1323 = vst [vmem:[%s14758_s12 + $0x50] sm:$0xff] %v1275_v37  ;;  %v1277_v61 = vadd.f32 %v1061_v34, %v14827_v26  ;;  %13235 = vmatpush3.bf16.msra.mxu1 %v15222_v5  ;;  %v1186_v27 = vpop.f32.mrf.mxu0  ;;  %3597 = vmatprep.subr.bf16.mxu0 %v15385_v18  ;;  %v15399_v26 = vsel %vm3546_vm4, %v15310_v14, %v15354_v17  ;;  %v1261_v34 = vld [vmem:[%s14758_s12 + $0x160] sm:$0xff] }
 0x1a8   : > { %1345 = vst.msk [vmem:[%s14758_s12 + $0x100] sm:$0xff] %vm670_vm3, %v1297_v6  ;;  %v1291_v8 = vadd.f32 %v1243_v56, %v1186_v27  ;;  %v1063_v24 = vpop.f32.mrf.mxu1  ;;  %13236 = vmatprep.subr.bf16.mxu1 %v15260_v11  ;;  %13222 = vmatprep.mubr.bf16.mxu0 %v15365_v35 }
 0x1a9   : > { %1325 = vst [vmem:[%s14758_s12 + $0x60] sm:$0xff] %v1277_v61  ;;  %v1278_v39 = vadd.f32 %v1063_v24, %v14853_v32  ;;  %v13093_v43 = vpop.f32.mrf.mxu0  ;;  %3100 = vmatprep.mubr.bf16.mxu1 %v21595_v9  ;;  %6373 = vrot.lane.b32.xlu0 %v15134_v25, %s14082_s22  ;;  %v15431_v25 = vsel %vm3546_vm4, %v3501_v0, %v15412_v31  ;;  %v13792_v61 = vld [vmem:[%s14179_s9 + $0x8] ss:$12 sps:$4 sm:$0xff]  }
 0x1aa   : > { %1339 = vst.msk [vmem:[%s14758_s12 + $0xd0] sm:$0xff] %vm670_vm3, %v1291_v8  ;;  %v1300_v52 = vadd.f32 %v13093_v43, %v1252_v53  ;;  %3598 = vmatpush1.bf16.msra.mxu0 %v15404_v49  ;;  %v1065_v32 = vpop.f32.mrf.mxu1  ;;  %6367 = vrot.lane.b32.xlu1 %v15143_v29, %s14082_s22  ;;  %v1255_v29 = vld [vmem:[%s14758_s12 + $0x130] sm:$0xff]  ;;  %v1264_v53 = vld [vmem:[%s14758_s12 + $0x178] sm:$0xff] }
 0x1ab   : > { %1326 = vst [vmem:[%s14758_s12 + $0x68] sm:$0xff] %v1278_v39  ;;  %v1280_v33 = vadd.f32 %v1065_v32, %v14876_v45  ;;  %13237 = vmatpush3.bf16.msra.mxu1 %v15260_v11  ;;  %v1189_v38 = vpop.f32.mrf.mxu0  ;;  %3599 = vmatprep.subr.bf16.mxu0 %v15399_v26  ;;  %v15435_v45 = vsel %vm3546_vm4, %v3505_v41, %v15310_v14  ;;  %v13793_v41 = vld [vmem:[%s14179_s9 + $0xb0] ss:$12 sps:$4 sm:$0xff]   ;;  %v15469_v32 = vld [vmem:[%s14179_s9 + $0xac] ss:$12 sps:$4 sm:$0xff]  }
 0x1ac   : > { %1348 = vst.msk [vmem:[%s14758_s12 + $0x118] sm:$0xff] %vm670_vm3, %v1300_v52  ;;  %v1294_v37 = vadd.f32 %v1246_v54, %v1189_v38  ;;  %v1067_v2 = vpop.f32.mrf.mxu1  ;;  %13238 = vmatprep.subr.bf16.mxu1 %v15354_v17  ;;  %v15465_v52 = vld [vmem:[#allocation2 + $0xc0] sm:$0xff]   ;;  %v1258_v54 = vld [vmem:[%s14758_s12 + $0x148] sm:$0xff] }
 0x1ad   : > { %1328 = vst [vmem:[%s14758_s12 + $0x78] sm:$0xff] %v1280_v33  ;;  %v1281_v44 = vadd.f32 %v1067_v2, %v14902_v55  ;;  %v13096_v6 = vpop.f32.mrf.mxu0  ;;  %13223 = vmatmul.mubr.bf16.gmra.mxu0 %v15410_v63  ;;  %v3499_v55 = vpop.permute.xlu1 %3498  ;;  %6371 = vrot.lane.b32.xlu0 %v13792_v61, %s14082_s22 }
 0x1ae   : > { %1342 = vst.msk [vmem:[%s14758_s12 + $0xe8] sm:$0xff] %vm670_vm3, %v1294_v37  ;;  %v1309_v27 = vadd.f32 %v13096_v6, %v1261_v34  ;;  %3600 = vmatpush1.bf16.msra.mxu0 %v15435_v45  ;;  %v1071_v14 = vpop.f32.mrf.mxu1  ;;  %3101 = vmatmul.mubr.bf16.gmra.mxu1 %v15275_v62  ;;  %v15494_v34 = vld [vmem:[%s14179_s9 + $0xa8] ss:$12 sps:$4 sm:$0xff]  }
 0x1af   : > { %1329 = vst [vmem:[%s14758_s12 + $0x80] sm:$0xff] %v1281_v44  ;;  %v1283_v56 = vadd.f32 %v1071_v14, %v14930_v1  ;;  %13239 = vmatpush3.bf16.msra.mxu1 %v15354_v17  ;;  %v1202_v8 = vpop.f32.mrf.mxu0  ;;  %3601 = vmatprep.subr.bf16.mxu0 %v15431_v25  ;;  %v15460_v1 = vsel %vm3546_vm4, %v3499_v55, %v3501_v0  ;;  %v15484_v44 = vld [vmem:[%s14179_s9 + $0x94] ss:$12 sps:$4 sm:$0xff]  }
 0x1b0   : > { %1357 = vst.msk [vmem:[%s14758_s12 + $0x160] sm:$0xff] %vm670_vm3, %v1309_v27  ;;  %v1303_v24 = vadd.f32 %v1255_v29, %v1202_v8  ;;  %v1073_v39 = vpop.f32.mrf.mxu1  ;;  %13240 = vmatprep.subr.bf16.mxu1 %v15412_v31  ;;  %3619 = vmatprep.mubr.bf16.mxu0 %v21595_v9  ;;  %v15516_v29 = vld [vmem:[#allocation2 + $0xc8] sm:$0xff]  }
 0x1b1   : > { %1331 = vst [vmem:[%s14758_s12 + $0x90] sm:$0xff] %v1283_v56  ;;  %v1284_v62 = vadd.f32 %v1073_v39, %v14957_v12  ;;  %v13097_v43 = vpop.f32.mrf.mxu0  ;;  %3110 = vmatprep.mubr.bf16.mxu1 %v21595_v9  ;;  %7057 = vrot.lane.b32.xlu1 %v13793_v41, %s14083_s23  ;;  %v15510_v41 = vld [vmem:[%s14179_s9 + $0x90] ss:$12 sps:$4 sm:$0xff]  }
 0x1b2   : > { %1351 = vst.msk [vmem:[%s14758_s12 + $0x130] sm:$0xff] %vm670_vm3, %v1303_v24  ;;  %v1312_v33 = vadd.f32 %v13097_v43, %v1264_v53  ;;  %3602 = vmatpush1.bf16.msra.mxu0 %v15460_v1  ;;  %v1075_v12 = vpop.f32.mrf.mxu1  ;;  %7055 = vrot.lane.b32.xlu0 %v15469_v32, %s14083_s23  ;;  %v13801_v24 = vld [vmem:[%s14179_s9 + $0x98] ss:$12 sps:$4 sm:$0xff]  }
 0x1b3   : > { %1332 = vst [vmem:[%s14758_s12 + $0x98] sm:$0xff] %v1284_v62  ;;  %v1286_v0 = vadd.f32 %v1075_v12, %v14982_v21  ;;  %13241 = vmatpush3.bf16.msra.mxu1 %v15412_v31  ;;  %13258 = vmatprep.subr.bf16.mxu0 %v15098_v19  ;;  %v1205_v38 = vpop.f32.mrf.mxu0  ;;  %v21599_v62 = vld [vmem:[#allocation10_spill] sm:$0xff]  ;;  %v13802_v12 = vld [vmem:[%s14179_s9 + $0x80] ss:$12 sps:$4 sm:$0xff]  }
 0x1b4   : > { %1360 = vst.msk [vmem:[%s14758_s12 + $0x178] sm:$0xff] %vm670_vm3, %v1312_v33  ;;  %v1306_v37 = vadd.f32 %v1258_v54, %v1205_v38  ;;  %4006 = vmatprep.subr.bf16.mxu1 %v15121_v59  ;;  %v1077_v2 = vpop.f32.mrf.mxu1 }
 0x1b5   : > { %1334 = vst [vmem:[%s14758_s12 + $0xa8] sm:$0xff] %v1286_v0  ;;  %v1287_v6 = vadd.f32 %v1077_v2, %v15003_v30  ;;  %v15488_v21 = vpop.f32.mrf.mxu0  ;;  %3620 = vmatmul.mubr.bf16.vlgmr.msra.gmra.mxu0 %v15465_v52  ;;  %v21597_v30 = vld [vmem:[#allocation8_spill] sm:$0xff]  ;;  %7049 = vrot.lane.b32.xlu1 %v15484_v44, %s14083_s23  ;;  %v21600_v0 = vld [vmem:[#allocation11_spill] sm:$0xff] }
 0x1b6   : > { %1354 = vst.msk [vmem:[%s14758_s12 + $0x148] sm:$0xff] %vm670_vm3, %v1306_v37  ;;  %13259 = vmatpush3.bf16.msra.mxu0 %v15098_v19  ;;  %v1081_v61 = vpop.f32.mrf.mxu1  ;;  %3111 = vmatmul.mubr.bf16.gmra.mxu1 %v15299_v42  ;;  %v21598_v42 = vld [vmem:[#allocation9_spill] sm:$0xff]  ;;  %v15537_v37 = vld [vmem:[%s14179_s9 + $0x7c] ss:$12 sps:$4 sm:$0xff]  }
 0x1b7   : > { %1335 = vst [vmem:[%s14758_s12 + $0xb0] sm:$0xff] %v1287_v6  ;;  %v1289_v27 = vadd.f32 %v1081_v61, %v21597_v30  ;;  %13260 = vmatprep.subr.bf16.mxu0 %v15138_v57  ;;  %v15503_v14 = vpop.f32.mrf.mxu0  ;;  %3629 = vmatprep.mubr.bf16.mxu0 %v21595_v9  ;;  %v6830_v6 = vld [vmem:[%s14179_s9 + $0x78] sm:$0xff]  ;;  %v6832_v61 = vld [vmem:[%s14179_s9 + $0x84] sm:$0xff] }
 0x1b8   : > { %v1083_v55 = vpop.f32.mrf.mxu1  ;;  %3120 = vmatprep.mubr.bf16.mxu1 %v21595_v9  ;;  %7053 = vrot.lane.b32.xlu0 %v15494_v34, %s14083_s23  ;;  %v21601_v30 = vld [vmem:[#allocation12_spill] sm:$0xff] }
 0x1b9   : > { %1337 = vst [vmem:[%s14758_s12 + $0xc0] sm:$0xff] %v1289_v27  ;;  %v1290_v56 = vadd.f32 %v1083_v55, %v21598_v42  ;;  %v15514_v8 = vpop.f32.mrf.mxu0  ;;  %7047 = vrot.lane.b32.xlu1 %v15510_v41, %s14083_s23 }
 0x1ba   : > { %13261 = vmatpush3.bf16.msra.mxu0 %v15138_v57  ;;  %v1085_v39 = vpop.f32.mrf.mxu1 }
 0x1bb   : > { %1338 = vst [vmem:[%s14758_s12 + $0xc8] sm:$0xff] %v1290_v56  ;;  %v1292_v43 = vadd.f32 %v1085_v39, %v21599_v62  ;;  %13262 = vmatprep.subr.bf16.mxu0 %v15171_v23  ;;  %v15525_v53 = vpop.f32.mrf.mxu0  ;;  %v21602_v56 = vld [vmem:[#allocation13_spill] sm:$0xff] }
 0x1bc   : > { %v1087_v33 = vpop.f32.mrf.mxu1  ;;  %7051 = vrot.lane.b32.xlu0 %v13801_v24, %s14083_s23  ;;  %v15558_v62 = vld [vmem:[#allocation2 + $0xd0] sm:$0xff]  }
 0x1bd   : > { %1340 = vst [vmem:[%s14758_s12 + $0xd8] sm:$0xff] %v1292_v43  ;;  %v1293_v38 = vadd.f32 %v1087_v33, %v21600_v0  ;;  %v15532_v54 = vpop.f32.mrf.mxu0  ;;  %3630 = vmatmul.mubr.bf16.gmra.mxu0 %v15516_v29  ;;  %7045 = vrot.lane.b32.xlu1 %v13802_v12, %s14083_s23  ;;  %v6826_v43 = vld [vmem:[%s14179_s9 + $0x60] sm:$0xff]  ;;  %v6828_v33 = vld [vmem:[%s14179_s9 + $0x6c] sm:$0xff]  ;;  %v15564_v0 = vcombine.low %v6830_v6, %v6832_v61 }
 0x1be   : > { %13263 = vmatpush3.bf16.msra.mxu0 %v15171_v23  ;;  %v1091_v2 = vpop.f32.mrf.mxu1  ;;  %3121 = vmatmul.mubr.bf16.gmra.mxu1 %v15343_v36  ;;  %v15552_v36 = vld [vmem:[%s14179_s9 + $0x64] ss:$12 sps:$4 sm:$0xff]   ;;  %v21604_v6 = vld [vmem:[#allocation15_spill] sm:$0xff] }
 0x1bf   : > { %1341 = vst [vmem:[%s14758_s12 + $0xe0] sm:$0xff] %v1293_v38  ;;  %v1295_v27 = vadd.f32 %v1091_v2, %v21601_v30  ;;  %13264 = vmatprep.subr.bf16.mxu0 %v15193_v13  ;;  %v15546_v55 = vpop.f32.mrf.mxu0  ;;  %3639 = vmatprep.mubr.bf16.mxu0 %v21595_v9  ;;  %v21603_v38 = vld [vmem:[#allocation14_spill] sm:$0xff] }
 0x1c0   : > { %v1093_v42 = vpop.f32.mrf.mxu1  ;;  %3130 = vmatprep.mubr.bf16.mxu1 %v21595_v9  ;;  %7043 = vrot.lane.b32.xlu0 %v15537_v37, %s14083_s23 }
 0x1c1   : > { %1343 = vst [vmem:[%s14758_s12 + $0xf0] sm:$0xff] %v1295_v27  ;;  %v1296_v24 = vadd.f32 %v1093_v42, %v21602_v56  ;;  %v15556_v39 = vpop.f32.mrf.mxu0  ;;  %7037 = vrot.lane.b32.xlu1 %v15552_v36, %s14083_s23  ;;  %v15574_v42 = vcombine.low %v6826_v43, %v6828_v33 }
 0x1c2   : > { %13265 = vmatpush3.bf16.msra.mxu0 %v15193_v13  ;;  %v1095_v12 = vpop.f32.mrf.mxu1 }
 0x1c3   : > { %1344 = vst [vmem:[%s14758_s12 + $0xf8] sm:$0xff] %v1296_v24  ;;  %v1298_v2 = vadd.f32 %v1095_v12, %v21603_v38  ;;  %13266 = vmatprep.subr.bf16.mxu0 %v15222_v5  ;;  %v15570_v30 = vpop.f32.mrf.mxu0  ;;  %v13809_v24 = vld [vmem:[%s14179_s9 + $0x68] ss:$12 sps:$4 sm:$0xff]  }
 0x1c4   : > { %v1097_v27 = vpop.f32.mrf.mxu1  ;;  %7041 = vrot.lane.b32.xlu0 %v15564_v0, %s14083_s23 }
 0x1c5   : > { %1346 = vst [vmem:[%s14758_s12 + $0x108] sm:$0xff] %v1298_v2  ;;  %v1299_v61 = vadd.f32 %v1097_v27, %v21604_v6  ;;  %v15578_v56 = vpop.f32.mrf.mxu0  ;;  %3640 = vmatmul.mubr.bf16.gmra.mxu0 %v15558_v62  ;;  %7035 = vrot.lane.b32.xlu1 %v15574_v42, %s14083_s23  ;;  %v13810_v2 = vld [vmem:[%s14179_s9 + $0x50] ss:$12 sps:$4 sm:$0xff]   ;;  %v15604_v6 = vld [vmem:[%s14179_s9 + $0x4c] ss:$12 sps:$4 sm:$0xff]  }
 0x1c6   : > { %13267 = vmatpush3.bf16.msra.mxu0 %v15222_v5  ;;  %v1101_v12 = vpop.f32.mrf.mxu1  ;;  %3131 = vmatmul.mubr.bf16.gmra.mxu1 %v15365_v35  ;;  %v15600_v27 = vld [vmem:[#allocation2 + $0xd8] sm:$0xff]  }
 0x1c7   : > { %1347 = vst [vmem:[%s14758_s12 + $0x110] sm:$0xff] %v1299_v61  ;;  %v1301_v43 = vadd.f32 %v1101_v12, %v15152_v3  ;;  %13268 = vmatprep.subr.bf16.mxu0 %v15260_v11  ;;  %v15589_v33 = vpop.f32.mrf.mxu0  ;;  %3649 = vmatprep.mubr.bf16.mxu0 %v21595_v9  ;;  %v6822_v12 = vld [vmem:[%s14179_s9 + $0x48] sm:$0xff] }
 0x1c8   : > { %21605 = vst [vmem:[#allocation8_spill] sm:$0xff] %v15589_v33  ;;  %v1103_v38 = vpop.f32.mrf.mxu1  ;;  %3140 = vmatprep.mubr.bf16.mxu1 %v21595_v9  ;;  %7039 = vrot.lane.b32.xlu0 %v13809_v24, %s14083_s23  ;;  %v6824_v33 = vld [vmem:[%s14179_s9 + $0x54] sm:$0xff] }
 0x1c9   : > { %1349 = vst [vmem:[%s14758_s12 + $0x120] sm:$0xff] %v1301_v43  ;;  %v1302_v3 = vadd.f32 %v1103_v38, %v15164_v20  ;;  %v15598_v35 = vpop.f32.mrf.mxu0  ;;  %7033 = vrot.lane.b32.xlu1 %v13810_v2, %s14083_s23  ;;  %v15616_v24 = vld [vmem:[%s14179_s9 + $0x34] ss:$12 sps:$4 sm:$0xff]  }
 0x1ca   : > { %21606 = vst [vmem:[#allocation9_spill] sm:$0xff] %v15598_v35  ;;  %13269 = vmatpush3.bf16.msra.mxu0 %v15260_v11  ;;  %v1105_v61 = vpop.f32.mrf.mxu1 }
 0x1cb   : > { %1350 = vst [vmem:[%s14758_s12 + $0x128] sm:$0xff] %v1302_v3  ;;  %v1304_v43 = vadd.f32 %v1105_v61, %v15174_v28  ;;  %13270 = vmatprep.subr.bf16.mxu0 %v15354_v17  ;;  %v15612_v20 = vpop.f32.mrf.mxu0  ;;  %v6818_v28 = vld [vmem:[%s14179_s9 + $0x30] sm:$0xff]  ;;  %v6820_v3 = vld [vmem:[%s14179_s9 + $0x3c] sm:$0xff]  ;;  %v15627_v61 = vcombine.low %v6822_v12, %v6824_v33  ;;  %v13816_v12 = vld [vmem:[%s14179_s9 + $0x38] ss:$12 sps:$4 sm:$0xff]  }
 0x1cc   : > { %v1107_v38 = vpop.f32.mrf.mxu1  ;;  %7031 = vrot.lane.b32.xlu0 %v15604_v6, %s14083_s23  ;;  %v15640_v33 = vcombine.low %v6818_v28, %v6820_v3 }
 0x1cd   : > { %1352 = vst [vmem:[%s14758_s12 + $0x138] sm:$0xff] %v1304_v43  ;;  %v1305_v35 = vadd.f32 %v1107_v38, %v15185_v50  ;;  %v15620_v11 = vpop.f32.mrf.mxu0  ;;  %3650 = vmatmul.mubr.bf16.gmra.mxu0 %v15600_v27  ;;  %7025 = vrot.lane.b32.xlu1 %v15616_v24, %s14083_s23 }
 0x1ce   : > { %13271 = vmatpush3.bf16.msra.mxu0 %v15354_v17  ;;  %v1111_v2 = vpop.f32.mrf.mxu1  ;;  %3141 = vmatmul.mubr.bf16.gmra.mxu1 %v15410_v63 }
 0x1cf   : > { %1353 = vst [vmem:[%s14758_s12 + $0x140] sm:$0xff] %v1305_v35  ;;  %v1307_v50 = vadd.f32 %v1111_v2, %v15198_v47  ;;  %13272 = vmatprep.subr.bf16.mxu0 %v15412_v31  ;;  %v15634_v43 = vpop.f32.mrf.mxu0  ;;  %3659 = vmatprep.mubr.bf16.mxu0 %v21595_v9  ;;  %v13753_v35 = vld [vmem:[#allocation2 + $0xe0] sm:$0xff]  }
 0x1d0   : > { %v1113_v38 = vpop.f32.mrf.mxu1  ;;  %13242 = vmatprep.mubr.bf16.mxu1 %v15465_v52  ;;  %7029 = vrot.lane.b32.xlu0 %v15627_v61, %s14083_s23  ;;  %v13817_v2 = vld [vmem:[%s14179_s9 + $0x20] ss:$12 sps:$4 sm:$0xff]  }
 0x1d1   : > { %1355 = vst [vmem:[%s14758_s12 + $0x150] sm:$0xff] %v1307_v50  ;;  %v1308_v47 = vadd.f32 %v1113_v38, %v15207_v22  ;;  %v15644_v63 = vpop.f32.mrf.mxu0  ;;  %7023 = vrot.lane.b32.xlu1 %v15640_v33, %s14083_s23 }
 0x1d2   : > { %13273 = vmatpush3.bf16.msra.mxu0 %v15412_v31  ;;  %v1115_v52 = vpop.f32.mrf.mxu1 }
 0x1d3   : > { %1356 = vst [vmem:[%s14758_s12 + $0x158] sm:$0xff] %v1308_v47  ;;  %v1310_v28 = vadd.f32 %v1115_v52, %v15218_v7  ;;  %4425 = vmatprep.subr.bf16.mxu0 %v15121_v59  ;;  %v15653_v22 = vpop.f32.mrf.mxu0  ;;  %v15664_v7 = vld [vmem:[%s14179_s9 + $0x1c] ss:$12 sps:$4 sm:$0xff]  }
 0x1d4   : > { %v1117_v3 = vpop.f32.mrf.mxu1  ;;  %7027 = vrot.lane.b32.xlu0 %v13816_v12, %s14083_s23  ;;  %v6814_v52 = vld [vmem:[%s14179_s9 + $0x18] sm:$0xff] }
 0x1d5   : > { %1358 = vst [vmem:[%s14758_s12 + $0x168] sm:$0xff] %v1310_v28  ;;  %v1311_v50 = vadd.f32 %v1117_v3, %v15233_v16  ;;  %v15660_v38 = vpop.f32.mrf.mxu0  ;;  %3660 = vmatmul.mubr.bf16.gmra.mxu0 %v13753_v35  ;;  %v6816_v28 = vld [vmem:[%s14179_s9 + $0x24] sm:$0xff]  ;;  %7021 = vrot.lane.b32.xlu1 %v13817_v2, %s14083_s23 }
 0x1d6   : > { %21607 = vst [vmem:[#allocation10_spill] sm:$0xff] %v15660_v38  ;;  %v13116_v47 = vpop.f32.mrf.mxu1  ;;  %13243 = vmatmul.mubr.bf16.vlgmr.msra.gmra.mxu1 %v15516_v29  ;;  %3669 = vmatprep.mubr.bf16.mxu0 %v21595_v9  ;;  %v15680_v29 = vld [vmem:[%s14179_s9 + $0x4] ss:$12 sps:$4 sm:$0xff]  }
 0x1d7   : > { %1359 = vst [vmem:[%s14758_s12 + $0x170] sm:$0xff] %v1311_v50  ;;  %11072 = vst.msk [vmem:[%s14758_s12 + $0x1c0] sm:$0xff] %vm670_vm3, %v13116_v47  ;;  %4007 = vmatpush1.bf16.msra.mxu1 %v15242_v15  ;;  %v15674_v16 = vpop.f32.mrf.mxu0  ;;  %13246 = vmatprep.mubr.bf16.mxu1 %v15558_v62  ;;  %v13758_v50 = vld [vmem:[#allocation2 + $0xe8] sm:$0xff]   ;;  %v6810_v47 = vld [vmem:[%s14179_s9] sm:$0xff]  ;;  %v15690_v62 = vcombine.low %v6814_v52, %v6816_v28 }
 0x1d8   : > { %21608 = vst [vmem:[#allocation11_spill] sm:$0xff] %v15674_v16  ;;  %4008 = vmatprep.subr.bf16.mxu1 %v15252_v58  ;;  %v1573_v12 = vpop.f32.mrf.mxu1  ;;  %7019 = vrot.lane.b32.xlu0 %v15664_v7, %s14083_s23  ;;  %v6812_v16 = vld [vmem:[%s14179_s9 + $0xc] sm:$0xff] }
 0x1d9   : > { %11066 = vst.msk [vmem:[%s14758_s12 + $0x190] sm:$0xff] %vm670_vm3, %v1573_v12  ;;  %v15684_v3 = vpop.f32.mrf.mxu0  ;;  %7013 = vrot.lane.b32.xlu1 %v15680_v29, %s14083_s23 }
 0x1da   : > { %21609 = vst [vmem:[#allocation12_spill] sm:$0xff] %v15684_v3  ;;  %v13117_v38 = vpop.f32.mrf.mxu1  ;;  %v15700_v3 = vcombine.low %v6810_v47, %v6812_v16 }
 0x1db   : > { %11075 = vst.msk [vmem:[%s14758_s12 + $0x1d8] sm:$0xff] %vm670_vm3, %v13117_v38  ;;  %4009 = vmatpush1.bf16.msra.mxu1 %v15269_v40  ;;  %v15695_v2 = vpop.f32.mrf.mxu0  ;;  %v13825_v38 = vld [vmem:[%s14179_s9 + $0x8] ss:$12 sps:$4 sm:$0xff]  }
 0x1dc   : > { %4010 = vmatprep.subr.bf16.mxu1 %v15285_v46  ;;  %v1576_v12 = vpop.f32.mrf.mxu1  ;;  %7017 = vrot.lane.b32.xlu0 %v15690_v62, %s14083_s23 }
 0x1dd   : > { %11069 = vst.msk [vmem:[%s14758_s12 + $0x1a8] sm:$0xff] %vm670_vm3, %v1576_v12  ;;  %v15704_v52 = vpop.f32.mrf.mxu0  ;;  %3670 = vmatmul.mubr.bf16.gmra.mxu0 %v13758_v50  ;;  %7011 = vrot.lane.b32.xlu1 %v15700_v3, %s14083_s23  ;;  %v13826_v12 = vld [vmem:[%s14179_s9 + $0xb0] ss:$12 sps:$4 sm:$0xff]  }
 0x1de   : > { %21610 = vst [vmem:[#allocation13_spill] sm:$0xff] %v15704_v52  ;;  %v13120_v28 = vpop.f32.mrf.mxu1  ;;  %13247 = vmatmul.mubr.bf16.gmra.mxu1 %v15600_v27  ;;  %3679 = vmatprep.mubr.bf16.mxu0 %v21595_v9  ;;  %v13765_v52 = vld [vmem:[#allocation2 + $0xf0] sm:$0xff]  }
 0x1df   : > { %11084 = vst.msk [vmem:[%s14758_s12 + $0x220] sm:$0xff] %vm670_vm3, %v13120_v28  ;;  %4011 = vmatpush1.bf16.msra.mxu1 %v15304_v51  ;;  %v15714_v16 = vpop.f32.mrf.mxu0  ;;  %13250 = vmatprep.mubr.bf16.mxu1 %v13753_v35 }
 0x1e0   : > { %21611 = vst [vmem:[#allocation14_spill] sm:$0xff] %v15714_v16  ;;  %4012 = vmatprep.subr.bf16.mxu1 %v15322_v48  ;;  %v1589_v47 = vpop.f32.mrf.mxu1  ;;  %7015 = vrot.lane.b32.xlu0 %v13825_v38, %s14083_s23 }
 0x1e1   : > { %11078 = vst.msk [vmem:[%s14758_s12 + $0x1f0] sm:$0xff] %vm670_vm3, %v1589_v47  ;;  %v15722_v27 = vpop.f32.mrf.mxu0  ;;  %8120 = vrot.lane.b32.xlu1 %v13826_v12, %s14084_s24  ;;  %v13829_v12 = vld [vmem:[%s14179_s9 + $0x98] ss:$12 sps:$4 sm:$0xff]  }
 0x1e2   : > { %v13121_v28 = vpop.f32.mrf.mxu1 }
 0x1e3   : > { %11087 = vst.msk [vmem:[%s14758_s12 + $0x238] sm:$0xff] %vm670_vm3, %v13121_v28  ;;  %4013 = vmatpush1.bf16.msra.mxu1 %v15337_v60  ;;  %v15728_v35 = vpop.f32.mrf.mxu0 }
 0x1e4   : > { %4014 = vmatprep.subr.bf16.mxu1 %v15352_v4  ;;  %v1592_v16 = vpop.f32.mrf.mxu1  ;;  %8118 = vrot.lane.b32.xlu0 %v15469_v32, %s14084_s24 }
 0x1e5   : > { %11081 = vst.msk [vmem:[%s14758_s12 + $0x208] sm:$0xff] %vm670_vm3, %v1592_v16  ;;  %v15734_v47 = vpop.f32.mrf.mxu0  ;;  %3680 = vmatmul.mubr.bf16.gmra.mxu0 %v13765_v52  ;;  %8112 = vrot.lane.b32.xlu1 %v15484_v44, %s14084_s24 }
 0x1e6   : > { %v13124_v38 = vpop.f32.mrf.mxu1  ;;  %13251 = vmatmul.mubr.bf16.gmra.mxu1 %v13758_v50  ;;  %3689 = vmatprep.mubr.bf16.mxu0 %v21595_v9  ;;  %v13768_v50 = vld [vmem:[#allocation2 + $0xf8] sm:$0xff]  }
 0x1e7   : > { %11096 = vst.msk [vmem:[%s14758_s12 + $0x280] sm:$0xff] %vm670_vm3, %v13124_v38  ;;  %4015 = vmatpush1.bf16.msra.mxu1 %v15370_v10  ;;  %v15742_v28 = vpop.f32.mrf.mxu0  ;;  %13254 = vmatprep.mubr.bf16.mxu1 %v13765_v52  ;;  %v13773_v52 = vld [vmem:[#allocation2 + $0x180] sm:$0xff]  }
 0x1e8   : > { %21612 = vst [vmem:[#allocation15_spill] sm:$0xff] %v15742_v28  ;;  %4016 = vmatprep.subr.bf16.mxu1 %v15385_v18  ;;  %v1605_v16 = vpop.f32.mrf.mxu1  ;;  %8116 = vrot.lane.b32.xlu0 %v15494_v34, %s14084_s24 }
 0x1e9   : > { %11090 = vst.msk [vmem:[%s14758_s12 + $0x250] sm:$0xff] %vm670_vm3, %v1605_v16  ;;  %v15749_v32 = vpop.f32.mrf.mxu0  ;;  %8110 = vrot.lane.b32.xlu1 %v15510_v41, %s14084_s24  ;;  %v13830_v16 = vld [vmem:[%s14179_s9 + $0x80] ss:$12 sps:$4 sm:$0xff]  }
 0x1ea   : > { %v13125_v38 = vpop.f32.mrf.mxu1 }
 0x1eb   : > { %11099 = vst.msk [vmem:[%s14758_s12 + $0x298] sm:$0xff] %vm670_vm3, %v13125_v38  ;;  %4017 = vmatpush1.bf16.msra.mxu1 %v15404_v49  ;;  %v15757_v28 = vpop.f32.mrf.mxu0 }
 0x1ec   : > { %21613 = vst [vmem:[#allocation17_spill] sm:$0xff] %v15757_v28  ;;  %4018 = vmatprep.subr.bf16.mxu1 %v15399_v26  ;;  %v1608_v44 = vpop.f32.mrf.mxu1  ;;  %8114 = vrot.lane.b32.xlu0 %v13829_v12, %s14084_s24 }
 0x1ed   : > { %11093 = vst.msk [vmem:[%s14758_s12 + $0x268] sm:$0xff] %vm670_vm3, %v1608_v44  ;;  %v15765_v34 = vpop.f32.mrf.mxu0  ;;  %3690 = vmatmul.mubr.bf16.gmra.mxu0 %v13768_v50  ;;  %8108 = vrot.lane.b32.xlu1 %v13830_v16, %s14084_s24 }
 0x1ee   : > { %21614 = vst [vmem:[#allocation18_spill] sm:$0xff] %v15765_v34  ;;  %v13128_v38 = vpop.f32.mrf.mxu1  ;;  %13255 = vmatmul.mubr.bf16.gmra.mxu1 %v13768_v50  ;;  %13274 = vmatprep.mubr.bf16.mxu0 %v13773_v52  ;;  %v15780_v50 = vld [vmem:[#allocation2 + $0x188] sm:$0xff]   ;;  %v11146_v34 = vld [vmem:[%s14758_s12 + $0x190] sm:$0xff] }
 0x1ef   : > { %11108 = vst.msk [vmem:[%s14758_s12 + $0x2e0] sm:$0xff] %vm670_vm3, %v13128_v38  ;;  %4019 = vmatpush1.bf16.msra.mxu1 %v15435_v45  ;;  %v15771_v28 = vpop.f32.mrf.mxu0  ;;  %4038 = vmatprep.mubr.bf16.mxu1 %v21595_v9 }
 0x1f0   : > { %21615 = vst [vmem:[#allocation19_spill] sm:$0xff] %v15771_v28  ;;  %4020 = vmatprep.subr.bf16.mxu1 %v15431_v25  ;;  %v1621_v41 = vpop.f32.mrf.mxu1  ;;  %8106 = vrot.lane.b32.xlu0 %v15537_v37, %s14084_s24  ;;  %v15790_v28 = vld [vmem:[#allocation2 + $0x190] sm:$0xff]  }
 0x1f1   : > { %11102 = vst.msk [vmem:[%s14758_s12 + $0x2b0] sm:$0xff] %vm670_vm3, %v1621_v41  ;;  %v15778_v12 = vpop.f32.mrf.mxu0  ;;  %8100 = vrot.lane.b32.xlu1 %v15552_v36, %s14084_s24  ;;  %v11152_v41 = vld [vmem:[%s14758_s12 + $0x1c0] sm:$0xff] }
 0x1f2   : > { %21616 = vst [vmem:[#allocation20_spill] sm:$0xff] %v15778_v12  ;;  %v13129_v44 = vpop.f32.mrf.mxu1  ;;  %v13835_v12 = vld [vmem:[%s14179_s9 + $0x68] ss:$12 sps:$4 sm:$0xff]  }
 0x1f3   : > { %11111 = vst.msk [vmem:[%s14758_s12 + $0x2f8] sm:$0xff] %vm670_vm3, %v13129_v44  ;;  %4021 = vmatpush1.bf16.msra.mxu1 %v15460_v1  ;;  %v15787_v38 = vpop.f32.mrf.mxu0 }
 0x1f4   : > { %21617 = vst [vmem:[#allocation21_spill] sm:$0xff] %v15787_v38  ;;  %13290 = vmatprep.subr.bf16.mxu1 %v15098_v19  ;;  %v1624_v16 = vpop.f32.mrf.mxu1  ;;  %8104 = vrot.lane.b32.xlu0 %v15564_v0, %s14084_s24 }
 0x1f5   : > { %11105 = vst.msk [vmem:[%s14758_s12 + $0x2c8] sm:$0xff] %vm670_vm3, %v1624_v16  ;;  %v13148_v37 = vpop.f32.mrf.mxu0  ;;  %13275 = vmatmul.mubr.bf16.vlgmr.msra.gmra.mxu0 %v15780_v50  ;;  %8098 = vrot.lane.b32.xlu1 %v15574_v42, %s14084_s24 }
 0x1f6   : > { %v2241_v44 = vadd.f32 %v13148_v37, %v11152_v41  ;;  %4426 = vmatpush1.bf16.msra.mxu0 %v15242_v15  ;;  %v2009_v38 = vpop.f32.mrf.mxu1  ;;  %4039 = vmatmul.mubr.bf16.vlgmr.msra.gmra.mxu1 %v13773_v52  ;;  %v15814_v41 = vld [vmem:[#allocation2 + $0x198] sm:$0xff]  }
 0x1f7   : > { %v2233_v36 = vadd.f32 %v2009_v38, %v15488_v21  ;;  %4427 = vmatprep.subr.bf16.mxu0 %v15252_v58  ;;  %13291 = vmatpush3.bf16.msra.mxu1 %v15098_v19  ;;  %v2122_v16 = vpop.f32.mrf.mxu0  ;;  %v11155_v38 = vld [vmem:[%s14758_s12 + $0x1d8] sm:$0xff] }
 0x1f8   : > { %11200 = vst.msk [vmem:[%s14758_s12 + $0x1c0] sm:$0xff] %vm670_vm3, %v2241_v44  ;;  %v2235_v0 = vadd.f32 %v11146_v34, %v2122_v16  ;;  %13292 = vmatprep.subr.bf16.mxu1 %v15138_v57  ;;  %v2011_v37 = vpop.f32.mrf.mxu1  ;;  %13278 = vmatprep.mubr.bf16.mxu0 %v15790_v28  ;;  %v13836_v34 = vld [vmem:[%s14179_s9 + $0x50] ss:$12 sps:$4 sm:$0xff]   ;;  %v11149_v16 = vld [vmem:[%s14758_s12 + $0x1a8] sm:$0xff] }
 0x1f9   : > { %11192 = vst [vmem:[%s14758_s12 + $0x180] sm:$0xff] %v2233_v36  ;;  %v2234_v21 = vadd.f32 %v2011_v37, %v15503_v14  ;;  %v13149_v52 = vpop.f32.mrf.mxu0  ;;  %4048 = vmatprep.mubr.bf16.mxu1 %v21595_v9  ;;  %8102 = vrot.lane.b32.xlu0 %v13835_v12, %s14084_s24 }
 0x1fa   : > { %11194 = vst.msk [vmem:[%s14758_s12 + $0x190] sm:$0xff] %vm670_vm3, %v2235_v0  ;;  %v2244_v44 = vadd.f32 %v13149_v52, %v11155_v38  ;;  %4428 = vmatpush1.bf16.msra.mxu0 %v15269_v40  ;;  %v2013_v36 = vpop.f32.mrf.mxu1  ;;  %v15831_v52 = vld [vmem:[#allocation2 + $0x1a0] sm:$0xff]   ;;  %8096 = vrot.lane.b32.xlu1 %v13836_v34, %s14084_s24  ;;  %v11158_v34 = vld [vmem:[%s14758_s12 + $0x1f0] sm:$0xff] }
 0x1fb   : > { %11193 = vst [vmem:[%s14758_s12 + $0x188] sm:$0xff] %v2234_v21  ;;  %v2236_v14 = vadd.f32 %v2013_v36, %v15514_v8  ;;  %4429 = vmatprep.subr.bf16.mxu0 %v15285_v46  ;;  %13293 = vmatpush3.bf16.msra.mxu1 %v15138_v57  ;;  %v2125_v42 = vpop.f32.mrf.mxu0  ;;  %v11164_v21 = vld [vmem:[%s14758_s12 + $0x220] sm:$0xff] }
 0x1fc   : > { %11203 = vst.msk [vmem:[%s14758_s12 + $0x1d8] sm:$0xff] %vm670_vm3, %v2244_v44  ;;  %v2238_v0 = vadd.f32 %v11149_v16, %v2125_v42  ;;  %13294 = vmatprep.subr.bf16.mxu1 %v15171_v23  ;;  %v2015_v37 = vpop.f32.mrf.mxu1  ;;  %v11167_v16 = vld [vmem:[%s14758_s12 + $0x238] sm:$0xff] }
 0x1fd   : > { %11195 = vst [vmem:[%s14758_s12 + $0x198] sm:$0xff] %v2236_v14  ;;  %v2237_v8 = vadd.f32 %v2015_v37, %v15525_v53  ;;  %v13152_v12 = vpop.f32.mrf.mxu0  ;;  %13279 = vmatmul.mubr.bf16.gmra.mxu0 %v15814_v41  ;;  %8094 = vrot.lane.b32.xlu0 %v15604_v6, %s14084_s24 }
 0x1fe   : > { %11197 = vst.msk [vmem:[%s14758_s12 + $0x1a8] sm:$0xff] %vm670_vm3, %v2238_v0  ;;  %v2253_v38 = vadd.f32 %v13152_v12, %v11164_v21  ;;  %4430 = vmatpush1.bf16.msra.mxu0 %v15304_v51  ;;  %v2019_v44 = vpop.f32.mrf.mxu1  ;;  %4049 = vmatmul.mubr.bf16.gmra.mxu1 %v15780_v50  ;;  %v15855_v0 = vld [vmem:[#allocation2 + $0x1a8] sm:$0xff]  }
 0x1ff   : > { %11196 = vst [vmem:[%s14758_s12 + $0x1a0] sm:$0xff] %v2237_v8  ;;  %v2239_v53 = vadd.f32 %v2019_v44, %v15532_v54  ;;  %4431 = vmatprep.subr.bf16.mxu0 %v15322_v48  ;;  %13295 = vmatpush3.bf16.msra.mxu1 %v15171_v23  ;;  %v2138_v36 = vpop.f32.mrf.mxu0  ;;  %v11161_v12 = vld [vmem:[%s14758_s12 + $0x208] sm:$0xff]  ;;  %v15872_v44 = vld [vmem:[#allocation2 + $0x1b0] sm:$0xff]  }
 0x200   : > { %11212 = vst.msk [vmem:[%s14758_s12 + $0x220] sm:$0xff] %vm670_vm3, %v2253_v38  ;;  %v2247_v14 = vadd.f32 %v11158_v34, %v2138_v36  ;;  %13296 = vmatprep.subr.bf16.mxu1 %v15193_v13  ;;  %v2021_v42 = vpop.f32.mrf.mxu1  ;;  %13282 = vmatprep.mubr.bf16.mxu0 %v15831_v52  ;;  %v15878_v36 = vpop.permute.xlu0 %5348 }
 0x201   : > { %11198 = vst [vmem:[%s14758_s12 + $0x1b0] sm:$0xff] %v2239_v53  ;;  %v2240_v50 = vadd.f32 %v2021_v42, %v15546_v55  ;;  %v13153_v54 = vpop.f32.mrf.mxu0  ;;  %4058 = vmatprep.mubr.bf16.mxu1 %v21595_v9  ;;  %8088 = vrot.lane.b32.xlu1 %v15616_v24, %s14084_s24  ;;  %v11176_v53 = vld [vmem:[%s14758_s12 + $0x280] sm:$0xff] }
 0x202   : > { %11206 = vst.msk [vmem:[%s14758_s12 + $0x1f0] sm:$0xff] %vm670_vm3, %v2247_v14  ;;  %v2256_v37 = vadd.f32 %v13153_v54, %v11167_v16  ;;  %4432 = vmatpush1.bf16.msra.mxu0 %v15337_v60  ;;  %v2023_v8 = vpop.f32.mrf.mxu1  ;;  %8092 = vrot.lane.b32.xlu0 %v15627_v61, %s14084_s24  ;;  %v13838_v42 = vld [vmem:[%s14179_s9 + $0x38] ss:$12 sps:$4 sm:$0xff]   ;;  %v11170_v54 = vld [vmem:[%s14758_s12 + $0x250] sm:$0xff] }
 0x203   : > { %11199 = vst [vmem:[%s14758_s12 + $0x1b8] sm:$0xff] %v2240_v50  ;;  %v2242_v55 = vadd.f32 %v2023_v8, %v15556_v39  ;;  %4433 = vmatprep.subr.bf16.mxu0 %v15352_v4  ;;  %13297 = vmatpush3.bf16.msra.mxu1 %v15193_v13  ;;  %v2141_v6 = vpop.f32.mrf.mxu0  ;;  %v21619_v8 = vld [vmem:[#allocation8_spill] sm:$0xff] }
 0x204   : > { %11215 = vst.msk [vmem:[%s14758_s12 + $0x238] sm:$0xff] %vm670_vm3, %v2256_v37  ;;  %v2250_v21 = vadd.f32 %v11161_v12, %v2141_v6  ;;  %13298 = vmatprep.subr.bf16.mxu1 %v15222_v5  ;;  %v2025_v38 = vpop.f32.mrf.mxu1  ;;  %v21618_v37 = vld [vmem:[#allocation16_spill] sm:$0xff]  ;;  %v11179_v6 = vld [vmem:[%s14758_s12 + $0x298] sm:$0xff] }
 0x205   : > { %11201 = vst [vmem:[%s14758_s12 + $0x1c8] sm:$0xff] %v2242_v55  ;;  %v2243_v39 = vadd.f32 %v2025_v38, %v15570_v30  ;;  %v13156_v24 = vpop.f32.mrf.mxu0  ;;  %13283 = vmatmul.mubr.bf16.gmra.mxu0 %v15855_v0  ;;  %v15886_v30 = vpop.permute.xlu1 %5350  ;;  %v15902_v12 = vld [vmem:[#allocation2 + $0x1b8] sm:$0xff]   ;;  %8086 = vrot.lane.b32.xlu1 %v15640_v33, %s14084_s24 }
 0x206   : > { %11209 = vst.msk [vmem:[%s14758_s12 + $0x208] sm:$0xff] %vm670_vm3, %v2250_v21  ;;  %v2265_v34 = vadd.f32 %v13156_v24, %v11176_v53  ;;  %4434 = vmatpush1.bf16.msra.mxu0 %v15370_v10  ;;  %v2029_v14 = vpop.f32.mrf.mxu1  ;;  %4059 = vmatmul.mubr.bf16.gmra.mxu1 %v15790_v28  ;;  %v13839_v21 = vld [vmem:[%s14179_s9 + $0x20] ss:$12 sps:$4 sm:$0xff]  }
 0x207   : > { %11202 = vst [vmem:[%s14758_s12 + $0x1d0] sm:$0xff] %v2243_v39  ;;  %v2245_v50 = vadd.f32 %v2029_v14, %v15578_v56  ;;  %4435 = vmatprep.subr.bf16.mxu0 %v15385_v18  ;;  %13299 = vmatpush3.bf16.msra.mxu1 %v15222_v5  ;;  %v2154_v61 = vpop.f32.mrf.mxu0  ;;  %v21620_v24 = vld [vmem:[#allocation9_spill] sm:$0xff]  ;;  %v15916_v14 = vpop.permute.xlu0 %5346 }
 0x208   : > { %11224 = vst.msk [vmem:[%s14758_s12 + $0x280] sm:$0xff] %vm670_vm3, %v2265_v34  ;;  %v2259_v16 = vadd.f32 %v11170_v54, %v2154_v61  ;;  %13300 = vmatprep.subr.bf16.mxu1 %v21618_v37  ;;  %v2031_v28 = vpop.f32.mrf.mxu1  ;;  %13286 = vmatprep.mubr.bf16.mxu0 %v15872_v44  ;;  %v11173_v34 = vld [vmem:[%s14758_s12 + $0x268] sm:$0xff] }
 0x209   : > { %11204 = vst [vmem:[%s14758_s12 + $0x1e0] sm:$0xff] %v2245_v50  ;;  %v2246_v56 = vadd.f32 %v2031_v28, %v21619_v8  ;;  %v13157_v55 = vpop.f32.mrf.mxu0  ;;  %4068 = vmatprep.mubr.bf16.mxu1 %v21595_v9  ;;  %8090 = vrot.lane.b32.xlu0 %v13838_v42, %s14084_s24  ;;  %v15921_v61 = vpop.permute.xlu1 %5342  ;;  %v11188_v28 = vld [vmem:[%s14758_s12 + $0x2e0] sm:$0xff] }
 0x20a   : > { %11218 = vst.msk [vmem:[%s14758_s12 + $0x250] sm:$0xff] %vm670_vm3, %v2259_v16  ;;  %v2268_v38 = vadd.f32 %v13157_v55, %v11179_v6  ;;  %4436 = vmatpush1.bf16.msra.mxu0 %v15404_v49  ;;  %v2033_v39 = vpop.f32.mrf.mxu1  ;;  %8084 = vrot.lane.b32.xlu1 %v13839_v21, %s14084_s24  ;;  %v11182_v6 = vld [vmem:[%s14758_s12 + $0x2b0] sm:$0xff] }
 0x20b   : > { %11205 = vst [vmem:[%s14758_s12 + $0x1e8] sm:$0xff] %v2246_v56  ;;  %v2248_v53 = vadd.f32 %v2033_v39, %v21620_v24  ;;  %4437 = vmatprep.subr.bf16.mxu0 %v15399_v26  ;;  %13301 = vmatpush3.bf16.msra.mxu1 %v21618_v37  ;;  %v2157_v33 = vpop.f32.mrf.mxu0  ;;  %v11191_v39 = vld [vmem:[%s14758_s12 + $0x2f8] sm:$0xff]  ;;  %v15945_v24 = vld [vmem:[#allocation2 + $0x240] sm:$0xff]  }
 0x20c   : > { %11227 = vst.msk [vmem:[%s14758_s12 + $0x298] sm:$0xff] %vm670_vm3, %v2268_v38  ;;  %v2262_v50 = vadd.f32 %v11173_v34, %v2157_v33  ;;  %13302 = vmatprep.subr.bf16.mxu1 %v15354_v17  ;;  %v2035_v42 = vpop.f32.mrf.mxu1 }
 0x20d   : > { %11207 = vst [vmem:[%s14758_s12 + $0x1f8] sm:$0xff] %v2248_v53  ;;  %v2249_v54 = vadd.f32 %v2035_v42, %v15612_v20  ;;  %v13160_v16 = vpop.f32.mrf.mxu0  ;;  %13287 = vmatmul.mubr.bf16.gmra.mxu0 %v15902_v12  ;;  %v15947_v53 = vpop.permute.xlu0 %5344  ;;  %8082 = vrot.lane.b32.xlu0 %v15664_v7, %s14084_s24  ;;  %v11185_v42 = vld [vmem:[%s14758_s12 + $0x2c8] sm:$0xff] }
 0x20e   : > { %11221 = vst.msk [vmem:[%s14758_s12 + $0x268] sm:$0xff] %vm670_vm3, %v2262_v50  ;;  %v2277_v8 = vadd.f32 %v13160_v16, %v11188_v28  ;;  %4438 = vmatpush1.bf16.msra.mxu0 %v15435_v45  ;;  %v2039_v56 = vpop.f32.mrf.mxu1  ;;  %4069 = vmatmul.mubr.bf16.gmra.mxu1 %v15814_v41  ;;  %v15954_v34 = vpop.permute.xlu1 %5340 }
 0x20f   : > { %11208 = vst [vmem:[%s14758_s12 + $0x200] sm:$0xff] %v2249_v54  ;;  %v2251_v20 = vadd.f32 %v2039_v56, %v15620_v11  ;;  %4439 = vmatprep.subr.bf16.mxu0 %v15431_v25  ;;  %13303 = vmatpush3.bf16.msra.mxu1 %v15354_v17  ;;  %v2170_v55 = vpop.f32.mrf.mxu0 }
 0x210   : > { %11236 = vst.msk [vmem:[%s14758_s12 + $0x2e0] sm:$0xff] %vm670_vm3, %v2277_v8  ;;  %v2271_v21 = vadd.f32 %v11182_v6, %v2170_v55  ;;  %13304 = vmatprep.subr.bf16.mxu1 %v15412_v31  ;;  %v2041_v38 = vpop.f32.mrf.mxu1  ;;  %4457 = vmatprep.mubr.bf16.mxu0 %v21595_v9  ;;  %v13842_v8 = vld [vmem:[%s14179_s9 + $0x8] ss:$12 sps:$4 sm:$0xff]  }
 0x211   : > { %11210 = vst [vmem:[%s14758_s12 + $0x210] sm:$0xff] %v2251_v20  ;;  %v2252_v41 = vadd.f32 %v2041_v38, %v15634_v43  ;;  %v13161_v11 = vpop.f32.mrf.mxu0  ;;  %4078 = vmatprep.mubr.bf16.mxu1 %v21595_v9  ;;  %8076 = vrot.lane.b32.xlu1 %v15680_v29, %s14084_s24  ;;  %v2830_v6 = vld [vmem:[%s14758_s12 + $0x8] sm:$0xff]  ;;  %v21622_v38 = vld [vmem:[#allocation11_spill] sm:$0xff] }
 0x212   : > { %11230 = vst.msk [vmem:[%s14758_s12 + $0x2b0] sm:$0xff] %vm670_vm3, %v2271_v21  ;;  %v2280_v33 = vadd.f32 %v13161_v11, %v11191_v39  ;;  %4440 = vmatpush1.bf16.msra.mxu0 %v15460_v1  ;;  %v2043_v43 = vpop.f32.mrf.mxu1  ;;  %8080 = vrot.lane.b32.xlu0 %v15690_v62, %s14084_s24  ;;  %v15982_v62 = vpop.permute.xlu0 %5336  ;;  %v2832_v39 = vld [vmem:[%s14758_s12 + $0x18] sm:$0xff] }
 0x213   : > { %11211 = vst [vmem:[%s14758_s12 + $0x218] sm:$0xff] %v2252_v41  ;;  %v2254_v50 = vadd.f32 %v2043_v43, %v15644_v63  ;;  %13305 = vmatpush3.bf16.msra.mxu1 %v15412_v31  ;;  %13322 = vmatprep.subr.bf16.mxu0 %v15098_v19  ;;  %v2173_v7 = vpop.f32.mrf.mxu0  ;;  %v2829_v63 = vld [vmem:[%s14758_s12] sm:$0xff] }
 0x214   : > { %11239 = vst.msk [vmem:[%s14758_s12 + $0x2f8] sm:$0xff] %vm670_vm3, %v2280_v33  ;;  %v2274_v54 = vadd.f32 %v11185_v42, %v2173_v7  ;;  %4844 = vmatprep.subr.bf16.mxu1 %v15121_v59  ;;  %v2045_v16 = vpop.f32.mrf.mxu1  ;;  %v15993_v33 = vld [vmem:[#allocation2 + $0x248] sm:$0xff]  }
 0x215   : > { %11213 = vst [vmem:[%s14758_s12 + $0x228] sm:$0xff] %v2254_v50  ;;  %v2255_v29 = vadd.f32 %v2045_v16, %v15653_v22  ;;  %v2653_v28 = vpop.f32.mrf.mxu0  ;;  %4458 = vmatmul.mubr.bf16.vlgmr.msra.gmra.mxu0 %v15945_v24  ;;  %v21621_v22 = vld [vmem:[#allocation10_spill] sm:$0xff]  ;;  %8074 = vrot.lane.b32.xlu1 %v15700_v3, %s14084_s24  ;;  %v21623_v3 = vld [vmem:[#allocation12_spill] sm:$0xff] }
 0x216   : > { %11233 = vst.msk [vmem:[%s14758_s12 + $0x2c8] sm:$0xff] %vm670_vm3, %v2274_v54  ;;  %v2877_v56 = vadd.f32 %v2829_v63, %v2653_v28  ;;  %13323 = vmatpush3.bf16.msra.mxu0 %v15098_v19  ;;  %v2049_v59 = vpop.f32.mrf.mxu1  ;;  %4079 = vmatmul.mubr.bf16.gmra.mxu1 %v15831_v52  ;;  %v15986_v52 = vpop.permute.xlu1 %5338  ;;  %v2833_v54 = vld [vmem:[%s14758_s12 + $0x20] sm:$0xff] }
 0x217   : > { %11214 = vst [vmem:[%s14758_s12 + $0x230] sm:$0xff] %v2255_v29  ;;  %v2257_v20 = vadd.f32 %v2049_v59, %v21621_v22  ;;  %13324 = vmatprep.subr.bf16.mxu0 %v15138_v57  ;;  %v2655_v55 = vpop.f32.mrf.mxu0  ;;  %4467 = vmatprep.mubr.bf16.mxu0 %v21595_v9 }
 0x218   : > { %2925 = vst [vmem:[%s14758_s12] sm:$0xff] %v2877_v56  ;;  %v2878_v19 = vadd.f32 %v2830_v6, %v2655_v55  ;;  %v2051_v21 = vpop.f32.mrf.mxu1  ;;  %4088 = vmatprep.mubr.bf16.mxu1 %v21595_v9  ;;  %8078 = vrot.lane.b32.xlu0 %v13842_v8, %s14084_s24  ;;  %v16007_v8 = vpop.permute.xlu0 %5334  ;;  %v2836_v6 = vld [vmem:[%s14758_s12 + $0x38] sm:$0xff] }
 0x219   : > { %11216 = vst [vmem:[%s14758_s12 + $0x240] sm:$0xff] %v2257_v20  ;;  %v2258_v41 = vadd.f32 %v2051_v21, %v21622_v38  ;;  %v2657_v11 = vpop.f32.mrf.mxu0 }
 0x21a   : > { %2926 = vst [vmem:[%s14758_s12 + $0x8] sm:$0xff] %v2878_v19  ;;  %v2880_v43 = vadd.f32 %v2832_v39, %v2657_v11  ;;  %13325 = vmatpush3.bf16.msra.mxu0 %v15138_v57  ;;  %v2053_v50 = vpop.f32.mrf.mxu1  ;;  %v2835_v57 = vld [vmem:[%s14758_s12 + $0x30] sm:$0xff]  ;;  %v16012_v22 = vpop.permute.xlu1 %5330 }
 0x21b   : > { %11217 = vst [vmem:[%s14758_s12 + $0x248] sm:$0xff] %v2258_v41  ;;  %v2260_v7 = vadd.f32 %v2053_v50, %v21623_v3  ;;  %13326 = vmatprep.subr.bf16.mxu0 %v15171_v23  ;;  %v2659_v42 = vpop.f32.mrf.mxu0  ;;  %v2838_v41 = vld [vmem:[%s14758_s12 + $0x48] sm:$0xff]  ;;  %v16024_v11 = vld [vmem:[#allocation2 + $0x250] sm:$0xff]  }
 0x21c   : > { %2928 = vst [vmem:[%s14758_s12 + $0x18] sm:$0xff] %v2880_v43  ;;  %v2881_v16 = vadd.f32 %v2833_v54, %v2659_v42  ;;  %v2055_v29 = vpop.f32.mrf.mxu1  ;;  %v16032_v42 = vpop.permute.xlu0 %5332 }
 0x21d   : > { %11219 = vst [vmem:[%s14758_s12 + $0x258] sm:$0xff] %v2260_v7  ;;  %v2261_v28 = vadd.f32 %v2055_v29, %v15695_v2  ;;  %v2663_v63 = vpop.f32.mrf.mxu0  ;;  %4468 = vmatmul.mubr.bf16.gmra.mxu0 %v15993_v33  ;;  %v21624_v2 = vld [vmem:[#allocation13_spill] sm:$0xff] }
 0x21e   : > { %2929 = vst [vmem:[%s14758_s12 + $0x20] sm:$0xff] %v2881_v16  ;;  %v2883_v56 = vadd.f32 %v2835_v57, %v2663_v63  ;;  %13327 = vmatpush3.bf16.msra.mxu0 %v15171_v23  ;;  %v2059_v59 = vpop.f32.mrf.mxu1  ;;  %4089 = vmatmul.mubr.bf16.gmra.mxu1 %v15855_v0  ;;  %v21625_v0 = vld [vmem:[#allocation14_spill] sm:$0xff]  ;;  %v16035_v29 = vpop.permute.xlu1 %5328  ;;  %v2841_v63 = vld [vmem:[%s14758_s12 + $0x60] sm:$0xff] }
 0x21f   : > { %11220 = vst [vmem:[%s14758_s12 + $0x260] sm:$0xff] %v2261_v28  ;;  %v2263_v20 = vadd.f32 %v2059_v59, %v21624_v2  ;;  %13328 = vmatprep.subr.bf16.mxu0 %v15193_v13  ;;  %v2665_v55 = vpop.f32.mrf.mxu0  ;;  %4477 = vmatprep.mubr.bf16.mxu0 %v21595_v9  ;;  %v2839_v7 = vld [vmem:[%s14758_s12 + $0x50] sm:$0xff]  ;;  %v2842_v59 = vld [vmem:[%s14758_s12 + $0x68] sm:$0xff] }
 0x220   : > { %2931 = vst [vmem:[%s14758_s12 + $0x30] sm:$0xff] %v2883_v56  ;;  %v2884_v19 = vadd.f32 %v2836_v6, %v2665_v55  ;;  %v2061_v23 = vpop.f32.mrf.mxu1  ;;  %4098 = vmatprep.mubr.bf16.mxu1 %v21595_v9  ;;  %v2844_v6 = vld [vmem:[%s14758_s12 + $0x78] sm:$0xff] }
 0x221   : > { %11222 = vst [vmem:[%s14758_s12 + $0x270] sm:$0xff] %v2263_v20  ;;  %v2264_v21 = vadd.f32 %v2061_v23, %v21625_v0  ;;  %v2667_v38 = vpop.f32.mrf.mxu0 }
 0x222   : > { %2932 = vst [vmem:[%s14758_s12 + $0x38] sm:$0xff] %v2884_v19  ;;  %v2886_v39 = vadd.f32 %v2838_v41, %v2667_v38  ;;  %13329 = vmatpush3.bf16.msra.mxu0 %v15193_v13  ;;  %v2063_v43 = vpop.f32.mrf.mxu1  ;;  %v16056_v19 = vpop.permute.xlu0 %5324 }
 0x223   : > { %11223 = vst [vmem:[%s14758_s12 + $0x278] sm:$0xff] %v2264_v21  ;;  %v2266_v50 = vadd.f32 %v2063_v43, %v15722_v27  ;;  %13330 = vmatprep.subr.bf16.mxu0 %v15222_v5  ;;  %v2669_v3 = vpop.f32.mrf.mxu0  ;;  %v16060_v21 = vpop.permute.xlu1 %5326 }
 0x224   : > { %2934 = vst [vmem:[%s14758_s12 + $0x48] sm:$0xff] %v2886_v39  ;;  %v2887_v54 = vadd.f32 %v2839_v7, %v2669_v3  ;;  %v2065_v16 = vpop.f32.mrf.mxu1  ;;  %v2845_v39 = vld [vmem:[%s14758_s12 + $0x80] sm:$0xff]  ;;  %v21627_v3 = vld [vmem:[#allocation17_spill] sm:$0xff] }
 0x225   : > { %11225 = vst [vmem:[%s14758_s12 + $0x288] sm:$0xff] %v2266_v50  ;;  %v2267_v13 = vadd.f32 %v2065_v16, %v15728_v35  ;;  %v2673_v28 = vpop.f32.mrf.mxu0  ;;  %4478 = vmatmul.mubr.bf16.gmra.mxu0 %v16024_v11 }
 0x226   : > { %2935 = vst [vmem:[%s14758_s12 + $0x50] sm:$0xff] %v2887_v54  ;;  %v2889_v27 = vadd.f32 %v2841_v63, %v2673_v28  ;;  %13331 = vmatpush3.bf16.msra.mxu0 %v15222_v5  ;;  %v2069_v57 = vpop.f32.mrf.mxu1  ;;  %4099 = vmatmul.mubr.bf16.gmra.mxu1 %v15872_v44  ;;  %v21626_v5 = vld [vmem:[#allocation15_spill] sm:$0xff]  ;;  %v2847_v54 = vld [vmem:[%s14758_s12 + $0x90] sm:$0xff] }
 0x227   : > { %11226 = vst [vmem:[%s14758_s12 + $0x290] sm:$0xff] %v2267_v13  ;;  %v2269_v56 = vadd.f32 %v2069_v57, %v15734_v47  ;;  %13332 = vmatprep.subr.bf16.mxu0 %v21618_v37  ;;  %v2675_v35 = vpop.f32.mrf.mxu0  ;;  %4487 = vmatprep.mubr.bf16.mxu0 %v21595_v9  ;;  %v16054_v47 = vld [vmem:[#allocation2 + $0x258] sm:$0xff]   ;;  %v16079_v57 = vpop.permute.xlu0 %5322 }
 0x228   : > { %2937 = vst [vmem:[%s14758_s12 + $0x60] sm:$0xff] %v2889_v27  ;;  %v2890_v2 = vadd.f32 %v2842_v59, %v2675_v35  ;;  %v2071_v20 = vpop.f32.mrf.mxu1  ;;  %4108 = vmatprep.mubr.bf16.mxu1 %v21595_v9  ;;  %v21628_v13 = vld [vmem:[#allocation18_spill] sm:$0xff]  ;;  %v16088_v35 = vpop.permute.xlu1 %5318  ;;  %v21629_v59 = vld [vmem:[#allocation19_spill] sm:$0xff] }
 0x229   : > { %11228 = vst [vmem:[%s14758_s12 + $0x2a0] sm:$0xff] %v2269_v56  ;;  %v2270_v44 = vadd.f32 %v2071_v20, %v21626_v5  ;;  %v2677_v55 = vpop.f32.mrf.mxu0  ;;  %v2848_v27 = vld [vmem:[%s14758_s12 + $0x98] sm:$0xff]  ;;  %v2850_v5 = vld [vmem:[%s14758_s12 + $0xa8] sm:$0xff] }
 0x22a   : > { %2938 = vst [vmem:[%s14758_s12 + $0x68] sm:$0xff] %v2890_v2  ;;  %v2892_v23 = vadd.f32 %v2844_v6, %v2677_v55  ;;  %13333 = vmatpush3.bf16.msra.mxu0 %v21618_v37  ;;  %v2073_v0 = vpop.f32.mrf.mxu1  ;;  %v21630_v6 = vld [vmem:[#allocation20_spill] sm:$0xff] }
 0x22b   : > { %11229 = vst [vmem:[%s14758_s12 + $0x2a8] sm:$0xff] %v2270_v44  ;;  %v2272_v38 = vadd.f32 %v2073_v0, %v15749_v32  ;;  %13334 = vmatprep.subr.bf16.mxu0 %v15354_v17  ;;  %v2679_v41 = vpop.f32.mrf.mxu0  ;;  %v16093_v44 = vld [vmem:[#allocation2 + $0x260] sm:$0xff]  }
 0x22c   : > { %2940 = vst [vmem:[%s14758_s12 + $0x78] sm:$0xff] %v2892_v23  ;;  %v2893_v43 = vadd.f32 %v2845_v39, %v2679_v41  ;;  %v2075_v50 = vpop.f32.mrf.mxu1 }
 0x22d   : > { %11231 = vst [vmem:[%s14758_s12 + $0x2b8] sm:$0xff] %v2272_v38  ;;  %v2273_v7 = vadd.f32 %v2075_v50, %v21627_v3  ;;  %v2683_v37 = vpop.f32.mrf.mxu0  ;;  %4488 = vmatmul.mubr.bf16.gmra.mxu0 %v16054_v47  ;;  %v2851_v38 = vld [vmem:[%s14758_s12 + $0xb0] sm:$0xff] }
 0x22e   : > { %2941 = vst [vmem:[%s14758_s12 + $0x80] sm:$0xff] %v2893_v43  ;;  %v2895_v32 = vadd.f32 %v2847_v54, %v2683_v37  ;;  %13335 = vmatpush3.bf16.msra.mxu0 %v15354_v17  ;;  %v2079_v16 = vpop.f32.mrf.mxu1  ;;  %4109 = vmatmul.mubr.bf16.gmra.mxu1 %v15902_v12  ;;  %v16086_v12 = vsel %vm5352_vm5, %v15878_v36, %v15886_v30  ;;  %v21631_v43 = vld [vmem:[#allocation21_spill] sm:$0xff] }
 0x22f   : > { %11232 = vst [vmem:[%s14758_s12 + $0x2c0] sm:$0xff] %v2273_v7  ;;  %v2275_v28 = vadd.f32 %v2079_v16, %v21628_v13  ;;  %13336 = vmatprep.subr.bf16.mxu0 %v15412_v31  ;;  %v2685_v63 = vpop.f32.mrf.mxu0  ;;  %4497 = vmatprep.mubr.bf16.mxu0 %v21595_v9  ;;  %v16106_v7 = vpop.permute.xlu0 %5320 }
 0x230   : > { %2943 = vst [vmem:[%s14758_s12 + $0x90] sm:$0xff] %v2895_v32  ;;  %v2896_v17 = vadd.f32 %v2848_v27, %v2685_v63  ;;  %v2081_v56 = vpop.f32.mrf.mxu1  ;;  %13306 = vmatprep.mubr.bf16.mxu1 %v15945_v24  ;;  %v2837_v32 = vld [vmem:[%s14758_s12 + $0x40] sm:$0xff]  ;;  %v16112_v16 = vpop.permute.xlu1 %5316  ;;  %v2854_v63 = vld [vmem:[%s14758_s12 + $0xc8] sm:$0xff] }
 0x231   : > { %11234 = vst [vmem:[%s14758_s12 + $0x2d0] sm:$0xff] %v2275_v28  ;;  %v2276_v2 = vadd.f32 %v2081_v56, %v21629_v59  ;;  %v2687_v20 = vpop.f32.mrf.mxu0 }
 0x232   : > { %2944 = vst [vmem:[%s14758_s12 + $0x98] sm:$0xff] %v2896_v17  ;;  %v2898_v55 = vadd.f32 %v2850_v5, %v2687_v20  ;;  %13337 = vmatpush3.bf16.msra.mxu0 %v15412_v31  ;;  %v2083_v24 = vpop.f32.mrf.mxu1  ;;  %v2853_v31 = vld [vmem:[%s14758_s12 + $0xc0] sm:$0xff]  ;;  %v2831_v17 = vld [vmem:[%s14758_s12 + $0x10] sm:$0xff]  ;;  %v2840_v5 = vld [vmem:[%s14758_s12 + $0x58] sm:$0xff] }
 0x233   : > { %11235 = vst [vmem:[%s14758_s12 + $0x2d8] sm:$0xff] %v2276_v2  ;;  %v2278_v23 = vadd.f32 %v2083_v24, %v21630_v6  ;;  %v2689_v0 = vpop.f32.mrf.mxu0  ;;  %5393 = vmatprep.subr.bf16.mxu0 %v16086_v12  ;;  %v2856_v2 = vld [vmem:[%s14758_s12 + $0xd8] sm:$0xff]  ;;  %v2857_v24 = vld [vmem:[%s14758_s12 + $0xe0] sm:$0xff]  ;;  %v16132_v6 = vpop.permute.xlu0 %5312 }
 0x234   : > { %2946 = vst [vmem:[%s14758_s12 + $0xa8] sm:$0xff] %v2898_v55  ;;  %v2899_v41 = vadd.f32 %v2851_v38, %v2689_v0  ;;  %v2085_v39 = vpop.f32.mrf.mxu1  ;;  %v2834_v38 = vld [vmem:[%s14758_s12 + $0x28] sm:$0xff] }
 0x235   : > { %11237 = vst [vmem:[%s14758_s12 + $0x2e8] sm:$0xff] %v2278_v23  ;;  %v2279_v50 = vadd.f32 %v2085_v39, %v21631_v43  ;;  %v2693_v3 = vpop.f32.mrf.mxu0  ;;  %4498 = vmatmul.mubr.bf16.gmra.mxu0 %v16093_v44  ;;  %v2859_v43 = vld [vmem:[%s14758_s12 + $0xf0] sm:$0xff] }
 0x236   : > { %2947 = vst [vmem:[%s14758_s12 + $0xb0] sm:$0xff] %v2899_v41  ;;  %v2901_v37 = vadd.f32 %v2853_v31, %v2693_v3  ;;  %v13180_v54 = vpop.f32.mrf.mxu1  ;;  %13307 = vmatmul.mubr.bf16.vlgmr.msra.gmra.mxu1 %v15993_v33  ;;  %4507 = vmatprep.mubr.bf16.mxu0 %v21595_v9  ;;  %v16137_v41 = vpop.permute.xlu1 %5314  ;;  %v2849_v31 = vld [vmem:[%s14758_s12 + $0xa0] sm:$0xff] }
 0x237   : > { %11238 = vst [vmem:[%s14758_s12 + $0x2f0] sm:$0xff] %v2279_v50  ;;  %v2885_v13 = vadd.f32 %v13180_v54, %v2837_v32  ;;  %4845 = vmatpush1.bf16.msra.mxu1 %v15242_v15  ;;  %v2695_v28 = vpop.f32.mrf.mxu0  ;;  %13310 = vmatprep.mubr.bf16.mxu1 %v16024_v11  ;;  %v16124_v15 = vld [vmem:[#allocation2 + $0x268] sm:$0xff]   ;;  %v2860_v54 = vld [vmem:[%s14758_s12 + $0xf8] sm:$0xff] }
 0x238   : > { %2949 = vst [vmem:[%s14758_s12 + $0xc0] sm:$0xff] %v2901_v37  ;;  %v2902_v27 = vadd.f32 %v2854_v63, %v2695_v28  ;;  %4846 = vmatprep.subr.bf16.mxu1 %v15252_v58  ;;  %v2766_v33 = vpop.f32.mrf.mxu1 }
 0x239   : > { %2933 = vst.msk [vmem:[%s14758_s12 + $0x40] sm:$0xff] %vm670_vm3, %v2885_v13  ;;  %v2879_v56 = vadd.f32 %v2831_v17, %v2766_v33  ;;  %v2697_v59 = vpop.f32.mrf.mxu0  ;;  %v2843_v13 = vld [vmem:[%s14758_s12 + $0x70] sm:$0xff]  ;;  %v16158_v33 = vpop.permute.xlu0 %5310 }
 0x23a   : > { %2950 = vst [vmem:[%s14758_s12 + $0xc8] sm:$0xff] %v2902_v27  ;;  %v2904_v20 = vadd.f32 %v2856_v2, %v2697_v59  ;;  %v13181_v11 = vpop.f32.mrf.mxu1  ;;  %v2862_v27 = vld [vmem:[%s14758_s12 + $0x108] sm:$0xff] }
 0x23b   : > { %2927 = vst.msk [vmem:[%s14758_s12 + $0x10] sm:$0xff] %vm670_vm3, %v2879_v56  ;;  %v2888_v58 = vadd.f32 %v13181_v11, %v2840_v5  ;;  %4847 = vmatpush1.bf16.msra.mxu1 %v15269_v40  ;;  %v2699_v55 = vpop.f32.mrf.mxu0  ;;  %v2852_v56 = vld [vmem:[%s14758_s12 + $0xb8] sm:$0xff] }
 0x23c   : > { %2952 = vst [vmem:[%s14758_s12 + $0xd8] sm:$0xff] %v2904_v20  ;;  %v2905_v23 = vadd.f32 %v2857_v24, %v2699_v55  ;;  %4848 = vmatprep.subr.bf16.mxu1 %v15285_v46  ;;  %v2769_v0 = vpop.f32.mrf.mxu1  ;;  %v2863_v20 = vld [vmem:[%s14758_s12 + $0x110] sm:$0xff] }
 0x23d   : > { %2936 = vst.msk [vmem:[%s14758_s12 + $0x58] sm:$0xff] %vm670_vm3, %v2888_v58  ;;  %v2882_v39 = vadd.f32 %v2834_v38, %v2769_v0  ;;  %v2703_v40 = vpop.f32.mrf.mxu0  ;;  %4508 = vmatmul.mubr.bf16.gmra.mxu0 %v16124_v15  ;;  %v2846_v58 = vld [vmem:[%s14758_s12 + $0x88] sm:$0xff]  ;;  %v2861_v38 = vld [vmem:[%s14758_s12 + $0x100] sm:$0xff] }
 0x23e   : > { %2953 = vst [vmem:[%s14758_s12 + $0xe0] sm:$0xff] %v2905_v23  ;;  %v2907_v50 = vadd.f32 %v2859_v43, %v2703_v40  ;;  %v13184_v3 = vpop.f32.mrf.mxu1  ;;  %13311 = vmatmul.mubr.bf16.gmra.mxu1 %v16054_v47  ;;  %4517 = vmatprep.mubr.bf16.mxu0 %v21595_v9  ;;  %v2865_v23 = vld [vmem:[%s14758_s12 + $0x120] sm:$0xff]  ;;  %v2866_v40 = vld [vmem:[%s14758_s12 + $0x128] sm:$0xff]  ;;  %v16182_v43 = vpop.permute.xlu0 %5308 }
 0x23f   : > { %2930 = vst.msk [vmem:[%s14758_s12 + $0x28] sm:$0xff] %vm670_vm3, %v2882_v39  ;;  %v2897_v46 = vadd.f32 %v13184_v3, %v2849_v31  ;;  %4849 = vmatpush1.bf16.msra.mxu1 %v15304_v51  ;;  %v2705_v37 = vpop.f32.mrf.mxu0  ;;  %13314 = vmatprep.mubr.bf16.mxu1 %v16093_v44  ;;  %v13815_v51 = vld [vmem:[#allocation2 + $0x270] sm:$0xff]  }
 0x240   : > { %2955 = vst [vmem:[%s14758_s12 + $0xf0] sm:$0xff] %v2907_v50  ;;  %v2908_v32 = vadd.f32 %v2860_v54, %v2705_v37  ;;  %4850 = vmatprep.subr.bf16.mxu1 %v15322_v48  ;;  %v2782_v47 = vpop.f32.mrf.mxu1  ;;  %v16162_v48 = vpop.permute.xlu1 %5306  ;;  %v2855_v3 = vld [vmem:[%s14758_s12 + $0xd0] sm:$0xff]  ;;  %v2868_v37 = vld [vmem:[%s14758_s12 + $0x138] sm:$0xff] }
 0x241   : > { %2945 = vst.msk [vmem:[%s14758_s12 + $0xa0] sm:$0xff] %vm670_vm3, %v2897_v46  ;;  %v2891_v28 = vadd.f32 %v2843_v13, %v2782_v47  ;;  %v2707_v63 = vpop.f32.mrf.mxu0  ;;  %v13818_v54 = vld [vmem:[#allocation2 + $0x278] sm:$0xff]  }
 0x242   : > { %2956 = vst [vmem:[%s14758_s12 + $0xf8] sm:$0xff] %v2908_v32  ;;  %v2910_v44 = vadd.f32 %v2862_v27, %v2707_v63  ;;  %v13185_v17 = vpop.f32.mrf.mxu1  ;;  %v2864_v13 = vld [vmem:[%s14758_s12 + $0x118] sm:$0xff]  ;;  %v2869_v27 = vld [vmem:[%s14758_s12 + $0x140] sm:$0xff] }
 0x243   : > { %2939 = vst.msk [vmem:[%s14758_s12 + $0x70] sm:$0xff] %vm670_vm3, %v2891_v28  ;;  %v2900_v59 = vadd.f32 %v13185_v17, %v2852_v56  ;;  %4851 = vmatpush1.bf16.msra.mxu1 %v15337_v60  ;;  %v2709_v2 = vpop.f32.mrf.mxu0  ;;  %v16194_v28 = vld [vmem:[#allocation2 + $0x300] sm:$0xff]   ;;  %v2858_v56 = vld [vmem:[%s14758_s12 + $0xe8] sm:$0xff] }
 0x244   : > { %2958 = vst [vmem:[%s14758_s12 + $0x108] sm:$0xff] %v2910_v44  ;;  %v2911_v11 = vadd.f32 %v2863_v20, %v2709_v2  ;;  %4852 = vmatprep.subr.bf16.mxu1 %v15352_v4  ;;  %v2785_v5 = vpop.f32.mrf.mxu1  ;;  %v16187_v31 = vpop.permute.xlu1 %5304  ;;  %v2871_v20 = vld [vmem:[%s14758_s12 + $0x150] sm:$0xff] }
 0x245   : > { %2948 = vst.msk [vmem:[%s14758_s12 + $0xb8] sm:$0xff] %vm670_vm3, %v2900_v59  ;;  %v2894_v55 = vadd.f32 %v2846_v58, %v2785_v5  ;;  %v2713_v24 = vpop.f32.mrf.mxu0  ;;  %4518 = vmatmul.mubr.bf16.gmra.mxu0 %v13815_v51  ;;  %v2873_v58 = vld [vmem:[%s14758_s12 + $0x160] sm:$0xff] }
 0x246   : > { %2959 = vst [vmem:[%s14758_s12 + $0x110] sm:$0xff] %v2911_v11  ;;  %v2913_v60 = vadd.f32 %v2865_v23, %v2713_v24  ;;  %v13188_v0 = vpop.f32.mrf.mxu1  ;;  %13315 = vmatmul.mubr.bf16.gmra.mxu1 %v16124_v15  ;;  %4527 = vmatprep.mubr.bf16.mxu0 %v21595_v9  ;;  %v2872_v24 = vld [vmem:[%s14758_s12 + $0x158] sm:$0xff] }
 0x247   : > { %2942 = vst.msk [vmem:[%s14758_s12 + $0x88] sm:$0xff] %vm670_vm3, %v2894_v55  ;;  %v2909_v4 = vadd.f32 %v13188_v0, %v2861_v38  ;;  %4853 = vmatpush1.bf16.msra.mxu1 %v15370_v10  ;;  %v2715_v39 = vpop.f32.mrf.mxu0  ;;  %13318 = vmatprep.mubr.bf16.mxu1 %v13815_v51  ;;  %v16200_v51 = vpop.permute.xlu0 %6411  ;;  %v2867_v0 = vld [vmem:[%s14758_s12 + $0x130] sm:$0xff] }
 0x248   : > { %2961 = vst [vmem:[%s14758_s12 + $0x120] sm:$0xff] %v2913_v60  ;;  %v2914_v50 = vadd.f32 %v2866_v40, %v2715_v39  ;;  %4854 = vmatprep.subr.bf16.mxu1 %v15385_v18  ;;  %v2798_v15 = vpop.f32.mrf.mxu1  ;;  %v16205_v59 = vpop.permute.xlu1 %6413  ;;  %v2874_v39 = vld [vmem:[%s14758_s12 + $0x168] sm:$0xff] }
 0x249   : > { %2957 = vst.msk [vmem:[%s14758_s12 + $0x100] sm:$0xff] %vm670_vm3, %v2909_v4  ;;  %v2903_v10 = vadd.f32 %v2855_v3, %v2798_v15  ;;  %v2717_v46 = vpop.f32.mrf.mxu0  ;;  %v2876_v3 = vld [vmem:[%s14758_s12 + $0x178] sm:$0xff] }
 0x24a   : > { %2962 = vst [vmem:[%s14758_s12 + $0x128] sm:$0xff] %v2914_v50  ;;  %v2916_v32 = vadd.f32 %v2868_v37, %v2717_v46  ;;  %v13189_v47 = vpop.f32.mrf.mxu1  ;;  %v2875_v37 = vld [vmem:[%s14758_s12 + $0x170] sm:$0xff] }
 0x24b   : > { %2951 = vst.msk [vmem:[%s14758_s12 + $0xd0] sm:$0xff] %vm670_vm3, %v2903_v10  ;;  %v2912_v18 = vadd.f32 %v13189_v47, %v2864_v13  ;;  %4855 = vmatpush1.bf16.msra.mxu1 %v15404_v49  ;;  %v2719_v63 = vpop.f32.mrf.mxu0  ;;  %v16226_v40 = vpop.permute.xlu0 %6409  ;;  %v2870_v47 = vld [vmem:[%s14758_s12 + $0x148] sm:$0xff]  ;;  %v16239_v13 = vld [vmem:[#allocation2 + $0x310] sm:$0xff]  }
 0x24c   : > { %2964 = vst [vmem:[%s14758_s12 + $0x138] sm:$0xff] %v2916_v32  ;;  %v2917_v44 = vadd.f32 %v2869_v27, %v2719_v63  ;;  %4856 = vmatprep.subr.bf16.mxu1 %v15399_v26  ;;  %v2801_v17 = vpop.f32.mrf.mxu1 }
 0x24d   : > { %2960 = vst.msk [vmem:[%s14758_s12 + $0x118] sm:$0xff] %vm670_vm3, %v2912_v18  ;;  %v2906_v2 = vadd.f32 %v2858_v56, %v2801_v17  ;;  %v2723_v49 = vpop.f32.mrf.mxu0  ;;  %4528 = vmatmul.mubr.bf16.gmra.mxu0 %v13818_v54  ;;  %v16244_v18 = vsel %vm5352_vm5, %v15916_v14, %v15878_v36  ;;  %v16257_v36 = vsel %vm5352_vm5, %v15921_v61, %v15947_v53 }
 0x24e   : > { %2965 = vst [vmem:[%s14758_s12 + $0x140] sm:$0xff] %v2917_v44  ;;  %v2919_v11 = vadd.f32 %v2871_v20, %v2723_v49  ;;  %v13192_v5 = vpop.f32.mrf.mxu1  ;;  %13319 = vmatmul.mubr.bf16.gmra.mxu1 %v13818_v54  ;;  %13338 = vmatprep.mubr.bf16.mxu0 %v16194_v28  ;;  %v16275_v56 = vsel %vm5352_vm5, %v15954_v34, %v15921_v61  ;;  %v16279_v49 = vld [vmem:[#allocation2 + $0x318] sm:$0xff]  }
 0x24f   : > { %2954 = vst.msk [vmem:[%s14758_s12 + $0xe8] sm:$0xff] %vm670_vm3, %v2906_v2  ;;  %v2921_v26 = vadd.f32 %v13192_v5, %v2873_v58  ;;  %4857 = vmatpush1.bf16.msra.mxu1 %v15435_v45  ;;  %v2725_v55 = vpop.f32.mrf.mxu0  ;;  %4876 = vmatprep.mubr.bf16.mxu1 %v21595_v9  ;;  %v16224_v45 = vld [vmem:[#allocation2 + $0x308] sm:$0xff]   ;;  %v16264_v44 = vpop.permute.xlu0 %6407  ;;  %v16295_v5 = vld [vmem:[#allocation2 + $0x320] sm:$0xff]   ;;  %v16300_v58 = vsel %vm5352_vm5, %v16007_v8, %v15982_v62 }
 0x250   : > { %2967 = vst [vmem:[%s14758_s12 + $0x150] sm:$0xff] %v2919_v11  ;;  %v2920_v23 = vadd.f32 %v2872_v24, %v2725_v55  ;;  %4858 = vmatprep.subr.bf16.mxu1 %v15431_v25  ;;  %v2814_v60 = vpop.f32.mrf.mxu1  ;;  %v16230_v25 = vpop.permute.xlu1 %6405  ;;  %v16287_v11 = vsel %vm5352_vm5, %v15982_v62, %v15986_v52  ;;  %v16313_v62 = vsel %vm5352_vm5, %v16012_v22, %v16032_v42 }
 0x251   : > { %2969 = vst.msk [vmem:[%s14758_s12 + $0x160] sm:$0xff] %vm670_vm3, %v2921_v26  ;;  %v2915_v38 = vadd.f32 %v2867_v0, %v2814_v60  ;;  %v2727_v4 = vpop.f32.mrf.mxu0  ;;  %v16327_v0 = vsel %vm5352_vm5, %v16035_v29, %v16012_v22 }
 0x252   : > { %2968 = vst [vmem:[%s14758_s12 + $0x158] sm:$0xff] %v2920_v23  ;;  %v2922_v50 = vadd.f32 %v2874_v39, %v2727_v4  ;;  %v13193_v15 = vpop.f32.mrf.mxu1  ;;  %v16331_v4 = vld [vmem:[#allocation2 + $0x328] sm:$0xff]  }
 0x253   : > { %2963 = vst.msk [vmem:[%s14758_s12 + $0x130] sm:$0xff] %vm670_vm3, %v2915_v38  ;;  %v2924_v10 = vadd.f32 %v13193_v15, %v2876_v3  ;;  %4859 = vmatpush1.bf16.msra.mxu1 %v15460_v1  ;;  %v2729_v46 = vpop.f32.mrf.mxu0  ;;  %v16304_v55 = vpop.permute.xlu0 %6399  ;;  %v16349_v15 = vld [vmem:[#allocation2 + $0x330] sm:$0xff]  }
 0x254   : > { %2970 = vst [vmem:[%s14758_s12 + $0x168] sm:$0xff] %v2922_v50  ;;  %v2923_v54 = vadd.f32 %v2875_v37, %v2729_v46  ;;  %v2817_v32 = vpop.f32.mrf.mxu1  ;;  %13354 = vmatprep.subr.bf16.mxu1 %v15886_v30  ;;  %v16270_v17 = vpop.permute.xlu1 %6403 }
 0x255   : > { %2972 = vst.msk [vmem:[%s14758_s12 + $0x178] sm:$0xff] %vm670_vm3, %v2924_v10  ;;  %v2918_v1 = vadd.f32 %v2870_v47, %v2817_v32  ;;  %v13212_v63 = vpop.f32.mrf.mxu0  ;;  %13339 = vmatmul.mubr.bf16.vlgmr.msra.gmra.mxu0 %v16224_v45  ;;  %v16356_v10 = vsel %vm5352_vm5, %v16079_v57, %v16056_v19  ;;  %v16379_v32 = vsel %vm5352_vm5, %v16132_v6, %v16137_v41 }
 0x256   : > { %2971 = vst [vmem:[%s14758_s12 + $0x170] sm:$0xff] %v2923_v54  ;;  %11288 = vst.msk [vmem:[%s14758_s12 + $0x340] sm:$0xff] %vm670_vm3, %v13212_v63  ;;  %5394 = vmatpush1.bf16.msra.mxu0 %v16244_v18  ;;  %v3072_v27 = vpop.f32.mrf.mxu1  ;;  %4877 = vmatmul.mubr.bf16.vlgmr.msra.gmra.mxu1 %v16194_v28  ;;  %v16367_v54 = vsel %vm5352_vm5, %v16088_v35, %v16106_v7  ;;  %v16384_v47 = vsel %vm5352_vm5, %v16112_v16, %v16088_v35 }
 0x257   : > { %2966 = vst.msk [vmem:[%s14758_s12 + $0x148] sm:$0xff] %vm670_vm3, %v2918_v1  ;;  %11280 = vst [vmem:[%s14758_s12 + $0x300] sm:$0xff] %v3072_v27  ;;  %13355 = vmatpush3.bf16.msra.mxu1 %v15886_v30  ;;  %v3185_v14 = vpop.f32.mrf.mxu0  ;;  %5395 = vmatprep.subr.bf16.mxu0 %v16257_v36  ;;  %v16344_v29 = vpop.permute.xlu0 %6397  ;;  %v16388_v1 = vld [vmem:[#allocation2 + $0x338] sm:$0xff]  }
 0x258   : > { %11282 = vst.msk [vmem:[%s14758_s12 + $0x310] sm:$0xff] %vm670_vm3, %v3185_v14  ;;  %v3074_v28 = vpop.f32.mrf.mxu1  ;;  %13356 = vmatprep.subr.bf16.mxu1 %v15947_v53  ;;  %13342 = vmatprep.mubr.bf16.mxu0 %v16239_v13  ;;  %v16315_v8 = vpop.permute.xlu1 %6401  ;;  %21632 = vst [vmem:[#allocation16_spill] sm:$0xff] %v16367_v54 }
 0x259   : > { %11281 = vst [vmem:[%s14758_s12 + $0x308] sm:$0xff] %v3074_v28  ;;  %v13213_v2 = vpop.f32.mrf.mxu0  ;;  %4886 = vmatprep.mubr.bf16.mxu1 %v21595_v9  ;;  %21633 = vst [vmem:[#allocation8_spill] sm:$0xff] %v16379_v32  ;;  %v16406_v28 = vsel %vm5352_vm5, %v16162_v48, %v16182_v43 }
 0x25a   : > { %11291 = vst.msk [vmem:[%s14758_s12 + $0x358] sm:$0xff] %vm670_vm3, %v13213_v2  ;;  %5396 = vmatpush1.bf16.msra.mxu0 %v16275_v56  ;;  %v3076_v20 = vpop.f32.mrf.mxu1  ;;  %21634 = vst [vmem:[#allocation9_spill] sm:$0xff] %v16384_v47  ;;  %v16411_v2 = vsel %vm5352_vm5, %v16158_v33, %v16132_v6 }
 0x25b   : > { %11283 = vst [vmem:[%s14758_s12 + $0x318] sm:$0xff] %v3076_v20  ;;  %13357 = vmatpush3.bf16.msra.mxu1 %v15947_v53  ;;  %v3188_v61 = vpop.f32.mrf.mxu0  ;;  %5397 = vmatprep.subr.bf16.mxu0 %v16287_v11  ;;  %v16390_v63 = vpop.permute.xlu0 %6395  ;;  %21635 = vst [vmem:[#allocation10_spill] sm:$0xff] %v16406_v28 }
 0x25c   : > { %11285 = vst.msk [vmem:[%s14758_s12 + $0x328] sm:$0xff] %vm670_vm3, %v3188_v61  ;;  %v3078_v34 = vpop.f32.mrf.mxu1  ;;  %13358 = vmatprep.subr.bf16.mxu1 %v15986_v52  ;;  %v16351_v3 = vpop.permute.xlu1 %6393  ;;  %21636 = vst [vmem:[#allocation11_spill] sm:$0xff] %v16411_v2 }
 0x25d   : > { %11284 = vst [vmem:[%s14758_s12 + $0x320] sm:$0xff] %v3078_v34  ;;  %v13216_v26 = vpop.f32.mrf.mxu0  ;;  %13343 = vmatmul.mubr.bf16.gmra.mxu0 %v16279_v49 }
 0x25e   : > { %11300 = vst.msk [vmem:[%s14758_s12 + $0x3a0] sm:$0xff] %vm670_vm3, %v13216_v26  ;;  %5398 = vmatpush1.bf16.msra.mxu0 %v16300_v58  ;;  %v3082_v24 = vpop.f32.mrf.mxu1  ;;  %4887 = vmatmul.mubr.bf16.gmra.mxu1 %v16224_v45  ;;  %v16339_v45 = vsel %vm5352_vm5, %v16056_v19, %v16060_v21 }
 0x25f   : > { %11286 = vst [vmem:[%s14758_s12 + $0x330] sm:$0xff] %v3082_v24  ;;  %13359 = vmatpush3.bf16.msra.mxu1 %v15986_v52  ;;  %v3201_v23 = vpop.f32.mrf.mxu0  ;;  %5399 = vmatprep.subr.bf16.mxu0 %v16313_v62  ;;  %v16422_v6 = vpop.permute.xlu0 %6387 }
 0x260   : > { %11294 = vst.msk [vmem:[%s14758_s12 + $0x370] sm:$0xff] %vm670_vm3, %v3201_v23  ;;  %v3084_v60 = vpop.f32.mrf.mxu1  ;;  %13360 = vmatprep.subr.bf16.mxu1 %v16032_v42  ;;  %13346 = vmatprep.mubr.bf16.mxu0 %v16295_v5  ;;  %v16395_v14 = vpop.permute.xlu1 %6391  ;;  %v16437_v23 = vld [vmem:[#allocation2 + $0x1c0] sm:$0xff]  }
 0x261   : > { %11287 = vst [vmem:[%s14758_s12 + $0x338] sm:$0xff] %v3084_v60  ;;  %v13217_v38 = vpop.f32.mrf.mxu0  ;;  %4896 = vmatprep.mubr.bf16.mxu1 %v21595_v9 }
 0x262   : > { %11303 = vst.msk [vmem:[%s14758_s12 + $0x3b8] sm:$0xff] %vm670_vm3, %v13217_v38  ;;  %5400 = vmatpush1.bf16.msra.mxu0 %v16327_v0  ;;  %v3086_v39 = vpop.f32.mrf.mxu1 }
 0x263   : > { %11289 = vst [vmem:[%s14758_s12 + $0x348] sm:$0xff] %v3086_v39  ;;  %13361 = vmatpush3.bf16.msra.mxu1 %v16032_v42  ;;  %v3204_v22 = vpop.f32.mrf.mxu0  ;;  %5401 = vmatprep.subr.bf16.mxu0 %v16339_v45  ;;  %v16452_v39 = vpop.permute.xlu0 %6385 }
 0x264   : > { %11297 = vst.msk [vmem:[%s14758_s12 + $0x388] sm:$0xff] %vm670_vm3, %v3204_v22  ;;  %v3088_v50 = vpop.f32.mrf.mxu1  ;;  %13362 = vmatprep.subr.bf16.mxu1 %v16060_v21  ;;  %v16428_v26 = vpop.permute.xlu1 %6389 }
 0x265   : > { %11290 = vst [vmem:[%s14758_s12 + $0x350] sm:$0xff] %v3088_v50  ;;  %v13220_v46 = vpop.f32.mrf.mxu0  ;;  %13347 = vmatmul.mubr.bf16.gmra.mxu0 %v16331_v4 }
 0x266   : > { %11312 = vst.msk [vmem:[%s14758_s12 + $0x400] sm:$0xff] %vm670_vm3, %v13220_v46  ;;  %5402 = vmatpush1.bf16.msra.mxu0 %v16356_v10  ;;  %v3092_v37 = vpop.f32.mrf.mxu1  ;;  %4897 = vmatmul.mubr.bf16.gmra.mxu1 %v16239_v13 }
 0x267   : > { %11292 = vst [vmem:[%s14758_s12 + $0x360] sm:$0xff] %v3092_v37  ;;  %13363 = vmatpush3.bf16.msra.mxu1 %v16060_v21  ;;  %v3217_v19 = vpop.f32.mrf.mxu0  ;;  %5403 = vmatprep.subr.bf16.mxu0 %v16367_v54 }
 0x268   : > { %11306 = vst.msk [vmem:[%s14758_s12 + $0x3d0] sm:$0xff] %vm670_vm3, %v3217_v19  ;;  %v3094_v57 = vpop.f32.mrf.mxu1  ;;  %13364 = vmatprep.subr.bf16.mxu1 %v16106_v7  ;;  %13350 = vmatprep.mubr.bf16.mxu0 %v16349_v15  ;;  %v16456_v50 = vpop.permute.xlu1 %6381 }
 0x269   : > { %11293 = vst [vmem:[%s14758_s12 + $0x368] sm:$0xff] %v3094_v57  ;;  %v13221_v13 = vpop.f32.mrf.mxu0  ;;  %4906 = vmatprep.mubr.bf16.mxu1 %v21595_v9  ;;  %v16474_v57 = vpop.permute.xlu0 %6383 }
 0x26a   : > { %11315 = vst.msk [vmem:[%s14758_s12 + $0x418] sm:$0xff] %vm670_vm3, %v13221_v13  ;;  %5404 = vmatpush1.bf16.msra.mxu0 %v16384_v47  ;;  %v3096_v27 = vpop.f32.mrf.mxu1  ;;  %21638 = vst [vmem:[#allocation13_spill] sm:$0xff] %v16474_v57  ;;  %v3797_v47 = vld [vmem:[%s14758_s12] sm:$0xff] }
 0x26b   : > { %11295 = vst [vmem:[%s14758_s12 + $0x378] sm:$0xff] %v3096_v27  ;;  %13365 = vmatpush3.bf16.msra.mxu1 %v16106_v7  ;;  %v3220_v35 = vpop.f32.mrf.mxu0  ;;  %5405 = vmatprep.subr.bf16.mxu0 %v16379_v32 }
 0x26c   : > { %11309 = vst.msk [vmem:[%s14758_s12 + $0x3e8] sm:$0xff] %vm670_vm3, %v3220_v35  ;;  %v3098_v16 = vpop.f32.mrf.mxu1  ;;  %13366 = vmatprep.subr.bf16.mxu1 %v16137_v41  ;;  %v16476_v27 = vpop.permute.xlu1 %6379 }
 0x26d   : > { %11296 = vst [vmem:[%s14758_s12 + $0x380] sm:$0xff] %v3098_v16  ;;  %v13224_v20 = vpop.f32.mrf.mxu0  ;;  %13351 = vmatmul.mubr.bf16.gmra.mxu0 %v16388_v1 }
 0x26e   : > { %11324 = vst.msk [vmem:[%s14758_s12 + $0x460] sm:$0xff] %vm670_vm3, %v13224_v20  ;;  %5406 = vmatpush1.bf16.msra.mxu0 %v16411_v2  ;;  %v3102_v61 = vpop.f32.mrf.mxu1  ;;  %4907 = vmatmul.mubr.bf16.gmra.mxu1 %v16279_v49  ;;  %v16433_v49 = vsel %vm5352_vm5, %v16187_v31, %v16162_v48 }
 0x26f   : > { %11298 = vst [vmem:[%s14758_s12 + $0x390] sm:$0xff] %v3102_v61  ;;  %13367 = vmatpush3.bf16.msra.mxu1 %v16137_v41  ;;  %v3233_v34 = vpop.f32.mrf.mxu0  ;;  %5407 = vmatprep.subr.bf16.mxu0 %v16406_v28  ;;  %21637 = vst [vmem:[#allocation12_spill] sm:$0xff] %v16433_v49 }
 0x270   : > { %11318 = vst.msk [vmem:[%s14758_s12 + $0x430] sm:$0xff] %vm670_vm3, %v3233_v34  ;;  %v3104_v33 = vpop.f32.mrf.mxu1  ;;  %13368 = vmatprep.subr.bf16.mxu1 %v16182_v43  ;;  %5425 = vmatprep.mubr.bf16.mxu0 %v21595_v9  ;;  %v16493_v34 = vld [vmem:[#allocation2 + $0x1d0] sm:$0xff]  }
 0x271   : > { %11299 = vst [vmem:[%s14758_s12 + $0x398] sm:$0xff] %v3104_v33  ;;  %v13225_v24 = vpop.f32.mrf.mxu0  ;;  %4916 = vmatprep.mubr.bf16.mxu1 %v21595_v9  ;;  %v16495_v33 = vpop.permute.xlu0 %6375 }
 0x272   : > { %11327 = vst.msk [vmem:[%s14758_s12 + $0x478] sm:$0xff] %vm670_vm3, %v13225_v24  ;;  %5408 = vmatpush1.bf16.msra.mxu0 %v16433_v49  ;;  %v3106_v60 = vpop.f32.mrf.mxu1  ;;  %v16498_v24 = vpop.permute.xlu1 %6377  ;;  %v3798_v49 = vld [vmem:[%s14758_s12 + $0x8] sm:$0xff] }
 0x273   : > { %11301 = vst [vmem:[%s14758_s12 + $0x3a8] sm:$0xff] %v3106_v60  ;;  %13369 = vmatpush3.bf16.msra.mxu1 %v16182_v43  ;;  %13386 = vmatprep.subr.bf16.mxu0 %v15886_v30  ;;  %v3236_v38 = vpop.f32.mrf.mxu0  ;;  %21639 = vst [vmem:[#allocation14_spill] sm:$0xff] %v16498_v24 }
 0x274   : > { %11321 = vst.msk [vmem:[%s14758_s12 + $0x448] sm:$0xff] %vm670_vm3, %v3236_v38  ;;  %5812 = vmatprep.subr.bf16.mxu1 %v16086_v12  ;;  %v3108_v48 = vpop.f32.mrf.mxu1 }
 0x275   : > { %11302 = vst [vmem:[%s14758_s12 + $0x3b0] sm:$0xff] %v3108_v48  ;;  %v16449_v31 = vpop.f32.mrf.mxu0  ;;  %5426 = vmatmul.mubr.bf16.vlgmr.msra.gmra.mxu0 %v16437_v23 }
 0x276   : > { %13387 = vmatpush3.bf16.msra.mxu0 %v15886_v30  ;;  %v3112_v22 = vpop.f32.mrf.mxu1  ;;  %4917 = vmatmul.mubr.bf16.gmra.mxu1 %v16295_v5  ;;  %v16467_v30 = vld [vmem:[#allocation2 + $0x1c8] sm:$0xff]   ;;  %v16546_v54 = vadd.f32 %v3797_v47, %v16449_v31  ;;  %v6431_v47 = vsel %vm6415_vm6, %v16200_v51, %v16205_v59  ;;  %v3801_v31 = vld [vmem:[%s14758_s12 + $0x20] sm:$0xff] }
 0x277   : > { %11304 = vst [vmem:[%s14758_s12 + $0x3c0] sm:$0xff] %v3112_v22  ;;  %13388 = vmatprep.subr.bf16.mxu0 %v15947_v53  ;;  %v16460_v12 = vpop.f32.mrf.mxu0  ;;  %5435 = vmatprep.mubr.bf16.mxu0 %v21595_v9 }
 0x278   : > { %v3114_v46 = vpop.f32.mrf.mxu1  ;;  %4926 = vmatprep.mubr.bf16.mxu1 %v21595_v9  ;;  %21642 = vst [vmem:[#allocation18_spill] sm:$0xff] %v16546_v54 }
 0x279   : > { %11305 = vst [vmem:[%s14758_s12 + $0x3c8] sm:$0xff] %v3114_v46  ;;  %v16465_v37 = vpop.f32.mrf.mxu0 }
 0x27a   : > { %13389 = vmatpush3.bf16.msra.mxu0 %v15947_v53  ;;  %v3116_v5 = vpop.f32.mrf.mxu1 }
 0x27b   : > { %11307 = vst [vmem:[%s14758_s12 + $0x3d8] sm:$0xff] %v3116_v5  ;;  %13390 = vmatprep.subr.bf16.mxu0 %v15986_v52  ;;  %v16472_v19 = vpop.f32.mrf.mxu0  ;;  %v16515_v5 = vpop.permute.xlu0 %6373 }
 0x27c   : > { %v3118_v13 = vpop.f32.mrf.mxu1 }
 0x27d   : > { %11308 = vst [vmem:[%s14758_s12 + $0x3e0] sm:$0xff] %v3118_v13  ;;  %v16479_v35 = vpop.f32.mrf.mxu0  ;;  %5436 = vmatmul.mubr.bf16.gmra.mxu0 %v16467_v30 }
 0x27e   : > { %13391 = vmatpush3.bf16.msra.mxu0 %v15986_v52  ;;  %v3122_v53 = vpop.f32.mrf.mxu1  ;;  %4927 = vmatmul.mubr.bf16.gmra.mxu1 %v16331_v4  ;;  %v8567_v52 = vlaneseq }
 0x27f   : > { %11310 = vst [vmem:[%s14758_s12 + $0x3f0] sm:$0xff] %v3122_v53  ;;  %13392 = vmatprep.subr.bf16.mxu0 %v16032_v42  ;;  %v16486_v16 = vpop.f32.mrf.mxu0  ;;  %5445 = vmatprep.mubr.bf16.mxu0 %v21595_v9 }
 0x280   : > { %v3124_v20 = vpop.f32.mrf.mxu1  ;;  %4936 = vmatprep.mubr.bf16.mxu1 %v21595_v9  ;;  %v8568_v22 = vshrl.u32 %v8567_v52, 7 }
 0x281   : > { %11311 = vst [vmem:[%s14758_s12 + $0x3f8] sm:$0xff] %v3124_v20  ;;  %v16491_v61 = vpop.f32.mrf.mxu0  ;;  %v16518_v20 = vpop.permute.xlu1 %6369 }
 0x282   : > { %13393 = vmatpush3.bf16.msra.mxu0 %v16032_v42  ;;  %v3126_v4 = vpop.f32.mrf.mxu1  ;;  %v8573_v53 = vsub.s32 1, %v8568_v22  ;;  %v8569_v52 = vsub.s32 0, %v8568_v22 }
 0x283   : > { %11313 = vst [vmem:[%s14758_s12 + $0x408] sm:$0xff] %v3126_v4  ;;  %13394 = vmatprep.subr.bf16.mxu0 %v16060_v21  ;;  %v16502_v60 = vpop.f32.mrf.mxu0 }
 0x284   : > { %v3128_v38 = vpop.f32.mrf.mxu1 }
 0x285   : > { %11314 = vst [vmem:[%s14758_s12 + $0x410] sm:$0xff] %v3128_v38  ;;  %v16505_v48 = vpop.f32.mrf.mxu0  ;;  %5446 = vmatmul.mubr.bf16.gmra.mxu0 %v16493_v34  ;;  %v8517_v38 = vld [vmem:[#allocation4] sm:$0x7] }
 0x286   : > { %13395 = vmatpush3.bf16.msra.mxu0 %v16060_v21  ;;  %v3132_v46 = vpop.f32.mrf.mxu1  ;;  %4937 = vmatmul.mubr.bf16.gmra.mxu1 %v16349_v15  ;;  %v16523_v15 = vld [vmem:[#allocation2 + $0x1d8] sm:$0xff]   ;;  %v16534_v32 = vrot.slane %v8517_v38, %v8573_v53  ;;  %v6368_v53 = vpop.permute.xlu1 %6367 }
 0x287   : > { %11316 = vst [vmem:[%s14758_s12 + $0x420] sm:$0xff] %v3132_v46  ;;  %13396 = vmatprep.subr.bf16.mxu0 %v16106_v7  ;;  %v16512_v42 = vpop.f32.mrf.mxu0  ;;  %5455 = vmatprep.mubr.bf16.mxu0 %v21595_v9  ;;  %v8577_v46 = vsub.s32 2, %v8568_v22  ;;  %v16541_v22 = vrot.slane %v8517_v38, %v8569_v52 }
 0x288   : > { %v3134_v13 = vpop.f32.mrf.mxu1  ;;  %4946 = vmatprep.mubr.bf16.mxu1 %v21595_v9 }
 0x289   : > { %11317 = vst [vmem:[%s14758_s12 + $0x428] sm:$0xff] %v3134_v13  ;;  %v16521_v21 = vpop.f32.mrf.mxu0  ;;  %v16532_v13 = vadd.f32 %v3798_v49, %v16460_v12  ;;  %v16555_v12 = vrot.slane %v8517_v38, %v8577_v46 }
 0x28a   : > { %13397 = vmatpush3.bf16.msra.mxu0 %v16106_v7  ;;  %v3136_v4 = vpop.f32.mrf.mxu1 }
 0x28b   : > { %11319 = vst [vmem:[%s14758_s12 + $0x438] sm:$0xff] %v3136_v4  ;;  %13398 = vmatprep.subr.bf16.mxu0 %v16137_v41  ;;  %v16529_v28 = vpop.f32.mrf.mxu0  ;;  %21640 = vst [vmem:[#allocation15_spill] sm:$0xff] %v16532_v13  ;;  %v16543_v4 = vpop.permute.xlu0 %6371  ;;  %v16580_v46 = vmul.f32 %v16534_v32, %v16532_v13  ;;  %v3804_v13 = vld [vmem:[%s14758_s12 + $0x38] sm:$0xff] }
 0x28c   : > { %v3138_v2 = vpop.f32.mrf.mxu1  ;;  %21641 = vst [vmem:[#allocation17_spill] sm:$0xff] %v16543_v4 }
 0x28d   : > { %11320 = vst [vmem:[%s14758_s12 + $0x440] sm:$0xff] %v3138_v2  ;;  %v16538_v7 = vpop.f32.mrf.mxu0  ;;  %5456 = vmatmul.mubr.bf16.gmra.mxu0 %v16523_v15  ;;  %v16553_v2 = vsel %vm6415_vm6, %v16226_v40, %v16200_v51  ;;  %v16570_v40 = vsel %vm6415_vm6, %v16344_v29, %v16304_v55  ;;  %v16590_v29 = vsel %vm6415_vm6, %v16452_v39, %v16422_v6 }
 0x28e   : > { %13399 = vmatpush3.bf16.msra.mxu0 %v16137_v41  ;;  %v3142_v49 = vpop.f32.mrf.mxu1  ;;  %4947 = vmatmul.mubr.bf16.gmra.mxu1 %v16388_v1  ;;  %v16565_v41 = vsel %vm6415_vm6, %v16270_v17, %v16230_v25  ;;  %v3800_v1 = vld [vmem:[%s14758_s12 + $0x18] sm:$0xff]  ;;  %v16585_v17 = vsel %vm6415_vm6, %v16395_v14, %v16351_v3  ;;  %v16595_v51 = vsel %vm6415_vm6, %v16230_v25, %v16264_v44 }
 0x28f   : > { %11322 = vst [vmem:[%s14758_s12 + $0x450] sm:$0xff] %v3142_v49  ;;  %13400 = vmatprep.subr.bf16.mxu0 %v16182_v43  ;;  %v16559_v52 = vpop.f32.mrf.mxu0  ;;  %5465 = vmatprep.mubr.bf16.mxu0 %v21595_v9  ;;  %21643 = vst [vmem:[#allocation19_spill] sm:$0xff] %v16585_v17  ;;  %v16601_v49 = vadd.f32 %v3801_v31, %v16472_v19  ;;  %v16607_v17 = vld [vmem:[#allocation2 + $0x1e0] sm:$0xff]   ;;  %v16612_v39 = vsel %vm6415_vm6, %v16304_v55, %v16315_v8 }
 0x290   : > { %v3144_v38 = vpop.f32.mrf.mxu1  ;;  %13370 = vmatprep.mubr.bf16.mxu1 %v16437_v23  ;;  %v16598_v23 = vadd.f32 %v3800_v1, %v16465_v37  ;;  %v16617_v25 = vsel %vm6415_vm6, %v16351_v3, %v16390_v63  ;;  %v3803_v37 = vld [vmem:[%s14758_s12 + $0x30] sm:$0xff]  ;;  %v16621_v19 = vadd.f32 %v3804_v13, %v16486_v16  ;;  %v8582_v31 = vmul.f32 %v16541_v22, %v16546_v54  ;;  %v16642_v13 = vpop.permute.xlu0 %7055 }
 0x291   : > { %21645 = vst [vmem:[#allocation21_spill] sm:$0xff] %v16601_v49  ;;  %11323 = vst [vmem:[%s14758_s12 + $0x458] sm:$0xff] %v3144_v38  ;;  %v16605_v14 = vpop.f32.mrf.mxu0  ;;  %v16629_v55 = vsel %vm6415_vm6, %v16476_v27, %v16456_v50  ;;  %v16632_v3 = vadd.f32 %v3803_v37, %v16479_v35  ;;  %v16647_v27 = vsel %vm6415_vm6, %v16422_v6, %v16428_v26  ;;  %v3807_v38 = vld [vmem:[%s14758_s12 + $0x50] sm:$0xff] }
 0x292   : > { %21644 = vst [vmem:[#allocation20_spill] sm:$0xff] %v16598_v23  ;;  %21646 = vst [vmem:[#allocation22_spill] sm:$0xff] %v16621_v19  ;;  %13401 = vmatpush3.bf16.msra.mxu0 %v16182_v43  ;;  %v3146_v1 = vpop.f32.mrf.mxu1  ;;  %v16640_v43 = vsel %vm6415_vm6, %v16515_v5, %v16495_v33  ;;  %v16652_v35 = vsel %vm6415_vm6, %v16456_v50, %v16474_v57  ;;  %v8711_v37 = vmul.f32 %v16580_v46, %v16580_v46  ;;  %v3825_v57 = vld [vmem:[%s14758_s12 + $0xe0] sm:$0xff] }
 0x293   : > { %21647 = vst [vmem:[#allocation23_spill] sm:$0xff] %v16632_v3  ;;  %11325 = vst [vmem:[%s14758_s12 + $0x468] sm:$0xff] %v3146_v1  ;;  %v16635_v16 = vpop.f32.mrf.mxu0  ;;  %6456 = vmatprep.subr.bf16.mxu0 %v6431_v47  ;;  %v16659_v5 = vsel %vm6415_vm6, %v6368_v53, %v16518_v20  ;;  %v16661_v1 = vpop.permute.xlu1 %7057  ;;  %v16666_v6 = vsel %vm6415_vm6, %v16495_v33, %v16498_v24  ;;  %v16671_v50 = vsel %vm6415_vm6, %v16518_v20, %v16543_v4  ;;  %v3805_v4 = vld [vmem:[%s14758_s12 + $0x40] sm:$0xff] }
 0x294   : > { %21648 = vst [vmem:[#allocation24_spill] sm:$0xff] %v16640_v43  ;;  %21649 = vst [vmem:[#allocation25_spill] sm:$0xff] %v16642_v13  ;;  %v3148_v47 = vpop.f32.mrf.mxu1  ;;  %v16674_v54 = vadd.f32 %v3807_v38, %v16502_v60  ;;  %v3810_v43 = vld [vmem:[%s14758_s12 + $0x68] sm:$0xff]  ;;  %v8585_v33 = vmul.f32 %v16541_v22, %v16598_v23  ;;  %v8586_v24 = vmul.f32 %v16534_v32, %v16601_v49 }
 0x295   : > { %21650 = vst [vmem:[#allocation26_spill] sm:$0xff] %v16659_v5  ;;  %21651 = vst [vmem:[#allocation27_spill] sm:$0xff] %v16661_v1  ;;  %v16678_v53 = vpop.f32.mrf.mxu0  ;;  %5466 = vmatmul.mubr.bf16.gmra.mxu0 %v16607_v17  ;;  %v16688_v20 = vsel %vm7059_vm7, %v16642_v13, %v16661_v1  ;;  %v3806_v60 = vld [vmem:[%s14758_s12 + $0x48] sm:$0xff]  ;;  %v16692_v38 = vadd.f32 %v3810_v43, %v16512_v42  ;;  %v8589_v23 = vmul.f32 %v16534_v32, %v16621_v19  ;;  %v3809_v13 = vld [vmem:[%s14758_s12 + $0x60] sm:$0xff] }
 0x296   : > { %21652 = vst [vmem:[#allocation28_spill] sm:$0xff] %v16671_v50  ;;  %21653 = vst [vmem:[#allocation29_spill] sm:$0xff] %v16674_v54  ;;  %13371 = vmatmul.mubr.bf16.vlgmr.msra.gmra.mxu1 %v16467_v30  ;;  %5475 = vmatprep.mubr.bf16.mxu0 %v21595_v9  ;;  %v8710_v49 = vmul.f32 %v8582_v31, %v8582_v31  ;;  %v16700_v5 = vadd.f32 %v3806_v60, %v16491_v61 }
 0x297   : > { %11326 = vst [vmem:[%s14758_s12 + $0x470] sm:$0xff] %v3148_v47  ;;  %21654 = vst [vmem:[#allocation30_spill] sm:$0xff] %v16688_v20  ;;  %v13244_v47 = vpop.f32.mrf.mxu1  ;;  %v3813_v20 = vld [vmem:[%s14758_s12 + $0x80] sm:$0xff]  ;;  %5813 = vmatpush1.bf16.msra.mxu1 %v16244_v18  ;;  %v16705_v43 = vpop.f32.mrf.mxu0  ;;  %13374 = vmatprep.mubr.bf16.mxu1 %v16493_v34  ;;  %v8588_v30 = vmul.f32 %v16541_v22, %v16632_v3  ;;  %v16711_v19 = vadd.f32 %v3809_v13, %v16505_v48  ;;  %v3812_v34 = vld [vmem:[%s14758_s12 + $0x78] sm:$0xff] }
 0x298   : > { %21655 = vst [vmem:[#allocation31_spill] sm:$0xff] %v16692_v38  ;;  %21656 = vst [vmem:[#allocation32_spill] sm:$0xff] %v16700_v5  ;;  %v3853_v42 = vadd.f32 %v13244_v47, %v3805_v4  ;;  %v16714_v61 = vadd.f32 %v3813_v20, %v16529_v28  ;;  %5814 = vmatprep.subr.bf16.mxu1 %v16257_v36  ;;  %v3799_v4 = vld [vmem:[%s14758_s12 + $0x10] sm:$0xff]  ;;  %v16719_v18 = vadd.f32 %v16580_v46, %v8582_v31  ;;  %v3824_v3 = vld [vmem:[%s14758_s12 + $0xd8] sm:$0xff] }
 0x299   : > { %21657 = vst [vmem:[#allocation33_spill] sm:$0xff] %v16711_v19  ;;  %v3734_v60 = vpop.f32.mrf.mxu1  ;;  %v16721_v47 = vadd.f32 %v8711_v37, %v8710_v49  ;;  %v3665_v13 = vpop.f32.mrf.mxu0  ;;  %v16727_v28 = vld [vmem:[#allocation2 + $0x1e8] sm:$0xff]   ;;  %v8592_v36 = vmul.f32 %v16534_v32, %v16674_v54  ;;  %v8713_v20 = vmul.f32 %v8585_v33, %v8585_v33  ;;  %v8714_v1 = vmul.f32 %v8586_v24, %v8586_v24  ;;  %v3808_v37 = vld [vmem:[%s14758_s12 + $0x58] sm:$0xff] }
 0x29a   : > { %21658 = vst [vmem:[#allocation34_spill] sm:$0xff] %v16714_v61  ;;  %3901 = vst.msk [vmem:[%s14758_s12 + $0x40] sm:$0xff] %vm670_vm3, %v3853_v42  ;;  %v3847_v48 = vadd.f32 %v3799_v4, %v3734_v60  ;;  %v16732_v46 = vadd.f32 %v3812_v34, %v16521_v21  ;;  %v3872_v49 = vadd.f32 %v3824_v3, %v3665_v13  ;;  %v3815_v60 = vld [vmem:[%s14758_s12 + $0x90] sm:$0xff] }
 0x29b   : > { %v13245_v31 = vpop.f32.mrf.mxu1  ;;  %v8717_v50 = vmul.f32 %v8589_v23, %v8589_v23  ;;  %v8595_v42 = vmul.f32 %v16534_v32, %v16692_v38  ;;  %5815 = vmatpush1.bf16.msra.mxu1 %v16275_v56  ;;  %v3667_v54 = vpop.f32.mrf.mxu0  ;;  %v8716_v21 = vmul.f32 %v8588_v30, %v8588_v30  ;;  %v8591_v3 = vmul.f32 %v16541_v22, %v16700_v5 }
 0x29c   : > { %21659 = vst [vmem:[#allocation35_spill] sm:$0xff] %v16732_v46  ;;  %3895 = vst.msk [vmem:[%s14758_s12 + $0x10] sm:$0xff] %vm670_vm3, %v3847_v48  ;;  %v3856_v4 = vadd.f32 %v13245_v31, %v3808_v37  ;;  %v16744_v34 = vadd.f32 %v8586_v24, %v8585_v33  ;;  %v16747_v13 = vadd.f32 %v3815_v60, %v16538_v7  ;;  %5816 = vmatprep.subr.bf16.mxu1 %v16287_v11  ;;  %v3802_v31 = vld [vmem:[%s14758_s12 + $0x28] sm:$0xff] }
 0x29d   : > { %3920 = vst [vmem:[%s14758_s12 + $0xd8] sm:$0xff] %v3872_v49  ;;  %v3873_v38 = vadd.f32 %v3825_v57, %v3667_v54  ;;  %v3737_v48 = vpop.f32.mrf.mxu1  ;;  %v8594_v56 = vmul.f32 %v16541_v22, %v16711_v19  ;;  %v8598_v37 = vmul.f32 %v16534_v32, %v16714_v61  ;;  %v16758_v7 = vpop.f32.mrf.mxu0  ;;  %5476 = vmatmul.mubr.bf16.gmra.mxu0 %v16727_v28  ;;  %v3817_v49 = vld [vmem:[%s14758_s12 + $0xa0] sm:$0xff] }
 0x29e   : > { %21660 = vst [vmem:[#allocation36_spill] sm:$0xff] %v16747_v13  ;;  %3904 = vst.msk [vmem:[%s14758_s12 + $0x58] sm:$0xff] %vm670_vm3, %v3856_v4  ;;  %v3850_v24 = vadd.f32 %v3802_v31, %v3737_v48  ;;  %v8640_v54 = vadd.f32 %v8589_v23, %v8588_v30  ;;  %v8720_v57 = vmul.f32 %v8592_v36, %v8592_v36  ;;  %13375 = vmatmul.mubr.bf16.gmra.mxu1 %v16523_v15  ;;  %v3816_v31 = vld [vmem:[%s14758_s12 + $0x98] sm:$0xff] }
 0x29f   : > { %v16761_v11 = vadd.f32 %v8714_v1, %v8713_v20  ;;  %3921 = vst [vmem:[%s14758_s12 + $0xe0] sm:$0xff] %v3873_v38  ;;  %v13248_v33 = vpop.f32.mrf.mxu1  ;;  %5485 = vmatprep.mubr.bf16.mxu0 %v21595_v9  ;;  %v16767_v60 = vadd.f32 %v8717_v50, %v8716_v21  ;;  %v8597_v4 = vmul.f32 %v16541_v22, %v16732_v46  ;;  %v16775_v1 = vpop.f32.mrf.mxu0  ;;  %v3811_v20 = vld [vmem:[%s14758_s12 + $0x70] sm:$0xff]  ;;  %v3820_v46 = vld [vmem:[%s14758_s12 + $0xb8] sm:$0xff] }
 0x2a0   : > { %v8723_v48 = vmul.f32 %v8595_v42, %v8595_v42  ;;  %3898 = vst.msk [vmem:[%s14758_s12 + $0x28] sm:$0xff] %vm670_vm3, %v3850_v24  ;;  %v3865_v23 = vadd.f32 %v13248_v33, %v3817_v49  ;;  %5817 = vmatpush1.bf16.msra.mxu1 %v16300_v58  ;;  %13378 = vmatprep.mubr.bf16.mxu1 %v16607_v17  ;;  %v3818_v17 = vld [vmem:[%s14758_s12 + $0xa8] sm:$0xff] }
 0x2a1   : > { %v16778_v15 = vadd.f32 %v8592_v36, %v8591_v3  ;;  %v8719_v50 = vmul.f32 %v8591_v3, %v8591_v3  ;;  %v16781_v38 = vadd.f32 %v3816_v31, %v16559_v52  ;;  %5818 = vmatprep.subr.bf16.mxu1 %v16313_v62  ;;  %v3750_v30 = vpop.f32.mrf.mxu1  ;;  %v8526_v21 = vld [vmem:[%s14758_s12 + $0x40] sm:$0xff]  ;;  %v16788_v58 = vmul.f32 %v16541_v22, %v16747_v13  ;;  %v16793_v52 = vpop.f32.mrf.mxu0  ;;  %v16795_v3 = vld [vmem:[#allocation2 + $0x1f0] sm:$0xff]  }
 0x2a2   : > { %v8722_v24 = vmul.f32 %v8594_v56, %v8594_v56  ;;  %v8726_v33 = vmul.f32 %v8598_v37, %v8598_v37  ;;  %3913 = vst.msk [vmem:[%s14758_s12 + $0xa0] sm:$0xff] %vm670_vm3, %v3865_v23  ;;  %v3859_v36 = vadd.f32 %v3811_v20, %v3750_v30  ;;  %v8590_v62 = vmul.f32 %v16555_v12, %v8526_v21 }
 0x2a3   : > { %21661 = vst [vmem:[#allocation37_spill] sm:$0xff] %v16781_v38  ;;  %v16798_v49 = vadd.f32 %v8720_v57, %v8719_v50  ;;  %v16800_v31 = vadd.f32 %v8595_v42, %v8594_v56  ;;  %v16803_v13 = vadd.f32 %v3818_v17, %v16605_v14  ;;  %v13249_v61 = vpop.f32.mrf.mxu1  ;;  %v8520_v19 = vld [vmem:[%s14758_s12 + $0x10] sm:$0xff]  ;;  %v16807_v23 = vadd.f32 %v8598_v37, %v8597_v4  ;;  %v16814_v42 = vpop.f32.mrf.mxu0 }
 0x2a4   : > { %v16809_v30 = vadd.f32 %v8723_v48, %v8722_v24  ;;  %v8725_v20 = vmul.f32 %v8597_v4, %v8597_v4  ;;  %3907 = vst.msk [vmem:[%s14758_s12 + $0x70] sm:$0xff] %vm670_vm3, %v3859_v36  ;;  %v3868_v57 = vadd.f32 %v13249_v61, %v3820_v46  ;;  %5819 = vmatpush1.bf16.msra.mxu1 %v16327_v0  ;;  %v8641_v14 = vsel %vm670_vm3, %v8590_v62, 0.0  ;;  %v3814_v48 = vld [vmem:[%s14758_s12 + $0x88] sm:$0xff]  ;;  %v3819_v24 = vld [vmem:[%s14758_s12 + $0xb0] sm:$0xff] }
 0x2a5   : > { %21662 = vst [vmem:[#allocation38_spill] sm:$0xff] %v16803_v13  ;;  %v8718_v56 = vmul.f32 %v8590_v62, %v8590_v62  ;;  %v8584_v50 = vmul.f32 %v16555_v12, %v8520_v19  ;;  %5820 = vmatprep.subr.bf16.mxu1 %v16339_v45  ;;  %v3753_v37 = vpop.f32.mrf.mxu1  ;;  %v8642_v4 = vadd.f32 %v8641_v14, %v8640_v54  ;;  %v8529_v21 = vld [vmem:[%s14758_s12 + $0x58] sm:$0xff]  ;;  %v3681_v19 = vpop.f32.mrf.mxu0  ;;  %v3833_v54 = vld [vmem:[%s14758_s12 + $0x120] sm:$0xff] }
 0x2a6   : > { %v8601_v61 = vmul.f32 %v16534_v32, %v16781_v38  ;;  %v16825_v0 = vmul.f32 %v16788_v58, %v16788_v58  ;;  %v16827_v46 = vadd.f32 %v8726_v33, %v8725_v20  ;;  %3916 = vst.msk [vmem:[%s14758_s12 + $0xb8] sm:$0xff] %vm670_vm3, %v3868_v57  ;;  %v3862_v45 = vadd.f32 %v3814_v48, %v3753_v37  ;;  %v3829_v38 = vld [vmem:[%s14758_s12 + $0x100] sm:$0xff]  ;;  %v3822_v48 = vld [vmem:[%s14758_s12 + $0xc8] sm:$0xff] }
 0x2a7   : > { %5486 = vmatmul.mubr.bf16.gmra.mxu0 %v16795_v3  ;;  %v8769_v17 = vsel %vm670_vm3, %v8718_v56, 0.0  ;;  %v8631_v36 = vsel %vm670_vm3, %v8584_v50, 0.0  ;;  %v8712_v62 = vmul.f32 %v8584_v50, %v8584_v50  ;;  %v16837_v14 = vadd.f32 %v3819_v24, %v16635_v16  ;;  %v13252_v20 = vpop.f32.mrf.mxu1  ;;  %13379 = vmatmul.mubr.bf16.gmra.mxu1 %v16727_v28  ;;  %v8523_v37 = vld [vmem:[%s14758_s12 + $0x28] sm:$0xff]  ;;  %v16847_v16 = vpop.f32.mrf.mxu0 }
 0x2a8   : > { %v3881_v33 = vadd.f32 %v3833_v54, %v3681_v19  ;;  %8643 = vadd.xlane.f32.xlu0 %v8642_v4  ;;  %v8770_v57 = vadd.f32 %v8769_v17, %v16767_v60  ;;  %3910 = vst.msk [vmem:[%s14758_s12 + $0x88] sm:$0xff] %vm670_vm3, %v3862_v45  ;;  %v3877_v56 = vadd.f32 %v13252_v20, %v3829_v38  ;;  %v3821_v4 = vld [vmem:[%s14758_s12 + $0xc0] sm:$0xff]  ;;  %v3823_v45 = vld [vmem:[%s14758_s12 + $0xd0] sm:$0xff]  ;;  %v3836_v20 = vld [vmem:[%s14758_s12 + $0x138] sm:$0xff] }
 0x2a9   : > { %21663 = vst [vmem:[#allocation39_spill] sm:$0xff] %v16837_v14  ;;  %5821 = vmatpush1.bf16.msra.mxu1 %v16356_v10  ;;  %v8759_v50 = vsel %vm670_vm3, %v8712_v62, 0.0  ;;  %5495 = vmatprep.mubr.bf16.mxu0 %v21595_v9  ;;  %v8593_v28 = vmul.f32 %v16555_v12, %v8529_v21  ;;  %v8587_v60 = vmul.f32 %v16555_v12, %v8523_v37  ;;  %v21665_v38 = vld [vmem:[#allocation16_spill] sm:$0xff]  ;;  %v3766_v10 = vpop.f32.mrf.mxu1 }
 0x2aa   : > { %v16855_v24 = vadd.f32 %v3822_v48, %v16705_v43  ;;  %3929 = vst [vmem:[%s14758_s12 + $0x120] sm:$0xff] %v3881_v33  ;;  %5822 = vmatprep.subr.bf16.mxu1 %v21665_v38  ;;  %8771 = vadd.xlane.f32.xlu1 %v8770_v57  ;;  %v8632_v19 = vadd.f32 %v8631_v36, %v16719_v18  ;;  %v8538_v54 = vld [vmem:[%s14758_s12 + $0xa0] sm:$0xff]  ;;  %3925 = vst.msk [vmem:[%s14758_s12 + $0x100] sm:$0xff] %vm670_vm3, %v3877_v56  ;;  %v3685_v43 = vpop.f32.mrf.mxu0  ;;  %v13847_v33 = vld [vmem:[#allocation2 + $0x1f8] sm:$0xff]  }
 0x2ab   : > { %v8729_v17 = vmul.f32 %v8601_v61, %v8601_v61  ;;  %v16863_v21 = vadd.f32 %v3821_v4, %v16678_v53  ;;  %v3871_v62 = vadd.f32 %v3823_v45, %v3766_v10  ;;  %13382 = vmatprep.mubr.bf16.mxu1 %v16795_v3  ;;  %v8646_v37 = vsel %vm670_vm3, %v8593_v28, 0.0  ;;  %v13253_v36 = vpop.f32.mrf.mxu1  ;;  %v3832_v48 = vld [vmem:[%s14758_s12 + $0x118] sm:$0xff]  ;;  %v3837_v10 = vld [vmem:[%s14758_s12 + $0x140] sm:$0xff] }
 0x2ac   : > { %21664 = vst [vmem:[#allocation40_spill] sm:$0xff] %v16855_v24  ;;  %v8721_v57 = vmul.f32 %v8593_v28, %v8593_v28  ;;  %v3884_v18 = vadd.f32 %v3836_v20, %v3685_v43  ;;  %8633 = vadd.xlane.f32.xlu0 %v8632_v19  ;;  %v8760_v53 = vadd.f32 %v8759_v50, %v16721_v47  ;;  %v21667_v28 = vld [vmem:[#allocation9_spill] sm:$0xff]  ;;  %v3687_v38 = vpop.f32.mrf.mxu0  ;;  %v8636_v45 = vsel %vm670_vm3, %v8587_v60, 0.0  ;;  %v16885_v50 = vld [vmem:[#allocation2 + $0x340] sm:$0xff]  }
 0x2ad   : > { %21666 = vst [vmem:[#allocation16_spill] sm:$0xff] %v16863_v21  ;;  %v16873_v56 = vadd.f32 %v8601_v61, %v16788_v58  ;;  %v16877_v4 = vmul.f32 %v16541_v22, %v16803_v13  ;;  %3919 = vst.msk [vmem:[%s14758_s12 + $0xd0] sm:$0xff] %vm670_vm3, %v3871_v62  ;;  %v3880_v3 = vadd.f32 %v13253_v36, %v3832_v48  ;;  %5823 = vmatpush1.bf16.msra.mxu1 %v21667_v28  ;;  %v8532_v58 = vld [vmem:[%s14758_s12 + $0x70] sm:$0xff]  ;;  %v21668_v62 = vld [vmem:[#allocation8_spill] sm:$0xff]  ;;  %v3769_v43 = vpop.f32.mrf.mxu1 }
 0x2ae   : > { %v8602_v47 = vmul.f32 %v16555_v12, %v8538_v54  ;;  %v16890_v61 = vmul.f32 %v16534_v32, %v16837_v14  ;;  %3932 = vst [vmem:[%s14758_s12 + $0x138] sm:$0xff] %v3884_v18  ;;  %v3885_v19 = vadd.f32 %v3837_v10, %v3687_v38  ;;  %5824 = vmatprep.subr.bf16.mxu1 %v21668_v62  ;;  %v3826_v20 = vld [vmem:[%s14758_s12 + $0xe8] sm:$0xff]  ;;  %v16902_v28 = vpop.f32.mrf.mxu0  ;;  %v8774_v18 = vsel %vm670_vm3, %v8721_v57, 0.0  ;;  %v3841_v10 = vld [vmem:[%s14758_s12 + $0x160] sm:$0xff] }
 0x2af   : > { %8761 = vadd.xlane.f32.xlu1 %v8760_v53  ;;  %v8647_v36 = vadd.f32 %v8646_v37, %v16778_v15  ;;  %v16898_v54 = vmul.f32 %v16534_v32, %v16855_v24  ;;  %3928 = vst.msk [vmem:[%s14758_s12 + $0x118] sm:$0xff] %vm670_vm3, %v3880_v3  ;;  %v3874_v48 = vadd.f32 %v3826_v20, %v3769_v43  ;;  %v3827_v37 = vld [vmem:[%s14758_s12 + $0xf0] sm:$0xff]  ;;  %v13256_v53 = vpop.f32.mrf.mxu1  ;;  %v21673_v14 = vld [vmem:[#allocation12_spill] sm:$0xff] }
 0x2b0   : > { %5496 = vmatmul.mubr.bf16.gmra.mxu0 %v13847_v33  ;;  %v16906_v38 = vadd.f32 %v8729_v17, %v16825_v0  ;;  %v8606_v15 = vmul.f32 %v16541_v22, %v16863_v21  ;;  %3933 = vst [vmem:[%s14758_s12 + $0x140] sm:$0xff] %v3885_v19  ;;  %13383 = vmatmul.mubr.bf16.gmra.mxu1 %v13847_v33  ;;  %v3828_v17 = vld [vmem:[%s14758_s12 + $0xf8] sm:$0xff]  ;;  %v16924_v20 = vpop.f32.mrf.mxu0  ;;  %v8661_v33 = vsel %vm670_vm3, %v8602_v47, 0.0 }
 0x2b1   : > { %8648 = vadd.xlane.f32.xlu0 %v8647_v36  ;;  %v8637_v3 = vadd.f32 %v8636_v45, %v16744_v34  ;;  %v8715_v62 = vmul.f32 %v8587_v60, %v8587_v60  ;;  %v16915_v43 = vmul.f32 %v16555_v12, %v8532_v58  ;;  %v16918_v0 = vadd.f32 %v3827_v37, %v16758_v7  ;;  %v21670_v19 = vld [vmem:[#allocation11_spill] sm:$0xff]  ;;  %v21672_v45 = vld [vmem:[#allocation10_spill] sm:$0xff]  ;;  %v3782_v58 = vpop.f32.mrf.mxu1  ;;  %v16937_v37 = vpop.permute.xlu0 %7053 }
 0x2b2   : > { %3922 = vst.msk [vmem:[%s14758_s12 + $0xe8] sm:$0xff] %vm670_vm3, %v3874_v48  ;;  %v3889_v57 = vadd.f32 %v13256_v53, %v3841_v10  ;;  %5825 = vmatpush1.bf16.msra.mxu1 %v21670_v19  ;;  %13402 = vmatprep.mubr.bf16.mxu0 %v16885_v50  ;;  %v8541_v34 = vld [vmem:[%s14758_s12 + $0xb8] sm:$0xff]  ;;  %v8732_v60 = vmul.f32 %v16890_v61, %v16890_v61  ;;  %v3835_v36 = vld [vmem:[%s14758_s12 + $0x130] sm:$0xff] }
 0x2b3   : > { %21669 = vst [vmem:[#allocation9_spill] sm:$0xff] %v16918_v0  ;;  %v16932_v7 = vadd.f32 %v3828_v17, %v16775_v1  ;;  %5826 = vmatprep.subr.bf16.mxu1 %v21672_v45  ;;  %8638 = vadd.xlane.f32.xlu1 %v8637_v3  ;;  %v8775_v48 = vadd.f32 %v8774_v18, %v16798_v49  ;;  %v16943_v1 = vpop.f32.mrf.mxu0  ;;  %v16946_v17 = vld [vmem:[#allocation2 + $0x348] sm:$0xff]   ;;  %v13257_v3 = vpop.f32.mrf.mxu1  ;;  %v3844_v45 = vld [vmem:[%s14758_s12 + $0x178] sm:$0xff] }
 0x2b4   : > { %v8735_v53 = vmul.f32 %v16898_v54, %v16898_v54  ;;  %3937 = vst.msk [vmem:[%s14758_s12 + $0x160] sm:$0xff] %vm670_vm3, %v3889_v57  ;;  %v3883_v10 = vadd.f32 %v3835_v36, %v3782_v58  ;;  %5844 = vmatprep.mubr.bf16.mxu1 %v21595_v9  ;;  %v8730_v19 = vmul.f32 %v8602_v47, %v8602_v47  ;;  %v8764_v57 = vsel %vm670_vm3, %v8715_v62, 0.0  ;;  %v8535_v47 = vld [vmem:[%s14758_s12 + $0x88] sm:$0xff] }
 0x2b5   : > { %21671 = vst [vmem:[#allocation8_spill] sm:$0xff] %v16932_v7  ;;  %v8731_v49 = vmul.f32 %v16877_v4, %v16877_v4  ;;  %v8734_v18 = vmul.f32 %v8606_v15, %v8606_v15  ;;  %8776 = vadd.xlane.f32.xlu0 %v8775_v48  ;;  %v8662_v24 = vadd.f32 %v8661_v33, %v16873_v56  ;;  %v8651_v58 = vsel %vm670_vm3, %v16915_v43, 0.0  ;;  %v16962_v13 = vpop.f32.mrf.mxu0  ;;  %v3838_v48 = vld [vmem:[%s14758_s12 + $0x148] sm:$0xff] }
 0x2b6   : > { %v16956_v36 = vmul.f32 %v16555_v12, %v8541_v34  ;;  %3931 = vst.msk [vmem:[%s14758_s12 + $0x130] sm:$0xff] %vm670_vm3, %v3883_v10  ;;  %v3892_v21 = vadd.f32 %v13257_v3, %v3844_v45  ;;  %5827 = vmatpush1.bf16.msra.mxu1 %v21673_v14  ;;  %v8665_v56 = vadd.f32 %v16890_v61, %v16877_v4  ;;  %v3785_v34 = vpop.f32.mrf.mxu1  ;;  %v16987_v45 = vld [vmem:[#allocation2 + $0x350] sm:$0xff]  }
 0x2b7   : > { %v16966_v62 = vadd.f32 %v8732_v60, %v8731_v49  ;;  %v8612_v33 = vmul.f32 %v16541_v22, %v16918_v0  ;;  %8663 = vadd.xlane.f32.xlu1 %v8662_v24  ;;  %13418 = vmatprep.subr.bf16.mxu1 %v16205_v59  ;;  %v16974_v10 = vmul.f32 %v16534_v32, %v16932_v7  ;;  %v13276_v60 = vpop.f32.mrf.mxu0  ;;  %v11376_v49 = vld [vmem:[%s14758_s12 + $0x1c0] sm:$0xff] }
 0x2b8   : > { %v16977_v14 = vadd.f32 %v16898_v54, %v8606_v15  ;;  %v16979_v4 = vadd.f32 %v8735_v53, %v8734_v18  ;;  %3940 = vst.msk [vmem:[%s14758_s12 + $0x178] sm:$0xff] %vm670_vm3, %v3892_v21  ;;  %v3886_v61 = vadd.f32 %v3838_v48, %v3785_v34  ;;  %13403 = vmatmul.mubr.bf16.vlgmr.msra.gmra.mxu0 %v16946_v17  ;;  %v3830_v15 = vld [vmem:[%s14758_s12 + $0x108] sm:$0xff]  ;;  %v4040_v21 = vpop.f32.mrf.mxu1  ;;  %v11368_v18 = vld [vmem:[%s14758_s12 + $0x180] sm:$0xff]  ;;  %v11370_v48 = vld [vmem:[%s14758_s12 + $0x190] sm:$0xff] }
 0x2b9   : > { %v8765_v24 = vadd.f32 %v8764_v57, %v16761_v11  ;;  %v8652_v3 = vadd.f32 %v8651_v58, %v16800_v31  ;;  %v16990_v54 = vmul.f32 %v16555_v12, %v8535_v47  ;;  %v4272_v53 = vadd.f32 %v13276_v60, %v11376_v49  ;;  %6457 = vmatpush1.bf16.msra.mxu0 %v16553_v2  ;;  %v17001_v58 = vpop.permute.xlu0 %7051  ;;  %v3831_v2 = vld [vmem:[%s14758_s12 + $0x110] sm:$0xff] }
 0x2ba   : > { %5845 = vmatmul.mubr.bf16.vlgmr.msra.gmra.mxu1 %v16885_v50  ;;  %v8666_v11 = vsel %vm670_vm3, %v16956_v36, 0.0  ;;  %v8789_v31 = vsel %vm670_vm3, %v8730_v19, 0.0  ;;  %v8724_v57 = vmul.f32 %v16915_v43, %v16915_v43  ;;  %v17004_v47 = vadd.f32 %v3830_v15, %v16793_v52  ;;  %3934 = vst.msk [vmem:[%s14758_s12 + $0x148] sm:$0xff] %vm670_vm3, %v3886_v61  ;;  %v4153_v50 = vpop.f32.mrf.mxu0  ;;  %6458 = vmatprep.subr.bf16.mxu0 %v16595_v51  ;;  %v8550_v19 = vld [vmem:[%s14758_s12 + $0x100] sm:$0xff]  ;;  %v4042_v49 = vpop.f32.mrf.mxu1  ;;  %v11369_v61 = vld [vmem:[%s14758_s12 + $0x188] sm:$0xff] }
 0x2bb   : > { %v4264_v34 = vadd.f32 %v11368_v18, %v4040_v21  ;;  %8766 = vadd.xlane.f32.xlu0 %v8765_v24  ;;  %v17012_v60 = vmul.f32 %v8612_v33, %v8612_v33  ;;  %v17015_v43 = vadd.f32 %v3831_v2, %v16814_v42  ;;  %11424 = vst.msk [vmem:[%s14758_s12 + $0x1c0] sm:$0xff] %vm670_vm3, %v4272_v53  ;;  %v17024_v51 = vpop.permute.xlu1 %7049  ;;  %v11379_v21 = vld [vmem:[%s14758_s12 + $0x1d8] sm:$0xff] }
 0x2bc   : > { %21674 = vst [vmem:[#allocation11_spill] sm:$0xff] %v17004_v47  ;;  %v4266_v52 = vadd.f32 %v11370_v48, %v4153_v50  ;;  %8653 = vadd.xlane.f32.xlu1 %v8652_v3  ;;  %13419 = vmatpush3.bf16.msra.mxu1 %v16205_v59  ;;  %v17022_v24 = vadd.f32 %v16974_v10, %v8612_v33  ;;  %v13277_v42 = vpop.f32.mrf.mxu0  ;;  %v17031_v3 = vld [vmem:[#allocation2 + $0x358] sm:$0xff]   ;;  %v8656_v59 = vsel %vm670_vm3, %v16990_v54, 0.0  ;;  %v3834_v33 = vld [vmem:[%s14758_s12 + $0x128] sm:$0xff] }
 0x2bd   : > { %21675 = vst [vmem:[#allocation10_spill] sm:$0xff] %v17015_v43  ;;  %11416 = vst [vmem:[%s14758_s12 + $0x180] sm:$0xff] %v4264_v34  ;;  %v4265_v15 = vadd.f32 %v11369_v61, %v4042_v49  ;;  %v8667_v18 = vadd.f32 %v8666_v11, %v8665_v56  ;;  %v8790_v53 = vadd.f32 %v8789_v31, %v16906_v38  ;;  %13406 = vmatprep.mubr.bf16.mxu0 %v16987_v45  ;;  %v4044_v38 = vpop.f32.mrf.mxu1  ;;  %v11371_v56 = vld [vmem:[%s14758_s12 + $0x198] sm:$0xff]  ;;  %v8544_v49 = vld [vmem:[%s14758_s12 + $0xd0] sm:$0xff] }
 0x2be   : > { %5854 = vmatprep.mubr.bf16.mxu1 %v21595_v9  ;;  %11418 = vst.msk [vmem:[%s14758_s12 + $0x190] sm:$0xff] %vm670_vm3, %v4266_v52  ;;  %v4275_v2 = vadd.f32 %v13277_v42, %v11379_v21  ;;  %6459 = vmatpush1.bf16.msra.mxu0 %v16565_v41  ;;  %v8779_v11 = vsel %vm670_vm3, %v8724_v57, 0.0  ;;  %v8733_v31 = vmul.f32 %v16956_v36, %v16956_v36  ;;  %v4156_v48 = vpop.f32.mrf.mxu0  ;;  %v11373_v52 = vld [vmem:[%s14758_s12 + $0x1a8] sm:$0xff]  ;;  %v17070_v21 = vpop.permute.xlu0 %7043 }
 0x2bf   : > { %13420 = vmatprep.subr.bf16.mxu1 %v16264_v44  ;;  %v17045_v34 = vmul.f32 %v16555_v12, %v8550_v19  ;;  %v17048_v50 = vadd.f32 %v3834_v33, %v16847_v16  ;;  %11417 = vst [vmem:[%s14758_s12 + $0x188] sm:$0xff] %v4265_v15  ;;  %v4267_v41 = vadd.f32 %v11371_v56, %v4044_v38  ;;  %v4046_v16 = vpop.f32.mrf.mxu1  ;;  %v11372_v19 = vld [vmem:[%s14758_s12 + $0x1a0] sm:$0xff]  ;;  %v11374_v56 = vld [vmem:[%s14758_s12 + $0x1b0] sm:$0xff] }
 0x2c0   : > { %8668 = vadd.xlane.f32.xlu0 %v8667_v18  ;;  %6460 = vmatprep.subr.bf16.mxu0 %v16612_v39  ;;  %v17056_v36 = vmul.f32 %v16541_v22, %v17004_v47  ;;  %11427 = vst.msk [vmem:[%s14758_s12 + $0x1d8] sm:$0xff] %vm670_vm3, %v4275_v2  ;;  %v4269_v57 = vadd.f32 %v11373_v52, %v4156_v48  ;;  %v17063_v15 = vld [vmem:[#allocation2 + $0x360] sm:$0xff]   ;;  %v8553_v39 = vld [vmem:[%s14758_s12 + $0x118] sm:$0xff]  ;;  %v13280_v33 = vpop.f32.mrf.mxu0 }
 0x2c1   : > { %21676 = vst [vmem:[#allocation12_spill] sm:$0xff] %v17048_v50  ;;  %8791 = vadd.xlane.f32.xlu1 %v8790_v53  ;;  %v8657_v61 = vadd.f32 %v8656_v59, %v16807_v23  ;;  %13421 = vmatpush3.bf16.msra.mxu1 %v16264_v44  ;;  %v17068_v42 = vmul.f32 %v16534_v32, %v17015_v43  ;;  %11419 = vst [vmem:[%s14758_s12 + $0x198] sm:$0xff] %v4267_v41  ;;  %v11388_v2 = vld [vmem:[%s14758_s12 + $0x220] sm:$0xff]  ;;  %v3839_v53 = vld [vmem:[%s14758_s12 + $0x150] sm:$0xff]  ;;  %v4050_v38 = vpop.f32.mrf.mxu1 }
 0x2c2   : > { %v4268_v18 = vadd.f32 %v11372_v19, %v4046_v16  ;;  %13407 = vmatmul.mubr.bf16.gmra.mxu0 %v17031_v3  ;;  %v8780_v23 = vadd.f32 %v8779_v11, %v16809_v30  ;;  %13422 = vmatprep.subr.bf16.mxu1 %v16315_v8  ;;  %v8727_v44 = vmul.f32 %v16990_v54, %v16990_v54  ;;  %v8794_v30 = vsel %vm670_vm3, %v8733_v31, 0.0  ;;  %v17089_v54 = vpop.permute.xlu1 %7047  ;;  %v3840_v52 = vld [vmem:[%s14758_s12 + $0x158] sm:$0xff]  ;;  %v4169_v31 = vpop.f32.mrf.mxu0 }
 0x2c3   : > { %11421 = vst.msk [vmem:[%s14758_s12 + $0x1a8] sm:$0xff] %vm670_vm3, %v4269_v57  ;;  %v4284_v59 = vadd.f32 %v13280_v33, %v11388_v2  ;;  %6461 = vmatpush1.bf16.msra.mxu0 %v16570_v40  ;;  %5855 = vmatmul.mubr.bf16.gmra.mxu1 %v16946_v17  ;;  %v8681_v11 = vsel %vm670_vm3, %v17045_v34, 0.0  ;;  %v8608_v41 = vmul.f32 %v16555_v12, %v8544_v49  ;;  %v3843_v40 = vld [vmem:[%s14758_s12 + $0x170] sm:$0xff]  ;;  %v8546_v33 = vld [vmem:[%s14758_s12 + $0xe0] sm:$0xff] }
 0x2c4   : > { %v17092_v48 = vadd.f32 %v3839_v53, %v16902_v28  ;;  %11420 = vst [vmem:[%s14758_s12 + $0x1a0] sm:$0xff] %v4268_v18  ;;  %v4270_v17 = vadd.f32 %v11374_v56, %v4050_v38  ;;  %8658 = vadd.xlane.f32.xlu0 %v8657_v61  ;;  %v11382_v57 = vld [vmem:[%s14758_s12 + $0x1f0] sm:$0xff]  ;;  %6462 = vmatprep.subr.bf16.mxu0 %v16617_v25  ;;  %v4052_v18 = vpop.f32.mrf.mxu1  ;;  %v11375_v61 = vld [vmem:[%s14758_s12 + $0x1b8] sm:$0xff]  ;;  %v8547_v25 = vld [vmem:[%s14758_s12 + $0xe8] sm:$0xff]  ;;  %v13281_v2 = vpop.f32.mrf.mxu0 }
 0x2c5   : > { %v17100_v49 = vmul.f32 %v16555_v12, %v8553_v39  ;;  %v17103_v16 = vadd.f32 %v3840_v52, %v16924_v20  ;;  %v17106_v28 = vadd.f32 %v3843_v40, %v16962_v13  ;;  %11436 = vst.msk [vmem:[%s14758_s12 + $0x220] sm:$0xff] %vm670_vm3, %v4284_v59  ;;  %v4278_v19 = vadd.f32 %v11382_v57, %v4169_v31  ;;  %v11391_v20 = vld [vmem:[%s14758_s12 + $0x238] sm:$0xff]  ;;  %v17119_v59 = vld [vmem:[#allocation2 + $0x368] sm:$0xff]  }
 0x2c6   : > { %21677 = vst [vmem:[#allocation41_spill] sm:$0xff] %v17092_v48  ;;  %8781 = vadd.xlane.f32.xlu1 %v8780_v23  ;;  %13410 = vmatprep.mubr.bf16.mxu0 %v17063_v15  ;;  %11422 = vst [vmem:[%s14758_s12 + $0x1b0] sm:$0xff] %v4270_v17  ;;  %v4271_v39 = vadd.f32 %v11375_v61, %v4052_v18  ;;  %v8795_v13 = vadd.f32 %v8794_v30, %v16966_v62  ;;  %v8784_v23 = vsel %vm670_vm3, %v8727_v44, 0.0  ;;  %v21680_v56 = vld [vmem:[#allocation19_spill] sm:$0xff]  ;;  %v4054_v52 = vpop.f32.mrf.mxu1  ;;  %v11377_v40 = vld [vmem:[%s14758_s12 + $0x1c8] sm:$0xff]  ;;  %v17134_v30 = vpop.permute.xlu0 %7041 }
 0x2c7   : > { %21678 = vst [vmem:[#allocation42_spill] sm:$0xff] %v17103_v16  ;;  %21679 = vst [vmem:[#allocation43_spill] sm:$0xff] %v17106_v28  ;;  %v8682_v53 = vadd.f32 %v8681_v11, %v17022_v24  ;;  %5864 = vmatprep.mubr.bf16.mxu1 %v21595_v9  ;;  %13423 = vmatpush3.bf16.msra.mxu1 %v16315_v8  ;;  %v4287_v38 = vadd.f32 %v13281_v2, %v11391_v20  ;;  %v8671_v62 = vsel %vm670_vm3, %v8608_v41, 0.0  ;;  %v8545_v44 = vld [vmem:[%s14758_s12 + $0xd8] sm:$0xff]  ;;  %v4172_v17 = vpop.f32.mrf.mxu0  ;;  %v11385_v31 = vld [vmem:[%s14758_s12 + $0x208] sm:$0xff]  ;;  %v17155_v20 = vpop.permute.xlu1 %7045 }
 0x2c8   : > { %11430 = vst.msk [vmem:[%s14758_s12 + $0x1f0] sm:$0xff] %vm670_vm3, %v4278_v19  ;;  %6463 = vmatpush1.bf16.msra.mxu0 %v21680_v56  ;;  %13424 = vmatprep.subr.bf16.mxu1 %v16390_v63  ;;  %v8741_v24 = vmul.f32 %v16974_v10, %v16974_v10  ;;  %v8742_v8 = vmul.f32 %v17045_v34, %v17045_v34  ;;  %11423 = vst [vmem:[%s14758_s12 + $0x1b8] sm:$0xff] %v4271_v39  ;;  %v8686_v57 = vsel %vm670_vm3, %v17100_v49, 0.0  ;;  %v4056_v18 = vpop.f32.mrf.mxu1  ;;  %v11378_v61 = vld [vmem:[%s14758_s12 + $0x1d0] sm:$0xff] }
 0x2c9   : > { %v4273_v11 = vadd.f32 %v11377_v40, %v4054_v52  ;;  %8796 = vadd.xlane.f32.xlu0 %v8795_v13  ;;  %6464 = vmatprep.subr.bf16.mxu0 %v16647_v27  ;;  %v17142_v10 = vmul.f32 %v16534_v32, %v8546_v33  ;;  %v17145_v34 = vmul.f32 %v16555_v12, %v8547_v25  ;;  %v17153_v2 = vld [vmem:[#allocation2 + $0x370] sm:$0xff]   ;;  %v13284_v13 = vpop.f32.mrf.mxu0  ;;  %v11380_v52 = vld [vmem:[%s14758_s12 + $0x1e0] sm:$0xff] }
 0x2ca   : > { %11439 = vst.msk [vmem:[%s14758_s12 + $0x238] sm:$0xff] %vm670_vm3, %v4287_v38  ;;  %v4281_v19 = vadd.f32 %v11385_v31, %v4172_v17  ;;  %8683 = vadd.xlane.f32.xlu1 %v8682_v53  ;;  %v8785_v27 = vadd.f32 %v8784_v23, %v16827_v46  ;;  %v8685_v39 = vadd.f32 %v17068_v42, %v17056_v36  ;;  %v11400_v38 = vld [vmem:[%s14758_s12 + $0x280] sm:$0xff]  ;;  %v8556_v23 = vld [vmem:[%s14758_s12 + $0x130] sm:$0xff]  ;;  %v4060_v56 = vpop.f32.mrf.mxu1  ;;  %v11381_v31 = vld [vmem:[%s14758_s12 + $0x1e8] sm:$0xff] }
 0x2cb   : > { %v8736_v33 = vmul.f32 %v8608_v41, %v8608_v41  ;;  %11425 = vst [vmem:[%s14758_s12 + $0x1c8] sm:$0xff] %v4273_v11  ;;  %v4274_v25 = vadd.f32 %v11378_v61, %v4056_v18  ;;  %13411 = vmatmul.mubr.bf16.gmra.mxu0 %v17119_v59  ;;  %v8672_v53 = vadd.f32 %v8671_v62, %v16977_v14  ;;  %v8554_v62 = vld [vmem:[%s14758_s12 + $0x120] sm:$0xff]  ;;  %v4185_v11 = vpop.f32.mrf.mxu0  ;;  %v11394_v17 = vld [vmem:[%s14758_s12 + $0x250] sm:$0xff]  ;;  %v17193_v18 = vpop.permute.xlu0 %7039 }
 0x2cc   : > { %13425 = vmatpush3.bf16.msra.mxu1 %v16390_v63  ;;  %v17163_v46 = vmul.f32 %v16541_v22, %v8545_v44  ;;  %11433 = vst.msk [vmem:[%s14758_s12 + $0x208] sm:$0xff] %vm670_vm3, %v4281_v19  ;;  %v4296_v41 = vadd.f32 %v13284_v13, %v11400_v38  ;;  %6465 = vmatpush1.bf16.msra.mxu0 %v16590_v29  ;;  %v8809_v63 = vsel %vm670_vm3, %v8742_v8, 0.0  ;;  %v4062_v8 = vpop.f32.mrf.mxu1  ;;  %v11383_v38 = vld [vmem:[%s14758_s12 + $0x1f8] sm:$0xff] }
 0x2cd   : > { %5865 = vmatmul.mubr.bf16.gmra.mxu1 %v16987_v45  ;;  %v8687_v40 = vadd.f32 %v8686_v57, %v8685_v39  ;;  %v8808_v14 = vadd.f32 %v8741_v24, %v17012_v60  ;;  %11426 = vst [vmem:[%s14758_s12 + $0x1d0] sm:$0xff] %v4274_v25  ;;  %v4276_v44 = vadd.f32 %v11380_v52, %v4060_v56  ;;  %v8676_v45 = vsel %vm670_vm3, %v17145_v34, 0.0  ;;  %v13285_v61 = vpop.f32.mrf.mxu0  ;;  %v17198_v25 = vld [vmem:[#allocation2 + $0x378] sm:$0xff]  }
 0x2ce   : > { %8786 = vadd.xlane.f32.xlu0 %v8785_v27  ;;  %6466 = vmatprep.subr.bf16.mxu0 %v16652_v35  ;;  %v8675_v29 = vadd.f32 %v17142_v10, %v17163_v46  ;;  %v8745_v60 = vmul.f32 %v17100_v49, %v17100_v49  ;;  %11448 = vst.msk [vmem:[%s14758_s12 + $0x280] sm:$0xff] %vm670_vm3, %v4296_v41  ;;  %v8799_v35 = vsel %vm670_vm3, %v8736_v33, 0.0  ;;  %v11403_v27 = vld [vmem:[%s14758_s12 + $0x298] sm:$0xff]  ;;  %v4064_v13 = vpop.f32.mrf.mxu1  ;;  %v17211_v41 = vpop.permute.xlu1 %7037 }
 0x2cf   : > { %v4290_v24 = vadd.f32 %v11394_v17, %v4185_v11  ;;  %8673 = vadd.xlane.f32.xlu1 %v8672_v53  ;;  %13414 = vmatprep.mubr.bf16.mxu0 %v17153_v2  ;;  %v8744_v57 = vmul.f32 %v17068_v42, %v17068_v42  ;;  %v17191_v19 = vmul.f32 %v16555_v12, %v8556_v23  ;;  %v4188_v52 = vpop.f32.mrf.mxu0  ;;  %v21681_v17 = vld [vmem:[#allocation13_spill] sm:$0xff] }
 0x2d0   : > { %11428 = vst [vmem:[%s14758_s12 + $0x1e0] sm:$0xff] %v4276_v44  ;;  %v4277_v49 = vadd.f32 %v11381_v31, %v4062_v8  ;;  %v8810_v39 = vadd.f32 %v8809_v63, %v8808_v14  ;;  %5874 = vmatprep.mubr.bf16.mxu1 %v21595_v9  ;;  %13426 = vmatprep.subr.bf16.mxu1 %v16428_v26  ;;  %v11397_v14 = vld [vmem:[%s14758_s12 + $0x268] sm:$0xff]  ;;  %v8814_v63 = vsel %vm670_vm3, %v8745_v60, 0.0  ;;  %v11384_v44 = vld [vmem:[%s14758_s12 + $0x200] sm:$0xff]  ;;  %v11670_v43 = vld [vmem:[%s14758_s12 + $0x1f0] sm:$0xff] }
 0x2d1   : > { %v17202_v42 = vmul.f32 %v16541_v22, %v8554_v62  ;;  %11442 = vst.msk [vmem:[%s14758_s12 + $0x250] sm:$0xff] %vm670_vm3, %v4290_v24  ;;  %v4299_v33 = vadd.f32 %v13285_v61, %v11403_v27  ;;  %6467 = vmatpush1.bf16.msra.mxu0 %v16629_v55  ;;  %v8677_v53 = vadd.f32 %v8676_v45, %v8675_v29  ;;  %v13288_v45 = vpop.f32.mrf.mxu0  ;;  %v11412_v60 = vld [vmem:[%s14758_s12 + $0x2e0] sm:$0xff]  ;;  %v11679_v7 = vld [vmem:[%s14758_s12 + $0x238] sm:$0xff] }
 0x2d2   : > { %13427 = vmatpush3.bf16.msra.mxu1 %v16428_v26  ;;  %v8743_v23 = vmul.f32 %v17056_v36, %v17056_v36  ;;  %11429 = vst [vmem:[%s14758_s12 + $0x1e8] sm:$0xff] %v4277_v49  ;;  %v4279_v56 = vadd.f32 %v11383_v38, %v4064_v13  ;;  %8688 = vadd.xlane.f32.xlu0 %v8687_v40  ;;  %v8562_v36 = vld [vmem:[%s14758_s12 + $0x160] sm:$0xff]  ;;  %v4066_v40 = vpop.f32.mrf.mxu1  ;;  %v11386_v49 = vld [vmem:[%s14758_s12 + $0x210] sm:$0xff] }
 0x2d3   : > { %6468 = vmatprep.subr.bf16.mxu0 %v16666_v6  ;;  %v8800_v55 = vadd.f32 %v8799_v35, %v16979_v4  ;;  %v17220_v26 = vmul.f32 %v16534_v32, %v17048_v50  ;;  %11451 = vst.msk [vmem:[%s14758_s12 + $0x298] sm:$0xff] %vm670_vm3, %v4299_v33  ;;  %v4293_v62 = vadd.f32 %v11397_v14, %v4188_v52  ;;  %v8691_v6 = vsel %vm670_vm3, %v17191_v19, 0.0  ;;  %v21682_v35 = vld [vmem:[#allocation24_spill] sm:$0xff]  ;;  %v17250_v33 = vpop.permute.xlu0 %7031  ;;  %v4201_v13 = vpop.f32.mrf.mxu0  ;;  %v11406_v38 = vld [vmem:[%s14758_s12 + $0x2b0] sm:$0xff] }
 0x2d4   : > { %8811 = vadd.xlane.f32.xlu1 %v8810_v39  ;;  %v8813_v11 = vadd.f32 %v8744_v57, %v8743_v23  ;;  %v8738_v4 = vmul.f32 %v17142_v10, %v17142_v10  ;;  %13428 = vmatprep.subr.bf16.mxu1 %v21681_v17  ;;  %11431 = vst [vmem:[%s14758_s12 + $0x1f8] sm:$0xff] %v4279_v56  ;;  %v4070_v57 = vpop.f32.mrf.mxu1  ;;  %v8559_v39 = vld [vmem:[%s14758_s12 + $0x148] sm:$0xff]  ;;  %v11676_v50 = vld [vmem:[%s14758_s12 + $0x220] sm:$0xff] }
 0x2d5   : > { %v4280_v29 = vadd.f32 %v11384_v44, %v4066_v40  ;;  %13415 = vmatmul.mubr.bf16.gmra.mxu0 %v17198_v25  ;;  %v8690_v24 = vadd.f32 %v17220_v26, %v17202_v42  ;;  %v8737_v8 = vmul.f32 %v17163_v46, %v17163_v46  ;;  %v8739_v10 = vmul.f32 %v17145_v34, %v17145_v34  ;;  %v8558_v46 = vld [vmem:[%s14758_s12 + $0x140] sm:$0xff]  ;;  %v17268_v40 = vpop.permute.xlu1 %7035 }
 0x2d6   : > { %11445 = vst.msk [vmem:[%s14758_s12 + $0x268] sm:$0xff] %vm670_vm3, %v4293_v62  ;;  %v4308_v31 = vadd.f32 %v13288_v45, %v11412_v60  ;;  %6469 = vmatpush1.bf16.msra.mxu0 %v21682_v35  ;;  %5875 = vmatmul.mubr.bf16.gmra.mxu1 %v17031_v3  ;;  %v8815_v61 = vadd.f32 %v8814_v63, %v8813_v11  ;;  %v21683_v23 = vld [vmem:[#allocation28_spill] sm:$0xff]  ;;  %v4072_v14 = vpop.f32.mrf.mxu1  ;;  %v11387_v63 = vld [vmem:[%s14758_s12 + $0x218] sm:$0xff]  ;;  %v13289_v11 = vpop.f32.mrf.mxu0 }
 0x2d7   : > { %v17246_v27 = vmul.f32 %v16555_v12, %v8562_v36  ;;  %11432 = vst [vmem:[%s14758_s12 + $0x200] sm:$0xff] %v4280_v29  ;;  %v4282_v34 = vadd.f32 %v11386_v49, %v4070_v57  ;;  %8678 = vadd.xlane.f32.xlu0 %v8677_v53  ;;  %6470 = vmatprep.subr.bf16.mxu0 %v21683_v23  ;;  %v8557_v62 = vld [vmem:[%s14758_s12 + $0x138] sm:$0xff]  ;;  %v3842_v49 = vld [vmem:[%s14758_s12 + $0x168] sm:$0xff] }
 0x2d8   : > { %v8692_v3 = vadd.f32 %v8691_v6, %v8690_v24  ;;  %v17257_v56 = vmul.f32 %v16534_v32, %v17103_v16  ;;  %11460 = vst.msk [vmem:[%s14758_s12 + $0x2e0] sm:$0xff] %vm670_vm3, %v4308_v31  ;;  %v4302_v52 = vadd.f32 %v11406_v38, %v4201_v13  ;;  %8801 = vadd.xlane.f32.xlu1 %v8800_v55  ;;  %v11415_v6 = vld [vmem:[%s14758_s12 + $0x2f8] sm:$0xff]  ;;  %v17273_v55 = vld [vmem:[#allocation2 + $0x280] sm:$0xff]   ;;  %v11389_v31 = vld [vmem:[%s14758_s12 + $0x228] sm:$0xff] }
 0x2d9   : > { %6488 = vmatprep.mubr.bf16.mxu0 %v21595_v9  ;;  %v8803_v53 = vadd.f32 %v8738_v4, %v8737_v8  ;;  %v17265_v36 = vmul.f32 %v16541_v22, %v17092_v48  ;;  %11434 = vst [vmem:[%s14758_s12 + $0x210] sm:$0xff] %v4282_v34  ;;  %v4283_v44 = vadd.f32 %v11387_v63, %v4072_v14  ;;  %v8804_v4 = vsel %vm670_vm3, %v8739_v10, 0.0  ;;  %v21684_v24 = vld [vmem:[#allocation26_spill] sm:$0xff]  ;;  %v4074_v8 = vpop.f32.mrf.mxu1  ;;  %v11409_v34 = vld [vmem:[%s14758_s12 + $0x2c8] sm:$0xff]  ;;  %v21686_v13 = vld [vmem:[#allocation27_spill] sm:$0xff] }
 0x2da   : > { %5884 = vmatprep.mubr.bf16.mxu1 %v21595_v9  ;;  %13429 = vmatpush3.bf16.msra.mxu1 %v21681_v17  ;;  %v17278_v29 = vmul.f32 %v16534_v32, %v8558_v46  ;;  %v17281_v45 = vmul.f32 %v16555_v12, %v8559_v39  ;;  %11454 = vst.msk [vmem:[%s14758_s12 + $0x2b0] sm:$0xff] %vm670_vm3, %v4302_v52  ;;  %v8701_v10 = vsel %vm670_vm3, %v17246_v27, 0.0  ;;  %v21685_v17 = vld [vmem:[#allocation14_spill] sm:$0xff]  ;;  %v4204_v39 = vpop.f32.mrf.mxu0  ;;  %v11668_v48 = vld [vmem:[%s14758_s12 + $0x1e0] sm:$0xff] }
 0x2db   : > { %v4311_v60 = vadd.f32 %v13289_v11, %v11415_v6  ;;  %6471 = vmatpush1.bf16.msra.mxu0 %v21684_v24  ;;  %13430 = vmatprep.subr.bf16.mxu1 %v21685_v17  ;;  %v8746_v35 = vmul.f32 %v17202_v42, %v17202_v42  ;;  %v8748_v57 = vmul.f32 %v17191_v19, %v17191_v19  ;;  %v8565_v42 = vld [vmem:[%s14758_s12 + $0x178] sm:$0xff]  ;;  %v11390_v14 = vld [vmem:[%s14758_s12 + $0x230] sm:$0xff]  ;;  %v17312_v11 = vpop.permute.xlu0 %7029  ;;  %v11472_v24 = vld [vmem:[%s14758_s12 + $0x300] sm:$0xff] }
 0x2dc   : > { %11435 = vst [vmem:[%s14758_s12 + $0x218] sm:$0xff] %v4283_v44  ;;  %v4285_v46 = vadd.f32 %v11389_v31, %v4074_v8  ;;  %8816 = vadd.xlane.f32.xlu0 %v8815_v61  ;;  %13450 = vmatprep.subr.bf16.mxu0 %v21686_v13  ;;  %v8700_v38 = vadd.f32 %v17257_v56, %v17265_v36  ;;  %v4076_v61 = vpop.f32.mrf.mxu1  ;;  %v4459_v6 = vpop.f32.mrf.mxu0 }
 0x2dd   : > { %v17301_v23 = vmul.f32 %v16541_v22, %v8557_v62  ;;  %v17305_v52 = vadd.f32 %v3842_v49, %v16943_v1  ;;  %11463 = vst.msk [vmem:[%s14758_s12 + $0x2f8] sm:$0xff] %vm670_vm3, %v4311_v60  ;;  %v4305_v19 = vadd.f32 %v11409_v34, %v4204_v39  ;;  %8693 = vadd.xlane.f32.xlu1 %v8692_v3  ;;  %v8696_v3 = vsel %vm670_vm3, %v17281_v45, 0.0  ;;  %v17331_v49 = vpop.permute.xlu1 %7033  ;;  %v11473_v39 = vld [vmem:[%s14758_s12 + $0x308] sm:$0xff] }
 0x2de   : > { %v8805_v63 = vadd.f32 %v8804_v4, %v8803_v53  ;;  %v8747_v44 = vmul.f32 %v17220_v26, %v17220_v26  ;;  %11437 = vst [vmem:[%s14758_s12 + $0x228] sm:$0xff] %v4285_v46  ;;  %v4286_v62 = vadd.f32 %v11390_v14, %v4076_v61  ;;  %6489 = vmatmul.mubr.bf16.vlgmr.msra.gmra.mxu0 %v17273_v55  ;;  %v4080_v53 = vpop.f32.mrf.mxu1  ;;  %v11392_v4 = vld [vmem:[%s14758_s12 + $0x240] sm:$0xff]  ;;  %v8819_v31 = vsel %vm670_vm3, %v8748_v57, 0.0  ;;  %v4461_v46 = vpop.f32.mrf.mxu0 }
 0x2df   : > { %21687 = vst [vmem:[#allocation19_spill] sm:$0xff] %v17305_v52  ;;  %v8702_v1 = vadd.f32 %v8701_v10, %v8700_v38  ;;  %v8695_v60 = vadd.f32 %v17278_v29, %v17301_v23  ;;  %13431 = vmatpush3.bf16.msra.mxu1 %v21685_v17  ;;  %11457 = vst.msk [vmem:[%s14758_s12 + $0x2c8] sm:$0xff] %vm670_vm3, %v4305_v19  ;;  %v4683_v26 = vadd.f32 %v11472_v24, %v4459_v6  ;;  %v11393_v38 = vld [vmem:[%s14758_s12 + $0x248] sm:$0xff] }
 0x2e0   : > { %13451 = vmatpush3.bf16.msra.mxu0 %v21686_v13  ;;  %5885 = vmatmul.mubr.bf16.gmra.mxu1 %v17063_v15  ;;  %v8818_v8 = vadd.f32 %v8747_v44, %v8746_v35  ;;  %v17329_v10 = vmul.f32 %v16555_v12, %v8565_v42  ;;  %11438 = vst [vmem:[%s14758_s12 + $0x230] sm:$0xff] %v4286_v62  ;;  %v4082_v34 = vpop.f32.mrf.mxu1  ;;  %v4463_v14 = vpop.f32.mrf.mxu0  ;;  %v17354_v62 = vld [vmem:[#allocation2 + $0x288] sm:$0xff]  }
 0x2e1   : > { %v4288_v17 = vadd.f32 %v11392_v4, %v4080_v53  ;;  %8806 = vadd.xlane.f32.xlu0 %v8805_v63  ;;  %13452 = vmatprep.subr.bf16.mxu0 %v17001_v58  ;;  %v17338_v15 = vmul.f32 %v16534_v32, %v17106_v28  ;;  %v8754_v35 = vmul.f32 %v17246_v27, %v17246_v27  ;;  %v11475_v27 = vld [vmem:[%s14758_s12 + $0x318] sm:$0xff]  ;;  %v21688_v6 = vld [vmem:[#allocation17_spill] sm:$0xff]  ;;  %v17366_v53 = vpop.permute.xlu0 %7027 }
 0x2e2   : > { %11520 = vst [vmem:[%s14758_s12 + $0x300] sm:$0xff] %v4683_v26  ;;  %v4684_v57 = vadd.f32 %v11473_v39, %v4461_v46  ;;  %8703 = vadd.xlane.f32.xlu1 %v8702_v1  ;;  %6498 = vmatprep.mubr.bf16.mxu0 %v21595_v9  ;;  %v17347_v42 = vmul.f32 %v16541_v22, %v17305_v52  ;;  %v4084_v1 = vpop.f32.mrf.mxu1  ;;  %v8706_v26 = vsel %vm670_vm3, %v17329_v10, 0.0 }
 0x2e3   : > { %v8753_v19 = vmul.f32 %v17257_v56, %v17257_v56  ;;  %11440 = vst [vmem:[%s14758_s12 + $0x240] sm:$0xff] %v4288_v17  ;;  %v4289_v61 = vadd.f32 %v11393_v38, %v4082_v34  ;;  %v8697_v63 = vadd.f32 %v8696_v3, %v8695_v60  ;;  %v8820_v44 = vadd.f32 %v8819_v31, %v8818_v8  ;;  %v11395_v56 = vld [vmem:[%s14758_s12 + $0x258] sm:$0xff]  ;;  %v4465_v8 = vpop.f32.mrf.mxu0  ;;  %v11476_v31 = vld [vmem:[%s14758_s12 + $0x320] sm:$0xff]  ;;  %v17379_v38 = vpop.permute.xlu1 %7025 }
 0x2e4   : > { %5894 = vmatprep.mubr.bf16.mxu1 %v21595_v9  ;;  %13432 = vmatprep.subr.bf16.mxu1 %v21688_v6  ;;  %11521 = vst [vmem:[%s14758_s12 + $0x308] sm:$0xff] %v4684_v57  ;;  %v4686_v24 = vadd.f32 %v11475_v27, %v4463_v14  ;;  %v8752_v60 = vmul.f32 %v17265_v36, %v17265_v36  ;;  %v8829_v17 = vsel %vm670_vm3, %v8754_v35, 0.0  ;;  %v4086_v39 = vpop.f32.mrf.mxu1  ;;  %v11396_v57 = vld [vmem:[%s14758_s12 + $0x260] sm:$0xff]  ;;  %v11478_v35 = vld [vmem:[%s14758_s12 + $0x330] sm:$0xff] }
 0x2e5   : > { %13453 = vmatpush3.bf16.msra.mxu0 %v17001_v58  ;;  %v8751_v3 = vmul.f32 %v17281_v45, %v17281_v45  ;;  %13433 = vmatpush3.bf16.msra.mxu1 %v21688_v6  ;;  %11441 = vst [vmem:[%s14758_s12 + $0x248] sm:$0xff] %v4289_v61  ;;  %v4291_v4 = vadd.f32 %v11395_v56, %v4084_v1  ;;  %v21689_v61 = vld [vmem:[#allocation30_spill] sm:$0xff]  ;;  %v4469_v27 = vpop.f32.mrf.mxu0 }
 0x2e6   : > { %8698 = vadd.xlane.f32.xlu0 %v8697_v63  ;;  %13454 = vmatprep.subr.bf16.mxu0 %v17155_v20  ;;  %v8705_v36 = vadd.f32 %v17338_v15, %v17347_v42  ;;  %v8750_v45 = vmul.f32 %v17278_v29, %v17278_v29  ;;  %11523 = vst [vmem:[%s14758_s12 + $0x318] sm:$0xff] %v4686_v24 }
 0x2e7   : > { %v4687_v46 = vadd.f32 %v11476_v31, %v4465_v8  ;;  %8821 = vadd.xlane.f32.xlu1 %v8820_v44  ;;  %v8828_v34 = vadd.f32 %v8753_v19, %v8752_v60  ;;  %7100 = vmatprep.subr.bf16.mxu1 %v21689_v61  ;;  %11443 = vst [vmem:[%s14758_s12 + $0x258] sm:$0xff] %v4291_v4  ;;  %v4090_v19 = vpop.f32.mrf.mxu1  ;;  %v11398_v44 = vld [vmem:[%s14758_s12 + $0x270] sm:$0xff]  ;;  %v8824_v1 = vsel %vm670_vm3, %v8751_v3, 0.0  ;;  %v11479_v60 = vld [vmem:[%s14758_s12 + $0x338] sm:$0xff] }
 0x2e8   : > { %v4292_v14 = vadd.f32 %v11396_v57, %v4086_v39  ;;  %6499 = vmatmul.mubr.bf16.gmra.mxu0 %v17354_v62  ;;  %v8707_v29 = vadd.f32 %v8706_v26, %v8705_v36  ;;  %v8749_v63 = vmul.f32 %v17301_v23, %v17301_v23  ;;  %v4689_v6 = vadd.f32 %v11478_v35, %v4469_v27  ;;  %v4471_v23 = vpop.f32.mrf.mxu0  ;;  %v11399_v31 = vld [vmem:[%s14758_s12 + $0x278] sm:$0xff]  ;;  %v17415_v35 = vpop.permute.xlu1 %7023 }
 0x2e9   : > { %11524 = vst [vmem:[%s14758_s12 + $0x320] sm:$0xff] %v4687_v46  ;;  %13455 = vmatpush3.bf16.msra.mxu0 %v17155_v20  ;;  %5895 = vmatmul.mubr.bf16.gmra.mxu1 %v17119_v59  ;;  %v8830_v24 = vadd.f32 %v8829_v17, %v8828_v34  ;;  %v8757_v56 = vmul.f32 %v17329_v10, %v17329_v10  ;;  %v4092_v3 = vpop.f32.mrf.mxu1  ;;  %v17402_v10 = vpop.permute.xlu0 %7019  ;;  %v11481_v46 = vld [vmem:[%s14758_s12 + $0x348] sm:$0xff]  ;;  %v11888_v5 = vld [vmem:[%s14758_s12 + $0x300] sm:$0xff] }
 0x2ea   : > { %11444 = vst [vmem:[%s14758_s12 + $0x260] sm:$0xff] %v4292_v14  ;;  %v4294_v26 = vadd.f32 %v11398_v44, %v4090_v19  ;;  %8708 = vadd.xlane.f32.xlu0 %v8707_v29  ;;  %13456 = vmatprep.subr.bf16.mxu0 %v17193_v18  ;;  %v8823_v4 = vadd.f32 %v8750_v45, %v8749_v63  ;;  %11526 = vst [vmem:[%s14758_s12 + $0x330] sm:$0xff] %v4689_v6  ;;  %v4473_v17 = vpop.f32.mrf.mxu0  ;;  %v11401_v14 = vld [vmem:[%s14758_s12 + $0x288] sm:$0xff]  ;;  %v11482_v6 = vld [vmem:[%s14758_s12 + $0x350] sm:$0xff] }
 0x2eb   : > { %v8756_v8 = vmul.f32 %v17338_v15, %v17338_v15  ;;  %v4690_v59 = vadd.f32 %v11479_v60, %v4471_v23  ;;  %8831 = vadd.xlane.f32.xlu1 %v8830_v24  ;;  %6508 = vmatprep.mubr.bf16.mxu0 %v21595_v9  ;;  %v4295_v36 = vadd.f32 %v11399_v31, %v4092_v3  ;;  %v17407_v15 = vld [vmem:[#allocation2 + $0x290] sm:$0xff]   ;;  %v4094_v34 = vpop.f32.mrf.mxu1  ;;  %v8834_v27 = vsel %vm670_vm3, %v8757_v56, 0.0 }
 0x2ec   : > { %11446 = vst [vmem:[%s14758_s12 + $0x270] sm:$0xff] %v4294_v26  ;;  %v8825_v45 = vadd.f32 %v8824_v1, %v8823_v4  ;;  %5904 = vmatprep.mubr.bf16.mxu1 %v21595_v9  ;;  %v8755_v39 = vmul.f32 %v17347_v42, %v17347_v42  ;;  %v4692_v57 = vadd.f32 %v11481_v46, %v4473_v17  ;;  %v4475_v63 = vpop.f32.mrf.mxu0  ;;  %v11402_v24 = vld [vmem:[%s14758_s12 + $0x290] sm:$0xff]  ;;  %v11484_v26 = vld [vmem:[%s14758_s12 + $0x360] sm:$0xff] }
 0x2ed   : > { %11527 = vst [vmem:[%s14758_s12 + $0x338] sm:$0xff] %v4690_v59  ;;  %13457 = vmatpush3.bf16.msra.mxu0 %v17193_v18  ;;  %11447 = vst [vmem:[%s14758_s12 + $0x278] sm:$0xff] %v4295_v36  ;;  %v4297_v29 = vadd.f32 %v11401_v14, %v4094_v34  ;;  %v4693_v19 = vadd.f32 %v11482_v6, %v4475_v63  ;;  %v4096_v44 = vpop.f32.mrf.mxu1  ;;  %v17429_v59 = vpop.permute.xlu0 %7017  ;;  %v11485_v36 = vld [vmem:[%s14758_s12 + $0x368] sm:$0xff]  ;;  %v11487_v34 = vld [vmem:[%s14758_s12 + $0x378] sm:$0xff] }
 0x2ee   : > { %8826 = vadd.xlane.f32.xlu0 %v8825_v45  ;;  %13458 = vmatprep.subr.bf16.mxu0 %v17331_v49  ;;  %v8833_v42 = vadd.f32 %v8756_v8, %v8755_v39  ;;  %11529 = vst [vmem:[%s14758_s12 + $0x348] sm:$0xff] %v4692_v57  ;;  %v4298_v1 = vadd.f32 %v11402_v24, %v4096_v44  ;;  %v4479_v56 = vpop.f32.mrf.mxu0  ;;  %v11404_v8 = vld [vmem:[%s14758_s12 + $0x2a0] sm:$0xff]  ;;  %v11405_v45 = vld [vmem:[%s14758_s12 + $0x2a8] sm:$0xff]  ;;  %v17436_v39 = vpop.permute.xlu1 %7021  ;;  %v17442_v14 = vld [vmem:[#allocation2 + $0x298] sm:$0xff]  }
 0x2ef   : > { %11449 = vst [vmem:[%s14758_s12 + $0x288] sm:$0xff] %v4297_v29  ;;  %11530 = vst [vmem:[%s14758_s12 + $0x350] sm:$0xff] %v4693_v19  ;;  %v4695_v60 = vadd.f32 %v11484_v26, %v4479_v56  ;;  %v4100_v4 = vpop.f32.mrf.mxu1  ;;  %v11407_v63 = vld [vmem:[%s14758_s12 + $0x2b8] sm:$0xff]  ;;  %v11488_v19 = vld [vmem:[%s14758_s12 + $0x380] sm:$0xff] }
 0x2f0   : > { %6509 = vmatmul.mubr.bf16.gmra.mxu0 %v17407_v15  ;;  %v8835_v23 = vadd.f32 %v8834_v27, %v8833_v42  ;;  %11450 = vst [vmem:[%s14758_s12 + $0x290] sm:$0xff] %v4298_v1  ;;  %v4300_v3 = vadd.f32 %v11404_v8, %v4100_v4  ;;  %v4481_v31 = vpop.f32.mrf.mxu0  ;;  %v11408_v1 = vld [vmem:[%s14758_s12 + $0x2c0] sm:$0xff] }
 0x2f1   : > { %13459 = vmatpush3.bf16.msra.mxu0 %v17331_v49  ;;  %5905 = vmatmul.mubr.bf16.gmra.mxu1 %v17153_v2  ;;  %11532 = vst [vmem:[%s14758_s12 + $0x360] sm:$0xff] %v4695_v60  ;;  %v4696_v17 = vadd.f32 %v11485_v36, %v4481_v31  ;;  %v4102_v46 = vpop.f32.mrf.mxu1  ;;  %v17452_v56 = vpop.permute.xlu0 %7015  ;;  %v11490_v60 = vld [vmem:[%s14758_s12 + $0x390] sm:$0xff] }
 0x2f2   : > { %8836 = vadd.xlane.f32.xlu0 %v8835_v23  ;;  %13460 = vmatprep.subr.bf16.mxu0 %v17366_v53  ;;  %11452 = vst [vmem:[%s14758_s12 + $0x2a0] sm:$0xff] %v4300_v3  ;;  %v4301_v2 = vadd.f32 %v11405_v45, %v4102_v46  ;;  %v4483_v57 = vpop.f32.mrf.mxu0  ;;  %v11410_v3 = vld [vmem:[%s14758_s12 + $0x2d0] sm:$0xff] }
 0x2f3   : > { %6518 = vmatprep.mubr.bf16.mxu0 %v21595_v9  ;;  %5914 = vmatprep.mubr.bf16.mxu1 %v21595_v9  ;;  %11533 = vst [vmem:[%s14758_s12 + $0x368] sm:$0xff] %v4696_v17  ;;  %v4698_v27 = vadd.f32 %v11487_v34, %v4483_v57  ;;  %v4104_v29 = vpop.f32.mrf.mxu1  ;;  %v11491_v17 = vld [vmem:[%s14758_s12 + $0x398] sm:$0xff]  ;;  %v11493_v34 = vld [vmem:[%s14758_s12 + $0x3a8] sm:$0xff] }
 0x2f4   : > { %11453 = vst [vmem:[%s14758_s12 + $0x2a8] sm:$0xff] %v4301_v2  ;;  %v4303_v6 = vadd.f32 %v11407_v63, %v4104_v29  ;;  %v4485_v42 = vpop.f32.mrf.mxu0  ;;  %v11411_v2 = vld [vmem:[%s14758_s12 + $0x2d8] sm:$0xff] }
 0x2f5   : > { %13461 = vmatpush3.bf16.msra.mxu0 %v17366_v53  ;;  %11535 = vst [vmem:[%s14758_s12 + $0x378] sm:$0xff] %v4698_v27  ;;  %v4699_v44 = vadd.f32 %v11488_v19, %v4485_v42  ;;  %v4106_v24 = vpop.f32.mrf.mxu1  ;;  %v17470_v27 = vld [vmem:[#allocation2 + $0x2a0] sm:$0xff]   ;;  %v11494_v19 = vld [vmem:[%s14758_s12 + $0x3b0] sm:$0xff] }
 0x2f6   : > { %13462 = vmatprep.subr.bf16.mxu0 %v17436_v39  ;;  %11455 = vst [vmem:[%s14758_s12 + $0x2b8] sm:$0xff] %v4303_v6  ;;  %v4304_v26 = vadd.f32 %v11408_v1, %v4106_v24  ;;  %v4489_v23 = vpop.f32.mrf.mxu0  ;;  %v11413_v6 = vld [vmem:[%s14758_s12 + $0x2e8] sm:$0xff]  ;;  %v11414_v1 = vld [vmem:[%s14758_s12 + $0x2f0] sm:$0xff] }
 0x2f7   : > { %11536 = vst [vmem:[%s14758_s12 + $0x380] sm:$0xff] %v4699_v44  ;;  %v4701_v4 = vadd.f32 %v11490_v60, %v4489_v23  ;;  %v4110_v8 = vpop.f32.mrf.mxu1  ;;  %v11496_v60 = vld [vmem:[%s14758_s12 + $0x3c0] sm:$0xff] }
 0x2f8   : > { %6519 = vmatmul.mubr.bf16.gmra.mxu0 %v17442_v14  ;;  %11456 = vst [vmem:[%s14758_s12 + $0x2c0] sm:$0xff] %v4304_v26  ;;  %v4306_v31 = vadd.f32 %v11410_v3, %v4110_v8  ;;  %v4491_v36 = vpop.f32.mrf.mxu0 }
 0x2f9   : > { %13463 = vmatpush3.bf16.msra.mxu0 %v17436_v39  ;;  %5915 = vmatmul.mubr.bf16.gmra.mxu1 %v17198_v25  ;;  %11538 = vst [vmem:[%s14758_s12 + $0x390] sm:$0xff] %v4701_v4  ;;  %v4702_v46 = vadd.f32 %v11491_v17, %v4491_v36  ;;  %v4112_v45 = vpop.f32.mrf.mxu1  ;;  %v21690_v4 = vld [vmem:[#allocation25_spill] sm:$0xff] }
 0x2fa   : > { %13464 = vmatprep.subr.bf16.mxu0 %v17452_v56  ;;  %6528 = vmatprep.mubr.bf16.mxu0 %v21595_v9  ;;  %11458 = vst [vmem:[%s14758_s12 + $0x2d0] sm:$0xff] %v4306_v31  ;;  %v4307_v25 = vadd.f32 %v11411_v2, %v4112_v45  ;;  %v4493_v57 = vpop.f32.mrf.mxu0  ;;  %v11480_v31 = vld [vmem:[%s14758_s12 + $0x340] sm:$0xff]  ;;  %v11474_v2 = vld [vmem:[%s14758_s12 + $0x310] sm:$0xff] }
 0x2fb   : > { %13434 = vmatprep.mubr.bf16.mxu1 %v17273_v55  ;;  %11539 = vst [vmem:[%s14758_s12 + $0x398] sm:$0xff] %v4702_v46  ;;  %v4704_v29 = vadd.f32 %v11493_v34, %v4493_v57  ;;  %v4114_v63 = vpop.f32.mrf.mxu1  ;;  %v11497_v46 = vld [vmem:[%s14758_s12 + $0x3c8] sm:$0xff]  ;;  %v11499_v34 = vld [vmem:[%s14758_s12 + $0x3d8] sm:$0xff] }
 0x2fc   : > { %11459 = vst [vmem:[%s14758_s12 + $0x2d8] sm:$0xff] %v4307_v25  ;;  %v4309_v42 = vadd.f32 %v11413_v6, %v4114_v63  ;;  %v4495_v55 = vpop.f32.mrf.mxu0 }
 0x2fd   : > { %13465 = vmatpush3.bf16.msra.mxu0 %v17452_v56  ;;  %11541 = vst [vmem:[%s14758_s12 + $0x3a8] sm:$0xff] %v4704_v29  ;;  %v4705_v44 = vadd.f32 %v11494_v19, %v4495_v55  ;;  %v4116_v24 = vpop.f32.mrf.mxu1  ;;  %v17507_v29 = vld [vmem:[#allocation2 + $0x2a8] sm:$0xff]  }
 0x2fe   : > { %7519 = vmatprep.subr.bf16.mxu0 %v21689_v61  ;;  %11461 = vst [vmem:[%s14758_s12 + $0x2e8] sm:$0xff] %v4309_v42  ;;  %v4310_v26 = vadd.f32 %v11414_v1, %v4116_v24  ;;  %v4499_v23 = vpop.f32.mrf.mxu0  ;;  %v17486_v61 = vsel %vm7059_vm7, %v16937_v37, %v21690_v4  ;;  %v17498_v37 = vsel %vm7059_vm7, %v17024_v51, %v17001_v58  ;;  %v11483_v42 = vld [vmem:[%s14758_s12 + $0x358] sm:$0xff]  ;;  %v11477_v1 = vld [vmem:[%s14758_s12 + $0x328] sm:$0xff] }
 0x2ff   : > { %11542 = vst [vmem:[%s14758_s12 + $0x3b0] sm:$0xff] %v4705_v44  ;;  %v4707_v8 = vadd.f32 %v11496_v60, %v4499_v23  ;;  %v13308_v3 = vpop.f32.mrf.mxu1  ;;  %v11500_v44 = vld [vmem:[%s14758_s12 + $0x3e0] sm:$0xff]  ;;  %v11502_v60 = vld [vmem:[%s14758_s12 + $0x3f0] sm:$0xff]  ;;  %v17535_v4 = vsel %vm7059_vm7, %v17134_v30, %v17070_v21  ;;  %v17548_v30 = vsel %vm7059_vm7, %v17211_v41, %v17193_v18 }
 0x300   : > { %6529 = vmatmul.mubr.bf16.gmra.mxu0 %v17470_v27  ;;  %11462 = vst [vmem:[%s14758_s12 + $0x2f0] sm:$0xff] %v4310_v26  ;;  %v4691_v36 = vadd.f32 %v13308_v3, %v11480_v31  ;;  %v4501_v17 = vpop.f32.mrf.mxu0  ;;  %v11492_v31 = vld [vmem:[%s14758_s12 + $0x3a0] sm:$0xff] }
 0x301   : > { %13435 = vmatmul.mubr.bf16.vlgmr.msra.gmra.mxu1 %v17354_v62  ;;  %6538 = vmatprep.mubr.bf16.mxu0 %v21595_v9  ;;  %11544 = vst [vmem:[%s14758_s12 + $0x3c0] sm:$0xff] %v4707_v8  ;;  %v4708_v62 = vadd.f32 %v11497_v46, %v4501_v17  ;;  %v4572_v45 = vpop.f32.mrf.mxu1 }
 0x302   : > { %7101 = vmatpush1.bf16.msra.mxu1 %v17486_v61  ;;  %13438 = vmatprep.mubr.bf16.mxu1 %v17407_v15  ;;  %11528 = vst.msk [vmem:[%s14758_s12 + $0x340] sm:$0xff] %vm670_vm3, %v4691_v36  ;;  %v4685_v25 = vadd.f32 %v11474_v2, %v4572_v45  ;;  %v4503_v57 = vpop.f32.mrf.mxu0  ;;  %v17512_v15 = vsel %vm7059_vm7, %v17089_v54, %v17024_v51 }
 0x303   : > { %7102 = vmatprep.subr.bf16.mxu1 %v17498_v37  ;;  %11545 = vst [vmem:[%s14758_s12 + $0x3c8] sm:$0xff] %v4708_v62  ;;  %v4710_v63 = vadd.f32 %v11499_v34, %v4503_v57  ;;  %v13309_v6 = vpop.f32.mrf.mxu1  ;;  %v17523_v51 = vsel %vm7059_vm7, %v17070_v21, %v17155_v20  ;;  %v11503_v21 = vld [vmem:[%s14758_s12 + $0x3f8] sm:$0xff]  ;;  %v11486_v62 = vld [vmem:[%s14758_s12 + $0x370] sm:$0xff] }
 0x304   : > { %11522 = vst.msk [vmem:[%s14758_s12 + $0x310] sm:$0xff] %vm670_vm3, %v4685_v25  ;;  %v4694_v55 = vadd.f32 %v13309_v6, %v11483_v42  ;;  %v4505_v19 = vpop.f32.mrf.mxu0  ;;  %v11505_v25 = vld [vmem:[%s14758_s12 + $0x408] sm:$0xff]  ;;  %v13862_v57 = vld [vmem:[#allocation2 + $0x2b0] sm:$0xff]   ;;  %v11495_v6 = vld [vmem:[%s14758_s12 + $0x3b8] sm:$0xff] }
 0x305   : > { %11547 = vst [vmem:[%s14758_s12 + $0x3d8] sm:$0xff] %v4710_v63  ;;  %v4711_v54 = vadd.f32 %v11500_v44, %v4505_v19  ;;  %v4575_v24 = vpop.f32.mrf.mxu1  ;;  %v11506_v19 = vld [vmem:[%s14758_s12 + $0x410] sm:$0xff]  ;;  %v17571_v44 = vsel %vm7059_vm7, %v17250_v33, %v17331_v49 }
 0x306   : > { %7103 = vmatpush1.bf16.msra.mxu1 %v17512_v15  ;;  %11531 = vst.msk [vmem:[%s14758_s12 + $0x358] sm:$0xff] %vm670_vm3, %v4694_v55  ;;  %v4688_v26 = vadd.f32 %v11477_v1, %v4575_v24  ;;  %v4509_v23 = vpop.f32.mrf.mxu0 }
 0x307   : > { %7104 = vmatprep.subr.bf16.mxu1 %v17523_v51  ;;  %11548 = vst [vmem:[%s14758_s12 + $0x3e0] sm:$0xff] %v4711_v54  ;;  %v4713_v8 = vadd.f32 %v11502_v60, %v4509_v23  ;;  %v13312_v3 = vpop.f32.mrf.mxu1  ;;  %v11489_v54 = vld [vmem:[%s14758_s12 + $0x388] sm:$0xff]  ;;  %v17582_v23 = vsel %vm7059_vm7, %v17379_v38, %v17366_v53  ;;  %v17587_v60 = vsel %vm7059_vm7, %v17312_v11, %v17250_v33 }
 0x308   : > { %6539 = vmatmul.mubr.bf16.gmra.mxu0 %v17507_v29  ;;  %11525 = vst.msk [vmem:[%s14758_s12 + $0x328] sm:$0xff] %vm670_vm3, %v4688_v26  ;;  %v4703_v36 = vadd.f32 %v13312_v3, %v11492_v31  ;;  %v4511_v17 = vpop.f32.mrf.mxu0  ;;  %v11508_v26 = vld [vmem:[%s14758_s12 + $0x420] sm:$0xff]  ;;  %v11509_v11 = vld [vmem:[%s14758_s12 + $0x428] sm:$0xff] }
 0x309   : > { %13439 = vmatmul.mubr.bf16.gmra.mxu1 %v17442_v14  ;;  %6548 = vmatprep.mubr.bf16.mxu0 %v21595_v9  ;;  %11550 = vst [vmem:[%s14758_s12 + $0x3f0] sm:$0xff] %v4713_v8  ;;  %v4714_v14 = vadd.f32 %v11503_v21, %v4511_v17  ;;  %v4588_v46 = vpop.f32.mrf.mxu1  ;;  %v7014_v8 = vpop.permute.xlu1 %7013 }
 0x30a   : > { %7105 = vmatpush1.bf16.msra.mxu1 %v17535_v4  ;;  %13442 = vmatprep.mubr.bf16.mxu1 %v17470_v27  ;;  %11540 = vst.msk [vmem:[%s14758_s12 + $0x3a0] sm:$0xff] %vm670_vm3, %v4703_v36  ;;  %v4697_v45 = vadd.f32 %v11486_v62, %v4588_v46  ;;  %v4513_v2 = vpop.f32.mrf.mxu0  ;;  %v17560_v27 = vsel %vm7059_vm7, %v17268_v40, %v17211_v41  ;;  %v11504_v36 = vld [vmem:[%s14758_s12 + $0x400] sm:$0xff]  ;;  %v11498_v46 = vld [vmem:[%s14758_s12 + $0x3d0] sm:$0xff] }
 0x30b   : > { %7106 = vmatprep.subr.bf16.mxu1 %v17548_v30  ;;  %11551 = vst [vmem:[%s14758_s12 + $0x3f8] sm:$0xff] %v4714_v14  ;;  %v4716_v34 = vadd.f32 %v11505_v25, %v4513_v2  ;;  %v13313_v63 = vpop.f32.mrf.mxu1  ;;  %v13863_v2 = vld [vmem:[#allocation2 + $0x2b8] sm:$0xff]   ;;  %v17606_v25 = vsel %vm7059_vm7, %v17402_v10, %v17436_v39 }
 0x30c   : > { %11534 = vst.msk [vmem:[%s14758_s12 + $0x370] sm:$0xff] %vm670_vm3, %v4697_v45  ;;  %v4706_v42 = vadd.f32 %v13313_v63, %v11495_v6  ;;  %v4515_v55 = vpop.f32.mrf.mxu0  ;;  %v11511_v45 = vld [vmem:[%s14758_s12 + $0x438] sm:$0xff] }
 0x30d   : > { %11553 = vst [vmem:[%s14758_s12 + $0x408] sm:$0xff] %v4716_v34  ;;  %v4717_v41 = vadd.f32 %v11506_v19, %v4515_v55  ;;  %v4591_v40 = vpop.f32.mrf.mxu1  ;;  %v11507_v6 = vld [vmem:[%s14758_s12 + $0x418] sm:$0xff] }
 0x30e   : > { %7107 = vmatpush1.bf16.msra.mxu1 %v17560_v27  ;;  %11543 = vst.msk [vmem:[%s14758_s12 + $0x3b8] sm:$0xff] %vm670_vm3, %v4706_v42  ;;  %v4700_v24 = vadd.f32 %v11489_v54, %v4591_v40  ;;  %v4519_v1 = vpop.f32.mrf.mxu0  ;;  %v17615_v42 = vld [vmem:[#allocation2 + $0x2c0] sm:$0xff]   ;;  %v7012_v40 = vpop.permute.xlu1 %7011  ;;  %v11501_v54 = vld [vmem:[%s14758_s12 + $0x3e8] sm:$0xff] }
 0x30f   : > { %7108 = vmatprep.subr.bf16.mxu1 %v17571_v44  ;;  %11554 = vst [vmem:[%s14758_s12 + $0x410] sm:$0xff] %v4717_v41  ;;  %v4719_v3 = vadd.f32 %v11508_v26, %v4519_v1  ;;  %v13316_v31 = vpop.f32.mrf.mxu1  ;;  %v11512_v41 = vld [vmem:[%s14758_s12 + $0x440] sm:$0xff] }
 0x310   : > { %6549 = vmatmul.mubr.bf16.gmra.mxu0 %v13862_v57  ;;  %11537 = vst.msk [vmem:[%s14758_s12 + $0x388] sm:$0xff] %vm670_vm3, %v4700_v24  ;;  %v4715_v17 = vadd.f32 %v13316_v31, %v11504_v36  ;;  %v4521_v33 = vpop.f32.mrf.mxu0  ;;  %v17624_v24 = vpop.permute.xlu0 %8118  ;;  %v17631_v31 = vsel %vm7059_vm7, %v7014_v8, %v17452_v56  ;;  %v17636_v36 = vsel %vm7059_vm7, %v17429_v59, %v17402_v10 }
 0x311   : > { %13443 = vmatmul.mubr.bf16.gmra.mxu1 %v17507_v29  ;;  %6558 = vmatprep.mubr.bf16.mxu0 %v21595_v9  ;;  %11556 = vst [vmem:[%s14758_s12 + $0x420] sm:$0xff] %v4719_v3  ;;  %v4720_v21 = vadd.f32 %v11509_v11, %v4521_v33  ;;  %v4604_v14 = vpop.f32.mrf.mxu1  ;;  %v11514_v3 = vld [vmem:[%s14758_s12 + $0x450] sm:$0xff]  ;;  %v11516_v11 = vld [vmem:[%s14758_s12 + $0x460] sm:$0xff]  ;;  %v17647_v10 = vsel %vm7059_vm7, %v7012_v40, %v7014_v8 }
 0x312   : > { %7109 = vmatpush1.bf16.msra.mxu1 %v17587_v60  ;;  %13446 = vmatprep.mubr.bf16.mxu1 %v13862_v57  ;;  %11552 = vst.msk [vmem:[%s14758_s12 + $0x400] sm:$0xff] %vm670_vm3, %v4715_v17  ;;  %v4709_v29 = vadd.f32 %v11498_v46, %v4604_v14  ;;  %v4523_v62 = vpop.f32.mrf.mxu0  ;;  %v17611_v57 = vsel %vm7059_vm7, %v17415_v35, %v17379_v38  ;;  %v11515_v46 = vld [vmem:[%s14758_s12 + $0x458] sm:$0xff] }
 0x313   : > { %7110 = vmatprep.subr.bf16.mxu1 %v17582_v23  ;;  %11557 = vst [vmem:[%s14758_s12 + $0x428] sm:$0xff] %v4720_v21  ;;  %v4722_v34 = vadd.f32 %v11511_v45, %v4523_v62  ;;  %v13317_v63 = vpop.f32.mrf.mxu1  ;;  %v11510_v62 = vld [vmem:[%s14758_s12 + $0x430] sm:$0xff] }
 0x314   : > { %11546 = vst.msk [vmem:[%s14758_s12 + $0x3d0] sm:$0xff] %vm670_vm3, %v4709_v29  ;;  %v4718_v55 = vadd.f32 %v13317_v63, %v11507_v6  ;;  %v4525_v19 = vpop.f32.mrf.mxu0  ;;  %v13865_v63 = vld [vmem:[#allocation2 + $0x2c8] sm:$0xff]   ;;  %v17655_v6 = vpop.permute.xlu1 %8120 }
 0x315   : > { %11559 = vst [vmem:[%s14758_s12 + $0x438] sm:$0xff] %v4722_v34  ;;  %v4723_v38 = vadd.f32 %v11512_v41, %v4525_v19  ;;  %v4607_v35 = vpop.f32.mrf.mxu1  ;;  %v11517_v34 = vld [vmem:[%s14758_s12 + $0x468] sm:$0xff]  ;;  %v11519_v19 = vld [vmem:[%s14758_s12 + $0x478] sm:$0xff]  ;;  %v17659_v41 = vpop.permute.xlu0 %8116 }
 0x316   : > { %7111 = vmatpush1.bf16.msra.mxu1 %v17611_v57  ;;  %11555 = vst.msk [vmem:[%s14758_s12 + $0x418] sm:$0xff] %vm670_vm3, %v4718_v55  ;;  %v4712_v1 = vadd.f32 %v11501_v54, %v4607_v35  ;;  %v4529_v26 = vpop.f32.mrf.mxu0  ;;  %v11518_v35 = vld [vmem:[%s14758_s12 + $0x470] sm:$0xff] }
 0x317   : > { %7112 = vmatprep.subr.bf16.mxu1 %v17606_v25  ;;  %11560 = vst [vmem:[%s14758_s12 + $0x440] sm:$0xff] %v4723_v38  ;;  %v4725_v17 = vadd.f32 %v11514_v3, %v4529_v26  ;;  %v13320_v33 = vpop.f32.mrf.mxu1  ;;  %v11513_v26 = vld [vmem:[%s14758_s12 + $0x448] sm:$0xff]  ;;  %v17668_v3 = vld [vmem:[#allocation2 + $0x2d0] sm:$0xff]  }
 0x318   : > { %6559 = vmatmul.mubr.bf16.gmra.mxu0 %v13863_v2  ;;  %11549 = vst.msk [vmem:[%s14758_s12 + $0x3e8] sm:$0xff] %vm670_vm3, %v4712_v1  ;;  %v4727_v21 = vadd.f32 %v13320_v33, %v11516_v11  ;;  %v4531_v14 = vpop.f32.mrf.mxu0 }
 0x319   : > { %13447 = vmatmul.mubr.bf16.gmra.mxu1 %v13863_v2  ;;  %13466 = vmatprep.mubr.bf16.mxu0 %v17615_v42  ;;  %11562 = vst [vmem:[%s14758_s12 + $0x450] sm:$0xff] %v4725_v17  ;;  %v4726_v59 = vadd.f32 %v11515_v46, %v4531_v14  ;;  %v4620_v29 = vpop.f32.mrf.mxu1  ;;  %v17682_v14 = vpop.permute.xlu1 %8112 }
 0x31a   : > { %7113 = vmatpush1.bf16.msra.mxu1 %v17636_v36  ;;  %7132 = vmatprep.mubr.bf16.mxu1 %v21595_v9  ;;  %11564 = vst.msk [vmem:[%s14758_s12 + $0x460] sm:$0xff] %vm670_vm3, %v4727_v21  ;;  %v4721_v45 = vadd.f32 %v11510_v62, %v4620_v29  ;;  %v4533_v2 = vpop.f32.mrf.mxu0  ;;  %v17703_v62 = vld [vmem:[#allocation2 + $0x2e0] sm:$0xff]  }
 0x31b   : > { %7114 = vmatprep.subr.bf16.mxu1 %v17631_v31  ;;  %11563 = vst [vmem:[%s14758_s12 + $0x458] sm:$0xff] %v4726_v59  ;;  %v4728_v8 = vadd.f32 %v11517_v34, %v4533_v2  ;;  %v13321_v55 = vpop.f32.mrf.mxu1 }
 0x31c   : > { %11558 = vst.msk [vmem:[%s14758_s12 + $0x430] sm:$0xff] %vm670_vm3, %v4721_v45  ;;  %v4730_v40 = vadd.f32 %v13321_v55, %v11519_v19  ;;  %v4535_v38 = vpop.f32.mrf.mxu0  ;;  %v17736_v19 = vld [vmem:[#allocation2 + $0x2f0] sm:$0xff]  }
 0x31d   : > { %11565 = vst [vmem:[%s14758_s12 + $0x468] sm:$0xff] %v4728_v8  ;;  %v4729_v54 = vadd.f32 %v11518_v35, %v4535_v38  ;;  %v4623_v1 = vpop.f32.mrf.mxu1  ;;  %v17755_v35 = vld [vmem:[#allocation2 + $0x2f8] sm:$0xff]  }
 0x31e   : > { %7115 = vmatpush1.bf16.msra.mxu1 %v17647_v10  ;;  %11567 = vst.msk [vmem:[%s14758_s12 + $0x478] sm:$0xff] %vm670_vm3, %v4730_v40  ;;  %v4724_v17 = vadd.f32 %v11513_v26, %v4623_v1  ;;  %v13340_v33 = vpop.f32.mrf.mxu0 }
 0x31f   : > { %13482 = vmatprep.subr.bf16.mxu1 %v21686_v13  ;;  %11566 = vst [vmem:[%s14758_s12 + $0x470] sm:$0xff] %v4729_v54  ;;  %11584 = vst.msk [vmem:[%s14758_s12 + $0x4c0] sm:$0xff] %vm670_vm3, %v13340_v33  ;;  %v4878_v11 = vpop.f32.mrf.mxu1 }
 0x320   : > { %13467 = vmatmul.mubr.bf16.vlgmr.msra.gmra.mxu0 %v13865_v63  ;;  %11561 = vst.msk [vmem:[%s14758_s12 + $0x448] sm:$0xff] %vm670_vm3, %v4724_v17  ;;  %11576 = vst [vmem:[%s14758_s12 + $0x480] sm:$0xff] %v4878_v11  ;;  %v4991_v21 = vpop.f32.mrf.mxu0 }
 0x321   : > { %7520 = vmatpush1.bf16.msra.mxu0 %v17486_v61  ;;  %7133 = vmatmul.mubr.bf16.vlgmr.msra.gmra.mxu1 %v17615_v42  ;;  %11578 = vst.msk [vmem:[%s14758_s12 + $0x490] sm:$0xff] %vm670_vm3, %v4991_v21  ;;  %v4880_v61 = vpop.f32.mrf.mxu1  ;;  %v17688_v42 = vpop.permute.xlu0 %8114 }
 0x322   : > { %7521 = vmatprep.subr.bf16.mxu0 %v17498_v37  ;;  %13483 = vmatpush3.bf16.msra.mxu1 %v21686_v13  ;;  %11577 = vst [vmem:[%s14758_s12 + $0x488] sm:$0xff] %v4880_v61  ;;  %v13341_v46 = vpop.f32.mrf.mxu0  ;;  %v17692_v37 = vld [vmem:[#allocation2 + $0x2d8] sm:$0xff]  }
 0x323   : > { %13484 = vmatprep.subr.bf16.mxu1 %v17001_v58  ;;  %13470 = vmatprep.mubr.bf16.mxu0 %v17668_v3  ;;  %11587 = vst.msk [vmem:[%s14758_s12 + $0x4d8] sm:$0xff] %vm670_vm3, %v13341_v46  ;;  %v4882_v13 = vpop.f32.mrf.mxu1 }
 0x324   : > { %7142 = vmatprep.mubr.bf16.mxu1 %v21595_v9  ;;  %11579 = vst [vmem:[%s14758_s12 + $0x498] sm:$0xff] %v4882_v13  ;;  %v4994_v59 = vpop.f32.mrf.mxu0 }
 0x325   : > { %7522 = vmatpush1.bf16.msra.mxu0 %v17512_v15  ;;  %11581 = vst.msk [vmem:[%s14758_s12 + $0x4a8] sm:$0xff] %vm670_vm3, %v4994_v59  ;;  %v4884_v29 = vpop.f32.mrf.mxu1  ;;  %v17707_v15 = vpop.permute.xlu1 %8110 }
 0x326   : > { %7523 = vmatprep.subr.bf16.mxu0 %v17523_v51  ;;  %13485 = vmatpush3.bf16.msra.mxu1 %v17001_v58  ;;  %11580 = vst [vmem:[%s14758_s12 + $0x4a0] sm:$0xff] %v4884_v29  ;;  %v13344_v45 = vpop.f32.mrf.mxu0  ;;  %v17712_v51 = vpop.permute.xlu0 %8106 }
 0x327   : > { %13486 = vmatprep.subr.bf16.mxu1 %v17155_v20  ;;  %11596 = vst.msk [vmem:[%s14758_s12 + $0x520] sm:$0xff] %vm670_vm3, %v13344_v45  ;;  %v4888_v58 = vpop.f32.mrf.mxu1 }
 0x328   : > { %13471 = vmatmul.mubr.bf16.gmra.mxu0 %v17692_v37  ;;  %11582 = vst [vmem:[%s14758_s12 + $0x4b0] sm:$0xff] %v4888_v58  ;;  %v5007_v2 = vpop.f32.mrf.mxu0 }
 0x329   : > { %7524 = vmatpush1.bf16.msra.mxu0 %v17535_v4  ;;  %7143 = vmatmul.mubr.bf16.gmra.mxu1 %v13865_v63  ;;  %11590 = vst.msk [vmem:[%s14758_s12 + $0x4f0] sm:$0xff] %vm670_vm3, %v5007_v2  ;;  %v4890_v34 = vpop.f32.mrf.mxu1  ;;  %v17723_v63 = vld [vmem:[#allocation2 + $0x2e8] sm:$0xff]   ;;  %v17731_v8 = vpop.permute.xlu1 %8108 }
 0x32a   : > { %7525 = vmatprep.subr.bf16.mxu0 %v17548_v30  ;;  %13487 = vmatpush3.bf16.msra.mxu1 %v17155_v20  ;;  %11583 = vst [vmem:[%s14758_s12 + $0x4b8] sm:$0xff] %v4890_v34  ;;  %v13345_v4 = vpop.f32.mrf.mxu0  ;;  %v17738_v40 = vpop.permute.xlu0 %8104 }
 0x32b   : > { %13488 = vmatprep.subr.bf16.mxu1 %v17193_v18  ;;  %13474 = vmatprep.mubr.bf16.mxu0 %v17703_v62  ;;  %11599 = vst.msk [vmem:[%s14758_s12 + $0x538] sm:$0xff] %vm670_vm3, %v13345_v4  ;;  %v4892_v20 = vpop.f32.mrf.mxu1 }
 0x32c   : > { %7152 = vmatprep.mubr.bf16.mxu1 %v21595_v9  ;;  %11585 = vst [vmem:[%s14758_s12 + $0x4c8] sm:$0xff] %v4892_v20  ;;  %v5010_v30 = vpop.f32.mrf.mxu0 }
 0x32d   : > { %7526 = vmatpush1.bf16.msra.mxu0 %v17560_v27  ;;  %11593 = vst.msk [vmem:[%s14758_s12 + $0x508] sm:$0xff] %vm670_vm3, %v5010_v30  ;;  %v4894_v55 = vpop.f32.mrf.mxu1 }
 0x32e   : > { %7527 = vmatprep.subr.bf16.mxu0 %v17571_v44  ;;  %13489 = vmatpush3.bf16.msra.mxu1 %v17193_v18  ;;  %11586 = vst [vmem:[%s14758_s12 + $0x4d0] sm:$0xff] %v4894_v55  ;;  %v13348_v27 = vpop.f32.mrf.mxu0  ;;  %v17762_v54 = vpop.permute.xlu0 %8102 }
 0x32f   : > { %13490 = vmatprep.subr.bf16.mxu1 %v17331_v49  ;;  %11608 = vst.msk [vmem:[%s14758_s12 + $0x580] sm:$0xff] %vm670_vm3, %v13348_v27  ;;  %v4898_v18 = vpop.f32.mrf.mxu1 }
 0x330   : > { %13475 = vmatmul.mubr.bf16.gmra.mxu0 %v17723_v63  ;;  %11588 = vst [vmem:[%s14758_s12 + $0x4e0] sm:$0xff] %v4898_v18  ;;  %v5023_v44 = vpop.f32.mrf.mxu0  ;;  %v17847_v18 = vld [vmem:[#allocation2 + $0x390] sm:$0xff]  }
 0x331   : > { %7528 = vmatpush1.bf16.msra.mxu0 %v17587_v60  ;;  %7153 = vmatmul.mubr.bf16.gmra.mxu1 %v17668_v3  ;;  %11602 = vst.msk [vmem:[%s14758_s12 + $0x550] sm:$0xff] %vm670_vm3, %v5023_v44  ;;  %v4900_v38 = vpop.f32.mrf.mxu1 }
 0x332   : > { %7529 = vmatprep.subr.bf16.mxu0 %v17582_v23  ;;  %13491 = vmatpush3.bf16.msra.mxu1 %v17331_v49  ;;  %11589 = vst [vmem:[%s14758_s12 + $0x4e8] sm:$0xff] %v4900_v38  ;;  %v13349_v60 = vpop.f32.mrf.mxu0  ;;  %v17757_v23 = vpop.permute.xlu1 %8100 }
 0x333   : > { %13492 = vmatprep.subr.bf16.mxu1 %v17366_v53  ;;  %13478 = vmatprep.mubr.bf16.mxu0 %v17736_v19  ;;  %11611 = vst.msk [vmem:[%s14758_s12 + $0x598] sm:$0xff] %vm670_vm3, %v13349_v60  ;;  %v4902_v49 = vpop.f32.mrf.mxu1 }
 0x334   : > { %7162 = vmatprep.mubr.bf16.mxu1 %v21595_v9  ;;  %11591 = vst [vmem:[%s14758_s12 + $0x4f8] sm:$0xff] %v4902_v49  ;;  %v5026_v1 = vpop.f32.mrf.mxu0 }
 0x335   : > { %7530 = vmatpush1.bf16.msra.mxu0 %v17611_v57  ;;  %11605 = vst.msk [vmem:[%s14758_s12 + $0x568] sm:$0xff] %vm670_vm3, %v5026_v1  ;;  %v4904_v26 = vpop.f32.mrf.mxu1 }
 0x336   : > { %7531 = vmatprep.subr.bf16.mxu0 %v17606_v25  ;;  %13493 = vmatpush3.bf16.msra.mxu1 %v17366_v53  ;;  %11592 = vst [vmem:[%s14758_s12 + $0x500] sm:$0xff] %v4904_v26  ;;  %v13352_v3 = vpop.f32.mrf.mxu0  ;;  %v17779_v57 = vpop.permute.xlu1 %8098 }
 0x337   : > { %13494 = vmatprep.subr.bf16.mxu1 %v17436_v39  ;;  %11620 = vst.msk [vmem:[%s14758_s12 + $0x5e0] sm:$0xff] %vm670_vm3, %v13352_v3  ;;  %v4908_v25 = vpop.f32.mrf.mxu1 }
 0x338   : > { %13479 = vmatmul.mubr.bf16.gmra.mxu0 %v17755_v35  ;;  %11594 = vst [vmem:[%s14758_s12 + $0x510] sm:$0xff] %v4908_v25  ;;  %v5039_v53 = vpop.f32.mrf.mxu0 }
 0x339   : > { %7532 = vmatpush1.bf16.msra.mxu0 %v17636_v36  ;;  %7163 = vmatmul.mubr.bf16.gmra.mxu1 %v17692_v37  ;;  %11614 = vst.msk [vmem:[%s14758_s12 + $0x5b0] sm:$0xff] %vm670_vm3, %v5039_v53  ;;  %v4910_v17 = vpop.f32.mrf.mxu1  ;;  %v17785_v36 = vpop.permute.xlu0 %8094 }
 0x33a   : > { %7533 = vmatprep.subr.bf16.mxu0 %v17631_v31  ;;  %13495 = vmatpush3.bf16.msra.mxu1 %v17436_v39  ;;  %11595 = vst [vmem:[%s14758_s12 + $0x518] sm:$0xff] %v4910_v17  ;;  %v13353_v33 = vpop.f32.mrf.mxu0  ;;  %v17789_v39 = vld [vmem:[#allocation2 + $0x380] sm:$0xff]   ;;  %v8138_v31 = vsel %vm8122_vm8, %v17624_v24, %v17655_v6 }
 0x33b   : > { %13496 = vmatprep.subr.bf16.mxu1 %v17452_v56  ;;  %7551 = vmatprep.mubr.bf16.mxu0 %v21595_v9  ;;  %11623 = vst.msk [vmem:[%s14758_s12 + $0x5f8] sm:$0xff] %vm670_vm3, %v13353_v33  ;;  %v4912_v11 = vpop.f32.mrf.mxu1 }
 0x33c   : > { %7172 = vmatprep.mubr.bf16.mxu1 %v21595_v9  ;;  %11597 = vst [vmem:[%s14758_s12 + $0x528] sm:$0xff] %v4912_v11  ;;  %v5042_v21 = vpop.f32.mrf.mxu0 }
 0x33d   : > { %7534 = vmatpush1.bf16.msra.mxu0 %v17647_v10  ;;  %11617 = vst.msk [vmem:[%s14758_s12 + $0x5c8] sm:$0xff] %vm670_vm3, %v5042_v21  ;;  %v4914_v61 = vpop.f32.mrf.mxu1  ;;  %v17806_v10 = vpop.permute.xlu1 %8096 }
 0x33e   : > { %13497 = vmatpush3.bf16.msra.mxu1 %v17452_v56  ;;  %13514 = vmatprep.subr.bf16.mxu0 %v17655_v6  ;;  %11598 = vst [vmem:[%s14758_s12 + $0x530] sm:$0xff] %v4914_v61  ;;  %v17803_v46 = vpop.f32.mrf.mxu0  ;;  %v17810_v56 = vpop.permute.xlu0 %8092 }
 0x33f   : > { %8163 = vmatprep.subr.bf16.mxu1 %v8138_v31  ;;  %v4918_v37 = vpop.f32.mrf.mxu1 }
 0x340   : > { %7552 = vmatmul.mubr.bf16.vlgmr.msra.gmra.mxu0 %v17789_v39  ;;  %11600 = vst [vmem:[%s14758_s12 + $0x540] sm:$0xff] %v4918_v37  ;;  %v17813_v13 = vpop.f32.mrf.mxu0 }
 0x341   : > { %7173 = vmatmul.mubr.bf16.gmra.mxu1 %v17703_v62  ;;  %7561 = vmatprep.mubr.bf16.mxu0 %v21595_v9  ;;  %v4920_v59 = vpop.f32.mrf.mxu1  ;;  %v17821_v62 = vld [vmem:[#allocation2 + $0x388] sm:$0xff]   ;;  %v17827_v2 = vpop.permute.xlu1 %8088 }
 0x342   : > { %7182 = vmatprep.mubr.bf16.mxu1 %v21595_v9  ;;  %13515 = vmatpush3.bf16.msra.mxu0 %v17655_v6  ;;  %11601 = vst [vmem:[%s14758_s12 + $0x548] sm:$0xff] %v4920_v59  ;;  %v17819_v29 = vpop.f32.mrf.mxu0  ;;  %v17830_v6 = vpop.permute.xlu0 %8090 }
 0x343   : > { %13516 = vmatprep.subr.bf16.mxu0 %v17688_v42  ;;  %v4922_v45 = vpop.f32.mrf.mxu1 }
 0x344   : > { %11603 = vst [vmem:[%s14758_s12 + $0x558] sm:$0xff] %v4922_v45  ;;  %v17824_v58 = vpop.f32.mrf.mxu0 }
 0x345   : > { %v4924_v34 = vpop.f32.mrf.mxu1 }
 0x346   : > { %13517 = vmatpush3.bf16.msra.mxu0 %v17688_v42  ;;  %11604 = vst [vmem:[%s14758_s12 + $0x560] sm:$0xff] %v4924_v34  ;;  %v17833_v4 = vpop.f32.mrf.mxu0  ;;  %v17851_v38 = vpop.permute.xlu0 %8082 }
 0x347   : > { %13518 = vmatprep.subr.bf16.mxu0 %v17731_v8  ;;  %v4928_v20 = vpop.f32.mrf.mxu1 }
 0x348   : > { %7562 = vmatmul.mubr.bf16.gmra.mxu0 %v17821_v62  ;;  %11606 = vst [vmem:[%s14758_s12 + $0x570] sm:$0xff] %v4928_v20  ;;  %v17839_v30 = vpop.f32.mrf.mxu0  ;;  %v11657_v20 = vld [vmem:[%s14758_s12 + $0x188] sm:$0xff] }
 0x349   : > { %7183 = vmatmul.mubr.bf16.gmra.mxu1 %v17723_v63  ;;  %7571 = vmatprep.mubr.bf16.mxu0 %v21595_v9  ;;  %v4930_v55 = vpop.f32.mrf.mxu1  ;;  %v17849_v63 = vpop.permute.xlu1 %8086 }
 0x34a   : > { %7192 = vmatprep.mubr.bf16.mxu1 %v21595_v9  ;;  %13519 = vmatpush3.bf16.msra.mxu0 %v17731_v8  ;;  %11607 = vst [vmem:[%s14758_s12 + $0x578] sm:$0xff] %v4930_v55  ;;  %v17845_v27 = vpop.f32.mrf.mxu0  ;;  %v8081_v17 = vpop.permute.xlu0 %8080 }
 0x34b   : > { %13520 = vmatprep.subr.bf16.mxu0 %v17762_v54  ;;  %v4932_v44 = vpop.f32.mrf.mxu1 }
 0x34c   : > { %11609 = vst [vmem:[%s14758_s12 + $0x588] sm:$0xff] %v4932_v44  ;;  %v17854_v60 = vpop.f32.mrf.mxu0  ;;  %v17900_v44 = vadd.f32 %v11657_v20, %v17813_v13  ;;  %v17917_v13 = vsel %vm8122_vm8, %v17738_v40, %v17712_v51  ;;  %v11659_v40 = vld [vmem:[%s14758_s12 + $0x198] sm:$0xff] }
 0x34d   : > { %v4934_v49 = vpop.f32.mrf.mxu1  ;;  %v17869_v25 = vpop.permute.xlu1 %8084 }
 0x34e   : > { %13521 = vmatpush3.bf16.msra.mxu0 %v17762_v54  ;;  %11610 = vst [vmem:[%s14758_s12 + $0x590] sm:$0xff] %v4934_v49  ;;  %v17859_v1 = vpop.f32.mrf.mxu0  ;;  %v17890_v45 = vpop.permute.xlu0 %8078  ;;  %21691 = vst [vmem:[#allocation13_spill] sm:$0xff] %v17900_v44  ;;  %v17905_v49 = vld [vmem:[#allocation2 + $0x3a0] sm:$0xff]  }
 0x34f   : > { %13522 = vmatprep.subr.bf16.mxu0 %v17806_v10  ;;  %v4938_v26 = vpop.f32.mrf.mxu1 }
 0x350   : > { %7572 = vmatmul.mubr.bf16.gmra.mxu0 %v17847_v18  ;;  %11612 = vst [vmem:[%s14758_s12 + $0x5a0] sm:$0xff] %v4938_v26  ;;  %v17865_v3 = vpop.f32.mrf.mxu0  ;;  %v11656_v26 = vld [vmem:[%s14758_s12 + $0x180] sm:$0xff] }
 0x351   : > { %7193 = vmatmul.mubr.bf16.gmra.mxu1 %v17736_v19  ;;  %7581 = vmatprep.mubr.bf16.mxu0 %v21595_v9  ;;  %v4940_v53 = vpop.f32.mrf.mxu1  ;;  %v17875_v19 = vld [vmem:[#allocation2 + $0x398] sm:$0xff]   ;;  %v17886_v37 = vpop.permute.xlu1 %8076 }
 0x352   : > { %7202 = vmatprep.mubr.bf16.mxu1 %v21595_v9  ;;  %13523 = vmatpush3.bf16.msra.mxu0 %v17806_v10  ;;  %11613 = vst [vmem:[%s14758_s12 + $0x5a8] sm:$0xff] %v4940_v53  ;;  %v17873_v33 = vpop.f32.mrf.mxu0 }
 0x353   : > { %13524 = vmatprep.subr.bf16.mxu0 %v17830_v6  ;;  %v4942_v31 = vpop.f32.mrf.mxu1 }
 0x354   : > { %11615 = vst [vmem:[%s14758_s12 + $0x5b8] sm:$0xff] %v4942_v31  ;;  %v17878_v11 = vpop.f32.mrf.mxu0  ;;  %v8135_v31 = vsel %vm8122_vm8, %v17707_v15, %v17682_v14  ;;  %v17940_v15 = vsel %vm8122_vm8, %v17849_v63, %v17827_v2 }
 0x355   : > { %v4944_v21 = vpop.f32.mrf.mxu1 }
 0x356   : > { %13525 = vmatpush3.bf16.msra.mxu0 %v17830_v6  ;;  %11616 = vst [vmem:[%s14758_s12 + $0x5c0] sm:$0xff] %v4944_v21  ;;  %v17883_v61 = vpop.f32.mrf.mxu0  ;;  %v17920_v21 = vadd.f32 %v11656_v26, %v17803_v46 }
 0x357   : > { %13526 = vmatprep.subr.bf16.mxu0 %v17869_v25  ;;  %v4948_v59 = vpop.f32.mrf.mxu1 }
 0x358   : > { %7582 = vmatmul.mubr.bf16.gmra.mxu0 %v17875_v19  ;;  %11618 = vst [vmem:[%s14758_s12 + $0x5d0] sm:$0xff] %v4948_v59  ;;  %v17893_v34 = vpop.f32.mrf.mxu0  ;;  %21692 = vst [vmem:[#allocation24_spill] sm:$0xff] %v17920_v21  ;;  %v11660_v59 = vld [vmem:[%s14758_s12 + $0x1a0] sm:$0xff] }
 0x359   : > { %7203 = vmatmul.mubr.bf16.gmra.mxu1 %v17755_v35  ;;  %7591 = vmatprep.mubr.bf16.mxu0 %v21595_v9  ;;  %v4950_v55 = vpop.f32.mrf.mxu1  ;;  %v17944_v46 = vadd.f32 %v11660_v59, %v17824_v58  ;;  %v8887_v58 = vmul.f32 %v16534_v32, %v17900_v44  ;;  %v11662_v59 = vld [vmem:[%s14758_s12 + $0x1b0] sm:$0xff] }
 0x35a   : > { %13498 = vmatprep.mubr.bf16.mxu1 %v17789_v39  ;;  %13527 = vmatpush3.bf16.msra.mxu0 %v17869_v25  ;;  %11619 = vst [vmem:[%s14758_s12 + $0x5d8] sm:$0xff] %v4950_v55  ;;  %v17903_v35 = vpop.f32.mrf.mxu0  ;;  %v8137_v39 = vsel %vm8122_vm8, %v17659_v41, %v17624_v24  ;;  %v17930_v24 = vsel %vm8122_vm8, %v17779_v57, %v17757_v23  ;;  %v11663_v55 = vld [vmem:[%s14758_s12 + $0x1b8] sm:$0xff] }
 0x35b   : > { %13528 = vmatprep.subr.bf16.mxu0 %v17890_v45  ;;  %v4952_v53 = vpop.f32.mrf.mxu1  ;;  %v17935_v41 = vsel %vm8122_vm8, %v17810_v56, %v17785_v36  ;;  %21693 = vst [vmem:[#allocation28_spill] sm:$0xff] %v17944_v46  ;;  %v17949_v57 = vsel %vm8122_vm8, %v8081_v17, %v17851_v38  ;;  %v17952_v56 = vadd.f32 %v11659_v40, %v17819_v29  ;;  %v11664_v29 = vld [vmem:[%s14758_s12 + $0x1c0] sm:$0xff] }
 0x35c   : > { %11621 = vst [vmem:[%s14758_s12 + $0x5e8] sm:$0xff] %v4952_v53  ;;  %v17924_v20 = vpop.f32.mrf.mxu0  ;;  %v8075_v53 = vpop.permute.xlu1 %8074  ;;  %v17955_v28 = vadd.f32 %v11663_v55, %v17839_v30  ;;  %v8136_v30 = vsel %vm8122_vm8, %v17682_v14, %v17688_v42  ;;  %v8134_v40 = vsel %vm8122_vm8, %v17712_v51, %v17731_v8  ;;  %v17978_v55 = vadd.f32 %v11662_v59, %v17833_v4  ;;  %v11658_v8 = vld [vmem:[%s14758_s12 + $0x190] sm:$0xff] }
 0x35d   : > { %v4954_v26 = vpop.f32.mrf.mxu1  ;;  %21694 = vst [vmem:[#allocation26_spill] sm:$0xff] %v17952_v56  ;;  %v17965_v17 = vsel %vm8122_vm8, %v8075_v53, %v17886_v37  ;;  %v8886_v14 = vmul.f32 %v16541_v22, %v17920_v21  ;;  %v17996_v4 = vsel %vm8122_vm8, %v17785_v36, %v17806_v10  ;;  %v9015_v36 = vmul.f32 %v8887_v58, %v8887_v58 }
 0x35e   : > { %13529 = vmatpush3.bf16.msra.mxu0 %v17890_v45  ;;  %21695 = vst [vmem:[#allocation14_spill] sm:$0xff] %v17955_v28  ;;  %11622 = vst [vmem:[%s14758_s12 + $0x5f0] sm:$0xff] %v4954_v26  ;;  %v17958_v63 = vpop.f32.mrf.mxu0  ;;  %v11666_v26 = vld [vmem:[%s14758_s12 + $0x1d0] sm:$0xff] }
 0x35f   : > { %v13372_v52 = vpop.f32.mrf.mxu1  ;;  %21696 = vst [vmem:[#allocation27_spill] sm:$0xff] %v17978_v55  ;;  %v17987_v42 = vadd.f32 %v11666_v26, %v17854_v60 }
 0x360   : > { %7592 = vmatmul.mubr.bf16.gmra.mxu0 %v17905_v49  ;;  %v5659_v53 = vadd.f32 %v13372_v52, %v11664_v29  ;;  %v8132_v52 = vsel %vm8122_vm8, %v17757_v23, %v17762_v54  ;;  %v11683_v29 = vld [vmem:[%s14758_s12 + $0x258] sm:$0xff]  ;;  %v18008_v23 = vmul.f32 %v16534_v32, %v17955_v28  ;;  %v8889_v54 = vmul.f32 %v16541_v22, %v17952_v56  ;;  %v11889_v28 = vld [vmem:[%s14758_s12 + $0x308] sm:$0xff] }
 0x361   : > { %13499 = vmatmul.mubr.bf16.vlgmr.msra.gmra.mxu1 %v17821_v62  ;;  %7601 = vmatprep.mubr.bf16.mxu0 %v21595_v9  ;;  %v17981_v62 = vpop.f32.mrf.mxu0  ;;  %21697 = vst [vmem:[#allocation17_spill] sm:$0xff] %v17987_v42  ;;  %v5540_v51 = vpop.f32.mrf.mxu1 }
 0x362   : > { %8164 = vmatpush1.bf16.msra.mxu1 %v8137_v39  ;;  %13502 = vmatprep.mubr.bf16.mxu1 %v17847_v18  ;;  %v8890_v18 = vmul.f32 %v16534_v32, %v17944_v46  ;;  %v11665_v39 = vld [vmem:[%s14758_s12 + $0x1c8] sm:$0xff]  ;;  %11712 = vst.msk [vmem:[%s14758_s12 + $0x1c0] sm:$0xff] %vm670_vm3, %v5659_v53  ;;  %v5653_v60 = vadd.f32 %v11658_v8, %v5540_v51  ;;  %v11667_v53 = vld [vmem:[%s14758_s12 + $0x1d8] sm:$0xff] }
 0x363   : > { %8165 = vmatprep.subr.bf16.mxu1 %v8136_v30  ;;  %v5471_v59 = vpop.f32.mrf.mxu0  ;;  %v18004_v30 = vld [vmem:[#allocation2 + $0x3a8] sm:$0xff]   ;;  %v18013_v10 = vadd.f32 %v11665_v39, %v17845_v27  ;;  %v13373_v16 = vpop.f32.mrf.mxu1  ;;  %v18019_v51 = vsel %vm8122_vm8, %v17827_v2, %v17830_v6  ;;  %v18024_v8 = vsel %vm8122_vm8, %v17851_v38, %v17869_v25  ;;  %v18036_v2 = vsel %vm8122_vm8, %v17886_v37, %v17890_v45 }
 0x364   : > { %v5678_v26 = vadd.f32 %v11683_v29, %v5471_v59  ;;  %11706 = vst.msk [vmem:[%s14758_s12 + $0x190] sm:$0xff] %vm670_vm3, %v5653_v60  ;;  %v5662_v27 = vadd.f32 %v13373_v16, %v11667_v53  ;;  %v8892_v59 = vmul.f32 %v16541_v22, %v17978_v55  ;;  %v9014_v6 = vmul.f32 %v8886_v14, %v8886_v14  ;;  %v11661_v16 = vld [vmem:[%s14758_s12 + $0x1a8] sm:$0xff] }
 0x365   : > { %21698 = vst [vmem:[#allocation30_spill] sm:$0xff] %v18013_v10  ;;  %v18029_v39 = vpop.f32.mrf.mxu0  ;;  %v18039_v38 = vadd.f32 %v11668_v48, %v17859_v1  ;;  %v5543_v25 = vpop.f32.mrf.mxu1  ;;  %v8896_v60 = vmul.f32 %v16534_v32, %v17987_v42  ;;  %v9018_v29 = vmul.f32 %v8890_v18, %v8890_v18  ;;  %v11669_v53 = vld [vmem:[%s14758_s12 + $0x1e8] sm:$0xff]  ;;  %v9021_v1 = vmul.f32 %v18008_v23, %v18008_v23 }
 0x366   : > { %8166 = vmatpush1.bf16.msra.mxu1 %v8135_v31  ;;  %11731 = vst [vmem:[%s14758_s12 + $0x258] sm:$0xff] %v5678_v26  ;;  %v18043_v31 = vadd.f32 %v8887_v58, %v8886_v14  ;;  %11715 = vst.msk [vmem:[%s14758_s12 + $0x1d8] sm:$0xff] %vm670_vm3, %v5662_v27  ;;  %v5656_v37 = vadd.f32 %v11661_v16, %v5543_v25  ;;  %v18055_v45 = vadd.f32 %v9015_v36, %v9014_v6  ;;  %v11672_v14 = vld [vmem:[%s14758_s12 + $0x200] sm:$0xff]  ;;  %v11671_v36 = vld [vmem:[%s14758_s12 + $0x1f8] sm:$0xff] }
 0x367   : > { %21699 = vst [vmem:[#allocation25_spill] sm:$0xff] %v18039_v38  ;;  %8167 = vmatprep.subr.bf16.mxu1 %v8134_v40  ;;  %v18050_v48 = vpop.f32.mrf.mxu0  ;;  %v9017_v58 = vmul.f32 %v8889_v54, %v8889_v54  ;;  %v18058_v40 = vadd.f32 %v11669_v53, %v17865_v3  ;;  %v13376_v26 = vpop.f32.mrf.mxu1  ;;  %v8895_v27 = vmul.f32 %v16541_v22, %v18013_v10 }
 0x368   : > { %7602 = vmatmul.mubr.bf16.gmra.mxu0 %v18004_v30  ;;  %v18066_v25 = vadd.f32 %v8890_v18, %v8889_v54  ;;  %v18070_v6 = vadd.f32 %v11672_v14, %v17878_v11  ;;  %11709 = vst.msk [vmem:[%s14758_s12 + $0x1a8] sm:$0xff] %vm670_vm3, %v5656_v37  ;;  %v5671_v3 = vadd.f32 %v13376_v26, %v11676_v50  ;;  %v13878_v37 = vld [vmem:[#allocation2 + $0x3b0] sm:$0xff]  }
 0x369   : > { %21700 = vst [vmem:[#allocation44_spill] sm:$0xff] %v18058_v40  ;;  %13503 = vmatmul.mubr.bf16.gmra.mxu1 %v17875_v19  ;;  %7611 = vmatprep.mubr.bf16.mxu0 %v21595_v9  ;;  %v18075_v16 = vpop.f32.mrf.mxu0  ;;  %v9020_v19 = vmul.f32 %v8892_v59, %v8892_v59  ;;  %v18079_v53 = vadd.f32 %v11671_v36, %v17873_v33  ;;  %v12496_v18 = vld [vmem:[%s14758_s12 + $0x1c0] sm:$0xff]  ;;  %v5556_v54 = vpop.f32.mrf.mxu1 }
 0x36a   : > { %21701 = vst [vmem:[#allocation45_spill] sm:$0xff] %v18070_v6  ;;  %8168 = vmatpush1.bf16.msra.mxu1 %v17917_v13  ;;  %13506 = vmatprep.mubr.bf16.mxu1 %v17905_v49  ;;  %v9024_v11 = vmul.f32 %v8896_v60, %v8896_v60  ;;  %v18083_v14 = vadd.f32 %v9018_v29, %v9017_v58  ;;  %v11674_v13 = vld [vmem:[%s14758_s12 + $0x210] sm:$0xff]  ;;  %11724 = vst.msk [vmem:[%s14758_s12 + $0x220] sm:$0xff] %vm670_vm3, %v5671_v3 }
 0x36b   : > { %21702 = vst [vmem:[#allocation46_spill] sm:$0xff] %v18079_v53  ;;  %8169 = vmatprep.subr.bf16.mxu1 %v8132_v52  ;;  %v18087_v50 = vmul.f32 %v16541_v22, %v18039_v38  ;;  %v5665_v49 = vadd.f32 %v11670_v43, %v5556_v54  ;;  %v18092_v33 = vpop.f32.mrf.mxu0  ;;  %v8894_v26 = vmul.f32 %v12496_v18, %v16555_v12  ;;  %v12490_v58 = vld [vmem:[%s14758_s12 + $0x190] sm:$0xff]  ;;  %v13377_v47 = vpop.f32.mrf.mxu1  ;;  %v11673_v18 = vld [vmem:[%s14758_s12 + $0x208] sm:$0xff]  ;;  %v13879_v38 = vld [vmem:[#allocation2 + $0x3b8] sm:$0xff]  }
 0x36c   : > { %v8944_v36 = vadd.f32 %v18008_v23, %v8892_v59  ;;  %v18096_v52 = vadd.f32 %v9021_v1, %v9020_v19  ;;  %v18099_v29 = vadd.f32 %v11674_v13, %v17883_v61  ;;  %v8949_v0 = vadd.f32 %v8896_v60, %v8895_v27  ;;  %v11675_v13 = vld [vmem:[%s14758_s12 + $0x218] sm:$0xff] }
 0x36d   : > { %v9023_v3 = vmul.f32 %v8895_v27, %v8895_v27  ;;  %v18105_v43 = vmul.f32 %v16534_v32, %v18058_v40  ;;  %11718 = vst.msk [vmem:[%s14758_s12 + $0x1f0] sm:$0xff] %vm670_vm3, %v5665_v49  ;;  %v5674_v23 = vadd.f32 %v13377_v47, %v11679_v7  ;;  %v18110_v59 = vpop.f32.mrf.mxu0  ;;  %v8945_v61 = vsel %vm670_vm3, %v8894_v26, 0.0  ;;  %v12499_v27 = vld [vmem:[%s14758_s12 + $0x1d8] sm:$0xff]  ;;  %v5559_v19 = vpop.f32.mrf.mxu1 }
 0x36e   : > { %21703 = vst [vmem:[#allocation47_spill] sm:$0xff] %v18099_v29  ;;  %8170 = vmatpush1.bf16.msra.mxu1 %v17930_v24  ;;  %v8888_v1 = vmul.f32 %v12490_v58, %v16555_v12  ;;  %v18116_v60 = vmul.f32 %v16534_v32, %v18070_v6  ;;  %v8946_v7 = vadd.f32 %v8945_v61, %v8944_v36 }
 0x36f   : > { %8171 = vmatprep.subr.bf16.mxu1 %v17996_v4  ;;  %v18121_v47 = vadd.f32 %v9024_v11, %v9023_v3  ;;  %v8901_v24 = vmul.f32 %v16541_v22, %v18079_v53  ;;  %v9026_v54 = vmul.f32 %v18087_v50, %v18087_v50  ;;  %11727 = vst.msk [vmem:[%s14758_s12 + $0x238] sm:$0xff] %vm670_vm3, %v5674_v23  ;;  %v18130_v58 = vpop.f32.mrf.mxu0  ;;  %v12493_v61 = vld [vmem:[%s14758_s12 + $0x1a8] sm:$0xff]  ;;  %v13380_v6 = vpop.f32.mrf.mxu1  ;;  %v11688_v53 = vld [vmem:[%s14758_s12 + $0x280] sm:$0xff] }
 0x370   : > { %v5668_v49 = vadd.f32 %v11673_v18, %v5559_v19  ;;  %7612 = vmatmul.mubr.bf16.gmra.mxu0 %v13878_v37  ;;  %v8935_v4 = vsel %vm670_vm3, %v8888_v1, 0.0  ;;  %v8897_v11 = vmul.f32 %v12499_v27, %v16555_v12  ;;  %v9022_v36 = vmul.f32 %v8894_v26, %v8894_v26  ;;  %8947 = vadd.xlane.f32.xlu1 %v8946_v7  ;;  %v11678_v18 = vld [vmem:[%s14758_s12 + $0x230] sm:$0xff] }
 0x371   : > { %v18135_v3 = vadd.f32 %v11675_v13, %v17893_v34  ;;  %13507 = vmatmul.mubr.bf16.gmra.mxu1 %v18004_v30  ;;  %v18142_v23 = vmul.f32 %v16541_v22, %v18099_v29  ;;  %v9027_v19 = vmul.f32 %v18105_v43, %v18105_v43  ;;  %v5683_v34 = vadd.f32 %v13380_v6, %v11688_v53  ;;  %v18149_v26 = vpop.f32.mrf.mxu0  ;;  %v11682_v29 = vld [vmem:[%s14758_s12 + $0x250] sm:$0xff]  ;;  %v11677_v53 = vld [vmem:[%s14758_s12 + $0x228] sm:$0xff] }
 0x372   : > { %11721 = vst.msk [vmem:[%s14758_s12 + $0x208] sm:$0xff] %vm670_vm3, %v5668_v49  ;;  %8172 = vmatpush1.bf16.msra.mxu1 %v17935_v41  ;;  %v8950_v30 = vsel %vm670_vm3, %v8897_v11, 0.0  ;;  %7621 = vmatprep.mubr.bf16.mxu0 %v21595_v9  ;;  %v8891_v27 = vmul.f32 %v12493_v61, %v16555_v12  ;;  %v9030_v7 = vmul.f32 %v18116_v60, %v18116_v60  ;;  %v5572_v49 = vpop.f32.mrf.mxu1 }
 0x373   : > { %21704 = vst [vmem:[#allocation48_spill] sm:$0xff] %v18135_v3  ;;  %v18158_v13 = vadd.f32 %v11678_v18, %v17924_v20  ;;  %8173 = vmatprep.subr.bf16.mxu1 %v18019_v51  ;;  %v8936_v41 = vadd.f32 %v8935_v4, %v18043_v31  ;;  %v8951_v6 = vadd.f32 %v8950_v30, %v8949_v0  ;;  %11736 = vst.msk [vmem:[%s14758_s12 + $0x280] sm:$0xff] %vm670_vm3, %v5683_v34  ;;  %v18166_v40 = vpop.f32.mrf.mxu0  ;;  %v12508_v51 = vld [vmem:[%s14758_s12 + $0x220] sm:$0xff]  ;;  %v11691_v0 = vld [vmem:[%s14758_s12 + $0x298] sm:$0xff] }
 0x374   : > { %13510 = vmatprep.mubr.bf16.mxu1 %v13878_v37  ;;  %v5677_v61 = vadd.f32 %v11682_v29, %v5572_v49  ;;  %v9073_v20 = vsel %vm670_vm3, %v9022_v36, 0.0  ;;  %v9016_v18 = vmul.f32 %v8888_v1, %v8888_v1  ;;  %v9029_v42 = vmul.f32 %v8901_v24, %v8901_v24  ;;  %v13381_v31 = vpop.f32.mrf.mxu1  ;;  %v11685_v49 = vld [vmem:[%s14758_s12 + $0x268] sm:$0xff] }
 0x375   : > { %21705 = vst [vmem:[#allocation49_spill] sm:$0xff] %v18158_v13  ;;  %v18170_v10 = vadd.f32 %v11677_v53, %v17903_v35  ;;  %8937 = vadd.xlane.f32.xlu1 %v8936_v41  ;;  %8952 = vadd.xlane.f32.xlu0 %v8951_v6  ;;  %v8940_v37 = vsel %vm670_vm3, %v8891_v27, 0.0  ;;  %v9025_v4 = vmul.f32 %v8897_v11, %v8897_v11  ;;  %v18179_v36 = vpop.f32.mrf.mxu0  ;;  %v18194_v6 = vld [vmem:[#allocation2 + $0x3c0] sm:$0xff]   ;;  %v12502_v53 = vld [vmem:[%s14758_s12 + $0x1f0] sm:$0xff] }
 0x376   : > { %v8905_v29 = vmul.f32 %v16534_v32, %v18135_v3  ;;  %11730 = vst.msk [vmem:[%s14758_s12 + $0x250] sm:$0xff] %vm670_vm3, %v5677_v61  ;;  %v5686_v1 = vadd.f32 %v13381_v31, %v11691_v0  ;;  %8174 = vmatpush1.bf16.msra.mxu1 %v17940_v15  ;;  %v18184_v35 = vadd.f32 %v18105_v43, %v18087_v50  ;;  %v5575_v11 = vpop.f32.mrf.mxu1  ;;  %v11680_v0 = vld [vmem:[%s14758_s12 + $0x240] sm:$0xff] }
 0x377   : > { %21706 = vst [vmem:[#allocation50_spill] sm:$0xff] %v18170_v10  ;;  %v18187_v34 = vadd.f32 %v18116_v60, %v8901_v24  ;;  %v18189_v30 = vadd.f32 %v9027_v19, %v9026_v54  ;;  %8175 = vmatprep.subr.bf16.mxu1 %v18024_v8  ;;  %v9074_v41 = vadd.f32 %v9073_v20, %v18096_v52  ;;  %v18204_v24 = vpop.f32.mrf.mxu0  ;;  %v9063_v52 = vsel %vm670_vm3, %v9016_v18, 0.0  ;;  %v11681_v19 = vld [vmem:[%s14758_s12 + $0x248] sm:$0xff] }
 0x378   : > { %v8908_v15 = vmul.f32 %v16534_v32, %v18158_v13  ;;  %v9032_v50 = vmul.f32 %v18142_v23, %v18142_v23  ;;  %v18200_v43 = vadd.f32 %v9030_v7, %v9029_v42  ;;  %11739 = vst.msk [vmem:[%s14758_s12 + $0x298] sm:$0xff] %vm670_vm3, %v5686_v1  ;;  %v5680_v60 = vadd.f32 %v11685_v49, %v5575_v11  ;;  %v13384_v42 = vpop.f32.mrf.mxu1  ;;  %v11700_v7 = vld [vmem:[%s14758_s12 + $0x2e0] sm:$0xff]  ;;  %v11694_v11 = vld [vmem:[%s14758_s12 + $0x2b0] sm:$0xff] }
 0x379   : > { %7622 = vmatmul.mubr.bf16.gmra.mxu0 %v13879_v38  ;;  %v8941_v8 = vadd.f32 %v8940_v37, %v18066_v25  ;;  %v18209_v54 = vmul.f32 %v12508_v51, %v16555_v12  ;;  %13511 = vmatmul.mubr.bf16.gmra.mxu1 %v13879_v38  ;;  %v9078_v61 = vsel %vm670_vm3, %v9025_v4, 0.0  ;;  %v9019_v20 = vmul.f32 %v8891_v27, %v8891_v27  ;;  %v12511_v51 = vld [vmem:[%s14758_s12 + $0x238] sm:$0xff]  ;;  %v18224_v38 = vpop.f32.mrf.mxu0 }
 0x37a   : > { %9075 = vadd.xlane.f32.xlu1 %v9074_v41  ;;  %v8907_v31 = vmul.f32 %v16541_v22, %v18170_v10  ;;  %v9033_v25 = vmul.f32 %v8905_v29, %v8905_v29  ;;  %v18219_v18 = vadd.f32 %v11681_v19, %v17981_v62  ;;  %11733 = vst.msk [vmem:[%s14758_s12 + $0x268] sm:$0xff] %vm670_vm3, %v5680_v60  ;;  %v5588_v1 = vpop.f32.mrf.mxu1  ;;  %v11703_v60 = vld [vmem:[%s14758_s12 + $0x2f8] sm:$0xff]  ;;  %v11934_v10 = vld [vmem:[%s14758_s12 + $0x470] sm:$0xff] }
 0x37b   : > { %v5695_v37 = vadd.f32 %v13384_v42, %v11700_v7  ;;  %8942 = vadd.xlane.f32.xlu0 %v8941_v8  ;;  %8176 = vmatpush1.bf16.msra.mxu1 %v17949_v57  ;;  %v8964_v27 = vadd.f32 %v8905_v29, %v18142_v23  ;;  %v18229_v4 = vadd.f32 %v11680_v0, %v17958_v63  ;;  %v18237_v23 = vpop.f32.mrf.mxu0  ;;  %v18241_v29 = vld [vmem:[#allocation2 + $0x3c8] sm:$0xff]   ;;  %v9068_v8 = vsel %vm670_vm3, %v9019_v20, 0.0  ;;  %v11684_v42 = vld [vmem:[%s14758_s12 + $0x260] sm:$0xff]  ;;  %v18262_v0 = vld [vmem:[#allocation2 + $0x3d0] sm:$0xff]  }
 0x37c   : > { %21707 = vst [vmem:[#allocation51_spill] sm:$0xff] %v18219_v18  ;;  %8177 = vmatprep.subr.bf16.mxu1 %v18036_v2  ;;  %v9064_v62 = vadd.f32 %v9063_v52, %v18055_v45  ;;  %13530 = vmatprep.mubr.bf16.mxu0 %v18194_v6  ;;  %v9036_v49 = vmul.f32 %v8908_v15, %v8908_v15  ;;  %v8965_v2 = vsel %vm670_vm3, %v18209_v54, 0.0  ;;  %v13385_v41 = vpop.f32.mrf.mxu1  ;;  %v12505_v7 = vld [vmem:[%s14758_s12 + $0x208] sm:$0xff] }
 0x37d   : > { %21708 = vst [vmem:[#allocation52_spill] sm:$0xff] %v18229_v4  ;;  %11748 = vst.msk [vmem:[%s14758_s12 + $0x2e0] sm:$0xff] %vm670_vm3, %v5695_v37  ;;  %v5689_v57 = vadd.f32 %v11694_v11, %v5588_v1  ;;  %v9079_v63 = vadd.f32 %v9078_v61, %v18121_v47  ;;  %8195 = vmatprep.mubr.bf16.mxu1 %v21595_v9  ;;  %v18246_v45 = vmul.f32 %v12502_v53, %v16555_v12  ;;  %v18259_v61 = vpop.f32.mrf.mxu0  ;;  %v11697_v37 = vld [vmem:[%s14758_s12 + $0x2c8] sm:$0xff] }
 0x37e   : > { %9065 = vadd.xlane.f32.xlu1 %v9064_v62  ;;  %v18251_v52 = vmul.f32 %v12511_v51, %v16555_v12  ;;  %v18253_v47 = vadd.f32 %v9033_v25, %v9032_v50  ;;  %v9035_v19 = vmul.f32 %v8907_v31, %v8907_v31  ;;  %v5698_v53 = vadd.f32 %v13385_v41, %v11703_v60  ;;  %v5591_v51 = vpop.f32.mrf.mxu1 }
 0x37f   : > { %11742 = vst.msk [vmem:[%s14758_s12 + $0x2b0] sm:$0xff] %vm670_vm3, %v5689_v57  ;;  %9080 = vadd.xlane.f32.xlu0 %v9079_v63  ;;  %8178 = vmatpush1.bf16.msra.mxu1 %v17965_v17  ;;  %v8969_v20 = vadd.f32 %v8908_v15, %v8907_v31  ;;  %v18266_v50 = vmul.f32 %v16534_v32, %v18219_v18  ;;  %v11686_v15 = vld [vmem:[%s14758_s12 + $0x270] sm:$0xff]  ;;  %v13404_v62 = vpop.f32.mrf.mxu0  ;;  %v11768_v57 = vld [vmem:[%s14758_s12 + $0x4c0] sm:$0xff] }
 0x380   : > { %v18269_v25 = vadd.f32 %v11684_v42, %v18029_v39  ;;  %v8966_v1 = vadd.f32 %v8965_v2, %v8964_v27  ;;  %v18272_v11 = vadd.f32 %v9036_v49, %v9035_v19  ;;  %v8910_v17 = vmul.f32 %v16541_v22, %v18229_v4  ;;  %11751 = vst.msk [vmem:[%s14758_s12 + $0x2f8] sm:$0xff] %vm670_vm3, %v5698_v53  ;;  %v11687_v2 = vld [vmem:[%s14758_s12 + $0x278] sm:$0xff]  ;;  %v5846_v60 = vpop.f32.mrf.mxu1  ;;  %v11760_v19 = vld [vmem:[%s14758_s12 + $0x480] sm:$0xff]  ;;  %v11762_v53 = vld [vmem:[%s14758_s12 + $0x490] sm:$0xff] }
 0x381   : > { %v5692_v31 = vadd.f32 %v11697_v37, %v5591_v51  ;;  %13531 = vmatmul.mubr.bf16.vlgmr.msra.gmra.mxu0 %v18241_v29  ;;  %v9069_v39 = vadd.f32 %v9068_v8, %v18083_v14  ;;  %v8955_v27 = vsel %vm670_vm3, %v18246_v45, 0.0  ;;  %v9034_v49 = vmul.f32 %v18209_v54, %v18209_v54  ;;  %v5959_v42 = vpop.f32.mrf.mxu0  ;;  %v11761_v51 = vld [vmem:[%s14758_s12 + $0x488] sm:$0xff] }
 0x382   : > { %21709 = vst [vmem:[#allocation53_spill] sm:$0xff] %v18269_v25  ;;  %v18287_v63 = vadd.f32 %v11686_v15, %v18050_v48  ;;  %v6078_v41 = vadd.f32 %v13404_v62, %v11768_v57  ;;  %8196 = vmatmul.mubr.bf16.vlgmr.msra.gmra.mxu1 %v18194_v6  ;;  %8967 = vadd.xlane.f32.xlu1 %v8966_v1  ;;  %v8970_v14 = vsel %vm670_vm3, %v18251_v52, 0.0  ;;  %v11771_v57 = vld [vmem:[%s14758_s12 + $0x4d8] sm:$0xff] }
 0x383   : > { %v18295_v8 = vmul.f32 %v12505_v7, %v16555_v12  ;;  %v18298_v54 = vadd.f32 %v11687_v2, %v18075_v16  ;;  %11745 = vst.msk [vmem:[%s14758_s12 + $0x2c8] sm:$0xff] %vm670_vm3, %v5692_v31  ;;  %v6070_v48 = vadd.f32 %v11760_v19, %v5846_v60  ;;  %9070 = vadd.xlane.f32.xlu0 %v9069_v39  ;;  %v5848_v16 = vpop.f32.mrf.mxu1  ;;  %v13405_v62 = vpop.f32.mrf.mxu0  ;;  %v18317_v2 = vld [vmem:[#allocation2 + $0x3d8] sm:$0xff]  }
 0x384   : > { %21710 = vst [vmem:[#allocation54_spill] sm:$0xff] %v18287_v63  ;;  %13534 = vmatprep.mubr.bf16.mxu0 %v18262_v0  ;;  %v9039_v6 = vmul.f32 %v18266_v50, %v18266_v50  ;;  %11816 = vst.msk [vmem:[%s14758_s12 + $0x4c0] sm:$0xff] %vm670_vm3, %v6078_v41  ;;  %v6072_v7 = vadd.f32 %v11762_v53, %v5959_v42  ;;  %v8956_v37 = vadd.f32 %v8955_v27, %v18184_v35  ;;  %v12520_v27 = vld [vmem:[%s14758_s12 + $0x280] sm:$0xff] }
 0x385   : > { %21711 = vst [vmem:[#allocation55_spill] sm:$0xff] %v18298_v54  ;;  %8205 = vmatprep.mubr.bf16.mxu1 %v21595_v9  ;;  %v18313_v1 = vmul.f32 %v16534_v32, %v18269_v25  ;;  %v9038_v15 = vmul.f32 %v8910_v17, %v8910_v17  ;;  %11808 = vst [vmem:[%s14758_s12 + $0x480] sm:$0xff] %v6070_v48  ;;  %v6071_v31 = vadd.f32 %v11761_v51, %v5848_v16  ;;  %v5850_v19 = vpop.f32.mrf.mxu1  ;;  %v11763_v48 = vld [vmem:[%s14758_s12 + $0x498] sm:$0xff]  ;;  %v5962_v53 = vpop.f32.mrf.mxu0  ;;  %v18335_v16 = vld [vmem:[#allocation2 + $0x3e0] sm:$0xff]  }
 0x386   : > { %v8971_v39 = vadd.f32 %v8970_v14, %v8969_v20  ;;  %v9093_v41 = vsel %vm670_vm3, %v9034_v49, 0.0  ;;  %v9028_v35 = vmul.f32 %v18246_v45, %v18246_v45  ;;  %11810 = vst.msk [vmem:[%s14758_s12 + $0x490] sm:$0xff] %vm670_vm3, %v6072_v7  ;;  %v6081_v60 = vadd.f32 %v13405_v62, %v11771_v57  ;;  %8957 = vadd.xlane.f32.xlu1 %v8956_v37  ;;  %v11689_v14 = vld [vmem:[%s14758_s12 + $0x288] sm:$0xff] }
 0x387   : > { %v8960_v42 = vsel %vm670_vm3, %v18295_v8, 0.0  ;;  %v9037_v20 = vmul.f32 %v18251_v52, %v18251_v52  ;;  %v8916_v49 = vmul.f32 %v16541_v22, %v18287_v63  ;;  %11809 = vst [vmem:[%s14758_s12 + $0x488] sm:$0xff] %v6071_v31  ;;  %v6073_v45 = vadd.f32 %v11763_v48, %v5850_v19  ;;  %v11765_v7 = vld [vmem:[%s14758_s12 + $0x4a8] sm:$0xff]  ;;  %v5852_v57 = vpop.f32.mrf.mxu1  ;;  %v11926_v63 = vld [vmem:[%s14758_s12 + $0x430] sm:$0xff] }
 0x388   : > { %8972 = vadd.xlane.f32.xlu0 %v8971_v39  ;;  %v18339_v51 = vmul.f32 %v16534_v32, %v18298_v54  ;;  %v18342_v52 = vadd.f32 %v18266_v50, %v8910_v17  ;;  %v18344_v37 = vadd.f32 %v9039_v6, %v9038_v15  ;;  %v18347_v31 = vadd.f32 %v11689_v14, %v18092_v33  ;;  %v11764_v39 = vld [vmem:[%s14758_s12 + $0x4a0] sm:$0xff]  ;;  %v13408_v6 = vpop.f32.mrf.mxu0 }
 0x389   : > { %11819 = vst.msk [vmem:[%s14758_s12 + $0x4d8] sm:$0xff] %vm670_vm3, %v6081_v60  ;;  %v6075_v62 = vadd.f32 %v11765_v7, %v5962_v53  ;;  %v9094_v19 = vadd.f32 %v9093_v41, %v18253_v47  ;;  %v18355_v50 = vmul.f32 %v18313_v1, %v18313_v1  ;;  %11811 = vst [vmem:[%s14758_s12 + $0x498] sm:$0xff] %v6073_v45  ;;  %v11780_v15 = vld [vmem:[%s14758_s12 + $0x520] sm:$0xff]  ;;  %13535 = vmatmul.mubr.bf16.gmra.mxu0 %v18317_v2  ;;  %v11690_v47 = vld [vmem:[%s14758_s12 + $0x290] sm:$0xff]  ;;  %v5856_v45 = vpop.f32.mrf.mxu1 }
 0x38a   : > { %21712 = vst [vmem:[#allocation56_spill] sm:$0xff] %v18347_v31  ;;  %v6074_v17 = vadd.f32 %v11764_v39, %v5852_v57  ;;  %v8961_v33 = vadd.f32 %v8960_v42, %v18187_v34  ;;  %v9083_v60 = vsel %vm670_vm3, %v9028_v35, 0.0  ;;  %v18363_v48 = vmul.f32 %v12520_v27, %v16555_v12  ;;  %v12514_v41 = vld [vmem:[%s14758_s12 + $0x250] sm:$0xff]  ;;  %8206 = vmatmul.mubr.bf16.gmra.mxu1 %v18241_v29  ;;  %v11692_v7 = vld [vmem:[%s14758_s12 + $0x2a0] sm:$0xff]  ;;  %v5975_v29 = vpop.f32.mrf.mxu0 }
 0x38b   : > { %11813 = vst.msk [vmem:[%s14758_s12 + $0x4a8] sm:$0xff] %vm670_vm3, %v6075_v62  ;;  %v6090_v14 = vadd.f32 %v13408_v6, %v11780_v15  ;;  %v11766_v53 = vld [vmem:[%s14758_s12 + $0x4b0] sm:$0xff]  ;;  %9095 = vadd.xlane.f32.xlu1 %v9094_v19  ;;  %v9098_v34 = vsel %vm670_vm3, %v9037_v20, 0.0  ;;  %v9031_v35 = vmul.f32 %v18295_v8, %v18295_v8  ;;  %v18374_v27 = vmul.f32 %v8916_v49, %v8916_v49  ;;  %v12523_v62 = vld [vmem:[%s14758_s12 + $0x298] sm:$0xff]  ;;  %v11932_v54 = vld [vmem:[%s14758_s12 + $0x460] sm:$0xff] }
 0x38c   : > { %v18377_v42 = vadd.f32 %v11690_v47, %v18110_v59  ;;  %11812 = vst [vmem:[%s14758_s12 + $0x4a0] sm:$0xff] %v6074_v17  ;;  %v6076_v57 = vadd.f32 %v11766_v53, %v5856_v45  ;;  %8962 = vadd.xlane.f32.xlu0 %v8961_v33  ;;  %v11774_v39 = vld [vmem:[%s14758_s12 + $0x4f0] sm:$0xff]  ;;  %13538 = vmatprep.mubr.bf16.mxu0 %v18335_v16  ;;  %v11693_v59 = vld [vmem:[%s14758_s12 + $0x2a8] sm:$0xff]  ;;  %v11695_v19 = vld [vmem:[%s14758_s12 + $0x2b8] sm:$0xff]  ;;  %v5858_v17 = vpop.f32.mrf.mxu1  ;;  %v13409_v45 = vpop.f32.mrf.mxu0 }
 0x38d   : > { %v8984_v8 = vadd.f32 %v18339_v51, %v8916_v49  ;;  %v18386_v20 = vadd.f32 %v11692_v7, %v18130_v58  ;;  %11828 = vst.msk [vmem:[%s14758_s12 + $0x520] sm:$0xff] %vm670_vm3, %v6090_v14  ;;  %v6084_v6 = vadd.f32 %v11774_v39, %v5975_v29  ;;  %v11767_v15 = vld [vmem:[%s14758_s12 + $0x4b8] sm:$0xff]  ;;  %v9084_v33 = vadd.f32 %v9083_v60, %v18189_v30  ;;  %v11696_v58 = vld [vmem:[%s14758_s12 + $0x2c0] sm:$0xff]  ;;  %v18403_v7 = vld [vmem:[#allocation2 + $0x3e8] sm:$0xff]  }
 0x38e   : > { %21713 = vst [vmem:[#allocation57_spill] sm:$0xff] %v18377_v42  ;;  %8215 = vmatprep.mubr.bf16.mxu1 %v21595_v9  ;;  %v18397_v49 = vmul.f32 %v16541_v22, %v18347_v31  ;;  %11814 = vst [vmem:[%s14758_s12 + $0x4b0] sm:$0xff] %v6076_v57  ;;  %v6077_v47 = vadd.f32 %v11767_v15, %v5858_v17  ;;  %v11783_v53 = vld [vmem:[%s14758_s12 + $0x538] sm:$0xff]  ;;  %v9099_v14 = vadd.f32 %v9098_v34, %v18272_v11  ;;  %v11698_v39 = vld [vmem:[%s14758_s12 + $0x2d0] sm:$0xff]  ;;  %v5860_v17 = vpop.f32.mrf.mxu1 }
 0x38f   : > { %21714 = vst [vmem:[#allocation58_spill] sm:$0xff] %v18386_v20  ;;  %v8985_v30 = vsel %vm670_vm3, %v18363_v48, 0.0  ;;  %v8912_v60 = vmul.f32 %v12514_v41, %v16555_v12  ;;  %v18409_v29 = vadd.f32 %v11693_v59, %v18149_v26  ;;  %11822 = vst.msk [vmem:[%s14758_s12 + $0x4f0] sm:$0xff] %vm670_vm3, %v6084_v6  ;;  %v6093_v57 = vadd.f32 %v13409_v45, %v11783_v53  ;;  %v11769_v11 = vld [vmem:[%s14758_s12 + $0x4c8] sm:$0xff]  ;;  %v18417_v31 = vld [vmem:[#allocation2 + $0x3f0] sm:$0xff]  }
 0x390   : > { %9085 = vadd.xlane.f32.xlu1 %v9084_v33  ;;  %v9088_v34 = vsel %vm670_vm3, %v9031_v35, 0.0  ;;  %v8921_v15 = vmul.f32 %v12523_v62, %v16555_v12  ;;  %v18420_v26 = vadd.f32 %v11695_v19, %v18166_v40  ;;  %v18423_v41 = vadd.f32 %v11696_v58, %v18179_v36  ;;  %v12517_v59 = vld [vmem:[%s14758_s12 + $0x268] sm:$0xff]  ;;  %11815 = vst [vmem:[%s14758_s12 + $0x4b8] sm:$0xff] %v6077_v47  ;;  %v5978_v33 = vpop.f32.mrf.mxu0  ;;  %v12371_v62 = vld [vmem:[%s14758_s12 + $0x258] sm:$0xff]  ;;  %v5862_v36 = vpop.f32.mrf.mxu1  ;;  %v11770_v19 = vld [vmem:[%s14758_s12 + $0x4d0] sm:$0xff] }
 0x391   : > { %21715 = vst [vmem:[#allocation59_spill] sm:$0xff] %v18409_v29  ;;  %v6079_v6 = vadd.f32 %v11769_v11, %v5860_v17  ;;  %9100 = vadd.xlane.f32.xlu0 %v9099_v14  ;;  %v11777_v45 = vld [vmem:[%s14758_s12 + $0x508] sm:$0xff]  ;;  %v8920_v35 = vmul.f32 %v16534_v32, %v18377_v42  ;;  %v18432_v53 = vadd.f32 %v11698_v39, %v18204_v24  ;;  %11831 = vst.msk [vmem:[%s14758_s12 + $0x538] sm:$0xff] %vm670_vm3, %v6093_v57  ;;  %v11792_v11 = vld [vmem:[%s14758_s12 + $0x580] sm:$0xff] }
 0x392   : > { %21716 = vst [vmem:[#allocation60_spill] sm:$0xff] %v18420_v26  ;;  %21717 = vst [vmem:[#allocation61_spill] sm:$0xff] %v18423_v41  ;;  %v6087_v40 = vadd.f32 %v11777_v45, %v5978_v33  ;;  %v8986_v58 = vadd.f32 %v8985_v30, %v8984_v8  ;;  %v9046_v47 = vmul.f32 %v18363_v48, %v18363_v48  ;;  %v13412_v17 = vpop.f32.mrf.mxu0  ;;  %13539 = vmatmul.mubr.bf16.gmra.mxu0 %v18403_v7  ;;  %v5866_v48 = vpop.f32.mrf.mxu1  ;;  %v11772_v30 = vld [vmem:[%s14758_s12 + $0x4e0] sm:$0xff]  ;;  %v11786_v45 = vld [vmem:[%s14758_s12 + $0x550] sm:$0xff] }
 0x393   : > { %21718 = vst [vmem:[#allocation62_spill] sm:$0xff] %v18432_v53  ;;  %11817 = vst [vmem:[%s14758_s12 + $0x4c8] sm:$0xff] %v6079_v6  ;;  %v6080_v14 = vadd.f32 %v11770_v19, %v5862_v36  ;;  %v9089_v24 = vadd.f32 %v9088_v34, %v18200_v43  ;;  %v8975_v39 = vsel %vm670_vm3, %v8912_v60, 0.0  ;;  %v9045_v57 = vmul.f32 %v18339_v51, %v18339_v51  ;;  %v11699_v36 = vld [vmem:[%s14758_s12 + $0x2d8] sm:$0xff] }
 0x394   : > { %11825 = vst.msk [vmem:[%s14758_s12 + $0x508] sm:$0xff] %vm670_vm3, %v6087_v40  ;;  %v6102_v8 = vadd.f32 %v13412_v17, %v11792_v11  ;;  %8216 = vmatmul.mubr.bf16.gmra.mxu1 %v18262_v0  ;;  %8987 = vadd.xlane.f32.xlu1 %v8986_v58  ;;  %v8990_v6 = vsel %vm670_vm3, %v8921_v15, 0.0  ;;  %v18452_v43 = vmul.f32 %v12371_v62, %v16541_v22  ;;  %v5991_v33 = vpop.f32.mrf.mxu0  ;;  %v5868_v19 = vpop.f32.mrf.mxu1  ;;  %v12526_v11 = vld [vmem:[%s14758_s12 + $0x2b0] sm:$0xff] }
 0x395   : > { %v8915_v34 = vmul.f32 %v12517_v59, %v16555_v12  ;;  %11818 = vst [vmem:[%s14758_s12 + $0x4d0] sm:$0xff] %v6080_v14  ;;  %v6082_v51 = vadd.f32 %v11772_v30, %v5866_v48  ;;  %9090 = vadd.xlane.f32.xlu0 %v9089_v24  ;;  %v8989_v40 = vadd.f32 %v8920_v35, %v18397_v49  ;;  %v11773_v59 = vld [vmem:[%s14758_s12 + $0x4e8] sm:$0xff]  ;;  %v9113_v14 = vsel %vm670_vm3, %v9046_v47, 0.0  ;;  %v11795_v48 = vld [vmem:[%s14758_s12 + $0x598] sm:$0xff] }
 0x396   : > { %13542 = vmatprep.mubr.bf16.mxu0 %v18417_v31  ;;  %v9040_v0 = vmul.f32 %v8912_v60, %v8912_v60  ;;  %11840 = vst.msk [vmem:[%s14758_s12 + $0x580] sm:$0xff] %vm670_vm3, %v6102_v8  ;;  %v6096_v62 = vadd.f32 %v11786_v45, %v5991_v33  ;;  %v8976_v58 = vadd.f32 %v8975_v39, %v18342_v52  ;;  %v13413_v60 = vpop.f32.mrf.mxu0  ;;  %v18469_v8 = vld [vmem:[#allocation2 + $0x3f8] sm:$0xff]   ;;  %v5870_v47 = vpop.f32.mrf.mxu1 }
 0x397   : > { %8225 = vmatprep.mubr.bf16.mxu1 %v21595_v9  ;;  %v9049_v17 = vmul.f32 %v8921_v15, %v8921_v15  ;;  %11820 = vst [vmem:[%s14758_s12 + $0x4e0] sm:$0xff] %v6082_v51  ;;  %v6083_v24 = vadd.f32 %v11773_v59, %v5868_v19  ;;  %v8991_v30 = vadd.f32 %v8990_v6, %v8989_v40  ;;  %v11775_v39 = vld [vmem:[%s14758_s12 + $0x4f8] sm:$0xff]  ;;  %v8980_v51 = vsel %vm670_vm3, %v8915_v34, 0.0  ;;  %v11776_v19 = vld [vmem:[%s14758_s12 + $0x500] sm:$0xff] }
 0x398   : > { %v9112_v33 = vadd.f32 %v9045_v57, %v18374_v27  ;;  %v9048_v45 = vmul.f32 %v8920_v35, %v8920_v35  ;;  %v18473_v52 = vadd.f32 %v11699_v36, %v18224_v38  ;;  %11834 = vst.msk [vmem:[%s14758_s12 + $0x550] sm:$0xff] %vm670_vm3, %v6096_v62  ;;  %v6105_v15 = vadd.f32 %v13413_v60, %v11795_v48  ;;  %v5994_v38 = vpop.f32.mrf.mxu0  ;;  %v11789_v35 = vld [vmem:[%s14758_s12 + $0x568] sm:$0xff]  ;;  %v5872_v62 = vpop.f32.mrf.mxu1 }
 0x399   : > { %8977 = vadd.xlane.f32.xlu1 %v8976_v58  ;;  %v8979_v6 = vadd.f32 %v18313_v1, %v18452_v43  ;;  %11821 = vst [vmem:[%s14758_s12 + $0x4e8] sm:$0xff] %v6083_v24  ;;  %v6085_v27 = vadd.f32 %v11775_v39, %v5870_v47  ;;  %8992 = vadd.xlane.f32.xlu0 %v8991_v30  ;;  %v9103_v40 = vsel %vm670_vm3, %v9040_v0, 0.0  ;;  %v9118_v59 = vsel %vm670_vm3, %v9049_v17, 0.0  ;;  %v11804_v24 = vld [vmem:[%s14758_s12 + $0x5e0] sm:$0xff] }
 0x39a   : > { %21719 = vst [vmem:[#allocation63_spill] sm:$0xff] %v18473_v52  ;;  %v9114_v57 = vadd.f32 %v9113_v14, %v9112_v33  ;;  %v9047_v36 = vmul.f32 %v18397_v49, %v18397_v49  ;;  %11843 = vst.msk [vmem:[%s14758_s12 + $0x598] sm:$0xff] %vm670_vm3, %v6105_v15  ;;  %v6099_v1 = vadd.f32 %v11789_v35, %v5994_v38  ;;  %v13416_v14 = vpop.f32.mrf.mxu0  ;;  %13543 = vmatmul.mubr.bf16.gmra.mxu0 %v18469_v8  ;;  %v12532_v17 = vld [vmem:[%s14758_s12 + $0x2e0] sm:$0xff]  ;;  %v12529_v33 = vld [vmem:[%s14758_s12 + $0x2c8] sm:$0xff]  ;;  %v5876_v47 = vpop.f32.mrf.mxu1 }
 0x39b   : > { %v18492_v58 = vmul.f32 %v16534_v32, %v18409_v29  ;;  %v18495_v0 = vmul.f32 %v12526_v11, %v16555_v12  ;;  %11823 = vst [vmem:[%s14758_s12 + $0x4f8] sm:$0xff] %v6085_v27  ;;  %v6086_v49 = vadd.f32 %v11776_v19, %v5872_v62  ;;  %v8981_v60 = vadd.f32 %v8980_v51, %v8979_v6  ;;  %v11778_v11 = vld [vmem:[%s14758_s12 + $0x510] sm:$0xff]  ;;  %v11807_v62 = vld [vmem:[%s14758_s12 + $0x5f8] sm:$0xff] }
 0x39c   : > { %v9117_v48 = vadd.f32 %v9048_v45, %v9047_v36  ;;  %v9043_v30 = vmul.f32 %v8915_v34, %v8915_v34  ;;  %11837 = vst.msk [vmem:[%s14758_s12 + $0x568] sm:$0xff] %vm670_vm3, %v6099_v1  ;;  %v6114_v15 = vadd.f32 %v13416_v14, %v11804_v24  ;;  %8226 = vmatmul.mubr.bf16.gmra.mxu1 %v18317_v2  ;;  %v6007_v6 = vpop.f32.mrf.mxu0  ;;  %v11798_v51 = vld [vmem:[%s14758_s12 + $0x5b0] sm:$0xff]  ;;  %v5878_v35 = vpop.f32.mrf.mxu1  ;;  %v11701_v14 = vld [vmem:[%s14758_s12 + $0x2e8] sm:$0xff] }
 0x39d   : > { %9115 = vadd.xlane.f32.xlu1 %v9114_v57  ;;  %v18508_v39 = vmul.f32 %v16541_v22, %v18386_v20  ;;  %v9041_v45 = vmul.f32 %v18452_v43, %v18452_v43  ;;  %11824 = vst [vmem:[%s14758_s12 + $0x500] sm:$0xff] %v6086_v49  ;;  %v6088_v34 = vadd.f32 %v11778_v11, %v5876_v47  ;;  %v11779_v43 = vld [vmem:[%s14758_s12 + $0x518] sm:$0xff]  ;;  %v8995_v36 = vsel %vm670_vm3, %v18495_v0, 0.0  ;;  %v11702_v24 = vld [vmem:[%s14758_s12 + $0x2f0] sm:$0xff] }
 0x39e   : > { %8982 = vadd.xlane.f32.xlu0 %v8981_v60  ;;  %v9104_v27 = vadd.f32 %v9103_v40, %v18344_v37  ;;  %v9119_v38 = vadd.f32 %v9118_v59, %v9117_v48  ;;  %8235 = vmatprep.mubr.bf16.mxu1 %v21595_v9  ;;  %11852 = vst.msk [vmem:[%s14758_s12 + $0x5e0] sm:$0xff] %vm670_vm3, %v6114_v15  ;;  %v13417_v1 = vpop.f32.mrf.mxu0  ;;  %v9108_v19 = vsel %vm670_vm3, %v9043_v30, 0.0  ;;  %v5880_v48 = vpop.f32.mrf.mxu1  ;;  %v11781_v15 = vld [vmem:[%s14758_s12 + $0x528] sm:$0xff]  ;;  %v12535_v11 = vld [vmem:[%s14758_s12 + $0x2f8] sm:$0xff] }
 0x39f   : > { %v6108_v2 = vadd.f32 %v11798_v51, %v6007_v6  ;;  %v8994_v57 = vadd.f32 %v18492_v58, %v18508_v39  ;;  %v18525_v37 = vmul.f32 %v16534_v32, %v18473_v52  ;;  %11826 = vst [vmem:[%s14758_s12 + $0x510] sm:$0xff] %v6088_v34  ;;  %v6089_v40 = vadd.f32 %v11779_v43, %v5878_v35  ;;  %v11782_v35 = vld [vmem:[%s14758_s12 + $0x530] sm:$0xff] }
 0x3a0   : > { %v8930_v59 = vmul.f32 %v12532_v17, %v16555_v12  ;;  %v18532_v49 = vmul.f32 %v12529_v33, %v16555_v12  ;;  %v6117_v60 = vadd.f32 %v13417_v1, %v11807_v62  ;;  %v9107_v47 = vadd.f32 %v18355_v50, %v9041_v45  ;;  %v6010_v51 = vpop.f32.mrf.mxu0  ;;  %v11801_v50 = vld [vmem:[%s14758_s12 + $0x5c8] sm:$0xff] }
 0x3a1   : > { %11846 = vst.msk [vmem:[%s14758_s12 + $0x5b0] sm:$0xff] %vm670_vm3, %v6108_v2  ;;  %9105 = vadd.xlane.f32.xlu1 %v9104_v27  ;;  %v18542_v30 = vmul.f32 %v16541_v22, %v18432_v53  ;;  %v8926_v17 = vmul.f32 %v16534_v32, %v18423_v41  ;;  %v18547_v33 = vadd.f32 %v11701_v14, %v18237_v23  ;;  %11827 = vst [vmem:[%s14758_s12 + $0x518] sm:$0xff] %v6089_v40  ;;  %v5882_v2 = vpop.f32.mrf.mxu1  ;;  %v11914_v41 = vld [vmem:[%s14758_s12 + $0x3d0] sm:$0xff] }
 0x3a2   : > { %v18551_v34 = vadd.f32 %v11702_v24, %v18259_v61  ;;  %v6091_v6 = vadd.f32 %v11781_v15, %v5880_v48  ;;  %9120 = vadd.xlane.f32.xlu0 %v9119_v38  ;;  %v8996_v45 = vadd.f32 %v8995_v36, %v8994_v57  ;;  %11855 = vst.msk [vmem:[%s14758_s12 + $0x5f8] sm:$0xff] %vm670_vm3, %v6117_v60  ;;  %v18563_v40 = vpop.f32.mrf.mxu0  ;;  %v9005_v57 = vsel %vm670_vm3, %v8930_v59, 0.0 }
 0x3a3   : > { %21720 = vst [vmem:[#allocation64_spill] sm:$0xff] %v18547_v33  ;;  %v6111_v27 = vadd.f32 %v11801_v50, %v6010_v51  ;;  %v9109_v23 = vadd.f32 %v9108_v19, %v9107_v47  ;;  %v9004_v43 = vadd.f32 %v18525_v37, %v18542_v30  ;;  %v8925_v61 = vmul.f32 %v16541_v22, %v18420_v26  ;;  %v5886_v62 = vpop.f32.mrf.mxu1  ;;  %v11784_v19 = vld [vmem:[%s14758_s12 + $0x540] sm:$0xff]  ;;  %v11785_v47 = vld [vmem:[%s14758_s12 + $0x548] sm:$0xff]  ;;  %v11923_v26 = vld [vmem:[%s14758_s12 + $0x418] sm:$0xff] }
 0x3a4   : > { %21721 = vst [vmem:[#allocation65_spill] sm:$0xff] %v18551_v34  ;;  %11829 = vst [vmem:[%s14758_s12 + $0x528] sm:$0xff] %v6091_v6  ;;  %v6092_v38 = vadd.f32 %v11782_v35, %v5882_v2  ;;  %v9000_v36 = vsel %vm670_vm3, %v18532_v49, 0.0  ;;  %v9052_v1 = vmul.f32 %v18495_v0, %v18495_v0  ;;  %8236 = vmatmul.mubr.bf16.gmra.mxu1 %v18335_v16  ;;  %v18578_v0 = vpop.f32.mrf.mxu0 }
 0x3a5   : > { %11849 = vst.msk [vmem:[%s14758_s12 + $0x5c8] sm:$0xff] %vm670_vm3, %v6111_v27  ;;  %8997 = vadd.xlane.f32.xlu1 %v8996_v45  ;;  %v8999_v14 = vadd.f32 %v8926_v17, %v8925_v61  ;;  %v9051_v24 = vmul.f32 %v18492_v58, %v18492_v58  ;;  %v8933_v60 = vmul.f32 %v12535_v11, %v16555_v12  ;;  %v5888_v16 = vpop.f32.mrf.mxu1 }
 0x3a6   : > { %11830 = vst [vmem:[%s14758_s12 + $0x530] sm:$0xff] %v6092_v38  ;;  %v6094_v48 = vadd.f32 %v11784_v19, %v5886_v62  ;;  %9110 = vadd.xlane.f32.xlu0 %v9109_v23  ;;  %8245 = vmatprep.mubr.bf16.mxu1 %v21595_v9  ;;  %v8932_v15 = vmul.f32 %v16534_v32, %v18551_v34  ;;  %v18587_v50 = vpop.f32.mrf.mxu0  ;;  %v9123_v45 = vsel %vm670_vm3, %v9052_v1, 0.0  ;;  %v11787_v23 = vld [vmem:[%s14758_s12 + $0x558] sm:$0xff]  ;;  %v11905_v34 = vld [vmem:[%s14758_s12 + $0x388] sm:$0xff] }
 0x3a7   : > { %v9006_v6 = vadd.f32 %v9005_v57, %v9004_v43  ;;  %v9001_v51 = vadd.f32 %v9000_v36, %v8999_v14  ;;  %v9050_v58 = vmul.f32 %v18508_v39, %v18508_v39  ;;  %v6095_v11 = vadd.f32 %v11785_v47, %v5888_v16  ;;  %v5890_v35 = vpop.f32.mrf.mxu1  ;;  %v11788_v14 = vld [vmem:[%s14758_s12 + $0x560] sm:$0xff] }
 0x3a8   : > { %11832 = vst [vmem:[%s14758_s12 + $0x540] sm:$0xff] %v6094_v48  ;;  %v8931_v27 = vmul.f32 %v16541_v22, %v18547_v33  ;;  %v9058_v2 = vmul.f32 %v8930_v59, %v8930_v59  ;;  %v9010_v38 = vsel %vm670_vm3, %v8933_v60, 0.0  ;;  %v9057_v39 = vmul.f32 %v18525_v37, %v18525_v37  ;;  %v18599_v1 = vpop.f32.mrf.mxu0 }
 0x3a9   : > { %9007 = vadd.xlane.f32.xlu1 %v9006_v6  ;;  %v9122_v43 = vadd.f32 %v9051_v24, %v9050_v58  ;;  %v9055_v57 = vmul.f32 %v18532_v49, %v18532_v49  ;;  %11833 = vst [vmem:[%s14758_s12 + $0x548] sm:$0xff] %v6095_v11  ;;  %v6097_v36 = vadd.f32 %v11787_v23, %v5890_v35  ;;  %v5892_v19 = vpop.f32.mrf.mxu1  ;;  %v11790_v58 = vld [vmem:[%s14758_s12 + $0x570] sm:$0xff] }
 0x3aa   : > { %9002 = vadd.xlane.f32.xlu0 %v9001_v51  ;;  %v9009_v59 = vadd.f32 %v8932_v15, %v8931_v27  ;;  %v9054_v62 = vmul.f32 %v8926_v17, %v8926_v17  ;;  %v9056_v48 = vmul.f32 %v18542_v30, %v18542_v30  ;;  %v6098_v37 = vadd.f32 %v11788_v14, %v5892_v19  ;;  %v18605_v16 = vpop.f32.mrf.mxu0 }
 0x3ab   : > { %v9124_v24 = vadd.f32 %v9123_v45, %v9122_v43  ;;  %11835 = vst [vmem:[%s14758_s12 + $0x558] sm:$0xff] %v6097_v36  ;;  %v9133_v47 = vsel %vm670_vm3, %v9058_v2, 0.0  ;;  %v9053_v6 = vmul.f32 %v8925_v61, %v8925_v61  ;;  %v5896_v51 = vpop.f32.mrf.mxu1  ;;  %v9128_v11 = vsel %vm670_vm3, %v9055_v57, 0.0  ;;  %v11791_v43 = vld [vmem:[%s14758_s12 + $0x578] sm:$0xff] }
 0x3ac   : > { %v9011_v49 = vadd.f32 %v9010_v38, %v9009_v59  ;;  %8246 = vmatmul.mubr.bf16.gmra.mxu1 %v18403_v7  ;;  %v9132_v17 = vadd.f32 %v9057_v39, %v9056_v48  ;;  %v9061_v45 = vmul.f32 %v8933_v60, %v8933_v60  ;;  %11836 = vst [vmem:[%s14758_s12 + $0x560] sm:$0xff] %v6098_v37  ;;  %v18612_v35 = vpop.f32.mrf.mxu0  ;;  %v11793_v59 = vld [vmem:[%s14758_s12 + $0x588] sm:$0xff]  ;;  %v11794_v48 = vld [vmem:[%s14758_s12 + $0x590] sm:$0xff] }
 0x3ad   : > { %9125 = vadd.xlane.f32.xlu1 %v9124_v24  ;;  %v6100_v30 = vadd.f32 %v11790_v58, %v5896_v51  ;;  %v9127_v2 = vadd.f32 %v9054_v62, %v9053_v6  ;;  %8255 = vmatprep.mubr.bf16.mxu1 %v21595_v9  ;;  %v9060_v61 = vmul.f32 %v8932_v15, %v8932_v15  ;;  %v5898_v23 = vpop.f32.mrf.mxu1  ;;  %v11796_v6 = vld [vmem:[%s14758_s12 + $0x5a0] sm:$0xff] }
 0x3ae   : > { %9012 = vadd.xlane.f32.xlu0 %v9011_v49  ;;  %v9134_v38 = vadd.f32 %v9133_v47, %v9132_v17  ;;  %v6101_v7 = vadd.f32 %v11791_v43, %v5898_v23  ;;  %v18617_v39 = vpop.f32.mrf.mxu0  ;;  %v9059_v57 = vmul.f32 %v8931_v27, %v8931_v27  ;;  %v9138_v62 = vsel %vm670_vm3, %v9061_v45, 0.0 }
 0x3af   : > { %11838 = vst [vmem:[%s14758_s12 + $0x570] sm:$0xff] %v6100_v30  ;;  %v9129_v60 = vadd.f32 %v9128_v11, %v9127_v2  ;;  %v5900_v36 = vpop.f32.mrf.mxu1  ;;  %v11797_v11 = vld [vmem:[%s14758_s12 + $0x5a8] sm:$0xff] }
 0x3b0   : > { %11839 = vst [vmem:[%s14758_s12 + $0x578] sm:$0xff] %v6101_v7  ;;  %v6103_v15 = vadd.f32 %v11793_v59, %v5900_v36  ;;  %v18622_v19 = vpop.f32.mrf.mxu0  ;;  %v9137_v14 = vadd.f32 %v9060_v61, %v9059_v57  ;;  %v11799_v61 = vld [vmem:[%s14758_s12 + $0x5b8] sm:$0xff]  ;;  %v11802_v57 = vld [vmem:[%s14758_s12 + $0x5d0] sm:$0xff] }
 0x3b1   : > { %9135 = vadd.xlane.f32.xlu1 %v9134_v38  ;;  %v5902_v24 = vpop.f32.mrf.mxu1  ;;  %v11800_v38 = vld [vmem:[%s14758_s12 + $0x5c0] sm:$0xff] }
 0x3b2   : > { %9130 = vadd.xlane.f32.xlu0 %v9129_v60  ;;  %11841 = vst [vmem:[%s14758_s12 + $0x588] sm:$0xff] %v6103_v15  ;;  %v6104_v37 = vadd.f32 %v11794_v48, %v5902_v24  ;;  %v18626_v27 = vpop.f32.mrf.mxu0  ;;  %v9139_v49 = vadd.f32 %v9138_v62, %v9137_v14  ;;  %v11803_v15 = vld [vmem:[%s14758_s12 + $0x5d8] sm:$0xff] }
 0x3b3   : > { %v5906_v47 = vpop.f32.mrf.mxu1 }
 0x3b4   : > { %8256 = vmatmul.mubr.bf16.gmra.mxu1 %v18417_v31  ;;  %11842 = vst [vmem:[%s14758_s12 + $0x590] sm:$0xff] %v6104_v37  ;;  %v6106_v51 = vadd.f32 %v11796_v6, %v5906_v47  ;;  %v18631_v58 = vpop.f32.mrf.mxu0  ;;  %v11805_v37 = vld [vmem:[%s14758_s12 + $0x5e8] sm:$0xff] }
 0x3b5   : > { %8265 = vmatprep.mubr.bf16.mxu1 %v21595_v9  ;;  %v5908_v17 = vpop.f32.mrf.mxu1 }
 0x3b6   : > { %9140 = vadd.xlane.f32.xlu0 %v9139_v49  ;;  %11844 = vst [vmem:[%s14758_s12 + $0x5a0] sm:$0xff] %v6106_v51  ;;  %v6107_v45 = vadd.f32 %v11797_v11, %v5908_v17  ;;  %v18636_v30 = vpop.f32.mrf.mxu0  ;;  %v18656_v49 = vpop.xlane.xlu0 %8643  ;;  %v11806_v51 = vld [vmem:[%s14758_s12 + $0x5f0] sm:$0xff] }
 0x3b7   : > { %v5910_v2 = vpop.f32.mrf.mxu1 }
 0x3b8   : > { %11845 = vst [vmem:[%s14758_s12 + $0x5a8] sm:$0xff] %v6107_v45  ;;  %v6109_v31 = vadd.f32 %v11799_v61, %v5910_v2  ;;  %v18640_v23 = vpop.f32.mrf.mxu0  ;;  %v11896_v2 = vld [vmem:[%s14758_s12 + $0x340] sm:$0xff] }
 0x3b9   : > { %v5912_v43 = vpop.f32.mrf.mxu1 }
 0x3ba   : > { %11847 = vst [vmem:[%s14758_s12 + $0x5b8] sm:$0xff] %v6109_v31  ;;  %v6110_v9 = vadd.f32 %v11800_v38, %v5912_v43  ;;  %v18644_v7 = vpop.f32.mrf.mxu0  ;;  %v11890_v38 = vld [vmem:[%s14758_s12 + $0x310] sm:$0xff] }
 0x3bb   : > { %v5916_v60 = vpop.f32.mrf.mxu1 }
 0x3bc   : > { %8266 = vmatmul.mubr.bf16.gmra.mxu1 %v18469_v8  ;;  %11848 = vst [vmem:[%s14758_s12 + $0x5c0] sm:$0xff] %v6110_v9  ;;  %v6112_v36 = vadd.f32 %v11802_v57, %v5916_v60  ;;  %v18649_v59 = vpop.f32.mrf.mxu0  ;;  %v18670_v9 = vpop.xlane.xlu0 %8633 }
 0x3bd   : > { %v5918_v62 = vpop.f32.mrf.mxu1 }
 0x3be   : > { %11850 = vst [vmem:[%s14758_s12 + $0x5d0] sm:$0xff] %v6112_v36  ;;  %v6113_v14 = vadd.f32 %v11803_v15, %v5918_v62  ;;  %v18653_v24 = vpop.f32.mrf.mxu0  ;;  %v18676_v36 = vpop.xlane.xlu1 %8771  ;;  %v11899_v15 = vld [vmem:[%s14758_s12 + $0x358] sm:$0xff] }
 0x3bf   : > { %v5920_v48 = vpop.f32.mrf.mxu1 }
 0x3c0   : > { %11851 = vst [vmem:[%s14758_s12 + $0x5d8] sm:$0xff] %v6113_v14  ;;  %v6115_v8 = vadd.f32 %v11805_v37, %v5920_v48  ;;  %v18659_v47 = vpop.f32.mrf.mxu0 }
 0x3c1   : > { %v5922_v6 = vpop.f32.mrf.mxu1 }
 0x3c2   : > { %11853 = vst [vmem:[%s14758_s12 + $0x5e8] sm:$0xff] %v6115_v8  ;;  %v6116_v17 = vadd.f32 %v11806_v51, %v5922_v6  ;;  %v18663_v11 = vpop.f32.mrf.mxu0  ;;  %v11893_v8 = vld [vmem:[%s14758_s12 + $0x328] sm:$0xff] }
 0x3c3   : > { %v13436_v45 = vpop.f32.mrf.mxu1 }
 0x3c4   : > { %11854 = vst [vmem:[%s14758_s12 + $0x5f0] sm:$0xff] %v6116_v17  ;;  %v6722_v61 = vadd.f32 %v13436_v45, %v11896_v2  ;;  %v18667_v31 = vpop.f32.mrf.mxu0  ;;  %v11908_v45 = vld [vmem:[%s14758_s12 + $0x3a0] sm:$0xff]  ;;  %v18689_v2 = vpop.xlane.xlu0 %8648 }
 0x3c5   : > { %v6603_v43 = vpop.f32.mrf.mxu1 }
 0x3c6   : > { %11944 = vst.msk [vmem:[%s14758_s12 + $0x340] sm:$0xff] %vm670_vm3, %v6722_v61  ;;  %v6716_v60 = vadd.f32 %v11890_v38, %v6603_v43  ;;  %v18674_v57 = vpop.f32.mrf.mxu0  ;;  %v18695_v38 = vpop.xlane.xlu1 %8761 }
 0x3c7   : > { %v13437_v62 = vpop.f32.mrf.mxu1  ;;  %21722 = vst [vmem:[#allocation66_spill] sm:$0xff] %v18695_v38 }
 0x3c8   : > { %11938 = vst.msk [vmem:[%s14758_s12 + $0x310] sm:$0xff] %vm670_vm3, %v6716_v60  ;;  %v6725_v14 = vadd.f32 %v13437_v62, %v11899_v15  ;;  %v18681_v48 = vpop.f32.mrf.mxu0  ;;  %v11902_v62 = vld [vmem:[%s14758_s12 + $0x370] sm:$0xff]  ;;  %v18708_v33 = vpop.xlane.xlu0 %8776 }
 0x3c9   : > { %v6606_v37 = vpop.f32.mrf.mxu1  ;;  %21723 = vst [vmem:[#allocation67_spill] sm:$0xff] %v18708_v33 }
 0x3ca   : > { %11947 = vst.msk [vmem:[%s14758_s12 + $0x358] sm:$0xff] %vm670_vm3, %v6725_v14  ;;  %v6719_v6 = vadd.f32 %v11893_v8, %v6606_v37  ;;  %v18686_v51 = vpop.f32.mrf.mxu0  ;;  %v11911_v8 = vld [vmem:[%s14758_s12 + $0x3b8] sm:$0xff] }
 0x3cb   : > { %v13440_v17 = vpop.f32.mrf.mxu1 }
 0x3cc   : > { %11941 = vst.msk [vmem:[%s14758_s12 + $0x328] sm:$0xff] %vm670_vm3, %v6719_v6  ;;  %v6734_v61 = vadd.f32 %v13440_v17, %v11908_v45  ;;  %v18693_v43 = vpop.f32.mrf.mxu0  ;;  %v18727_v29 = vpop.xlane.xlu0 %8766 }
 0x3cd   : > { %v6619_v60 = vpop.f32.mrf.mxu1  ;;  %21724 = vst [vmem:[#allocation68_spill] sm:$0xff] %v18727_v29 }
 0x3ce   : > { %11956 = vst.msk [vmem:[%s14758_s12 + $0x3a0] sm:$0xff] %vm670_vm3, %v6734_v61  ;;  %v6728_v15 = vadd.f32 %v11902_v62, %v6619_v60  ;;  %v18700_v14 = vpop.f32.mrf.mxu0  ;;  %v18714_v62 = vpop.xlane.xlu1 %8638 }
 0x3cf   : > { %v13441_v37 = vpop.f32.mrf.mxu1 }
 0x3d0   : > { %11950 = vst.msk [vmem:[%s14758_s12 + $0x370] sm:$0xff] %vm670_vm3, %v6728_v15  ;;  %v6737_v6 = vadd.f32 %v13441_v37, %v11911_v8  ;;  %v18705_v17 = vpop.f32.mrf.mxu0  ;;  %v11920_v15 = vld [vmem:[%s14758_s12 + $0x400] sm:$0xff]  ;;  %v18746_v25 = vpop.xlane.xlu0 %8668 }
 0x3d1   : > { %v6622_v45 = vpop.f32.mrf.mxu1  ;;  %21726 = vst [vmem:[#allocation70_spill] sm:$0xff] %v18746_v25 }
 0x3d2   : > { %11959 = vst.msk [vmem:[%s14758_s12 + $0x3b8] sm:$0xff] %vm670_vm3, %v6737_v6  ;;  %v6731_v61 = vadd.f32 %v11905_v34, %v6622_v45  ;;  %v18712_v60 = vpop.f32.mrf.mxu0 }
 0x3d3   : > { %v13444_v52 = vpop.f32.mrf.mxu1  ;;  %v12021_v46 = vld [vmem:[%s14758_s12 + $0x328] sm:$0xff] }
 0x3d4   : > { %11953 = vst.msk [vmem:[%s14758_s12 + $0x388] sm:$0xff] %vm670_vm3, %v6731_v61  ;;  %v6746_v37 = vadd.f32 %v13444_v52, %v11920_v15  ;;  %v18719_v8 = vpop.f32.mrf.mxu0  ;;  %v18733_v15 = vpop.xlane.xlu1 %8663 }
 0x3d5   : > { %v6635_v53 = vpop.f32.mrf.mxu1  ;;  %21725 = vst [vmem:[#allocation69_spill] sm:$0xff] %v18733_v15 }
 0x3d6   : > { %11968 = vst.msk [vmem:[%s14758_s12 + $0x400] sm:$0xff] %vm670_vm3, %v6746_v37  ;;  %v6740_v34 = vadd.f32 %v11914_v41, %v6635_v53  ;;  %v18724_v6 = vpop.f32.mrf.mxu0  ;;  %v11917_v37 = vld [vmem:[%s14758_s12 + $0x3e8] sm:$0xff] }
 0x3d7   : > { %v13445_v45 = vpop.f32.mrf.mxu1 }
 0x3d8   : > { %11962 = vst.msk [vmem:[%s14758_s12 + $0x3d0] sm:$0xff] %vm670_vm3, %v6740_v34  ;;  %v6749_v52 = vadd.f32 %v13445_v45, %v11923_v26  ;;  %v18731_v61 = vpop.f32.mrf.mxu0  ;;  %v18751_v18 = vpop.xlane.xlu1 %8653 }
 0x3d9   : > { %v6638_v20 = vpop.f32.mrf.mxu1  ;;  %21727 = vst [vmem:[#allocation71_spill] sm:$0xff] %v18751_v18 }
 0x3da   : > { %11971 = vst.msk [vmem:[%s14758_s12 + $0x418] sm:$0xff] %vm670_vm3, %v6749_v52  ;;  %v6743_v41 = vadd.f32 %v11917_v37, %v6638_v20  ;;  %v18738_v53 = vpop.f32.mrf.mxu0  ;;  %v11933_v37 = vld [vmem:[%s14758_s12 + $0x468] sm:$0xff] }
 0x3db   : > { %v13448_v42 = vpop.f32.mrf.mxu1  ;;  %v12033_v29 = vld [vmem:[%s14758_s12 + $0x388] sm:$0xff] }
 0x3dc   : > { %11965 = vst.msk [vmem:[%s14758_s12 + $0x3e8] sm:$0xff] %vm670_vm3, %v6743_v41  ;;  %v6758_v26 = vadd.f32 %v13448_v42, %v11932_v54  ;;  %v18743_v34 = vpop.f32.mrf.mxu0  ;;  %v11935_v41 = vld [vmem:[%s14758_s12 + $0x478] sm:$0xff] }
 0x3dd   : > { %v6651_v45 = vpop.f32.mrf.mxu1 }
 0x3de   : > { %11980 = vst.msk [vmem:[%s14758_s12 + $0x460] sm:$0xff] %vm670_vm3, %v6758_v26  ;;  %v6752_v20 = vadd.f32 %v11926_v63, %v6651_v45  ;;  %v6564_v52 = vpop.f32.mrf.mxu0  ;;  %v11929_v45 = vld [vmem:[%s14758_s12 + $0x448] sm:$0xff] }
 0x3df   : > { %v6759_v54 = vadd.f32 %v11933_v37, %v6564_v52  ;;  %v13449_v42 = vpop.f32.mrf.mxu1  ;;  %v12024_v37 = vld [vmem:[%s14758_s12 + $0x340] sm:$0xff] }
 0x3e0   : > { %11974 = vst.msk [vmem:[%s14758_s12 + $0x430] sm:$0xff] %vm670_vm3, %v6752_v20  ;;  %v6761_v4 = vadd.f32 %v13449_v42, %v11935_v41  ;;  %v6566_v13 = vpop.f32.mrf.mxu0  ;;  %v18765_v41 = vpop.xlane.xlu0 %8658 }
 0x3e1   : > { %11981 = vst [vmem:[%s14758_s12 + $0x468] sm:$0xff] %v6759_v54  ;;  %v6760_v26 = vadd.f32 %v11934_v10, %v6566_v13  ;;  %v6654_v63 = vpop.f32.mrf.mxu1  ;;  %21728 = vst [vmem:[#allocation72_spill] sm:$0xff] %v18765_v41  ;;  %v6714_v10 = vadd.f32 %v11888_v5, %v18563_v40  ;;  %v6715_v13 = vadd.f32 %v11889_v28, %v18578_v0  ;;  %v12018_v54 = vld [vmem:[%s14758_s12 + $0x310] sm:$0xff]  ;;  %v12027_v40 = vld [vmem:[%s14758_s12 + $0x358] sm:$0xff] }
 0x3e2   : > { %11983 = vst.msk [vmem:[%s14758_s12 + $0x478] sm:$0xff] %vm670_vm3, %v6761_v4  ;;  %v6755_v3 = vadd.f32 %v11929_v45, %v6654_v63  ;;  %v13468_v52 = vpop.f32.mrf.mxu0  ;;  %v18772_v63 = vpop.xlane.xlu1 %8791  ;;  %v11892_v0 = vld [vmem:[%s14758_s12 + $0x320] sm:$0xff] }
 0x3e3   : > { %11982 = vst [vmem:[%s14758_s12 + $0x470] sm:$0xff] %v6760_v26  ;;  %v7366_v20 = vadd.f32 %v13468_v52, %v12024_v37  ;;  %v7134_v42 = vpop.f32.mrf.mxu1  ;;  %21729 = vst [vmem:[#allocation73_spill] sm:$0xff] %v18772_v63  ;;  %v11891_v52 = vld [vmem:[%s14758_s12 + $0x318] sm:$0xff] }
 0x3e4   : > { %11977 = vst.msk [vmem:[%s14758_s12 + $0x448] sm:$0xff] %vm670_vm3, %v6755_v3  ;;  %v7247_v4 = vpop.f32.mrf.mxu0  ;;  %v18777_v37 = vadd.f32 %v7134_v42, %v6714_v10  ;;  %v6717_v3 = vadd.f32 %v11891_v52, %v18587_v50  ;;  %v11894_v10 = vld [vmem:[%s14758_s12 + $0x330] sm:$0xff]  ;;  %v18796_v52 = vpop.xlane.xlu0 %8796 }
 0x3e5   : > { %12072 = vst.msk [vmem:[%s14758_s12 + $0x340] sm:$0xff] %vm670_vm3, %v7366_v20  ;;  %v7360_v26 = vadd.f32 %v12018_v54, %v7247_v4  ;;  %v7136_v45 = vpop.f32.mrf.mxu1  ;;  %v6718_v54 = vadd.f32 %v11892_v0, %v18599_v1  ;;  %21733 = vst [vmem:[#allocation77_spill] sm:$0xff] %v18796_v52  ;;  %v6720_v1 = vadd.f32 %v11894_v10, %v18605_v16  ;;  %v12048_v52 = vld [vmem:[%s14758_s12 + $0x400] sm:$0xff] }
 0x3e6   : > { %21730 = vst [vmem:[#allocation74_spill] sm:$0xff] %v18777_v37  ;;  %v18779_v5 = vadd.f32 %v7136_v45, %v6715_v13  ;;  %v13469_v28 = vpop.f32.mrf.mxu0  ;;  %v11895_v13 = vld [vmem:[%s14758_s12 + $0x338] sm:$0xff] }
 0x3e7   : > { %12066 = vst.msk [vmem:[%s14758_s12 + $0x310] sm:$0xff] %vm670_vm3, %v7360_v26  ;;  %v7369_v20 = vadd.f32 %v13469_v28, %v12027_v40  ;;  %v7138_v4 = vpop.f32.mrf.mxu1  ;;  %v11897_v28 = vld [vmem:[%s14758_s12 + $0x348] sm:$0xff]  ;;  %v11898_v40 = vld [vmem:[%s14758_s12 + $0x350] sm:$0xff] }
 0x3e8   : > { %21731 = vst [vmem:[#allocation75_spill] sm:$0xff] %v18779_v5  ;;  %v7250_v55 = vpop.f32.mrf.mxu0  ;;  %v9223_v42 = vmul.f32 %v16534_v32, %v18779_v5  ;;  %v18794_v50 = vadd.f32 %v7138_v4, %v6717_v3  ;;  %v12036_v5 = vld [vmem:[%s14758_s12 + $0x3a0] sm:$0xff]  ;;  %v9222_v3 = vmul.f32 %v16541_v22, %v18777_v37  ;;  %v6724_v16 = vadd.f32 %v11898_v40, %v18622_v19 }
 0x3e9   : > { %12075 = vst.msk [vmem:[%s14758_s12 + $0x358] sm:$0xff] %vm670_vm3, %v7369_v20  ;;  %v7363_v26 = vadd.f32 %v12021_v46, %v7250_v55  ;;  %v7140_v45 = vpop.f32.mrf.mxu1  ;;  %v18806_v20 = vpop.xlane.xlu1 %8781  ;;  %v6721_v46 = vadd.f32 %v11895_v13, %v18612_v35  ;;  %v6723_v55 = vadd.f32 %v11897_v28, %v18617_v39  ;;  %v11900_v4 = vld [vmem:[%s14758_s12 + $0x360] sm:$0xff]  ;;  %v11903_v35 = vld [vmem:[%s14758_s12 + $0x378] sm:$0xff]  ;;  %v12030_v28 = vld [vmem:[%s14758_s12 + $0x370] sm:$0xff] }
 0x3ea   : > { %21732 = vst [vmem:[#allocation76_spill] sm:$0xff] %v18794_v50  ;;  %v18801_v0 = vadd.f32 %v7140_v45, %v6718_v54  ;;  %v13472_v56 = vpop.f32.mrf.mxu0  ;;  %21735 = vst [vmem:[#allocation79_spill] sm:$0xff] %v18806_v20  ;;  %v11901_v54 = vld [vmem:[%s14758_s12 + $0x368] sm:$0xff]  ;;  %v18816_v37 = vadd.f32 %v11900_v4, %v18626_v27  ;;  %v11904_v39 = vld [vmem:[%s14758_s12 + $0x380] sm:$0xff]  ;;  %v9351_v40 = vmul.f32 %v9223_v42, %v9223_v42 }
 0x3eb   : > { %12069 = vst.msk [vmem:[%s14758_s12 + $0x328] sm:$0xff] %vm670_vm3, %v7363_v26  ;;  %v7378_v10 = vadd.f32 %v13472_v56, %v12036_v5  ;;  %v7144_v45 = vpop.f32.mrf.mxu1  ;;  %v18819_v44 = vadd.f32 %v11901_v54, %v18631_v58  ;;  %v18827_v26 = vadd.f32 %v11903_v35, %v18636_v30  ;;  %v18830_v56 = vadd.f32 %v11904_v39, %v18640_v23  ;;  %v11906_v27 = vld [vmem:[%s14758_s12 + $0x390] sm:$0xff]  ;;  %v12039_v39 = vld [vmem:[%s14758_s12 + $0x3b8] sm:$0xff] }
 0x3ec   : > { %21734 = vst [vmem:[#allocation78_spill] sm:$0xff] %v18801_v0  ;;  %v18823_v19 = vadd.f32 %v7144_v45, %v6720_v1  ;;  %v7263_v13 = vpop.f32.mrf.mxu0  ;;  %v12592_v58 = vld [vmem:[%s14758_s12 + $0x340] sm:$0xff]  ;;  %v9225_v1 = vmul.f32 %v16541_v22, %v18794_v50  ;;  %v18839_v54 = vadd.f32 %v11906_v27, %v18644_v7  ;;  %v11907_v45 = vld [vmem:[%s14758_s12 + $0x398] sm:$0xff]  ;;  %v9350_v21 = vmul.f32 %v9222_v3, %v9222_v3 }
 0x3ed   : > { %12084 = vst.msk [vmem:[%s14758_s12 + $0x3a0] sm:$0xff] %vm670_vm3, %v7378_v10  ;;  %v7372_v5 = vadd.f32 %v12030_v28, %v7263_v13  ;;  %v7146_v4 = vpop.f32.mrf.mxu1  ;;  %v9226_v10 = vmul.f32 %v16534_v32, %v18801_v0  ;;  %v18849_v13 = vadd.f32 %v11907_v45, %v18649_v59  ;;  %v9270_v50 = vadd.f32 %v9223_v42, %v9222_v3  ;;  %v18862_v45 = vpop.xlane.xlu1 %8683 }
 0x3ee   : > { %21736 = vst [vmem:[#allocation80_spill] sm:$0xff] %v18823_v19  ;;  %v12586_v30 = vld [vmem:[%s14758_s12 + $0x310] sm:$0xff]  ;;  %v18843_v35 = vadd.f32 %v7146_v4, %v6721_v46  ;;  %v13473_v23 = vpop.f32.mrf.mxu0  ;;  %v18854_v46 = vpop.xlane.xlu0 %8786  ;;  %v9398_v38 = vadd.f32 %v9351_v40, %v9350_v21  ;;  %v9228_v0 = vmul.f32 %v16541_v22, %v18823_v19  ;;  %21739 = vst [vmem:[#allocation83_spill] sm:$0xff] %v18862_v45 }
 0x3ef   : > { %12078 = vst.msk [vmem:[%s14758_s12 + $0x370] sm:$0xff] %vm670_vm3, %v7372_v5  ;;  %v7381_v28 = vadd.f32 %v13473_v23, %v12039_v39  ;;  %v7148_v7 = vpop.f32.mrf.mxu1  ;;  %v9224_v27 = vmul.f32 %v12586_v30, %v16555_v12  ;;  %21738 = vst [vmem:[#allocation82_spill] sm:$0xff] %v18854_v46  ;;  %v9230_v5 = vmul.f32 %v12592_v58, %v16555_v12 }
 0x3f0   : > { %21737 = vst [vmem:[#allocation81_spill] sm:$0xff] %v18843_v35  ;;  %v7266_v4 = vpop.f32.mrf.mxu0  ;;  %v9229_v59 = vmul.f32 %v16534_v32, %v18843_v35  ;;  %v9353_v21 = vmul.f32 %v9225_v1, %v9225_v1  ;;  %v18868_v39 = vadd.f32 %v7148_v7, %v6723_v55  ;;  %v9275_v45 = vadd.f32 %v9226_v10, %v9225_v1  ;;  %v12042_v55 = vld [vmem:[%s14758_s12 + $0x3d0] sm:$0xff] }
 0x3f1   : > { %12087 = vst.msk [vmem:[%s14758_s12 + $0x3b8] sm:$0xff] %vm670_vm3, %v7381_v28  ;;  %v7375_v42 = vadd.f32 %v12033_v29, %v7266_v4  ;;  %v7150_v3 = vpop.f32.mrf.mxu1  ;;  %v9271_v30 = vsel %vm670_vm3, %v9224_v27, 0.0  ;;  %v9352_v23 = vmul.f32 %v9224_v27, %v9224_v27  ;;  %v9354_v7 = vmul.f32 %v9226_v10, %v9226_v10  ;;  %v12051_v10 = vld [vmem:[%s14758_s12 + $0x418] sm:$0xff] }
 0x3f2   : > { %v12589_v40 = vld [vmem:[%s14758_s12 + $0x328] sm:$0xff]  ;;  %21740 = vst [vmem:[#allocation84_spill] sm:$0xff] %v18868_v39  ;;  %v18870_v19 = vadd.f32 %v7150_v3, %v6724_v16  ;;  %v13476_v35 = vpop.f32.mrf.mxu0  ;;  %v9272_v58 = vadd.f32 %v9271_v30, %v9270_v50  ;;  %v9357_v25 = vmul.f32 %v9229_v59, %v9229_v59  ;;  %v9280_v16 = vadd.f32 %v9229_v59, %v9228_v0  ;;  %v12595_v50 = vld [vmem:[%s14758_s12 + $0x358] sm:$0xff] }
 0x3f3   : > { %12081 = vst.msk [vmem:[%s14758_s12 + $0x388] sm:$0xff] %vm670_vm3, %v7375_v42  ;;  %v7390_v29 = vadd.f32 %v13476_v35, %v12048_v52  ;;  %v7154_v28 = vpop.f32.mrf.mxu1  ;;  %v9399_v4 = vsel %vm670_vm3, %v9352_v23, 0.0  ;;  %v9227_v27 = vmul.f32 %v12589_v40, %v16555_v12  ;;  %v9356_v3 = vmul.f32 %v9228_v0, %v9228_v0  ;;  %v18884_v23 = vpop.xlane.xlu0 %8688 }
 0x3f4   : > { %21741 = vst [vmem:[#allocation85_spill] sm:$0xff] %v18870_v19  ;;  %v7279_v63 = vpop.f32.mrf.mxu0  ;;  %9273 = vadd.xlane.f32.xlu1 %v9272_v58  ;;  %v9358_v46 = vmul.f32 %v9230_v5, %v9230_v5  ;;  %v9232_v30 = vmul.f32 %v16534_v32, %v18870_v19  ;;  %21742 = vst [vmem:[#allocation86_spill] sm:$0xff] %v18884_v23  ;;  %v9400_v40 = vadd.f32 %v9399_v4, %v9398_v38  ;;  %v12045_v4 = vld [vmem:[%s14758_s12 + $0x3e8] sm:$0xff] }
 0x3f5   : > { %12096 = vst.msk [vmem:[%s14758_s12 + $0x400] sm:$0xff] %vm670_vm3, %v7390_v29  ;;  %v7384_v52 = vadd.f32 %v12042_v55, %v7279_v63  ;;  %v7156_v1 = vpop.f32.mrf.mxu1  ;;  %v9276_v35 = vsel %vm670_vm3, %v9227_v27, 0.0  ;;  %v9355_v42 = vmul.f32 %v9227_v27, %v9227_v27  ;;  %v9231_v63 = vmul.f32 %v16541_v22, %v18868_v39  ;;  %v18892_v29 = vpop.xlane.xlu1 %8673  ;;  %v11909_v27 = vld [vmem:[%s14758_s12 + $0x3a8] sm:$0xff] }
 0x3f6   : > { %v18887_v59 = vadd.f32 %v7156_v1, %v18819_v44  ;;  %v13477_v0 = vpop.f32.mrf.mxu0  ;;  %v9277_v58 = vadd.f32 %v9276_v35, %v9275_v45  ;;  %21744 = vst [vmem:[#allocation88_spill] sm:$0xff] %v18892_v29  ;;  %v18896_v55 = vadd.f32 %v7154_v28, %v18816_v37  ;;  %v9408_v23 = vadd.f32 %v9357_v25, %v9356_v3 }
 0x3f7   : > { %12090 = vst.msk [vmem:[%s14758_s12 + $0x3d0] sm:$0xff] %vm670_vm3, %v7384_v52  ;;  %v7393_v44 = vadd.f32 %v13477_v0, %v12051_v10  ;;  %v7158_v1 = vpop.f32.mrf.mxu1  ;;  %v9404_v19 = vsel %vm670_vm3, %v9355_v42, 0.0  ;;  %v18902_v38 = vadd.f32 %v11909_v27, %v18653_v24  ;;  %v9281_v35 = vsel %vm670_vm3, %v9230_v5, 0.0  ;;  %v12598_v52 = vld [vmem:[%s14758_s12 + $0x370] sm:$0xff] }
 0x3f8   : > { %21743 = vst [vmem:[#allocation87_spill] sm:$0xff] %v18887_v59  ;;  %21745 = vst [vmem:[#allocation89_spill] sm:$0xff] %v18896_v55  ;;  %v7282_v45 = vpop.f32.mrf.mxu0  ;;  %9401 = vadd.xlane.f32.xlu1 %v9400_v40  ;;  %9278 = vadd.xlane.f32.xlu0 %v9277_v58  ;;  %v9403_v37 = vadd.f32 %v9354_v7, %v9353_v21  ;;  %v9233_v28 = vmul.f32 %v12595_v50, %v16555_v12  ;;  %v9409_v3 = vsel %vm670_vm3, %v9358_v46, 0.0  ;;  %v11910_v10 = vld [vmem:[%s14758_s12 + $0x3b0] sm:$0xff]  ;;  %v12060_v21 = vld [vmem:[%s14758_s12 + $0x460] sm:$0xff] }
 0x3f9   : > { %12099 = vst.msk [vmem:[%s14758_s12 + $0x418] sm:$0xff] %vm670_vm3, %v7393_v44  ;;  %v7387_v42 = vadd.f32 %v12045_v4, %v7282_v45  ;;  %v7160_v25 = vpop.f32.mrf.mxu1  ;;  %v9285_v24 = vadd.f32 %v9232_v30, %v9231_v63  ;;  %v9235_v0 = vmul.f32 %v16534_v32, %v18887_v59  ;;  %v9282_v7 = vadd.f32 %v9281_v35, %v9280_v16  ;;  %v18925_v59 = vpop.xlane.xlu0 %8678  ;;  %v12054_v16 = vld [vmem:[%s14758_s12 + $0x430] sm:$0xff] }
 0x3fa   : > { %v18915_v40 = vadd.f32 %v7160_v25, %v18830_v56  ;;  %v13480_v5 = vpop.f32.mrf.mxu0  ;;  %v9405_v50 = vadd.f32 %v9404_v19, %v9403_v37  ;;  %v9360_v58 = vmul.f32 %v9232_v30, %v9232_v30  ;;  %v18919_v27 = vadd.f32 %v11910_v10, %v18659_v47  ;;  %21747 = vst [vmem:[#allocation91_spill] sm:$0xff] %v18925_v59  ;;  %v18933_v35 = vpop.xlane.xlu1 %8811  ;;  %v12601_v10 = vld [vmem:[%s14758_s12 + $0x388] sm:$0xff] }
 0x3fb   : > { %12093 = vst.msk [vmem:[%s14758_s12 + $0x3e8] sm:$0xff] %vm670_vm3, %v7387_v42  ;;  %v7402_v46 = vadd.f32 %v13480_v5, %v12060_v21  ;;  %v7164_v44 = vpop.f32.mrf.mxu1  ;;  %v9410_v45 = vadd.f32 %v9409_v3, %v9408_v23  ;;  %v9234_v4 = vmul.f32 %v16541_v22, %v18896_v55  ;;  %v18928_v56 = vadd.f32 %v7158_v1, %v18827_v26  ;;  %v11912_v3 = vld [vmem:[%s14758_s12 + $0x3c0] sm:$0xff] }
 0x3fc   : > { %21746 = vst [vmem:[#allocation90_spill] sm:$0xff] %v18915_v40  ;;  %v7295_v19 = vpop.f32.mrf.mxu0  ;;  %9283 = vadd.xlane.f32.xlu1 %v9282_v7  ;;  %9406 = vadd.xlane.f32.xlu0 %v9405_v50  ;;  %v9286_v47 = vsel %vm670_vm3, %v9233_v28, 0.0  ;;  %v9236_v30 = vmul.f32 %v12598_v52, %v16555_v12  ;;  %v9359_v23 = vmul.f32 %v9231_v63, %v9231_v63  ;;  %21749 = vst [vmem:[#allocation93_spill] sm:$0xff] %v18933_v35  ;;  %v12063_v52 = vld [vmem:[%s14758_s12 + $0x478] sm:$0xff] }
 0x3fd   : > { %21748 = vst [vmem:[#allocation92_spill] sm:$0xff] %v18928_v56  ;;  %12108 = vst.msk [vmem:[%s14758_s12 + $0x460] sm:$0xff] %vm670_vm3, %v7402_v46  ;;  %v7396_v37 = vadd.f32 %v12054_v16, %v7295_v19  ;;  %v7166_v26 = vpop.f32.mrf.mxu1  ;;  %v9287_v1 = vadd.f32 %v9286_v47, %v9285_v24  ;;  %v9361_v42 = vmul.f32 %v9233_v28, %v9233_v28  ;;  %v11913_v24 = vld [vmem:[%s14758_s12 + $0x3c8] sm:$0xff] }
 0x3fe   : > { %v9363_v25 = vmul.f32 %v9235_v0, %v9235_v0  ;;  %v18940_v5 = vadd.f32 %v7166_v26, %v18849_v13  ;;  %v13481_v21 = vpop.f32.mrf.mxu0  ;;  %v9290_v63 = vadd.f32 %v9235_v0, %v9234_v4  ;;  %v9413_v7 = vadd.f32 %v9360_v58, %v9359_v23  ;;  %v12057_v58 = vld [vmem:[%s14758_s12 + $0x448] sm:$0xff] }
 0x3ff   : > { %v9238_v50 = vmul.f32 %v16534_v32, %v18915_v40  ;;  %v6738_v46 = vadd.f32 %v11912_v3, %v18663_v11  ;;  %v18948_v28 = vadd.f32 %v7164_v44, %v18839_v54  ;;  %12102 = vst.msk [vmem:[%s14758_s12 + $0x430] sm:$0xff] %vm670_vm3, %v7396_v37  ;;  %v7405_v19 = vadd.f32 %v13481_v21, %v12063_v52  ;;  %v7168_v13 = vpop.f32.mrf.mxu1  ;;  %v12604_v54 = vld [vmem:[%s14758_s12 + $0x3a0] sm:$0xff]  ;;  %v18962_v21 = vpop.xlane.xlu0 %8816 }
 0x400   : > { %21750 = vst [vmem:[#allocation94_spill] sm:$0xff] %v18940_v5  ;;  %v9362_v16 = vmul.f32 %v9234_v4, %v9234_v4  ;;  %v6739_v47 = vadd.f32 %v11913_v24, %v18667_v31  ;;  %v7298_v0 = vpop.f32.mrf.mxu0  ;;  %9411 = vadd.xlane.f32.xlu1 %v9410_v45  ;;  %9288 = vadd.xlane.f32.xlu0 %v9287_v1  ;;  %v9291_v23 = vsel %vm670_vm3, %v9236_v30, 0.0  ;;  %v9414_v4 = vsel %vm670_vm3, %v9361_v42, 0.0  ;;  %v12120_v1 = vld [vmem:[%s14758_s12 + $0x480] sm:$0xff] }
 0x401   : > { %21751 = vst [vmem:[#allocation95_spill] sm:$0xff] %v18948_v28  ;;  %v9364_v11 = vmul.f32 %v9236_v30, %v9236_v30  ;;  %v9237_v26 = vmul.f32 %v16541_v22, %v18928_v56  ;;  %12111 = vst.msk [vmem:[%s14758_s12 + $0x478] sm:$0xff] %vm670_vm3, %v7405_v19  ;;  %v7399_v44 = vadd.f32 %v12057_v58, %v7298_v0  ;;  %v7170_v37 = vpop.f32.mrf.mxu1  ;;  %v18967_v19 = vpop.xlane.xlu1 %8801  ;;  %v12121_v58 = vld [vmem:[%s14758_s12 + $0x488] sm:$0xff] }
 0x402   : > { %v9418_v31 = vadd.f32 %v9363_v25, %v9362_v16  ;;  %v9239_v3 = vmul.f32 %v12601_v10, %v16555_v12  ;;  %21752 = vst [vmem:[#allocation96_spill] sm:$0xff] %v18962_v21  ;;  %v7553_v45 = vpop.f32.mrf.mxu0  ;;  %v9292_v30 = vadd.f32 %v9291_v23, %v9290_v63  ;;  %v9415_v52 = vadd.f32 %v9414_v4, %v9413_v7 }
 0x403   : > { %v9295_v24 = vadd.f32 %v9238_v50, %v9237_v26  ;;  %v9241_v40 = vmul.f32 %v16534_v32, %v18940_v5  ;;  %21753 = vst [vmem:[#allocation97_spill] sm:$0xff] %v18967_v19  ;;  %v18970_v0 = vadd.f32 %v7168_v13, %v18902_v38  ;;  %12105 = vst.msk [vmem:[%s14758_s12 + $0x448] sm:$0xff] %vm670_vm3, %v7399_v44  ;;  %v7174_v25 = vpop.f32.mrf.mxu1  ;;  %v9419_v38 = vsel %vm670_vm3, %v9364_v11, 0.0  ;;  %v12123_v5 = vld [vmem:[%s14758_s12 + $0x498] sm:$0xff] }
 0x404   : > { %v7777_v42 = vadd.f32 %v12120_v1, %v7553_v45  ;;  %v9240_v10 = vmul.f32 %v16541_v22, %v18948_v28  ;;  %v9366_v63 = vmul.f32 %v9238_v50, %v9238_v50  ;;  %v18977_v7 = vadd.f32 %v7170_v37, %v18919_v27  ;;  %v7555_v16 = vpop.f32.mrf.mxu0  ;;  %9293 = vadd.xlane.f32.xlu1 %v9292_v30  ;;  %v12607_v27 = vld [vmem:[%s14758_s12 + $0x3b8] sm:$0xff] }
 0x405   : > { %21754 = vst [vmem:[#allocation98_spill] sm:$0xff] %v18970_v0  ;;  %9416 = vadd.xlane.f32.xlu0 %v9415_v52  ;;  %v9242_v13 = vmul.f32 %v12604_v54, %v16555_v12  ;;  %v9365_v23 = vmul.f32 %v9237_v26, %v9237_v26  ;;  %v7778_v44 = vadd.f32 %v12121_v58, %v7555_v16  ;;  %v7176_v4 = vpop.f32.mrf.mxu1  ;;  %v9296_v50 = vsel %vm670_vm3, %v9239_v3, 0.0  ;;  %v18991_v16 = vpop.xlane.xlu0 %8806  ;;  %v12124_v58 = vld [vmem:[%s14758_s12 + $0x4a0] sm:$0xff] }
 0x406   : > { %21755 = vst [vmem:[#allocation99_spill] sm:$0xff] %v18977_v7  ;;  %12168 = vst [vmem:[%s14758_s12 + $0x480] sm:$0xff] %v7777_v42  ;;  %v9420_v45 = vadd.f32 %v9419_v38, %v9418_v31  ;;  %v9367_v1 = vmul.f32 %v9239_v3, %v9239_v3  ;;  %v7557_v37 = vpop.f32.mrf.mxu0  ;;  %v9297_v28 = vadd.f32 %v9296_v50, %v9295_v24 }
 0x407   : > { %v9300_v30 = vadd.f32 %v9241_v40, %v9240_v10  ;;  %v9423_v52 = vadd.f32 %v9366_v63, %v9365_v23  ;;  %v9369_v56 = vmul.f32 %v9241_v40, %v9241_v40  ;;  %v18986_v11 = vadd.f32 %v7174_v25, %v6738_v46  ;;  %12169 = vst [vmem:[%s14758_s12 + $0x488] sm:$0xff] %v7778_v44  ;;  %v7178_v42 = vpop.f32.mrf.mxu1  ;;  %v12126_v44 = vld [vmem:[%s14758_s12 + $0x4b0] sm:$0xff] }
 0x408   : > { %v18989_v26 = vadd.f32 %v7176_v4, %v6739_v47  ;;  %v7780_v54 = vadd.f32 %v12123_v5, %v7557_v37  ;;  %v9368_v31 = vmul.f32 %v9240_v10, %v9240_v10  ;;  %21758 = vst [vmem:[#allocation102_spill] sm:$0xff] %v18991_v16  ;;  %v7559_v3 = vpop.f32.mrf.mxu0  ;;  %9421 = vadd.xlane.f32.xlu1 %v9420_v45  ;;  %v9301_v24 = vsel %vm670_vm3, %v9242_v13, 0.0  ;;  %v18999_v47 = vpop.xlane.xlu1 %8693  ;;  %v11915_v37 = vld [vmem:[%s14758_s12 + $0x3d8] sm:$0xff] }
 0x409   : > { %21756 = vst [vmem:[#allocation100_spill] sm:$0xff] %v18986_v11  ;;  %9298 = vadd.xlane.f32.xlu0 %v9297_v28  ;;  %v9370_v40 = vmul.f32 %v9242_v13, %v9242_v13  ;;  %v9243_v46 = vmul.f32 %v16541_v22, %v18970_v0  ;;  %v9244_v5 = vmul.f32 %v16534_v32, %v18977_v7  ;;  %21759 = vst [vmem:[#allocation103_spill] sm:$0xff] %v18999_v47  ;;  %v7180_v10 = vpop.f32.mrf.mxu1  ;;  %v12610_v13 = vld [vmem:[%s14758_s12 + $0x3d0] sm:$0xff]  ;;  %v11916_v7 = vld [vmem:[%s14758_s12 + $0x3e0] sm:$0xff] }
 0x40a   : > { %21757 = vst [vmem:[#allocation101_spill] sm:$0xff] %v18989_v26  ;;  %12171 = vst [vmem:[%s14758_s12 + $0x498] sm:$0xff] %v7780_v54  ;;  %v7781_v25 = vadd.f32 %v12124_v58, %v7559_v3  ;;  %v9424_v63 = vsel %vm670_vm3, %v9367_v1, 0.0  ;;  %v9428_v28 = vadd.f32 %v9369_v56, %v9368_v31  ;;  %v9245_v38 = vmul.f32 %v12607_v27, %v16555_v12  ;;  %v7563_v23 = vpop.f32.mrf.mxu0  ;;  %v11918_v27 = vld [vmem:[%s14758_s12 + $0x3f0] sm:$0xff] }
 0x40b   : > { %v9302_v4 = vadd.f32 %v9301_v24, %v9300_v30  ;;  %v9425_v45 = vadd.f32 %v9424_v63, %v9423_v52  ;;  %v9305_v50 = vadd.f32 %v9244_v5, %v9243_v46  ;;  %v7783_v0 = vadd.f32 %v12126_v44, %v7563_v23  ;;  %v7184_v54 = vpop.f32.mrf.mxu1 }
 0x40c   : > { %12172 = vst [vmem:[%s14758_s12 + $0x4a0] sm:$0xff] %v7781_v25  ;;  %v9247_v3 = vmul.f32 %v16534_v32, %v18989_v26  ;;  %v6741_v56 = vadd.f32 %v11915_v37, %v18674_v57  ;;  %v6742_v1 = vadd.f32 %v11916_v7, %v18681_v48  ;;  %v19014_v31 = vpop.f32.mrf.mxu0  ;;  %v9429_v30 = vsel %vm670_vm3, %v9370_v40, 0.0  ;;  %v19023_v48 = vpop.xlane.xlu0 %8698  ;;  %v11919_v7 = vld [vmem:[%s14758_s12 + $0x3f8] sm:$0xff] }
 0x40d   : > { %9303 = vadd.xlane.f32.xlu1 %v9302_v4  ;;  %9426 = vadd.xlane.f32.xlu0 %v9425_v45  ;;  %v9246_v52 = vmul.f32 %v16541_v22, %v18986_v11  ;;  %v6744_v58 = vadd.f32 %v11918_v27, %v18686_v51  ;;  %12174 = vst [vmem:[%s14758_s12 + $0x4b0] sm:$0xff] %v7783_v0  ;;  %v7186_v24 = vpop.f32.mrf.mxu1  ;;  %v9306_v63 = vsel %vm670_vm3, %v9245_v38, 0.0  ;;  %21760 = vst [vmem:[#allocation104_spill] sm:$0xff] %v19023_v48  ;;  %v19028_v37 = vpop.xlane.xlu1 %8703 }
 0x40e   : > { %v9430_v25 = vadd.f32 %v9429_v30, %v9428_v28  ;;  %v9248_v57 = vmul.f32 %v12610_v13, %v16555_v12  ;;  %v19026_v23 = vpop.f32.mrf.mxu0  ;;  %v9307_v44 = vadd.f32 %v9306_v63, %v9305_v50  ;;  %v9371_v4 = vmul.f32 %v9243_v46, %v9243_v46  ;;  %21761 = vst [vmem:[#allocation105_spill] sm:$0xff] %v19028_v37 }
 0x40f   : > { %v9310_v40 = vadd.f32 %v9247_v3, %v9246_v52  ;;  %v9372_v45 = vmul.f32 %v9244_v5, %v9244_v5  ;;  %v6745_v51 = vadd.f32 %v11919_v7, %v18693_v43  ;;  %v19031_v0 = vadd.f32 %v7178_v42, %v6741_v56  ;;  %v7188_v27 = vpop.f32.mrf.mxu1  ;;  %v12613_v5 = vld [vmem:[%s14758_s12 + $0x3e8] sm:$0xff]  ;;  %v11922_v7 = vld [vmem:[%s14758_s12 + $0x410] sm:$0xff] }
 0x410   : > { %v19033_v28 = vadd.f32 %v7180_v10, %v6742_v1  ;;  %v9373_v13 = vmul.f32 %v9245_v38, %v9245_v38  ;;  %v19035_v30 = vpop.f32.mrf.mxu0  ;;  %v9374_v63 = vmul.f32 %v9246_v52, %v9246_v52  ;;  %v9375_v46 = vmul.f32 %v9247_v3, %v9247_v3  ;;  %v11921_v3 = vld [vmem:[%s14758_s12 + $0x408] sm:$0xff] }
 0x411   : > { %21762 = vst [vmem:[#allocation106_spill] sm:$0xff] %v19031_v0  ;;  %9431 = vadd.xlane.f32.xlu1 %v9430_v25  ;;  %9308 = vadd.xlane.f32.xlu0 %v9307_v44  ;;  %v9433_v50 = vadd.f32 %v9372_v45, %v9371_v4  ;;  %v19038_v26 = vadd.f32 %v7184_v54, %v6744_v58  ;;  %v7190_v11 = vpop.f32.mrf.mxu1  ;;  %v9311_v43 = vsel %vm670_vm3, %v9248_v57, 0.0  ;;  %v19052_v4 = vpop.xlane.xlu0 %8708  ;;  %v11924_v45 = vld [vmem:[%s14758_s12 + $0x420] sm:$0xff] }
 0x412   : > { %21763 = vst [vmem:[#allocation107_spill] sm:$0xff] %v19033_v28  ;;  %v9434_v42 = vsel %vm670_vm3, %v9373_v13, 0.0  ;;  %v9376_v10 = vmul.f32 %v9248_v57, %v9248_v57  ;;  %v19042_v38 = vadd.f32 %v7186_v24, %v6745_v51  ;;  %v19044_v56 = vpop.f32.mrf.mxu0  ;;  %v9312_v1 = vadd.f32 %v9311_v43, %v9310_v40  ;;  %21766 = vst [vmem:[#allocation110_spill] sm:$0xff] %v19052_v4  ;;  %v11925_v51 = vld [vmem:[%s14758_s12 + $0x428] sm:$0xff]  ;;  %v12616_v40 = vld [vmem:[%s14758_s12 + $0x400] sm:$0xff] }
 0x413   : > { %21764 = vst [vmem:[#allocation108_spill] sm:$0xff] %v19038_v26  ;;  %v9435_v25 = vadd.f32 %v9434_v42, %v9433_v50  ;;  %v9438_v52 = vadd.f32 %v9375_v46, %v9374_v63  ;;  %v7194_v54 = vpop.f32.mrf.mxu1  ;;  %v9249_v58 = vmul.f32 %v16541_v22, %v19031_v0  ;;  %v9250_v44 = vmul.f32 %v16534_v32, %v19033_v28  ;;  %v19062_v63 = vpop.xlane.xlu1 %8821  ;;  %v11931_v4 = vld [vmem:[%s14758_s12 + $0x458] sm:$0xff] }
 0x414   : > { %21765 = vst [vmem:[#allocation109_spill] sm:$0xff] %v19042_v38  ;;  %v6747_v57 = vadd.f32 %v11921_v3, %v18700_v14  ;;  %v6748_v24 = vadd.f32 %v11922_v7, %v18705_v17  ;;  %v19059_v13 = vpop.f32.mrf.mxu0  ;;  %v9251_v50 = vmul.f32 %v12613_v5, %v16555_v12  ;;  %21767 = vst [vmem:[#allocation111_spill] sm:$0xff] %v19062_v63  ;;  %v9439_v14 = vsel %vm670_vm3, %v9376_v10, 0.0 }
 0x415   : > { %9313 = vadd.xlane.f32.xlu1 %v9312_v1  ;;  %9436 = vadd.xlane.f32.xlu0 %v9435_v25  ;;  %v6750_v46 = vadd.f32 %v11924_v45, %v18712_v60  ;;  %v6751_v43 = vadd.f32 %v11925_v51, %v18719_v8  ;;  %v7196_v42 = vpop.f32.mrf.mxu1  ;;  %v9315_v3 = vadd.f32 %v9250_v44, %v9249_v58 }
 0x416   : > { %v19067_v17 = vpop.f32.mrf.mxu0  ;;  %v9440_v7 = vadd.f32 %v9439_v14, %v9438_v52  ;;  %v9316_v28 = vsel %vm670_vm3, %v9251_v50, 0.0  ;;  %v9252_v1 = vmul.f32 %v16541_v22, %v19038_v26  ;;  %v9253_v5 = vmul.f32 %v16534_v32, %v19042_v38 }
 0x417   : > { %v19074_v25 = vadd.f32 %v7188_v27, %v6747_v57  ;;  %v19076_v60 = vadd.f32 %v7190_v11, %v6748_v24  ;;  %v7198_v8 = vpop.f32.mrf.mxu1  ;;  %v9317_v45 = vadd.f32 %v9316_v28, %v9315_v3  ;;  %v9254_v10 = vmul.f32 %v12616_v40, %v16555_v12  ;;  %v19082_v27 = vpop.xlane.xlu0 %8826 }
 0x418   : > { %v19079_v51 = vpop.f32.mrf.mxu0  ;;  %v9320_v52 = vadd.f32 %v9253_v5, %v9252_v1  ;;  %v9377_v14 = vmul.f32 %v9249_v58, %v9249_v58  ;;  %v9378_v0 = vmul.f32 %v9250_v44, %v9250_v44  ;;  %v9379_v55 = vmul.f32 %v9251_v50, %v9251_v50  ;;  %21770 = vst [vmem:[#allocation114_spill] sm:$0xff] %v19082_v27  ;;  %v19090_v3 = vpop.xlane.xlu1 %8831  ;;  %v12619_v58 = vld [vmem:[%s14758_s12 + $0x418] sm:$0xff] }
 0x419   : > { %21768 = vst [vmem:[#allocation112_spill] sm:$0xff] %v19074_v25  ;;  %21769 = vst [vmem:[#allocation113_spill] sm:$0xff] %v19076_v60  ;;  %9441 = vadd.xlane.f32.xlu1 %v9440_v7  ;;  %v7200_v26 = vpop.f32.mrf.mxu1  ;;  %9318 = vadd.xlane.f32.xlu0 %v9317_v45  ;;  %v9321_v38 = vsel %vm670_vm3, %v9254_v10, 0.0  ;;  %v19084_v11 = vadd.f32 %v7194_v54, %v6750_v46  ;;  %v19086_v57 = vadd.f32 %v7196_v42, %v6751_v43  ;;  %v11927_v43 = vld [vmem:[%s14758_s12 + $0x438] sm:$0xff]  ;;  %v12622_v42 = vld [vmem:[%s14758_s12 + $0x430] sm:$0xff] }
 0x41a   : > { %v19088_v28 = vpop.f32.mrf.mxu0  ;;  %v9322_v24 = vadd.f32 %v9321_v38, %v9320_v52  ;;  %v9443_v40 = vadd.f32 %v9378_v0, %v9377_v14  ;;  %21773 = vst [vmem:[#allocation117_spill] sm:$0xff] %v19090_v3  ;;  %v9444_v50 = vsel %vm670_vm3, %v9379_v55, 0.0  ;;  %v9380_v7 = vmul.f32 %v9252_v1, %v9252_v1  ;;  %v11928_v1 = vld [vmem:[%s14758_s12 + $0x440] sm:$0xff] }
 0x41b   : > { %21771 = vst [vmem:[#allocation115_spill] sm:$0xff] %v19084_v11  ;;  %21772 = vst [vmem:[#allocation116_spill] sm:$0xff] %v19086_v57  ;;  %v7204_v44 = vpop.f32.mrf.mxu1  ;;  %v9381_v45 = vmul.f32 %v9253_v5, %v9253_v5  ;;  %v9382_v39 = vmul.f32 %v9254_v10, %v9254_v10  ;;  %v9255_v38 = vmul.f32 %v16541_v22, %v19074_v25  ;;  %v11930_v25 = vld [vmem:[%s14758_s12 + $0x450] sm:$0xff] }
 0x41c   : > { %v19094_v54 = vpop.f32.mrf.mxu0  ;;  %v9445_v46 = vadd.f32 %v9444_v50, %v9443_v40  ;;  %v9256_v0 = vmul.f32 %v16534_v32, %v19076_v60  ;;  %v6753_v55 = vadd.f32 %v11927_v43, %v18724_v6  ;;  %v6754_v50 = vadd.f32 %v11928_v1, %v18731_v61  ;;  %v19111_v60 = vpop.xlane.xlu1 %8947 }
 0x41d   : > { %9323 = vadd.xlane.f32.xlu1 %v9322_v24  ;;  %v7206_v52 = vpop.f32.mrf.mxu1  ;;  %v9448_v14 = vadd.f32 %v9381_v45, %v9380_v7  ;;  %v9449_v10 = vsel %vm670_vm3, %v9382_v39, 0.0  ;;  %v9257_v24 = vmul.f32 %v12619_v58, %v16555_v12  ;;  %v9258_v6 = vmul.f32 %v16541_v22, %v19084_v11 }
 0x41e   : > { %v19104_v5 = vpop.f32.mrf.mxu0  ;;  %9446 = vadd.xlane.f32.xlu0 %v9445_v46  ;;  %v9325_v40 = vadd.f32 %v9256_v0, %v9255_v38  ;;  %v9259_v45 = vmul.f32 %v16534_v32, %v19086_v57  ;;  %v19119_v46 = vpop.xlane.xlu0 %8836  ;;  %v6756_v39 = vadd.f32 %v11930_v25, %v18738_v53  ;;  %v6757_v58 = vadd.f32 %v11931_v4, %v18743_v34 }
 0x41f   : > { %v19113_v3 = vpop.f32.mrf.mxu1  ;;  %v9450_v7 = vadd.f32 %v9449_v10, %v9448_v14  ;;  %21774 = vst [vmem:[#allocation118_spill] sm:$0xff] %v19119_v46  ;;  %v9326_v43 = vsel %vm670_vm3, %v9257_v24, 0.0  ;;  %v9260_v1 = vmul.f32 %v12622_v42, %v16555_v12  ;;  %v19127_v14 = vadd.f32 %v7198_v8, %v6753_v55  ;;  %v12128_v8 = vld [vmem:[%s14758_s12 + $0x4c0] sm:$0xff] }
 0x420   : > { %v19123_v61 = vpop.f32.mrf.mxu0  ;;  %v19129_v10 = vadd.f32 %v7200_v26, %v6754_v50  ;;  %v9327_v57 = vadd.f32 %v9326_v43, %v9325_v40  ;;  %v9330_v46 = vadd.f32 %v9259_v45, %v9258_v6  ;;  %v19133_v53 = vadd.f32 %v7204_v44, %v6756_v39  ;;  %v12625_v40 = vld [vmem:[%s14758_s12 + $0x448] sm:$0xff]  ;;  %v12122_v43 = vld [vmem:[%s14758_s12 + $0x490] sm:$0xff] }
 0x421   : > { %21775 = vst [vmem:[#allocation119_spill] sm:$0xff] %v19127_v14  ;;  %v19131_v11 = vpop.f32.mrf.mxu1  ;;  %9451 = vadd.xlane.f32.xlu1 %v9450_v7  ;;  %v9331_v4 = vsel %vm670_vm3, %v9260_v1, 0.0  ;;  %v9383_v25 = vmul.f32 %v9255_v38, %v9255_v38  ;;  %v9384_v27 = vmul.f32 %v9256_v0, %v9256_v0  ;;  %v19138_v37 = vadd.f32 %v7206_v52, %v6757_v58  ;;  %v19146_v58 = vpop.xlane.xlu1 %8937 }
 0x422   : > { %21776 = vst [vmem:[#allocation120_spill] sm:$0xff] %v19129_v10  ;;  %21777 = vst [vmem:[#allocation121_spill] sm:$0xff] %v19133_v53  ;;  %v19135_v34 = vpop.f32.mrf.mxu0  ;;  %9328 = vadd.xlane.f32.xlu0 %v9327_v57  ;;  %v9332_v42 = vadd.f32 %v9331_v4, %v9330_v46  ;;  %v9385_v55 = vmul.f32 %v9257_v24, %v9257_v24  ;;  %v9386_v50 = vmul.f32 %v9258_v6, %v9258_v6  ;;  %v19142_v7 = vpop.xlane.xlu0 %8952 }
 0x423   : > { %21778 = vst [vmem:[#allocation122_spill] sm:$0xff] %v19138_v37  ;;  %v13500_v26 = vpop.f32.mrf.mxu1  ;;  %v9453_v38 = vadd.f32 %v9384_v27, %v9383_v25  ;;  %v9387_v0 = vmul.f32 %v9259_v45, %v9259_v45  ;;  %v9388_v52 = vmul.f32 %v9260_v1, %v9260_v1  ;;  %v12131_v45 = vld [vmem:[%s14758_s12 + $0x4d8] sm:$0xff]  ;;  %v9261_v25 = vmul.f32 %v16541_v22, %v19127_v14 }
 0x424   : > { %v7785_v44 = vadd.f32 %v13500_v26, %v12128_v8  ;;  %v19144_v39 = vpop.f32.mrf.mxu0  ;;  %v9454_v24 = vsel %vm670_vm3, %v9385_v55, 0.0  ;;  %v12628_v8 = vld [vmem:[%s14758_s12 + $0x460] sm:$0xff]  ;;  %v9263_v55 = vmul.f32 %v12625_v40, %v16555_v12  ;;  %v12061_v40 = vld [vmem:[%s14758_s12 + $0x468] sm:$0xff] }
 0x425   : > { %v7666_v57 = vpop.f32.mrf.mxu1  ;;  %9333 = vadd.xlane.f32.xlu1 %v9332_v42  ;;  %v9455_v4 = vadd.f32 %v9454_v24, %v9453_v38  ;;  %v9458_v26 = vadd.f32 %v9387_v0, %v9386_v50  ;;  %v9459_v1 = vsel %vm670_vm3, %v9388_v52, 0.0  ;;  %v9262_v42 = vmul.f32 %v16534_v32, %v19129_v10 }
 0x426   : > { %12176 = vst.msk [vmem:[%s14758_s12 + $0x4c0] sm:$0xff] %vm670_vm3, %v7785_v44  ;;  %v7779_v6 = vadd.f32 %v12122_v43, %v7666_v57  ;;  %v19152_v46 = vpop.f32.mrf.mxu0  ;;  %v9264_v0 = vmul.f32 %v16541_v22, %v19133_v53  ;;  %v9265_v52 = vmul.f32 %v16534_v32, %v19138_v37  ;;  %v12125_v43 = vld [vmem:[%s14758_s12 + $0x4a8] sm:$0xff]  ;;  %v19171_v10 = vpop.xlane.xlu0 %8942  ;;  %v19183_v37 = vadd.f32 %v12061_v40, %v19113_v3  ;;  %v12062_v53 = vld [vmem:[%s14758_s12 + $0x470] sm:$0xff]  ;;  %v12631_v40 = vld [vmem:[%s14758_s12 + $0x478] sm:$0xff] }
 0x427   : > { %v13501_v27 = vpop.f32.mrf.mxu1  ;;  %9456 = vadd.xlane.f32.xlu0 %v9455_v4  ;;  %v9460_v38 = vadd.f32 %v9459_v1, %v9458_v26  ;;  %v9335_v24 = vadd.f32 %v9262_v42, %v9261_v25  ;;  %v9336_v26 = vsel %vm670_vm3, %v9263_v55, 0.0  ;;  %v19180_v1 = vpop.xlane.xlu1 %9075  ;;  %v19188_v48 = vadd.f32 %v12062_v53, %v19131_v11 }
 0x428   : > { %12170 = vst.msk [vmem:[%s14758_s12 + $0x490] sm:$0xff] %vm670_vm3, %v7779_v6  ;;  %v7788_v50 = vadd.f32 %v13501_v27, %v12131_v45  ;;  %v19164_v44 = vpop.f32.mrf.mxu0  ;;  %v9266_v27 = vmul.f32 %v12628_v8, %v16555_v12  ;;  %v9340_v45 = vadd.f32 %v9265_v52, %v9264_v0  ;;  %21779 = vst [vmem:[#allocation123_spill] sm:$0xff] %v19180_v1 }
 0x429   : > { %v7669_v57 = vpop.f32.mrf.mxu1  ;;  %9461 = vadd.xlane.f32.xlu1 %v9460_v38  ;;  %21780 = vst [vmem:[#allocation124_spill] sm:$0xff] %v19183_v37  ;;  %v9337_v14 = vadd.f32 %v9336_v26, %v9335_v24  ;;  %v9389_v38 = vmul.f32 %v9261_v25, %v9261_v25  ;;  %21781 = vst [vmem:[#allocation125_spill] sm:$0xff] %v19188_v48  ;;  %v9391_v3 = vmul.f32 %v9263_v55, %v9263_v55  ;;  %v12134_v26 = vld [vmem:[%s14758_s12 + $0x4f0] sm:$0xff] }
 0x42a   : > { %12179 = vst.msk [vmem:[%s14758_s12 + $0x4d8] sm:$0xff] %vm670_vm3, %v7788_v50  ;;  %v7782_v6 = vadd.f32 %v12125_v43, %v7669_v57  ;;  %v19176_v4 = vpop.f32.mrf.mxu0  ;;  %v12140_v57 = vld [vmem:[%s14758_s12 + $0x520] sm:$0xff]  ;;  %v9390_v43 = vmul.f32 %v9262_v42, %v9262_v42  ;;  %v9341_v21 = vsel %vm670_vm3, %v9266_v27, 0.0  ;;  %v9394_v35 = vmul.f32 %v9266_v27, %v9266_v27 }
 0x42b   : > { %v13504_v50 = vpop.f32.mrf.mxu1  ;;  %9338 = vadd.xlane.f32.xlu0 %v9337_v14  ;;  %v9342_v47 = vadd.f32 %v9341_v21, %v9340_v45  ;;  %v9464_v42 = vsel %vm670_vm3, %v9391_v3, 0.0  ;;  %v12143_v14 = vld [vmem:[%s14758_s12 + $0x538] sm:$0xff]  ;;  %v9267_v21 = vmul.f32 %v16541_v22, %v19183_v37  ;;  %v19205_v45 = vpop.xlane.xlu0 %9080  ;;  %v12137_v3 = vld [vmem:[%s14758_s12 + $0x508] sm:$0xff] }
 0x42c   : > { %12173 = vst.msk [vmem:[%s14758_s12 + $0x4a8] sm:$0xff] %vm670_vm3, %v7782_v6  ;;  %v7797_v8 = vadd.f32 %v13504_v50, %v12140_v57  ;;  %v19192_v63 = vpop.f32.mrf.mxu0  ;;  %v9463_v25 = vadd.f32 %v9390_v43, %v9389_v38  ;;  %v9392_v6 = vmul.f32 %v9264_v0, %v9264_v0  ;;  %v9393_v50 = vmul.f32 %v9265_v52, %v9265_v52  ;;  %v12161_v37 = vld [vmem:[%s14758_s12 + $0x5c8] sm:$0xff] }
 0x42d   : > { %v7682_v24 = vpop.f32.mrf.mxu1  ;;  %9343 = vadd.xlane.f32.xlu1 %v9342_v47  ;;  %21782 = vst [vmem:[#allocation126_spill] sm:$0xff] %v19205_v45  ;;  %v9268_v47 = vmul.f32 %v16534_v32, %v19188_v48  ;;  %v9269_v52 = vmul.f32 %v12631_v40, %v16555_v12 }
 0x42e   : > { %12188 = vst.msk [vmem:[%s14758_s12 + $0x520] sm:$0xff] %vm670_vm3, %v7797_v8  ;;  %v7791_v11 = vadd.f32 %v12134_v26, %v7682_v24  ;;  %v19199_v53 = vpop.f32.mrf.mxu0  ;;  %v9465_v55 = vadd.f32 %v9464_v42, %v9463_v25  ;;  %v9468_v0 = vadd.f32 %v9393_v50, %v9392_v6  ;;  %v19214_v8 = vpop.xlane.xlu1 %9065  ;;  %v9469_v24 = vsel %vm670_vm3, %v9394_v35, 0.0  ;;  %v12152_v50 = vld [vmem:[%s14758_s12 + $0x580] sm:$0xff] }
 0x42f   : > { %v13505_v57 = vpop.f32.mrf.mxu1  ;;  %21783 = vst [vmem:[#allocation127_spill] sm:$0xff] %v19214_v8  ;;  %v9345_v42 = vadd.f32 %v9268_v47, %v9267_v21  ;;  %v9346_v6 = vsel %vm670_vm3, %v9269_v52, 0.0  ;;  %v19229_v48 = vpop.xlane.xlu0 %9070  ;;  %v12250_v59 = vld [vmem:[%s14758_s12 + $0x490] sm:$0xff] }
 0x430   : > { %12182 = vst.msk [vmem:[%s14758_s12 + $0x4f0] sm:$0xff] %vm670_vm3, %v7791_v11  ;;  %v7800_v38 = vadd.f32 %v13505_v57, %v12143_v14  ;;  %v19209_v43 = vpop.f32.mrf.mxu0  ;;  %9466 = vadd.xlane.f32.xlu0 %v9465_v55  ;;  %v9470_v25 = vadd.f32 %v9469_v24, %v9468_v0  ;;  %v9395_v57 = vmul.f32 %v9267_v21, %v9267_v21  ;;  %21784 = vst [vmem:[#allocation128_spill] sm:$0xff] %v19229_v48 }
 0x431   : > { %v7685_v27 = vpop.f32.mrf.mxu1  ;;  %v9396_v14 = vmul.f32 %v9268_v47, %v9268_v47  ;;  %v9397_v55 = vmul.f32 %v9269_v52, %v9269_v52  ;;  %v9347_v35 = vadd.f32 %v9346_v6, %v9345_v42  ;;  %v12155_v42 = vld [vmem:[%s14758_s12 + $0x598] sm:$0xff] }
 0x432   : > { %12191 = vst.msk [vmem:[%s14758_s12 + $0x538] sm:$0xff] %vm670_vm3, %v7800_v38  ;;  %v7794_v26 = vadd.f32 %v12137_v3, %v7685_v27  ;;  %v19220_v11 = vpop.f32.mrf.mxu0  ;;  %9471 = vadd.xlane.f32.xlu1 %v9470_v25  ;;  %v12146_v3 = vld [vmem:[%s14758_s12 + $0x550] sm:$0xff]  ;;  %v19235_v52 = vpop.xlane.xlu1 %8967 }
 0x433   : > { %v13508_v40 = vpop.f32.mrf.mxu1  ;;  %v9473_v24 = vadd.f32 %v9396_v14, %v9395_v57  ;;  %21785 = vst [vmem:[#allocation129_spill] sm:$0xff] %v19235_v52  ;;  %v12149_v14 = vld [vmem:[%s14758_s12 + $0x568] sm:$0xff] }
 0x434   : > { %12185 = vst.msk [vmem:[%s14758_s12 + $0x508] sm:$0xff] %vm670_vm3, %v7794_v26  ;;  %v7809_v38 = vadd.f32 %v13508_v40, %v12152_v50  ;;  %v19226_v27 = vpop.f32.mrf.mxu0  ;;  %9348 = vadd.xlane.f32.xlu0 %v9347_v35  ;;  %v9474_v26 = vsel %vm670_vm3, %v9397_v55, 0.0 }
 0x435   : > { %v7698_v0 = vpop.f32.mrf.mxu1  ;;  %v9475_v6 = vadd.f32 %v9474_v26, %v9473_v24  ;;  %v12268_v15 = vld [vmem:[%s14758_s12 + $0x520] sm:$0xff] }
 0x436   : > { %12200 = vst.msk [vmem:[%s14758_s12 + $0x580] sm:$0xff] %vm670_vm3, %v7809_v38  ;;  %v7803_v21 = vadd.f32 %v12146_v3, %v7698_v0  ;;  %v19233_v47 = vpop.f32.mrf.mxu0  ;;  %v12164_v0 = vld [vmem:[%s14758_s12 + $0x5e0] sm:$0xff]  ;;  %v19249_v3 = vpop.xlane.xlu0 %8972 }
 0x437   : > { %v13509_v25 = vpop.f32.mrf.mxu1  ;;  %21786 = vst [vmem:[#allocation130_spill] sm:$0xff] %v19249_v3  ;;  %v19255_v26 = vpop.xlane.xlu1 %8957  ;;  %v12262_v41 = vld [vmem:[%s14758_s12 + $0x4f0] sm:$0xff] }
 0x438   : > { %12194 = vst.msk [vmem:[%s14758_s12 + $0x550] sm:$0xff] %vm670_vm3, %v7803_v21  ;;  %v7812_v40 = vadd.f32 %v13509_v25, %v12155_v42  ;;  %v19241_v50 = vpop.f32.mrf.mxu0  ;;  %9476 = vadd.xlane.f32.xlu0 %v9475_v6  ;;  %21787 = vst [vmem:[#allocation131_spill] sm:$0xff] %v19255_v26  ;;  %v12158_v42 = vld [vmem:[%s14758_s12 + $0x5b0] sm:$0xff] }
 0x439   : > { %v7701_v57 = vpop.f32.mrf.mxu1 }
 0x43a   : > { %12203 = vst.msk [vmem:[%s14758_s12 + $0x598] sm:$0xff] %vm670_vm3, %v7812_v40  ;;  %v7806_v35 = vadd.f32 %v12149_v14, %v7701_v57  ;;  %v19246_v55 = vpop.f32.mrf.mxu0  ;;  %v12167_v14 = vld [vmem:[%s14758_s12 + $0x5f8] sm:$0xff]  ;;  %v19268_v48 = vpop.xlane.xlu0 %8962 }
 0x43b   : > { %v13512_v38 = vpop.f32.mrf.mxu1  ;;  %21788 = vst [vmem:[#allocation132_spill] sm:$0xff] %v19268_v48  ;;  %v19273_v8 = vpop.xlane.xlu1 %9095 }
 0x43c   : > { %12197 = vst.msk [vmem:[%s14758_s12 + $0x568] sm:$0xff] %vm670_vm3, %v7806_v35  ;;  %v7821_v24 = vadd.f32 %v13512_v38, %v12164_v0  ;;  %v19253_v21 = vpop.f32.mrf.mxu0  ;;  %21789 = vst [vmem:[#allocation133_spill] sm:$0xff] %v19273_v8  ;;  %v12251_v8 = vld [vmem:[%s14758_s12 + $0x498] sm:$0xff] }
 0x43d   : > { %v7714_v25 = vpop.f32.mrf.mxu1  ;;  %v12280_v45 = vld [vmem:[%s14758_s12 + $0x580] sm:$0xff] }
 0x43e   : > { %12212 = vst.msk [vmem:[%s14758_s12 + $0x5e0] sm:$0xff] %vm670_vm3, %v7821_v24  ;;  %v7815_v6 = vadd.f32 %v12158_v42, %v7714_v25  ;;  %v19260_v40 = vpop.f32.mrf.mxu0  ;;  %v12256_v42 = vld [vmem:[%s14758_s12 + $0x4c0] sm:$0xff]  ;;  %v19290_v52 = vpop.xlane.xlu0 %9100 }
 0x43f   : > { %v13513_v57 = vpop.f32.mrf.mxu1  ;;  %21792 = vst [vmem:[#allocation136_spill] sm:$0xff] %v19290_v52  ;;  %v12130_v52 = vld [vmem:[%s14758_s12 + $0x4d0] sm:$0xff] }
 0x440   : > { %12206 = vst.msk [vmem:[%s14758_s12 + $0x5b0] sm:$0xff] %vm670_vm3, %v7815_v6  ;;  %v7824_v35 = vadd.f32 %v13513_v57, %v12167_v14  ;;  %v19265_v38 = vpop.f32.mrf.mxu0  ;;  %v12248_v57 = vld [vmem:[%s14758_s12 + $0x480] sm:$0xff] }
 0x441   : > { %v7717_v0 = vpop.f32.mrf.mxu1 }
 0x442   : > { %12215 = vst.msk [vmem:[%s14758_s12 + $0x5f8] sm:$0xff] %vm670_vm3, %v7824_v35  ;;  %v7818_v24 = vadd.f32 %v12161_v37, %v7717_v0  ;;  %v13532_v25 = vpop.f32.mrf.mxu0  ;;  %v12249_v0 = vld [vmem:[%s14758_s12 + $0x488] sm:$0xff] }
 0x443   : > { %v8429_v6 = vadd.f32 %v13532_v25, %v12256_v42  ;;  %v8197_v16 = vpop.f32.mrf.mxu1  ;;  %v12259_v42 = vld [vmem:[%s14758_s12 + $0x4d8] sm:$0xff] }
 0x444   : > { %12209 = vst.msk [vmem:[%s14758_s12 + $0x5c8] sm:$0xff] %vm670_vm3, %v7818_v24  ;;  %v8310_v14 = vpop.f32.mrf.mxu0  ;;  %v19281_v19 = vadd.f32 %v12248_v57, %v8197_v16 }
 0x445   : > { %12304 = vst.msk [vmem:[%s14758_s12 + $0x4c0] sm:$0xff] %vm670_vm3, %v8429_v6  ;;  %v8423_v37 = vadd.f32 %v12250_v59, %v8310_v14  ;;  %v8199_v35 = vpop.f32.mrf.mxu1  ;;  %v12253_v6 = vld [vmem:[%s14758_s12 + $0x4a8] sm:$0xff]  ;;  %v19299_v14 = vadd.f32 %v19146_v58, %v18670_v9  ;;  %v19312_v9 = vadd.f32 %v19171_v10, %v18714_v62  ;;  %v12135_v10 = vld [vmem:[%s14758_s12 + $0x4f8] sm:$0xff] }
 0x446   : > { %21790 = vst [vmem:[#allocation134_spill] sm:$0xff] %v19281_v19  ;;  %v19284_v29 = vadd.f32 %v12249_v0, %v8199_v35  ;;  %v13533_v25 = vpop.f32.mrf.mxu0  ;;  %v12129_v35 = vld [vmem:[%s14758_s12 + $0x4c8] sm:$0xff]  ;;  %v19303_v0 = vpop.xlane.xlu1 %9085 }
 0x447   : > { %12298 = vst.msk [vmem:[%s14758_s12 + $0x490] sm:$0xff] %vm670_vm3, %v8423_v37  ;;  %v8432_v24 = vadd.f32 %v13533_v25, %v12259_v42  ;;  %v8201_v3 = vpop.f32.mrf.mxu1  ;;  %v12127_v37 = vld [vmem:[%s14758_s12 + $0x4b8] sm:$0xff]  ;;  %21794 = vst [vmem:[#allocation138_spill] sm:$0xff] %v19303_v0  ;;  %v12252_v25 = vld [vmem:[%s14758_s12 + $0x4a0] sm:$0xff]  ;;  %v9558_v42 = vmul.f32 %v16541_v22, %v19281_v19  ;;  %v7787_v19 = vadd.f32 %v12130_v52, %v19035_v30 }
 0x448   : > { %21791 = vst [vmem:[#allocation135_spill] sm:$0xff] %v19284_v29  ;;  %v19292_v16 = vadd.f32 %v12251_v8, %v8201_v3  ;;  %v8313_v59 = vpop.f32.mrf.mxu0  ;;  %v9559_v57 = vmul.f32 %v16534_v32, %v19284_v29  ;;  %v7784_v58 = vadd.f32 %v12127_v37, %v19014_v31  ;;  %v7786_v29 = vadd.f32 %v12129_v35, %v19026_v23  ;;  %v12133_v62 = vld [vmem:[%s14758_s12 + $0x4e8] sm:$0xff]  ;;  %v12254_v37 = vld [vmem:[%s14758_s12 + $0x4b0] sm:$0xff] }
 0x449   : > { %12307 = vst.msk [vmem:[%s14758_s12 + $0x4d8] sm:$0xff] %vm670_vm3, %v8432_v24  ;;  %v8426_v8 = vadd.f32 %v12253_v6, %v8313_v59  ;;  %v8203_v3 = vpop.f32.mrf.mxu1  ;;  %v12132_v24 = vld [vmem:[%s14758_s12 + $0x4e0] sm:$0xff]  ;;  %v19334_v30 = vadd.f32 %v12135_v10, %v19067_v17  ;;  %v12138_v52 = vld [vmem:[%s14758_s12 + $0x510] sm:$0xff] }
 0x44a   : > { %21793 = vst [vmem:[#allocation137_spill] sm:$0xff] %v19292_v16  ;;  %v19318_v59 = vadd.f32 %v12252_v25, %v8203_v3  ;;  %v13536_v6 = vpop.f32.mrf.mxu0  ;;  %v19323_v48 = vadd.f32 %v12132_v24, %v19044_v56  ;;  %v9687_v35 = vmul.f32 %v9559_v57, %v9559_v57  ;;  %v19331_v3 = vadd.f32 %v12133_v62, %v19059_v13  ;;  %v12136_v56 = vld [vmem:[%s14758_s12 + $0x500] sm:$0xff]  ;;  %v12141_v13 = vld [vmem:[%s14758_s12 + $0x528] sm:$0xff] }
 0x44b   : > { %12301 = vst.msk [vmem:[%s14758_s12 + $0x4a8] sm:$0xff] %vm670_vm3, %v8426_v8  ;;  %v8441_v31 = vadd.f32 %v13536_v6, %v12268_v15  ;;  %v8207_v23 = vpop.f32.mrf.mxu1  ;;  %v9561_v15 = vmul.f32 %v16541_v22, %v19292_v16  ;;  %v19344_v8 = vadd.f32 %v12136_v56, %v19079_v51  ;;  %v12139_v6 = vld [vmem:[%s14758_s12 + $0x518] sm:$0xff]  ;;  %v19354_v0 = vadd.f32 %v12138_v52, %v19088_v28  ;;  %v19359_v56 = vpop.xlane.xlu0 %9090 }
 0x44c   : > { %21795 = vst [vmem:[#allocation139_spill] sm:$0xff] %v19318_v59  ;;  %v19338_v25 = vadd.f32 %v12254_v37, %v8207_v23  ;;  %v8326_v24 = vpop.f32.mrf.mxu0  ;;  %v12688_v62 = vld [vmem:[%s14758_s12 + $0x4c0] sm:$0xff]  ;;  %v9686_v23 = vmul.f32 %v9558_v42, %v9558_v42  ;;  %v9562_v37 = vmul.f32 %v16534_v32, %v19318_v59  ;;  %v19357_v51 = vadd.f32 %v12139_v6, %v19094_v54  ;;  %v19370_v59 = vpop.xlane.xlu1 %8987 }
 0x44d   : > { %12316 = vst.msk [vmem:[%s14758_s12 + $0x520] sm:$0xff] %vm670_vm3, %v8441_v31  ;;  %v8435_v17 = vadd.f32 %v12262_v41, %v8326_v24  ;;  %v8209_v10 = vpop.f32.mrf.mxu1  ;;  %21797 = vst [vmem:[#allocation141_spill] sm:$0xff] %v19359_v56  ;;  %v19362_v16 = vadd.f32 %v12141_v13, %v19104_v5  ;;  %v12271_v24 = vld [vmem:[%s14758_s12 + $0x538] sm:$0xff]  ;;  %v9606_v6 = vadd.f32 %v9559_v57, %v9558_v42  ;;  %v12265_v56 = vld [vmem:[%s14758_s12 + $0x508] sm:$0xff] }
 0x44e   : > { %21796 = vst [vmem:[#allocation140_spill] sm:$0xff] %v19338_v25  ;;  %v19365_v20 = vld [vmem:[%s14758_s12 + $0x490] sm:$0xff]  ;;  %v19367_v41 = vadd.f32 %v8209_v10, %v7784_v58  ;;  %v13537_v31 = vpop.f32.mrf.mxu0  ;;  %21800 = vst [vmem:[#allocation144_spill] sm:$0xff] %v19370_v59  ;;  %v9734_v5 = vadd.f32 %v9687_v35, %v9686_v23  ;;  %v9564_v58 = vmul.f32 %v16541_v22, %v19338_v25 }
 0x44f   : > { %21798 = vst [vmem:[#allocation142_spill] sm:$0xff] %v19365_v20  ;;  %12310 = vst.msk [vmem:[%s14758_s12 + $0x4f0] sm:$0xff] %vm670_vm3, %v8435_v17  ;;  %v8444_v28 = vadd.f32 %v13537_v31, %v12271_v24  ;;  %v8211_v52 = vpop.f32.mrf.mxu1  ;;  %v9560_v54 = vmul.f32 %v19365_v20, %v16555_v12  ;;  %v9566_v17 = vmul.f32 %v12688_v62, %v16555_v12 }
 0x450   : > { %21799 = vst [vmem:[#allocation143_spill] sm:$0xff] %v19367_v41  ;;  %v8329_v13 = vpop.f32.mrf.mxu0  ;;  %v9565_v10 = vmul.f32 %v16534_v32, %v19367_v41  ;;  %v9689_v31 = vmul.f32 %v9561_v15, %v9561_v15  ;;  %v9611_v35 = vadd.f32 %v9562_v37, %v9561_v15  ;;  %v19388_v20 = vadd.f32 %v8211_v52, %v7786_v29  ;;  %v19398_v29 = vpop.xlane.xlu0 %8992 }
 0x451   : > { %12319 = vst.msk [vmem:[%s14758_s12 + $0x538] sm:$0xff] %vm670_vm3, %v8444_v28  ;;  %v8438_v24 = vadd.f32 %v12265_v56, %v8329_v13  ;;  %v8213_v59 = vpop.f32.mrf.mxu1  ;;  %v9607_v57 = vsel %vm670_vm3, %v9560_v54, 0.0  ;;  %v9688_v42 = vmul.f32 %v9560_v54, %v9560_v54  ;;  %v9690_v62 = vmul.f32 %v9562_v37, %v9562_v37  ;;  %21803 = vst [vmem:[#allocation147_spill] sm:$0xff] %v19398_v29 }
 0x452   : > { %v19386_v23 = vld [vmem:[%s14758_s12 + $0x4a8] sm:$0xff]  ;;  %v19390_v25 = vadd.f32 %v8213_v59, %v7787_v19  ;;  %v13540_v41 = vpop.f32.mrf.mxu0  ;;  %v9608_v33 = vadd.f32 %v9607_v57, %v9606_v6  ;;  %v9693_v13 = vmul.f32 %v9565_v10, %v9565_v10  ;;  %v12274_v59 = vld [vmem:[%s14758_s12 + $0x550] sm:$0xff]  ;;  %v9616_v52 = vadd.f32 %v9565_v10, %v9564_v58 }
 0x453   : > { %21801 = vst [vmem:[#allocation145_spill] sm:$0xff] %v19386_v23  ;;  %12313 = vst.msk [vmem:[%s14758_s12 + $0x508] sm:$0xff] %vm670_vm3, %v8438_v24  ;;  %v8453_v56 = vadd.f32 %v13540_v41, %v12280_v45  ;;  %v9735_v54 = vsel %vm670_vm3, %v9688_v42, 0.0  ;;  %v9563_v15 = vmul.f32 %v19386_v23, %v16555_v12  ;;  %v9617_v37 = vsel %vm670_vm3, %v9566_v17, 0.0  ;;  %v19402_v45 = vpop.xlane.xlu1 %8977  ;;  %v12691_v41 = vld [vmem:[%s14758_s12 + $0x4d8] sm:$0xff] }
 0x454   : > { %21802 = vst [vmem:[#allocation146_spill] sm:$0xff] %v19390_v25  ;;  %v8217_v28 = vpop.f32.mrf.mxu1  ;;  %v8342_v19 = vpop.f32.mrf.mxu0  ;;  %9609 = vadd.xlane.f32.xlu1 %v9608_v33  ;;  %v9692_v6 = vmul.f32 %v9564_v58, %v9564_v58  ;;  %v9694_v24 = vmul.f32 %v9566_v17, %v9566_v17  ;;  %21804 = vst [vmem:[#allocation148_spill] sm:$0xff] %v19402_v45  ;;  %v9568_v33 = vmul.f32 %v16534_v32, %v19390_v25  ;;  %v12283_v45 = vld [vmem:[%s14758_s12 + $0x598] sm:$0xff]  ;;  %v12277_v25 = vld [vmem:[%s14758_s12 + $0x568] sm:$0xff] }
 0x455   : > { %12328 = vst.msk [vmem:[%s14758_s12 + $0x580] sm:$0xff] %vm670_vm3, %v8453_v56  ;;  %v8447_v57 = vadd.f32 %v12274_v59, %v8342_v19  ;;  %v9612_v23 = vsel %vm670_vm3, %v9563_v15, 0.0  ;;  %v9691_v29 = vmul.f32 %v9563_v15, %v9563_v15  ;;  %v19412_v26 = vadd.f32 %v8217_v28, %v19323_v48 }
 0x456   : > { %v8219_v42 = vpop.f32.mrf.mxu1  ;;  %v12694_v10 = vld [vmem:[%s14758_s12 + $0x4f0] sm:$0xff]  ;;  %v13541_v17 = vpop.f32.mrf.mxu0  ;;  %v9736_v18 = vadd.f32 %v9735_v54, %v9734_v5  ;;  %v9613_v56 = vadd.f32 %v9612_v23, %v9611_v35  ;;  %v9744_v1 = vadd.f32 %v9693_v13, %v9692_v6  ;;  %v9567_v48 = vmul.f32 %v16541_v22, %v19388_v20 }
 0x457   : > { %21805 = vst [vmem:[#allocation149_spill] sm:$0xff] %v19412_v26  ;;  %v19415_v58 = vadd.f32 %v8219_v42, %v19331_v3  ;;  %12322 = vst.msk [vmem:[%s14758_s12 + $0x550] sm:$0xff] %vm670_vm3, %v8447_v57  ;;  %v8456_v19 = vadd.f32 %v13541_v17, %v12283_v45  ;;  %v9740_v59 = vsel %vm670_vm3, %v9691_v29, 0.0  ;;  %v9739_v3 = vadd.f32 %v9690_v62, %v9689_v31  ;;  %v19432_v57 = vpop.xlane.xlu0 %8982 }
 0x458   : > { %v8221_v15 = vpop.f32.mrf.mxu1  ;;  %v8345_v28 = vpop.f32.mrf.mxu0  ;;  %9737 = vadd.xlane.f32.xlu1 %v9736_v18  ;;  %9614 = vadd.xlane.f32.xlu0 %v9613_v56  ;;  %v9745_v5 = vsel %vm670_vm3, %v9694_v24, 0.0  ;;  %v9569_v35 = vmul.f32 %v12691_v41, %v16555_v12  ;;  %v9618_v29 = vadd.f32 %v9617_v37, %v9616_v52  ;;  %v9621_v6 = vadd.f32 %v9568_v33, %v9567_v48  ;;  %v12142_v18 = vld [vmem:[%s14758_s12 + $0x530] sm:$0xff]  ;;  %v12292_v24 = vld [vmem:[%s14758_s12 + $0x5e0] sm:$0xff] }
 0x459   : > { %21806 = vst [vmem:[#allocation150_spill] sm:$0xff] %v19415_v58  ;;  %v9571_v23 = vmul.f32 %v16534_v32, %v19415_v58  ;;  %12331 = vst.msk [vmem:[%s14758_s12 + $0x598] sm:$0xff] %vm670_vm3, %v8456_v19  ;;  %v8450_v54 = vadd.f32 %v12277_v25, %v8345_v28  ;;  %v9572_v45 = vmul.f32 %v12694_v10, %v16555_v12  ;;  %v19441_v37 = vpop.xlane.xlu1 %9115 }
 0x45a   : > { %v8223_v13 = vpop.f32.mrf.mxu1  ;;  %v13544_v62 = vpop.f32.mrf.mxu0  ;;  %v9741_v41 = vadd.f32 %v9740_v59, %v9739_v3  ;;  %v9570_v42 = vmul.f32 %v16541_v22, %v19412_v26  ;;  %v9696_v25 = vmul.f32 %v9568_v33, %v9568_v33  ;;  %v7799_v52 = vadd.f32 %v12142_v18, %v19123_v61  ;;  %v12286_v59 = vld [vmem:[%s14758_s12 + $0x5b0] sm:$0xff] }
 0x45b   : > { %v19435_v31 = vadd.f32 %v8223_v13, %v19344_v8  ;;  %v19444_v10 = vadd.f32 %v8221_v15, %v19334_v30  ;;  %12325 = vst.msk [vmem:[%s14758_s12 + $0x568] sm:$0xff] %vm670_vm3, %v8450_v54  ;;  %v8465_v8 = vadd.f32 %v13544_v62, %v12292_v24  ;;  %v9746_v56 = vadd.f32 %v9745_v5, %v9744_v1  ;;  %v12697_v13 = vld [vmem:[%s14758_s12 + $0x508] sm:$0xff]  ;;  %v12295_v62 = vld [vmem:[%s14758_s12 + $0x5f8] sm:$0xff] }
 0x45c   : > { %v8227_v17 = vpop.f32.mrf.mxu1  ;;  %v8358_v19 = vpop.f32.mrf.mxu0  ;;  %9619 = vadd.xlane.f32.xlu1 %v9618_v29  ;;  %9742 = vadd.xlane.f32.xlu0 %v9741_v41  ;;  %v9622_v33 = vsel %vm670_vm3, %v9569_v35, 0.0  ;;  %v9626_v28 = vadd.f32 %v9571_v23, %v9570_v42  ;;  %v9695_v61 = vmul.f32 %v9567_v48, %v9567_v48  ;;  %v9697_v3 = vmul.f32 %v9569_v35, %v9569_v35  ;;  %v12144_v41 = vld [vmem:[%s14758_s12 + $0x540] sm:$0xff] }
 0x45d   : > { %21807 = vst [vmem:[#allocation151_spill] sm:$0xff] %v19435_v31  ;;  %21808 = vst [vmem:[#allocation152_spill] sm:$0xff] %v19444_v10  ;;  %v8459_v30 = vadd.f32 %v12286_v59, %v8358_v19  ;;  %v9623_v54 = vadd.f32 %v9622_v33, %v9621_v6  ;;  %v9627_v1 = vsel %vm670_vm3, %v9572_v45, 0.0  ;;  %v9699_v5 = vmul.f32 %v9571_v23, %v9571_v23  ;;  %v12289_v33 = vld [vmem:[%s14758_s12 + $0x5c8] sm:$0xff] }
 0x45e   : > { %12340 = vst.msk [vmem:[%s14758_s12 + $0x5e0] sm:$0xff] %vm670_vm3, %v8465_v8  ;;  %v8229_v15 = vpop.f32.mrf.mxu1  ;;  %v19455_v29 = vadd.f32 %v8227_v17, %v19354_v0  ;;  %v13545_v48 = vpop.f32.mrf.mxu0  ;;  %v9749_v35 = vadd.f32 %v9696_v25, %v9695_v61  ;;  %v9574_v24 = vmul.f32 %v16534_v32, %v19435_v31  ;;  %v9698_v8 = vmul.f32 %v9570_v42, %v9570_v42  ;;  %v12700_v25 = vld [vmem:[%s14758_s12 + $0x520] sm:$0xff]  ;;  %v12145_v31 = vld [vmem:[%s14758_s12 + $0x548] sm:$0xff] }
 0x45f   : > { %v19458_v18 = vadd.f32 %v8229_v15, %v19357_v51  ;;  %12334 = vst.msk [vmem:[%s14758_s12 + $0x5b0] sm:$0xff] %vm670_vm3, %v8459_v30  ;;  %v8468_v6 = vadd.f32 %v13545_v48, %v12295_v62  ;;  %v9700_v19 = vmul.f32 %v9572_v45, %v9572_v45  ;;  %v9573_v0 = vmul.f32 %v16541_v22, %v19444_v10  ;;  %v19469_v17 = vpop.xlane.xlu0 %9120  ;;  %v19475_v45 = vpop.xlane.xlu1 %9105 }
 0x460   : > { %21809 = vst [vmem:[#allocation153_spill] sm:$0xff] %v19455_v29  ;;  %v8231_v23 = vpop.f32.mrf.mxu1  ;;  %v7801_v51 = vadd.f32 %v12144_v41, %v19135_v34  ;;  %v8361_v59 = vpop.f32.mrf.mxu0  ;;  %9747 = vadd.xlane.f32.xlu1 %v9746_v56  ;;  %9624 = vadd.xlane.f32.xlu0 %v9623_v54  ;;  %v9628_v61 = vadd.f32 %v9627_v1, %v9626_v28  ;;  %v9750_v30 = vsel %vm670_vm3, %v9697_v3, 0.0  ;;  %v12147_v56 = vld [vmem:[%s14758_s12 + $0x558] sm:$0xff] }
 0x461   : > { %21810 = vst [vmem:[#allocation154_spill] sm:$0xff] %v19458_v18  ;;  %v9575_v42 = vmul.f32 %v12697_v13, %v16555_v12  ;;  %12343 = vst.msk [vmem:[%s14758_s12 + $0x5f8] sm:$0xff] %vm670_vm3, %v8468_v6  ;;  %v8462_v34 = vadd.f32 %v12289_v33, %v8361_v59  ;;  %v9754_v48 = vadd.f32 %v9699_v5, %v9698_v8  ;;  %v9755_v8 = vsel %vm670_vm3, %v9700_v19, 0.0  ;;  %v12148_v19 = vld [vmem:[%s14758_s12 + $0x560] sm:$0xff] }
 0x462   : > { %v8233_v15 = vpop.f32.mrf.mxu1  ;;  %v9631_v62 = vadd.f32 %v9574_v24, %v9573_v0  ;;  %v9577_v41 = vmul.f32 %v16534_v32, %v19458_v18  ;;  %v9751_v28 = vadd.f32 %v9750_v30, %v9749_v35  ;;  %v9576_v3 = vmul.f32 %v16541_v22, %v19455_v29  ;;  %v12706_v18 = vld [vmem:[%s14758_s12 + $0x550] sm:$0xff] }
 0x463   : > { %v19483_v54 = vadd.f32 %v8233_v15, %v7799_v52  ;;  %v9702_v13 = vmul.f32 %v9574_v24, %v9574_v24  ;;  %v7802_v1 = vadd.f32 %v12145_v31, %v19144_v39  ;;  %v7804_v6 = vadd.f32 %v12147_v56, %v19152_v46  ;;  %12337 = vst.msk [vmem:[%s14758_s12 + $0x5c8] sm:$0xff] %vm670_vm3, %v8462_v34  ;;  %v12703_v31 = vld [vmem:[%s14758_s12 + $0x538] sm:$0xff]  ;;  %v12150_v56 = vld [vmem:[%s14758_s12 + $0x570] sm:$0xff] }
 0x464   : > { %v8237_v5 = vpop.f32.mrf.mxu1  ;;  %v9578_v52 = vmul.f32 %v12700_v25, %v16555_v12  ;;  %v19494_v59 = vadd.f32 %v8231_v23, %v19362_v16  ;;  %9629 = vadd.xlane.f32.xlu1 %v9628_v61  ;;  %9752 = vadd.xlane.f32.xlu0 %v9751_v28  ;;  %v9632_v35 = vsel %vm670_vm3, %v9575_v42, 0.0  ;;  %v9701_v24 = vmul.f32 %v9573_v0, %v9573_v0  ;;  %v19500_v25 = vpop.xlane.xlu0 %9110 }
 0x465   : > { %21811 = vst [vmem:[#allocation155_spill] sm:$0xff] %v19483_v54  ;;  %v9705_v39 = vmul.f32 %v9577_v41, %v9577_v41  ;;  %v9756_v33 = vadd.f32 %v9755_v8, %v9754_v48  ;;  %v9633_v30 = vadd.f32 %v9632_v35, %v9631_v62  ;;  %v9636_v34 = vadd.f32 %v9577_v41, %v9576_v3  ;;  %v19508_v62 = vpop.xlane.xlu1 %8997  ;;  %v12151_v35 = vld [vmem:[%s14758_s12 + $0x578] sm:$0xff] }
 0x466   : > { %21812 = vst [vmem:[#allocation156_spill] sm:$0xff] %v19494_v59  ;;  %v8239_v46 = vpop.f32.mrf.mxu1  ;;  %v9703_v15 = vmul.f32 %v9575_v42, %v9575_v42  ;;  %v9759_v23 = vadd.f32 %v9702_v13, %v9701_v24  ;;  %v9704_v61 = vmul.f32 %v9576_v3, %v9576_v3  ;;  %v9580_v0 = vmul.f32 %v16534_v32, %v19483_v54 }
 0x467   : > { %v19502_v16 = vadd.f32 %v8239_v46, %v7802_v1  ;;  %v7805_v28 = vadd.f32 %v12148_v19, %v19164_v44  ;;  %v7807_v48 = vadd.f32 %v12150_v56, %v19176_v4  ;;  %v19510_v41 = vadd.f32 %v8237_v5, %v7801_v51  ;;  %v12153_v19 = vld [vmem:[%s14758_s12 + $0x588] sm:$0xff] }
 0x468   : > { %v8241_v42 = vpop.f32.mrf.mxu1  ;;  %v9706_v8 = vmul.f32 %v9578_v52, %v9578_v52  ;;  %9757 = vadd.xlane.f32.xlu1 %v9756_v33  ;;  %9634 = vadd.xlane.f32.xlu0 %v9633_v30  ;;  %v9637_v3 = vsel %vm670_vm3, %v9578_v52, 0.0  ;;  %v9764_v13 = vadd.f32 %v9705_v39, %v9704_v61  ;;  %v9579_v1 = vmul.f32 %v16541_v22, %v19494_v59 }
 0x469   : > { %21813 = vst [vmem:[#allocation157_spill] sm:$0xff] %v19502_v16  ;;  %21814 = vst [vmem:[#allocation158_spill] sm:$0xff] %v19510_v41  ;;  %v9581_v44 = vmul.f32 %v12703_v31, %v16555_v12  ;;  %v7808_v4 = vadd.f32 %v12151_v35, %v19192_v63  ;;  %v9638_v51 = vadd.f32 %v9637_v3, %v9636_v34  ;;  %v9760_v5 = vsel %vm670_vm3, %v9703_v15, 0.0  ;;  %v19530_v15 = vpop.xlane.xlu0 %9002  ;;  %v19535_v35 = vpop.xlane.xlu1 %9007 }
 0x46a   : > { %v8243_v24 = vpop.f32.mrf.mxu1  ;;  %v9583_v46 = vmul.f32 %v16534_v32, %v19502_v16  ;;  %v9761_v30 = vadd.f32 %v9760_v5, %v9759_v23  ;;  %v9641_v52 = vadd.f32 %v9580_v0, %v9579_v1  ;;  %v9708_v39 = vmul.f32 %v9580_v0, %v9580_v0  ;;  %v12154_v16 = vld [vmem:[%s14758_s12 + $0x590] sm:$0xff] }
 0x46b   : > { %v19523_v33 = vadd.f32 %v8243_v24, %v7805_v28  ;;  %v7810_v56 = vadd.f32 %v12153_v19, %v19199_v53  ;;  %v9765_v31 = vsel %vm670_vm3, %v9706_v8, 0.0  ;;  %v9582_v63 = vmul.f32 %v16541_v22, %v19510_v41  ;;  %v12709_v8 = vld [vmem:[%s14758_s12 + $0x568] sm:$0xff]  ;;  %v12156_v41 = vld [vmem:[%s14758_s12 + $0x5a0] sm:$0xff] }
 0x46c   : > { %v8247_v61 = vpop.f32.mrf.mxu1  ;;  %v9584_v34 = vmul.f32 %v12706_v18, %v16555_v12  ;;  %v19532_v28 = vadd.f32 %v8241_v42, %v7804_v6  ;;  %9639 = vadd.xlane.f32.xlu1 %v9638_v51  ;;  %9762 = vadd.xlane.f32.xlu0 %v9761_v30  ;;  %v9766_v23 = vadd.f32 %v9765_v31, %v9764_v13  ;;  %v9642_v0 = vsel %vm670_vm3, %v9581_v44, 0.0 }
 0x46d   : > { %21815 = vst [vmem:[#allocation159_spill] sm:$0xff] %v19523_v33  ;;  %v9707_v53 = vmul.f32 %v9579_v1, %v9579_v1  ;;  %v19538_v3 = vadd.f32 %v8247_v61, %v7807_v48  ;;  %v9646_v5 = vadd.f32 %v9583_v46, %v9582_v63  ;;  %v9709_v18 = vmul.f32 %v9581_v44, %v9581_v44  ;;  %v12712_v44 = vld [vmem:[%s14758_s12 + $0x580] sm:$0xff] }
 0x46e   : > { %21816 = vst [vmem:[#allocation160_spill] sm:$0xff] %v19532_v28  ;;  %v8249_v24 = vpop.f32.mrf.mxu1  ;;  %v9711_v19 = vmul.f32 %v9583_v46, %v9583_v46  ;;  %v9643_v42 = vadd.f32 %v9642_v0, %v9641_v52  ;;  %v9586_v13 = vmul.f32 %v16534_v32, %v19523_v33  ;;  %v7811_v1 = vadd.f32 %v12154_v16, %v19209_v43  ;;  %v19559_v0 = vpop.xlane.xlu0 %9012 }
 0x46f   : > { %21817 = vst [vmem:[#allocation161_spill] sm:$0xff] %v19538_v3  ;;  %v19542_v6 = vadd.f32 %v8249_v24, %v7808_v4  ;;  %v9769_v51 = vadd.f32 %v9708_v39, %v9707_v53  ;;  %v7813_v30 = vadd.f32 %v12156_v41, %v19220_v11  ;;  %v9710_v61 = vmul.f32 %v9582_v63, %v9582_v63  ;;  %v19564_v33 = vpop.xlane.xlu1 %9125 }
 0x470   : > { %v8251_v48 = vpop.f32.mrf.mxu1  ;;  %v9712_v31 = vmul.f32 %v9584_v34, %v9584_v34  ;;  %9767 = vadd.xlane.f32.xlu1 %v9766_v23  ;;  %9644 = vadd.xlane.f32.xlu0 %v9643_v42  ;;  %v9647_v4 = vsel %vm670_vm3, %v9584_v34, 0.0  ;;  %v9585_v46 = vmul.f32 %v16541_v22, %v19532_v28  ;;  %v9587_v52 = vmul.f32 %v12709_v8, %v16555_v12  ;;  %v12157_v23 = vld [vmem:[%s14758_s12 + $0x5a8] sm:$0xff]  ;;  %v12159_v34 = vld [vmem:[%s14758_s12 + $0x5b8] sm:$0xff] }
 0x471   : > { %21818 = vst [vmem:[#allocation162_spill] sm:$0xff] %v19542_v6  ;;  %v9589_v43 = vmul.f32 %v16534_v32, %v19542_v6  ;;  %v9648_v11 = vadd.f32 %v9647_v4, %v9646_v5  ;;  %v9770_v41 = vsel %vm670_vm3, %v9709_v18, 0.0  ;;  %v9774_v39 = vadd.f32 %v9711_v19, %v9710_v61 }
 0x472   : > { %v8253_v16 = vpop.f32.mrf.mxu1  ;;  %v9588_v63 = vmul.f32 %v16541_v22, %v19538_v3  ;;  %v9771_v24 = vadd.f32 %v9770_v41, %v9769_v51  ;;  %v9651_v8 = vadd.f32 %v9586_v13, %v9585_v46  ;;  %v9714_v42 = vmul.f32 %v9586_v13, %v9586_v13  ;;  %v12715_v41 = vld [vmem:[%s14758_s12 + $0x598] sm:$0xff]  ;;  %v12162_v3 = vld [vmem:[%s14758_s12 + $0x5d0] sm:$0xff] }
 0x473   : > { %v19562_v53 = vadd.f32 %v8253_v16, %v7811_v1  ;;  %v7814_v5 = vadd.f32 %v12157_v23, %v19226_v27  ;;  %v7816_v18 = vadd.f32 %v12159_v34, %v19233_v47  ;;  %v19568_v19 = vadd.f32 %v8251_v48, %v7810_v56  ;;  %v12160_v48 = vld [vmem:[%s14758_s12 + $0x5c0] sm:$0xff] }
 0x474   : > { %v8257_v61 = vpop.f32.mrf.mxu1  ;;  %v9590_v4 = vmul.f32 %v12712_v44, %v16555_v12  ;;  %9649 = vadd.xlane.f32.xlu1 %v9648_v11  ;;  %9772 = vadd.xlane.f32.xlu0 %v9771_v24  ;;  %v9775_v1 = vsel %vm670_vm3, %v9712_v31, 0.0  ;;  %v9652_v51 = vsel %vm670_vm3, %v9587_v52, 0.0  ;;  %v9713_v13 = vmul.f32 %v9585_v46, %v9585_v46 }
 0x475   : > { %21819 = vst [vmem:[#allocation163_spill] sm:$0xff] %v19562_v53  ;;  %21820 = vst [vmem:[#allocation164_spill] sm:$0xff] %v19568_v19  ;;  %v9717_v16 = vmul.f32 %v9589_v43, %v9589_v43  ;;  %v9776_v27 = vadd.f32 %v9775_v1, %v9774_v39  ;;  %v9715_v23 = vmul.f32 %v9587_v52, %v9587_v52  ;;  %v19585_v1 = vpop.xlane.xlu0 %9130 }
 0x476   : > { %v8259_v6 = vpop.f32.mrf.mxu1  ;;  %v9716_v47 = vmul.f32 %v9588_v63, %v9588_v63  ;;  %v9592_v56 = vmul.f32 %v16534_v32, %v19562_v53  ;;  %v9653_v44 = vadd.f32 %v9652_v51, %v9651_v8  ;;  %v9656_v11 = vadd.f32 %v9589_v43, %v9588_v63  ;;  %v19589_v63 = vpop.xlane.xlu1 %9135 }
 0x477   : > { %v19577_v34 = vadd.f32 %v8259_v6, %v7814_v5  ;;  %v9779_v31 = vadd.f32 %v9714_v42, %v9713_v13  ;;  %v7817_v24 = vadd.f32 %v12160_v48, %v19241_v50  ;;  %v19581_v46 = vadd.f32 %v8257_v61, %v7813_v30  ;;  %v12718_v50 = vld [vmem:[%s14758_s12 + $0x5b0] sm:$0xff]  ;;  %v12163_v13 = vld [vmem:[%s14758_s12 + $0x5d8] sm:$0xff] }
 0x478   : > { %v8261_v28 = vpop.f32.mrf.mxu1  ;;  %v9718_v39 = vmul.f32 %v9590_v4, %v9590_v4  ;;  %v9591_v52 = vmul.f32 %v16541_v22, %v19568_v19  ;;  %v7819_v6 = vadd.f32 %v12162_v3, %v19246_v55  ;;  %9777 = vadd.xlane.f32.xlu1 %v9776_v27  ;;  %9654 = vadd.xlane.f32.xlu0 %v9653_v44  ;;  %v9657_v42 = vsel %vm670_vm3, %v9590_v4, 0.0  ;;  %v19841_v19 = vld [vmem:[%s14758_s12 + $0x1a8] sm:$0xff] }
 0x479   : > { %21821 = vst [vmem:[#allocation165_spill] sm:$0xff] %v19577_v34  ;;  %21822 = vst [vmem:[#allocation166_spill] sm:$0xff] %v19581_v46  ;;  %v9784_v8 = vadd.f32 %v9717_v16, %v9716_v47  ;;  %v9593_v43 = vmul.f32 %v12715_v41, %v16555_v12  ;;  %v9780_v5 = vsel %vm670_vm3, %v9715_v23, 0.0  ;;  %v9595_v51 = vmul.f32 %v16534_v32, %v19577_v34 }
 0x47a   : > { %v8263_v30 = vpop.f32.mrf.mxu1  ;;  %v9661_v61 = vadd.f32 %v9592_v56, %v9591_v52  ;;  %v9658_v3 = vadd.f32 %v9657_v42, %v9656_v11  ;;  %v9781_v16 = vadd.f32 %v9780_v5, %v9779_v31  ;;  %v9720_v27 = vmul.f32 %v9592_v56, %v9592_v56  ;;  %v12721_v31 = vld [vmem:[%s14758_s12 + $0x5c8] sm:$0xff]  ;;  %v19610_v5 = vpop.xlane.xlu0 %9140 }
 0x47b   : > { %v19597_v55 = vadd.f32 %v8263_v30, %v7817_v24  ;;  %v7820_v41 = vadd.f32 %v12163_v13, %v19253_v21  ;;  %v19600_v47 = vadd.f32 %v8261_v28, %v7816_v18  ;;  %v9785_v4 = vsel %vm670_vm3, %v9718_v39, 0.0  ;;  %v12165_v13 = vld [vmem:[%s14758_s12 + $0x5e8] sm:$0xff] }
 0x47c   : > { %v8267_v48 = vpop.f32.mrf.mxu1  ;;  %v9594_v23 = vmul.f32 %v16541_v22, %v19581_v46  ;;  %9659 = vadd.xlane.f32.xlu1 %v9658_v3  ;;  %9782 = vadd.xlane.f32.xlu0 %v9781_v16  ;;  %v9786_v44 = vadd.f32 %v9785_v4, %v9784_v8  ;;  %v9662_v24 = vsel %vm670_vm3, %v9593_v43, 0.0  ;;  %v9596_v11 = vmul.f32 %v12718_v50, %v16555_v12  ;;  %v12166_v4 = vld [vmem:[%s14758_s12 + $0x5f0] sm:$0xff] }
 0x47d   : > { %21823 = vst [vmem:[#allocation167_spill] sm:$0xff] %v19597_v55  ;;  %21824 = vst [vmem:[#allocation168_spill] sm:$0xff] %v19600_v47  ;;  %v9719_v56 = vmul.f32 %v9591_v52, %v9591_v52  ;;  %v9274_v28 = vpop.xlane.xlu1 %9273  ;;  %v9663_v18 = vadd.f32 %v9662_v24, %v9661_v61  ;;  %v9721_v30 = vmul.f32 %v9593_v43, %v9593_v43 }
 0x47e   : > { %v8269_v21 = vpop.f32.mrf.mxu1  ;;  %v9723_v42 = vmul.f32 %v9595_v51, %v9595_v51  ;;  %v9598_v39 = vmul.f32 %v16534_v32, %v19597_v55  ;;  %v19616_v8 = vadd.f32 %v9274_v28, %v19299_v14  ;;  %v9666_v50 = vadd.f32 %v9595_v51, %v9594_v23 }
 0x47f   : > { %v19613_v3 = vadd.f32 %v8269_v21, %v7820_v41  ;;  %v9789_v52 = vadd.f32 %v9720_v27, %v9719_v56  ;;  %v7822_v16 = vadd.f32 %v12165_v13, %v19260_v40  ;;  %v19620_v61 = vadd.f32 %v8267_v48, %v7819_v6  ;;  %v12724_v27 = vld [vmem:[%s14758_s12 + $0x5e0] sm:$0xff] }
 0x480   : > { %v8271_v43 = vpop.f32.mrf.mxu1  ;;  %v9722_v24 = vmul.f32 %v9594_v23, %v9594_v23  ;;  %v9597_v55 = vmul.f32 %v16541_v22, %v19600_v47  ;;  %v7823_v34 = vadd.f32 %v12166_v4, %v19265_v38  ;;  %9787 = vadd.xlane.f32.xlu1 %v9786_v44  ;;  %9664 = vadd.xlane.f32.xlu0 %v9663_v18  ;;  %v9667_v41 = vsel %vm670_vm3, %v9596_v11, 0.0 }
 0x481   : > { %21825 = vst [vmem:[#allocation169_spill] sm:$0xff] %v19613_v3  ;;  %21826 = vst [vmem:[#allocation170_spill] sm:$0xff] %v19620_v61  ;;  %v9724_v14 = vmul.f32 %v9596_v11, %v9596_v11  ;;  %v9599_v51 = vmul.f32 %v12721_v31, %v16555_v12  ;;  %v19628_v40 = vpop.xlane.xlu1 %9401  ;;  %v9790_v6 = vsel %vm670_vm3, %v9721_v30, 0.0  ;;  %v9601_v23 = vmul.f32 %v16534_v32, %v19613_v3  ;;  %v9279_v38 = vpop.xlane.xlu0 %9278  ;;  %v21902_v3 = vld [vmem:[#allocation76_spill] sm:$0xff] }
 0x482   : > { %v8273_v56 = vpop.f32.mrf.mxu1  ;;  %v9794_v48 = vadd.f32 %v9723_v42, %v9722_v24  ;;  %v9726_v21 = vmul.f32 %v9598_v39, %v9598_v39  ;;  %v9668_v44 = vadd.f32 %v9667_v41, %v9666_v50  ;;  %v9791_v18 = vadd.f32 %v9790_v6, %v9789_v52  ;;  %v12727_v41 = vld [vmem:[%s14758_s12 + $0x5f8] sm:$0xff] }
 0x483   : > { %v19633_v28 = vadd.f32 %v8273_v56, %v7823_v34  ;;  %v9671_v13 = vadd.f32 %v9598_v39, %v9597_v55  ;;  %v9144_v11 = vadd.f32 %v19111_v60, %v18656_v49  ;;  %v19638_v31 = vadd.f32 %v9279_v38, %v19312_v9 }
 0x484   : > { %v9600_v30 = vmul.f32 %v16541_v22, %v19620_v61  ;;  %v9725_v42 = vmul.f32 %v9597_v55, %v9597_v55  ;;  %v19642_v4 = vadd.f32 %v8271_v43, %v7822_v16  ;;  %9669 = vadd.xlane.f32.xlu1 %v9668_v44  ;;  %9792 = vadd.xlane.f32.xlu0 %v9791_v18  ;;  %v9795_v34 = vsel %vm670_vm3, %v9724_v14, 0.0  ;;  %v21898_v61 = vld [vmem:[#allocation20_spill] sm:$0xff] }
 0x485   : > { %21827 = vst [vmem:[#allocation171_spill] sm:$0xff] %v19633_v28  ;;  %v9602_v50 = vmul.f32 %v12724_v27, %v16555_v12  ;;  %v9727_v39 = vmul.f32 %v9599_v51, %v9599_v51  ;;  %v9284_v52 = vpop.xlane.xlu1 %9283  ;;  %v9796_v24 = vadd.f32 %v9795_v34, %v9794_v48  ;;  %v9672_v49 = vsel %vm670_vm3, %v9599_v51, 0.0  ;;  %v19650_v6 = vpop.xlane.xlu0 %9406  ;;  %v21829_v27 = vld [vmem:[#allocation123_spill] sm:$0xff] }
 0x486   : > { %21828 = vst [vmem:[#allocation172_spill] sm:$0xff] %v19642_v4  ;;  %v9676_v60 = vadd.f32 %v9601_v23, %v9600_v30  ;;  %v9799_v9 = vadd.f32 %v9726_v21, %v9725_v42  ;;  %v19648_v56 = vadd.f32 %v9284_v52, %v9144_v11  ;;  %v9673_v55 = vadd.f32 %v9672_v49, %v9671_v13  ;;  %v21832_v49 = vld [vmem:[#allocation67_spill] sm:$0xff] }
 0x487   : > { %v9729_v16 = vmul.f32 %v9601_v23, %v9601_v23  ;;  %v9604_v43 = vmul.f32 %v16534_v32, %v19633_v28  ;;  %v9145_v14 = vadd.f32 %v19142_v7, %v18689_v2  ;;  %v9160_v48 = vadd.f32 %v21829_v27, %v18676_v36 }
 0x488   : > { %9797 = vadd.xlane.f32.xlu1 %v9796_v24  ;;  %9674 = vadd.xlane.f32.xlu0 %v9673_v55  ;;  %v9677_v51 = vsel %vm670_vm3, %v9602_v50, 0.0  ;;  %v9800_v21 = vsel %vm670_vm3, %v9727_v39, 0.0  ;;  %v9728_v38 = vmul.f32 %v9600_v30, %v9600_v30  ;;  %v9603_v44 = vmul.f32 %v16541_v22, %v19642_v4  ;;  %v21830_v24 = vld [vmem:[#allocation71_spill] sm:$0xff] }
 0x489   : > { %v9412_v23 = vpop.xlane.xlu1 %9411  ;;  %v9678_v18 = vadd.f32 %v9677_v51, %v9676_v60  ;;  %v9801_v13 = vadd.f32 %v9800_v21, %v9799_v9  ;;  %v9730_v32 = vmul.f32 %v9602_v50, %v9602_v50  ;;  %v9605_v11 = vmul.f32 %v12727_v41, %v16555_v12  ;;  %v9289_v7 = vpop.xlane.xlu0 %9288  ;;  %v21831_v39 = vld [vmem:[#allocation131_spill] sm:$0xff]  ;;  %v21833_v60 = vld [vmem:[#allocation126_spill] sm:$0xff] }
 0x48a   : > { %v19663_v2 = vadd.f32 %v9412_v23, %v9160_v48  ;;  %v9804_v36 = vadd.f32 %v9729_v16, %v9728_v38  ;;  %v9681_v42 = vadd.f32 %v9604_v43, %v9603_v44  ;;  %v9732_v34 = vmul.f32 %v9604_v43, %v9604_v43  ;;  %v21834_v21 = vld [vmem:[#allocation79_spill] sm:$0xff]  ;;  %v21835_v38 = vld [vmem:[#allocation138_spill] sm:$0xff]  ;;  %v21836_v23 = vld [vmem:[#allocation72_spill] sm:$0xff] }
 0x48b   : > { %v19665_v52 = vadd.f32 %v9289_v7, %v9145_v14  ;;  %v9146_v30 = vadd.f32 %v21831_v39, %v21830_v24  ;;  %v9731_v22 = vmul.f32 %v9603_v44, %v9603_v44  ;;  %v9161_v9 = vadd.f32 %v21833_v60, %v21832_v49  ;;  %v21841_v49 = vld [vmem:[#allocation141_spill] sm:$0xff]  ;;  %v21896_v4 = vld [vmem:[#allocation135_spill] sm:$0xff] }
 0x48c   : > { %9679 = vadd.xlane.f32.xlu1 %v9678_v18  ;;  %9802 = vadd.xlane.f32.xlu0 %v9801_v13  ;;  %v9805_v12 = vsel %vm670_vm3, %v9730_v32, 0.0  ;;  %v9682_v41 = vsel %vm670_vm3, %v9605_v11, 0.0  ;;  %v9733_v55 = vmul.f32 %v9605_v11, %v9605_v11  ;;  %v9162_v44 = vadd.f32 %v21835_v38, %v21834_v21  ;;  %v21837_v18 = vld [vmem:[#allocation132_spill] sm:$0xff] }
 0x48d   : > { %v9294_v50 = vpop.xlane.xlu1 %9293  ;;  %v9806_v14 = vadd.f32 %v9805_v12, %v9804_v36  ;;  %v9683_v27 = vadd.f32 %v9682_v41, %v9681_v42  ;;  %v9809_v48 = vadd.f32 %v9732_v34, %v9731_v22  ;;  %v9147_v13 = vadd.f32 %v21837_v18, %v21836_v23  ;;  %v21838_v42 = vld [vmem:[#allocation69_spill] sm:$0xff]  ;;  %v21840_v22 = vld [vmem:[#allocation82_spill] sm:$0xff] }
 0x48e   : > { %v19673_v16 = vadd.f32 %v9294_v50, %v9146_v30  ;;  %v9417_v43 = vpop.xlane.xlu0 %9416  ;;  %v9810_v7 = vsel %vm670_vm3, %v9733_v55, 0.0  ;;  %v21839_v34 = vld [vmem:[#allocation129_spill] sm:$0xff]  ;;  %v9163_v60 = vadd.f32 %v21841_v49, %v21840_v22 }
 0x48f   : > { %v19675_v51 = vadd.f32 %v9417_v43, %v9161_v9  ;;  %v9811_v39 = vadd.f32 %v9810_v7, %v9809_v48  ;;  %v9148_v30 = vadd.f32 %v21839_v34, %v21838_v42  ;;  %v21842_v55 = vld [vmem:[#allocation73_spill] sm:$0xff]  ;;  %v21845_v48 = vld [vmem:[#allocation130_spill] sm:$0xff] }
 0x490   : > { %9807 = vadd.xlane.f32.xlu1 %v9806_v14  ;;  %9684 = vadd.xlane.f32.xlu0 %v9683_v27  ;;  %v21843_v43 = vld [vmem:[#allocation133_spill] sm:$0xff]  ;;  %v21844_v27 = vld [vmem:[#allocation70_spill] sm:$0xff] }
 0x491   : > { %v9422_v32 = vpop.xlane.xlu1 %9421  ;;  %v9164_v14 = vadd.f32 %v21843_v43, %v21842_v55  ;;  %v9149_v21 = vadd.f32 %v21845_v48, %v21844_v27 }
 0x492   : > { %v19682_v11 = vadd.f32 %v9422_v32, %v9162_v44  ;;  %v9299_v24 = vpop.xlane.xlu0 %9298  ;;  %v21848_v32 = vld [vmem:[#allocation148_spill] sm:$0xff] }
 0x493   : > { %v19684_v36 = vadd.f32 %v9299_v24, %v9147_v13  ;;  %v21847_v13 = vld [vmem:[#allocation88_spill] sm:$0xff]  ;;  %v21849_v24 = vld [vmem:[#allocation77_spill] sm:$0xff] }
 0x494   : > { %9812 = vadd.xlane.f32.xlu0 %v9811_v39  ;;  %v9150_v7 = vadd.f32 %v21848_v32, %v21847_v13  ;;  %v21850_v39 = vld [vmem:[#allocation136_spill] sm:$0xff]  ;;  %v21859_v32 = vld [vmem:[#allocation102_spill] sm:$0xff] }
 0x495   : > { %v9165_v42 = vadd.f32 %v21850_v39, %v21849_v24 }
 0x496   : > { %v9304_v9 = vpop.xlane.xlu1 %9303  ;;  %v9427_v12 = vpop.xlane.xlu0 %9426 }
 0x497   : > { %v19690_v50 = vadd.f32 %v9304_v9, %v9148_v30  ;;  %v19692_v41 = vadd.f32 %v9427_v12, %v9163_v60  ;;  %v21853_v60 = vld [vmem:[#allocation97_spill] sm:$0xff]  ;;  %v21854_v12 = vld [vmem:[#allocation91_spill] sm:$0xff] }
 0x498   : > { %v9166_v9 = vadd.f32 %v19475_v45, %v21853_v60  ;;  %v9151_v55 = vadd.f32 %v19432_v57, %v21854_v12  ;;  %v21864_v60 = vld [vmem:[#allocation147_spill] sm:$0xff] }
 0x49a   : > { %v9432_v38 = vpop.xlane.xlu1 %9431  ;;  %v9309_v23 = vpop.xlane.xlu0 %9308 }
 0x49b   : > { %v19698_v44 = vadd.f32 %v9432_v38, %v9164_v14  ;;  %v19700_v18 = vadd.f32 %v9309_v23, %v9149_v21  ;;  %v21857_v21 = vld [vmem:[#allocation83_spill] sm:$0xff]  ;;  %v21858_v38 = vld [vmem:[#allocation144_spill] sm:$0xff] }
 0x49c   : > { %v9152_v23 = vadd.f32 %v21858_v38, %v21857_v21 }
 0x49d   : > { %21846 = vst [vmem:[#allocation123_spill] sm:$0xff] %v19700_v18 }
 0x49e   : > { %v9314_v34 = vpop.xlane.xlu1 %9313  ;;  %v9437_v22 = vpop.xlane.xlu0 %9436 }
 0x49f   : > { %v19706_v30 = vadd.f32 %v9314_v34, %v9150_v7  ;;  %v19708_v49 = vadd.f32 %v9437_v22, %v9165_v42  ;;  %v9167_v7 = vadd.f32 %v19500_v25, %v21859_v32  ;;  %v21862_v42 = vld [vmem:[#allocation93_spill] sm:$0xff]  ;;  %v21863_v22 = vld [vmem:[#allocation86_spill] sm:$0xff] }
 0x4a0   : > { %v9168_v57 = vadd.f32 %v19441_v37, %v21862_v42  ;;  %v21870_v37 = vld [vmem:[#allocation111_spill] sm:$0xff] }
 0x4a1   : > { %21851 = vst [vmem:[#allocation71_spill] sm:$0xff] %v19706_v30  ;;  %21852 = vst [vmem:[#allocation131_spill] sm:$0xff] %v19708_v49 }
 0x4a2   : > { %v9442_v43 = vpop.xlane.xlu1 %9441  ;;  %v9319_v27 = vpop.xlane.xlu0 %9318 }
 0x4a3   : > { %v19714_v14 = vadd.f32 %v9442_v43, %v9166_v9  ;;  %v19716_v48 = vadd.f32 %v9319_v27, %v9151_v55  ;;  %v9153_v9 = vadd.f32 %v21864_v60, %v21863_v22  ;;  %v21866_v43 = vld [vmem:[#allocation103_spill] sm:$0xff]  ;;  %v21874_v60 = vld [vmem:[#allocation105_spill] sm:$0xff] }
 0x4a4   : > { %v9154_v27 = vadd.f32 %v19508_v62, %v21866_v43 }
 0x4a5   : > { %21855 = vst [vmem:[#allocation67_spill] sm:$0xff] %v19714_v14  ;;  %21856 = vst [vmem:[#allocation126_spill] sm:$0xff] %v19716_v48 }
 0x4a6   : > { %v9324_v13 = vpop.xlane.xlu1 %9323 }
 0x4a7   : > { %v19722_v24 = vadd.f32 %v9324_v13, %v9152_v23  ;;  %v9447_v39 = vpop.xlane.xlu0 %9446  ;;  %v21869_v23 = vld [vmem:[#allocation96_spill] sm:$0xff] }
 0x4a8   : > { %v19724_v45 = vadd.f32 %v9447_v39, %v9167_v7  ;;  %v9169_v13 = vadd.f32 %v19469_v17, %v21869_v23  ;;  %v9170_v7 = vadd.f32 %v19564_v33, %v21870_v37  ;;  %v21876_v17 = vld [vmem:[#allocation114_spill] sm:$0xff] }
 0x4a9   : > { %21860 = vst [vmem:[#allocation79_spill] sm:$0xff] %v19722_v24  ;;  %v19898_v24 = vld [vmem:[%s14758_s12 + $0x4c0] sm:$0xff] }
 0x4aa   : > { %21861 = vst [vmem:[#allocation138_spill] sm:$0xff] %v19724_v45  ;;  %v9452_v34 = vpop.xlane.xlu1 %9451  ;;  %v19889_v45 = vld [vmem:[%s14758_s12 + $0x340] sm:$0xff] }
 0x4ab   : > { %v19730_v12 = vadd.f32 %v9452_v34, %v9168_v57  ;;  %v9329_v55 = vpop.xlane.xlu0 %9328  ;;  %v21873_v34 = vld [vmem:[#allocation104_spill] sm:$0xff] }
 0x4ac   : > { %v19734_v21 = vadd.f32 %v9329_v55, %v9153_v9  ;;  %v9155_v62 = vadd.f32 %v19530_v15, %v21873_v34  ;;  %v9156_v9 = vadd.f32 %v19535_v35, %v21874_v60  ;;  %v21880_v15 = vld [vmem:[#allocation110_spill] sm:$0xff] }
 0x4ad   : > { %21865 = vst [vmem:[#allocation72_spill] sm:$0xff] %v19730_v12  ;;  %v19871_v12 = vld [vmem:[%s14758_s12 + $0x40] sm:$0xff] }
 0x4ae   : > { %21867 = vst [vmem:[#allocation132_spill] sm:$0xff] %v19734_v21  ;;  %v9334_v25 = vpop.xlane.xlu1 %9333 }
 0x4af   : > { %v19736_v38 = vadd.f32 %v9334_v25, %v9154_v27  ;;  %v9171_v27 = vadd.f32 %v19585_v1, %v21876_v17  ;;  %v21885_v17 = vld [vmem:[#allocation66_spill] sm:$0xff] }
 0x4b0   : > { %v9457_v32 = vpop.xlane.xlu0 %9456 }
 0x4b1   : > { %21868 = vst [vmem:[#allocation69_spill] sm:$0xff] %v19736_v38  ;;  %v19742_v39 = vadd.f32 %v9457_v32, %v9169_v13  ;;  %v21879_v13 = vld [vmem:[#allocation117_spill] sm:$0xff] }
 0x4b2   : > { %v9462_v42 = vpop.xlane.xlu1 %9461  ;;  %v9172_v32 = vadd.f32 %v19589_v63, %v21879_v13  ;;  %v21886_v63 = vld [vmem:[#allocation127_spill] sm:$0xff] }
 0x4b3   : > { %21871 = vst [vmem:[#allocation129_spill] sm:$0xff] %v19742_v39  ;;  %v19744_v57 = vadd.f32 %v9462_v42, %v9170_v7  ;;  %v9157_v7 = vadd.f32 %v19559_v0, %v21880_v15 }
 0x4b4   : > { %v9339_v22 = vpop.xlane.xlu0 %9338 }
 0x4b5   : > { %21872 = vst [vmem:[#allocation82_spill] sm:$0xff] %v19744_v57  ;;  %v19750_v55 = vadd.f32 %v9339_v22, %v9155_v62  ;;  %v21883_v62 = vld [vmem:[#allocation118_spill] sm:$0xff]  ;;  %v21913_v57 = vld [vmem:[#allocation140_spill] sm:$0xff] }
 0x4b6   : > { %v9344_v43 = vpop.xlane.xlu1 %9343  ;;  %v9173_v1 = vadd.f32 %v19610_v5, %v21883_v62 }
 0x4b7   : > { %21875 = vst [vmem:[#allocation141_spill] sm:$0xff] %v19750_v55  ;;  %v19754_v25 = vadd.f32 %v9344_v43, %v9156_v9  ;;  %v21907_v55 = vld [vmem:[#allocation23_spill] sm:$0xff] }
 0x4b9   : > { %21877 = vst [vmem:[#allocation73_spill] sm:$0xff] %v19754_v25  ;;  %v9467_v33 = vpop.xlane.xlu0 %9466  ;;  %v21906_v25 = vld [vmem:[#allocation145_spill] sm:$0xff] }
 0x4ba   : > { %v19756_v23 = vadd.f32 %v9467_v33, %v9171_v27  ;;  %v9158_v27 = vadd.f32 %v21886_v63, %v21885_v17 }
 0x4bb   : > { %v9472_v37 = vpop.xlane.xlu1 %9471 }
 0x4bc   : > { %21878 = vst [vmem:[#allocation133_spill] sm:$0xff] %v19756_v23  ;;  %v19762_v42 = vadd.f32 %v9472_v37, %v9172_v32  ;;  %v9494_v0 = vadd.f32 %v19628_v40, %v9158_v27 }
 0x4bd   : > { %v9349_v35 = vpop.xlane.xlu0 %9348 }
 0x4be   : > { %21881 = vst [vmem:[#allocation70_spill] sm:$0xff] %v19762_v42  ;;  %v19764_v34 = vadd.f32 %v9349_v35, %v9157_v7  ;;  %v21887_v7 = vld [vmem:[#allocation68_spill] sm:$0xff]  ;;  %v21900_v42 = vld [vmem:[#allocation26_spill] sm:$0xff] }
 0x4bf   : > { %v21888_v35 = vld [vmem:[#allocation128_spill] sm:$0xff] }
 0x4c0   : > { %21882 = vst [vmem:[#allocation130_spill] sm:$0xff] %v19764_v34  ;;  %v9159_v5 = vadd.f32 %v21888_v35, %v21887_v7  ;;  %v21899_v7 = vld [vmem:[#allocation21_spill] sm:$0xff] }
 0x4c1   : > { %v9477_v22 = vpop.xlane.xlu0 %9476 }
 0x4c2   : > { %v19768_v60 = vadd.f32 %v9477_v22, %v9173_v1  ;;  %v9495_v22 = vadd.f32 %v19650_v6, %v9159_v5  ;;  %v19790_v6 = vld [vmem:[%s14758_s12 + $0x10] sm:$0xff]  ;;  %v21891_v5 = vld [vmem:[#allocation24_spill] sm:$0xff] }
 0x4c4   : > { %21884 = vst [vmem:[#allocation88_spill] sm:$0xff] %v19768_v60 }
 0x4dd   : > { %v9610_v9 = vpop.xlane.xlu1 %9609 }
 0x4de   : > { %v9814_v43 = vadd.f32 %v9610_v9, %v19616_v8 }
 0x4e0   : > { %v19774_v32 = vmul.f32 0.0009765625, %v9814_v43 }
 0x4e1   : > { %v9738_v33 = vpop.xlane.xlu1 %9737  ;;  %v9615_v13 = vpop.xlane.xlu0 %9614 }
 0x4e2   : > { %v9830_v37 = vadd.f32 %v9738_v33, %v9494_v0  ;;  %v9878_v62 = vmul.f32 %v19774_v32, %v19774_v32  ;;  %v9815_v9 = vadd.f32 %v9615_v13, %v19638_v31  ;;  %v21889_v0 = vld [vmem:[#allocation18_spill] sm:$0xff] }
 0x4e3   : > { %v21903_v31 = vld [vmem:[#allocation78_spill] sm:$0xff]  ;;  %v21915_v54 = vsub.f32 %v21889_v0, %v19774_v32 }
 0x4e4   : > { %v9862_v1 = vmul.f32 0.0009765625, %v9830_v37  ;;  %v19783_v33 = vmul.f32 0.0009765625, %v9815_v9  ;;  %v21890_v37 = vld [vmem:[#allocation15_spill] sm:$0xff]  ;;  %v19830_v9 = vld [vmem:[%s14758_s12 + $0x28] sm:$0xff] }
 0x4e5   : > { %v9620_v15 = vpop.xlane.xlu1 %9619  ;;  %v9743_v8 = vpop.xlane.xlu0 %9742  ;;  %v21916_v59 = vsub.f32 %v21890_v37, %v19774_v32 }
 0x4e6   : > { %v9894_v17 = vsub.f32 %v9862_v1, %v9878_v62  ;;  %v9816_v43 = vadd.f32 %v9620_v15, %v19648_v56  ;;  %v9831_v63 = vadd.f32 %v9743_v8, %v9495_v22  ;;  %v21892_v1 = vld [vmem:[#allocation13_spill] sm:$0xff]  ;;  %v9879_v62 = vmul.f32 %v19783_v33, %v19783_v33 }
 0x4e7   : > { %v19801_v22 = vld [vmem:[%s14758_s12 + $0x190] sm:$0xff] }
 0x4e8   : > { %v9910_v27 = vmax.f32 %v9894_v17, 0.0  ;;  %v19794_v13 = vmul.f32 0.0009765625, %v9816_v43  ;;  %v9863_v56 = vmul.f32 0.0009765625, %v9831_v63  ;;  %v21894_v63 = vld [vmem:[#allocation75_spill] sm:$0xff]  ;;  %v19813_v8 = vld [vmem:[%s14758_s12 + $0x310] sm:$0xff] }
 0x4e9   : > { %v9748_v40 = vpop.xlane.xlu1 %9747  ;;  %v9625_v15 = vpop.xlane.xlu0 %9624  ;;  %v21897_v43 = vld [vmem:[#allocation142_spill] sm:$0xff] }
 0x4ea   : > { %v9926_v35 = vadd.f32 1e-05, %v9910_v27  ;;  %v21893_v27 = vld [vmem:[#allocation74_spill] sm:$0xff]  ;;  %v9832_v28 = vadd.f32 %v9748_v40, %v19663_v2  ;;  %v9895_v60 = vsub.f32 %v9863_v56, %v9879_v62  ;;  %v9880_v2 = vmul.f32 %v19794_v13, %v19794_v13  ;;  %v21901_v56 = vld [vmem:[#allocation28_spill] sm:$0xff] }
 0x4eb   : > { %v9817_v23 = vadd.f32 %v9625_v15, %v19665_v52  ;;  %v19850_v52 = vld [vmem:[%s14758_s12 + $0x328] sm:$0xff]  ;;  %v21921_v37 = vsub.f32 %v21893_v27, %v19774_v32 }
 0x4ec   : > { %13888 = vrsqrt.f32 %v9926_v35  ;;  %v21895_v35 = vld [vmem:[#allocation134_spill] sm:$0xff]  ;;  %v9864_v40 = vmul.f32 0.0009765625, %v9832_v28  ;;  %v9911_v47 = vmax.f32 %v9895_v60, 0.0 }
 0x4ed   : > { %v9630_v17 = vpop.xlane.xlu1 %9629  ;;  %v9753_v53 = vpop.xlane.xlu0 %9752  ;;  %v19862_v38 = vmul.f32 0.0009765625, %v9817_v23  ;;  %v21909_v23 = vld [vmem:[#allocation27_spill] sm:$0xff] }
 0x4ee   : > { %v9896_v46 = vsub.f32 %v9864_v40, %v9880_v2  ;;  %v9818_v28 = vadd.f32 %v9630_v17, %v19673_v16  ;;  %v21904_v16 = vld [vmem:[#allocation137_spill] sm:$0xff]  ;;  %v21905_v2 = vld [vmem:[#allocation139_spill] sm:$0xff]  ;;  %v9927_v34 = vadd.f32 1e-05, %v9911_v47  ;;  %v9833_v60 = vadd.f32 %v9753_v53, %v19675_v51  ;;  %v21910_v53 = vld [vmem:[#allocation14_spill] sm:$0xff] }
 0x4ef   : > { %v21914_v51 = vld [vmem:[#allocation143_spill] sm:$0xff]  ;;  %v9881_v47 = vmul.f32 %v19862_v38, %v19862_v38 }
 0x4f0   : > { %v9912_v62 = vmax.f32 %v9896_v46, 0.0  ;;  %13890 = vrsqrt.f32 %v9927_v34  ;;  %v19865_v17 = vmul.f32 0.0009765625, %v9818_v28  ;;  %v21908_v46 = vld [vmem:[#allocation22_spill] sm:$0xff]  ;;  %v19880_v34 = vld [vmem:[%s14758_s12 + $0x1c0] sm:$0xff]  ;;  %v9865_v29 = vmul.f32 0.0009765625, %v9833_v60 }
 0x4f1   : > { %v9758_v15 = vpop.xlane.xlu1 %9757  ;;  %v21918_v60 = vsub.f32 %v21891_v5, %v19774_v32 }
 0x4f2   : > { %v9928_v21 = vadd.f32 1e-05, %v9912_v62  ;;  %v9834_v40 = vadd.f32 %v9758_v15, %v19682_v11  ;;  %v21911_v11 = vld [vmem:[#allocation80_spill] sm:$0xff]  ;;  %v21912_v15 = vld [vmem:[#allocation81_spill] sm:$0xff]  ;;  %v9882_v39 = vmul.f32 %v19865_v17, %v19865_v17 }
 0x4f4   : > { %13892 = vrsqrt.f32 %v9928_v21  ;;  %v9866_v48 = vmul.f32 0.0009765625, %v9834_v40  ;;  %v21917_v21 = vsub.f32 %v19790_v6, %v19774_v32  ;;  %v21919_v40 = vsub.f32 %v21892_v1, %v19774_v32 }
 0x4f9   : > { %v13889_v28 = vpop.eup %13888 }
 0x4fa   : > { %v10006_v14 = vmul.f32 %v13889_v28, %v21915_v54  ;;  %v10007_v49 = vmul.f32 %v13889_v28, %v21916_v59  ;;  %v10008_v62 = vmul.f32 %v13889_v28, %v21917_v21  ;;  %v10246_v30 = vmul.f32 %v13889_v28, %v21918_v60 }
 0x4fb   : > { %v10247_v0 = vmul.f32 %v13889_v28, %v21919_v40  ;;  %v21920_v54 = vsub.f32 %v19801_v22, %v19774_v32  ;;  %v10486_v6 = vmul.f32 %v13889_v28, %v21921_v37  ;;  %v21922_v21 = vsub.f32 %v21894_v63, %v19774_v32  ;;  %v9635_v40 = vpop.xlane.xlu0 %9634 }
 0x4fc   : > { %v10054_v18 = vmax.f32 %v10006_v14, 0.0  ;;  %v10055_v60 = vmax.f32 %v10007_v49, 0.0  ;;  %v10056_v10 = vmax.f32 %v10008_v62, 0.0  ;;  %v10294_v1 = vmax.f32 %v10246_v30, 0.0 }
 0x4fd   : > { %v10248_v59 = vmul.f32 %v13889_v28, %v21920_v54  ;;  %v10487_v5 = vmul.f32 %v13889_v28, %v21922_v21  ;;  %v10295_v58 = vmax.f32 %v10247_v0, 0.0  ;;  %v21923_v54 = vsub.f32 %v19813_v8, %v19774_v32  ;;  %v21979_v21 = vld [vmem:[#allocation123_spill] sm:$0xff] }
 0x4fe   : > { %v10534_v27 = vmax.f32 %v10486_v6, 0.0  ;;  %10102 = vst [vmem:[%s14758_s12] sm:$0xff] %v10054_v18  ;;  %10103 = vst [vmem:[%s14758_s12 + $0x8] sm:$0xff] %v10055_v60  ;;  %v21924_v14 = vsub.f32 %v21895_v35, %v19774_v32  ;;  %v21925_v63 = vsub.f32 %v21896_v4, %v19774_v32  ;;  %v21926_v8 = vsub.f32 %v21897_v43, %v19774_v32  ;;  %v9640_v4 = vpop.xlane.xlu1 %9639  ;;  %v21930_v6 = vld [vmem:[#allocation17_spill] sm:$0xff]  ;;  %v19975_v60 = vld [vmem:[%s14758_s12 + $0x1d8] sm:$0xff] }
 0x4ff   : > { %v10296_v22 = vmax.f32 %v10248_v59, 0.0  ;;  %v10488_v26 = vmul.f32 %v13889_v28, %v21923_v54  ;;  %10104 = vst.msk [vmem:[%s14758_s12 + $0x10] sm:$0xff] %vm670_vm3, %v10056_v10  ;;  %12536 = vst [vmem:[%s14758_s12 + $0x180] sm:$0xff] %v10294_v1  ;;  %v10535_v49 = vmax.f32 %v10487_v5, 0.0  ;;  %v9897_v18 = vsub.f32 %v9865_v29, %v9881_v47  ;;  %v13891_v5 = vpop.eup %13890 }
 0x500   : > { %v10726_v30 = vmul.f32 %v13889_v28, %v21924_v14  ;;  %v10727_v62 = vmul.f32 %v13889_v28, %v21925_v63  ;;  %v10728_v0 = vmul.f32 %v13889_v28, %v21926_v8  ;;  %12537 = vst [vmem:[%s14758_s12 + $0x188] sm:$0xff] %v10295_v58  ;;  %12632 = vst [vmem:[%s14758_s12 + $0x300] sm:$0xff] %v10534_v27  ;;  %v21927_v58 = vld [vmem:[#allocation32_spill] sm:$0xff]  ;;  %v21982_v28 = vld [vmem:[#allocation67_spill] sm:$0xff] }
 0x501   : > { %12538 = vst.msk [vmem:[%s14758_s12 + $0x190] sm:$0xff] %vm670_vm3, %v10296_v22  ;;  %v10536_v10 = vmax.f32 %v10488_v26, 0.0  ;;  %v9898_v59 = vsub.f32 %v9866_v48, %v9882_v39  ;;  %v19952_v35 = vadd.f32 %v9635_v40, %v19684_v36  ;;  %12633 = vst [vmem:[%s14758_s12 + $0x308] sm:$0xff] %v10535_v49  ;;  %v21928_v26 = vld [vmem:[#allocation29_spill] sm:$0xff]  ;;  %v19962_v48 = vld [vmem:[%s14758_s12 + $0x58] sm:$0xff]  ;;  %v19979_v40 = vmax.f32 %v9897_v18, 0.0 }
 0x502   : > { %v10774_v37 = vmax.f32 %v10726_v30, 0.0  ;;  %v10775_v32 = vmax.f32 %v10727_v62, 0.0  ;;  %v10776_v43 = vmax.f32 %v10728_v0, 0.0  ;;  %v21929_v39 = vld [vmem:[#allocation30_spill] sm:$0xff]  ;;  %v19984_v54 = vadd.f32 %v9640_v4, %v19690_v50  ;;  %v13893_v4 = vpop.eup %13892  ;;  %v21980_v36 = vld [vmem:[#allocation71_spill] sm:$0xff] }
 0x503   : > { %12634 = vst.msk [vmem:[%s14758_s12 + $0x310] sm:$0xff] %vm670_vm3, %v10536_v10  ;;  %v19981_v22 = vmax.f32 %v9898_v59, 0.0  ;;  %v21931_v27 = vsub.f32 %v21898_v61, %v19783_v33  ;;  %v21932_v14 = vsub.f32 %v21899_v7, %v19783_v33  ;;  %v21933_v63 = vsub.f32 %v19830_v9, %v19783_v33 }
 0x504   : > { %12728 = vst [vmem:[%s14758_s12 + $0x480] sm:$0xff] %v10774_v37  ;;  %12729 = vst [vmem:[%s14758_s12 + $0x488] sm:$0xff] %v10775_v32  ;;  %v21934_v8 = vsub.f32 %v21900_v42, %v19783_v33  ;;  %v21935_v50 = vsub.f32 %v21901_v56, %v19783_v33  ;;  %v21936_v10 = vsub.f32 %v19841_v19, %v19783_v33 }
 0x505   : > { %12730 = vst.msk [vmem:[%s14758_s12 + $0x490] sm:$0xff] %vm670_vm3, %v10776_v43  ;;  %v10009_v49 = vmul.f32 %v13891_v5, %v21931_v27  ;;  %v10010_v30 = vmul.f32 %v13891_v5, %v21932_v14  ;;  %v10011_v62 = vmul.f32 %v13891_v5, %v21933_v63  ;;  %v21937_v9 = vsub.f32 %v21902_v3, %v19783_v33 }
 0x506   : > { %v10249_v0 = vmul.f32 %v13891_v5, %v21934_v8  ;;  %v10250_v61 = vmul.f32 %v13891_v5, %v21935_v50  ;;  %v10251_v7 = vmul.f32 %v13891_v5, %v21936_v10  ;;  %v21938_v59 = vsub.f32 %v21903_v31, %v19783_v33 }
 0x507   : > { %v10489_v18 = vmul.f32 %v13891_v5, %v21937_v9  ;;  %v10057_v37 = vmax.f32 %v10009_v49, 0.0  ;;  %v10058_v32 = vmax.f32 %v10010_v30, 0.0  ;;  %v10059_v56 = vmax.f32 %v10011_v62, 0.0 }
 0x508   : > { %v10490_v42 = vmul.f32 %v13891_v5, %v21938_v59  ;;  %v10297_v43 = vmax.f32 %v10249_v0, 0.0  ;;  %v10298_v27 = vmax.f32 %v10250_v61, 0.0  ;;  %v10299_v19 = vmax.f32 %v10251_v7, 0.0 }
 0x509   : > { %v21939_v14 = vsub.f32 %v19850_v52, %v19783_v33  ;;  %v10537_v3 = vmax.f32 %v10489_v18, 0.0  ;;  %10105 = vst [vmem:[%s14758_s12 + $0x18] sm:$0xff] %v10057_v37  ;;  %10106 = vst [vmem:[%s14758_s12 + $0x20] sm:$0xff] %v10058_v32  ;;  %v21940_v49 = vsub.f32 %v21904_v16, %v19783_v33  ;;  %v21941_v62 = vsub.f32 %v21905_v2, %v19783_v33 }
 0x50a   : > { %10107 = vst.msk [vmem:[%s14758_s12 + $0x28] sm:$0xff] %vm670_vm3, %v10059_v56  ;;  %12539 = vst [vmem:[%s14758_s12 + $0x198] sm:$0xff] %v10297_v43  ;;  %v10538_v31 = vmax.f32 %v10490_v42, 0.0  ;;  %v21942_v52 = vsub.f32 %v21906_v25, %v19783_v33  ;;  %v21943_v16 = vsub.f32 %v21907_v55, %v19794_v13  ;;  %v21944_v2 = vsub.f32 %v21908_v46, %v19794_v13 }
 0x50b   : > { %v10491_v63 = vmul.f32 %v13891_v5, %v21939_v14  ;;  %v10729_v30 = vmul.f32 %v13891_v5, %v21940_v49  ;;  %v10730_v8 = vmul.f32 %v13891_v5, %v21941_v62  ;;  %12540 = vst [vmem:[%s14758_s12 + $0x1a0] sm:$0xff] %v10298_v27  ;;  %12541 = vst.msk [vmem:[%s14758_s12 + $0x1a8] sm:$0xff] %vm670_vm3, %v10299_v19 }
 0x50c   : > { %v10731_v0 = vmul.f32 %v13891_v5, %v21942_v52  ;;  %12635 = vst [vmem:[%s14758_s12 + $0x318] sm:$0xff] %v10537_v3  ;;  %v10012_v61 = vmul.f32 %v13893_v4, %v21943_v16  ;;  %v10013_v10 = vmul.f32 %v13893_v4, %v21944_v2  ;;  %v21945_v25 = vsub.f32 %v19871_v12, %v19794_v13  ;;  %v9768_v16 = vpop.xlane.xlu1 %9767  ;;  %v21981_v2 = vld [vmem:[#allocation131_spill] sm:$0xff] }
 0x50d   : > { %v10539_v50 = vmax.f32 %v10491_v63, 0.0  ;;  %12636 = vst [vmem:[%s14758_s12 + $0x320] sm:$0xff] %v10538_v31  ;;  %v10777_v5 = vmax.f32 %v10729_v30, 0.0  ;;  %v10778_v7 = vmax.f32 %v10730_v8, 0.0  ;;  %v21946_v18 = vsub.f32 %v21909_v23, %v19794_v13 }
 0x50e   : > { %v10014_v33 = vmul.f32 %v13893_v4, %v21945_v25  ;;  %v10779_v9 = vmax.f32 %v10731_v0, 0.0  ;;  %v10060_v59 = vmax.f32 %v10012_v61, 0.0  ;;  %v10061_v46 = vmax.f32 %v10013_v10, 0.0  ;;  %v20199_v25 = vld [vmem:[%s14758_s12 + $0xa0] sm:$0xff] }
 0x50f   : > { %v10252_v55 = vmul.f32 %v13893_v4, %v21946_v18  ;;  %12637 = vst.msk [vmem:[%s14758_s12 + $0x328] sm:$0xff] %vm670_vm3, %v10539_v50  ;;  %v21947_v12 = vsub.f32 %v21910_v53, %v19794_v13  ;;  %12731 = vst [vmem:[%s14758_s12 + $0x498] sm:$0xff] %v10777_v5  ;;  %v21948_v32 = vsub.f32 %v19880_v34, %v19794_v13  ;;  %v9763_v50 = vpop.xlane.xlu0 %9762  ;;  %v9930_v10 = vadd.f32 1e-05, %v19981_v22  ;;  %v21957_v5 = vld [vmem:[#allocation146_spill] sm:$0xff] }
 0x510   : > { %v10062_v42 = vmax.f32 %v10014_v33, 0.0  ;;  %12732 = vst [vmem:[%s14758_s12 + $0x4a0] sm:$0xff] %v10778_v7  ;;  %12733 = vst.msk [vmem:[%s14758_s12 + $0x4a8] sm:$0xff] %vm670_vm3, %v10779_v9  ;;  %v21949_v43 = vsub.f32 %v21911_v11, %v19794_v13  ;;  %v21950_v19 = vsub.f32 %v21912_v15, %v19794_v13  ;;  %v21951_v63 = vsub.f32 %v19889_v45, %v19794_v13 }
 0x511   : > { %v10253_v37 = vmul.f32 %v13893_v4, %v21947_v12  ;;  %v10254_v23 = vmul.f32 %v13893_v4, %v21948_v32  ;;  %v10300_v56 = vmax.f32 %v10252_v55, 0.0  ;;  %10108 = vst [vmem:[%s14758_s12 + $0x30] sm:$0xff] %v10060_v59  ;;  %10109 = vst [vmem:[%s14758_s12 + $0x38] sm:$0xff] %v10061_v46  ;;  %v21952_v3 = vsub.f32 %v21913_v57, %v19794_v13  ;;  %v20114_v59 = vld [vmem:[%s14758_s12 + $0x4d8] sm:$0xff]  ;;  %v20123_v32 = vld [vmem:[%s14758_s12 + $0x70] sm:$0xff] }
 0x512   : > { %v10492_v27 = vmul.f32 %v13893_v4, %v21949_v43  ;;  %v10493_v53 = vmul.f32 %v13893_v4, %v21950_v19  ;;  %10110 = vst.msk [vmem:[%s14758_s12 + $0x40] sm:$0xff] %vm670_vm3, %v10062_v42  ;;  %v10494_v34 = vmul.f32 %v13893_v4, %v21951_v63  ;;  %v21953_v31 = vsub.f32 %v21914_v51, %v19794_v13  ;;  %v21958_v42 = vld [vmem:[#allocation33_spill] sm:$0xff] }
 0x513   : > { %v10301_v14 = vmax.f32 %v10253_v37, 0.0  ;;  %v10732_v11 = vmul.f32 %v13893_v4, %v21952_v3  ;;  %v10302_v49 = vmax.f32 %v10254_v23, 0.0  ;;  %12542 = vst [vmem:[%s14758_s12 + $0x1b0] sm:$0xff] %v10300_v56  ;;  %v21954_v8 = vsub.f32 %v19898_v24, %v19794_v13  ;;  %v21955_v24 = vld [vmem:[#allocation84_spill] sm:$0xff]  ;;  %v21959_v37 = vld [vmem:[#allocation31_spill] sm:$0xff]  ;;  %v20132_v43 = vld [vmem:[%s14758_s12 + $0x1f0] sm:$0xff] }
 0x514   : > { %v10733_v15 = vmul.f32 %v13893_v4, %v21953_v31  ;;  %v10540_v30 = vmax.f32 %v10492_v27, 0.0  ;;  %v10541_v62 = vmax.f32 %v10493_v53, 0.0  ;;  %v10542_v57 = vmax.f32 %v10494_v34, 0.0  ;;  %v21962_v19 = vld [vmem:[#allocation89_spill] sm:$0xff]  ;;  %v21968_v31 = vld [vmem:[#allocation46_spill] sm:$0xff]  ;;  %v20208_v13 = vld [vmem:[%s14758_s12 + $0x220] sm:$0xff] }
 0x515   : > { %v10734_v45 = vmul.f32 %v13893_v4, %v21954_v8  ;;  %12543 = vst [vmem:[%s14758_s12 + $0x1b8] sm:$0xff] %v10301_v14  ;;  %v10780_v52 = vmax.f32 %v10732_v11, 0.0  ;;  %v9929_v51 = vadd.f32 1e-05, %v19979_v40  ;;  %12544 = vst.msk [vmem:[%s14758_s12 + $0x1c0] sm:$0xff] %vm670_vm3, %v10302_v49  ;;  %v21956_v4 = vld [vmem:[#allocation85_spill] sm:$0xff]  ;;  %v9835_v18 = vadd.f32 %v9763_v50, %v19692_v41  ;;  %v9650_v49 = vpop.xlane.xlu1 %9649 }
 0x516   : > { %v10781_v0 = vmax.f32 %v10733_v15, 0.0  ;;  %12638 = vst [vmem:[%s14758_s12 + $0x330] sm:$0xff] %v10540_v30  ;;  %12639 = vst [vmem:[%s14758_s12 + $0x338] sm:$0xff] %v10541_v62  ;;  %v20095_v40 = vld [vmem:[%s14758_s12 + $0x358] sm:$0xff]  ;;  %v20106_v22 = vmul.f32 0.0009765625, %v19952_v35  ;;  %v20109_v9 = vmul.f32 0.0009765625, %v19984_v54  ;;  %v9836_v55 = vadd.f32 %v9768_v16, %v19698_v44  ;;  %v9645_v15 = vpop.xlane.xlu0 %9644 }
 0x517   : > { %v10782_v61 = vmax.f32 %v10734_v45, 0.0  ;;  %12640 = vst.msk [vmem:[%s14758_s12 + $0x340] sm:$0xff] %vm670_vm3, %v10542_v57  ;;  %12734 = vst [vmem:[%s14758_s12 + $0x4b0] sm:$0xff] %v10780_v52  ;;  %13894 = vrsqrt.f32 %v9929_v51  ;;  %v21960_v41 = vld [vmem:[#allocation25_spill] sm:$0xff]  ;;  %v21961_v44 = vld [vmem:[#allocation44_spill] sm:$0xff]  ;;  %v9867_v62 = vmul.f32 0.0009765625, %v9835_v18  ;;  %v20215_v47 = vadd.f32 %v9645_v15, %v21979_v21 }
 0x518   : > { %12735 = vst [vmem:[%s14758_s12 + $0x4b8] sm:$0xff] %v10781_v0  ;;  %13896 = vrsqrt.f32 %v9930_v10  ;;  %v21963_v14 = vld [vmem:[#allocation87_spill] sm:$0xff]  ;;  %v20141_v34 = vld [vmem:[%s14758_s12 + $0x370] sm:$0xff]  ;;  %v9883_v30 = vmul.f32 %v20106_v22, %v20106_v22  ;;  %v9884_v8 = vmul.f32 %v20109_v9, %v20109_v9  ;;  %v9868_v45 = vmul.f32 0.0009765625, %v9836_v55  ;;  %v20163_v18 = vld [vmem:[%s14758_s12 + $0x88] sm:$0xff] }
 0x519   : > { %12736 = vst.msk [vmem:[%s14758_s12 + $0x4c0] sm:$0xff] %vm670_vm3, %v10782_v61  ;;  %v21964_v11 = vld [vmem:[#allocation149_spill] sm:$0xff]  ;;  %v21965_v57 = vld [vmem:[#allocation150_spill] sm:$0xff]  ;;  %v21966_v50 = vld [vmem:[#allocation35_spill] sm:$0xff]  ;;  %v9778_v33 = vpop.xlane.xlu1 %9777  ;;  %v21983_v12 = vsub.f32 %v21927_v58, %v19862_v38  ;;  %v21984_v21 = vsub.f32 %v21928_v26, %v19862_v38 }
 0x51a   : > { %v20154_v0 = vld [vmem:[%s14758_s12 + $0x4f0] sm:$0xff]  ;;  %v9899_v3 = vsub.f32 %v9867_v62, %v9883_v30  ;;  %v9900_v63 = vsub.f32 %v9868_v45, %v9884_v8  ;;  %v20172_v27 = vld [vmem:[%s14758_s12 + $0x208] sm:$0xff]  ;;  %v21973_v52 = vld [vmem:[#allocation151_spill] sm:$0xff]  ;;  %v9773_v7 = vpop.xlane.xlu0 %9772  ;;  %v20226_v8 = vadd.f32 %v9778_v33, %v21982_v28  ;;  %v21987_v28 = vsub.f32 %v21930_v6, %v19862_v38 }
 0x51b   : > { %v21967_v61 = vld [vmem:[#allocation34_spill] sm:$0xff]  ;;  %v21969_v53 = vld [vmem:[#allocation45_spill] sm:$0xff]  ;;  %v21970_v16 = vld [vmem:[#allocation92_spill] sm:$0xff]  ;;  %v21988_v33 = vsub.f32 %v19975_v60, %v19862_v38 }
 0x51c   : > { %v21971_v23 = vld [vmem:[#allocation90_spill] sm:$0xff]  ;;  %v20181_v54 = vld [vmem:[%s14758_s12 + $0x388] sm:$0xff]  ;;  %v9915_v45 = vmax.f32 %v9899_v3, 0.0  ;;  %v9916_v51 = vmax.f32 %v9900_v63, 0.0  ;;  %v21976_v3 = vld [vmem:[#allocation47_spill] sm:$0xff]  ;;  %v20218_v63 = vadd.f32 %v9650_v49, %v21980_v36  ;;  %v21985_v36 = vsub.f32 %v19962_v48, %v19862_v38 }
 0x51d   : > { %v21972_v62 = vld [vmem:[#allocation152_spill] sm:$0xff]  ;;  %v21975_v46 = vld [vmem:[#allocation37_spill] sm:$0xff]  ;;  %v21989_v48 = vsub.f32 %v21955_v24, %v19862_v38  ;;  %v21990_v49 = vsub.f32 %v21956_v4, %v19862_v38  ;;  %v21992_v4 = vsub.f32 %v19388_v20, %v19862_v38  ;;  %v21995_v20 = vsub.f32 %v21958_v42, %v19865_v17 }
 0x51e   : > { %v20190_v35 = vld [vmem:[%s14758_s12 + $0x508] sm:$0xff]  ;;  %v9931_v56 = vadd.f32 1e-05, %v9915_v45  ;;  %v20220_v10 = vadd.f32 1e-05, %v9916_v51  ;;  %v20223_v45 = vadd.f32 %v9773_v7, %v21981_v2  ;;  %v21986_v2 = vsub.f32 %v21929_v39, %v19862_v38 }
 0x51f   : > { %v21974_v55 = vld [vmem:[#allocation36_spill] sm:$0xff] }
 0x520   : > { %13898 = vrsqrt.f32 %v9931_v56 }
 0x521   : > { %13900 = vrsqrt.f32 %v20220_v10  ;;  %v22008_v10 = vsub.f32 %v21966_v50, %v20106_v22  ;;  %v22012_v50 = vsub.f32 %v21969_v53, %v20106_v22 }
 0x524   : > { %v13895_v29 = vpop.eup %13894 }
 0x525   : > { %v10015_v1 = vmul.f32 %v13895_v29, %v21983_v12  ;;  %v10016_v15 = vmul.f32 %v13895_v29, %v21984_v21  ;;  %v10017_v56 = vmul.f32 %v13895_v29, %v21985_v36  ;;  %v10255_v7 = vmul.f32 %v13895_v29, %v21986_v2  ;;  %v13897_v51 = vpop.eup %13896 }
 0x526   : > { %v10256_v58 = vmul.f32 %v13895_v29, %v21987_v28  ;;  %v10257_v26 = vmul.f32 %v13895_v29, %v21988_v33  ;;  %v10495_v12 = vmul.f32 %v13895_v29, %v21989_v48  ;;  %v10496_v39 = vmul.f32 %v13895_v29, %v21990_v49 }
 0x527   : > { %v10063_v21 = vmax.f32 %v10015_v1, 0.0  ;;  %v10064_v36 = vmax.f32 %v10016_v15, 0.0  ;;  %v10065_v6 = vmax.f32 %v10017_v56, 0.0  ;;  %v10303_v2 = vmax.f32 %v10255_v7, 0.0 }
 0x528   : > { %v10304_v28 = vmax.f32 %v10256_v58, 0.0  ;;  %v10305_v60 = vmax.f32 %v10257_v26, 0.0  ;;  %v21991_v33 = vsub.f32 %v20095_v40, %v19862_v38  ;;  %v10543_v24 = vmax.f32 %v10495_v12, 0.0 }
 0x529   : > { %10111 = vst [vmem:[%s14758_s12 + $0x48] sm:$0xff] %v10063_v21  ;;  %10112 = vst [vmem:[%s14758_s12 + $0x50] sm:$0xff] %v10064_v36  ;;  %v10544_v1 = vmax.f32 %v10496_v39, 0.0  ;;  %v10735_v15 = vmul.f32 %v13895_v29, %v21992_v4  ;;  %v21993_v56 = vsub.f32 %v21957_v5, %v19862_v38  ;;  %v21994_v40 = vsub.f32 %v20114_v59, %v19862_v38 }
 0x52a   : > { %v10497_v30 = vmul.f32 %v13895_v29, %v21991_v33  ;;  %10113 = vst.msk [vmem:[%s14758_s12 + $0x58] sm:$0xff] %vm670_vm3, %v10065_v6  ;;  %12545 = vst [vmem:[%s14758_s12 + $0x1c8] sm:$0xff] %v10303_v2  ;;  %v10018_v48 = vmul.f32 %v13897_v51, %v21995_v20  ;;  %v21996_v5 = vsub.f32 %v21959_v37, %v19865_v17 }
 0x52b   : > { %v10736_v7 = vmul.f32 %v13895_v29, %v21993_v56  ;;  %v10737_v58 = vmul.f32 %v13895_v29, %v21994_v40  ;;  %12546 = vst [vmem:[%s14758_s12 + $0x1d0] sm:$0xff] %v10304_v28  ;;  %12547 = vst.msk [vmem:[%s14758_s12 + $0x1d8] sm:$0xff] %vm670_vm3, %v10305_v60  ;;  %v21997_v38 = vsub.f32 %v20123_v32, %v19865_v17  ;;  %v10783_v59 = vmax.f32 %v10735_v15, 0.0 }
 0x52c   : > { %v10545_v26 = vmax.f32 %v10497_v30, 0.0  ;;  %12641 = vst [vmem:[%s14758_s12 + $0x348] sm:$0xff] %v10543_v24  ;;  %v10019_v12 = vmul.f32 %v13897_v51, %v21996_v5  ;;  %12642 = vst [vmem:[%s14758_s12 + $0x350] sm:$0xff] %v10544_v1  ;;  %v21998_v39 = vsub.f32 %v21960_v41, %v19865_v17  ;;  %v10066_v21 = vmax.f32 %v10018_v48, 0.0 }
 0x52d   : > { %v10020_v29 = vmul.f32 %v13897_v51, %v21997_v38  ;;  %v10784_v49 = vmax.f32 %v10736_v7, 0.0  ;;  %v10785_v30 = vmax.f32 %v10737_v58, 0.0  ;;  %v21999_v32 = vsub.f32 %v21961_v44, %v19865_v17  ;;  %12737 = vst [vmem:[%s14758_s12 + $0x4c8] sm:$0xff] %v10783_v59  ;;  %v9655_v7 = vpop.xlane.xlu0 %9654 }
 0x52e   : > { %v10258_v42 = vmul.f32 %v13897_v51, %v21998_v39  ;;  %12643 = vst.msk [vmem:[%s14758_s12 + $0x358] sm:$0xff] %vm670_vm3, %v10545_v26  ;;  %v10067_v37 = vmax.f32 %v10019_v12, 0.0  ;;  %v22000_v2 = vsub.f32 %v20132_v43, %v19865_v17  ;;  %v22001_v60 = vsub.f32 %v21962_v19, %v19865_v17  ;;  %10114 = vst [vmem:[%s14758_s12 + $0x60] sm:$0xff] %v10066_v21 }
 0x52f   : > { %v10068_v36 = vmax.f32 %v10020_v29, 0.0  ;;  %v10259_v6 = vmul.f32 %v13897_v51, %v21999_v32  ;;  %12738 = vst [vmem:[%s14758_s12 + $0x4d0] sm:$0xff] %v10784_v49  ;;  %12739 = vst.msk [vmem:[%s14758_s12 + $0x4d8] sm:$0xff] %vm670_vm3, %v10785_v30  ;;  %v22002_v24 = vsub.f32 %v21963_v14, %v19865_v17  ;;  %v22003_v4 = vsub.f32 %v20141_v34, %v19865_v17 }
 0x530   : > { %v10260_v41 = vmul.f32 %v13897_v51, %v22000_v2  ;;  %v10306_v28 = vmax.f32 %v10258_v42, 0.0  ;;  %v10498_v33 = vmul.f32 %v13897_v51, %v22001_v60  ;;  %10115 = vst [vmem:[%s14758_s12 + $0x68] sm:$0xff] %v10067_v37  ;;  %v22004_v15 = vsub.f32 %v21964_v11, %v19865_v17 }
 0x531   : > { %v10499_v44 = vmul.f32 %v13897_v51, %v22002_v24  ;;  %10116 = vst.msk [vmem:[%s14758_s12 + $0x70] sm:$0xff] %vm670_vm3, %v10068_v36  ;;  %v10307_v1 = vmax.f32 %v10259_v6, 0.0  ;;  %v10500_v43 = vmul.f32 %v13897_v51, %v22003_v4  ;;  %v22005_v56 = vsub.f32 %v21965_v57, %v19865_v17  ;;  %v13899_v57 = vpop.eup %13898 }
 0x532   : > { %v10738_v19 = vmul.f32 %v13897_v51, %v22004_v15  ;;  %v10308_v40 = vmax.f32 %v10260_v41, 0.0  ;;  %12548 = vst [vmem:[%s14758_s12 + $0x1e0] sm:$0xff] %v10306_v28  ;;  %v10546_v58 = vmax.f32 %v10498_v33, 0.0  ;;  %v22006_v34 = vsub.f32 %v20154_v0, %v19865_v17  ;;  %v22007_v0 = vld [vmem:[#allocation126_spill] sm:$0xff] }
 0x533   : > { %v10739_v14 = vmul.f32 %v13897_v51, %v22005_v56  ;;  %v10547_v26 = vmax.f32 %v10499_v44, 0.0  ;;  %12549 = vst [vmem:[%s14758_s12 + $0x1e8] sm:$0xff] %v10307_v1  ;;  %v10548_v11 = vmax.f32 %v10500_v43, 0.0  ;;  %v20328_v38 = vmul.f32 0.0009765625, %v20215_v47  ;;  %v22020_v43 = vld [vmem:[#allocation94_spill] sm:$0xff]  ;;  %v9660_v56 = vpop.xlane.xlu1 %9659 }
 0x534   : > { %v10740_v20 = vmul.f32 %v13897_v51, %v22006_v34  ;;  %v10786_v48 = vmax.f32 %v10738_v19, 0.0  ;;  %12550 = vst.msk [vmem:[%s14758_s12 + $0x1f0] sm:$0xff] %vm670_vm3, %v10308_v40  ;;  %12644 = vst [vmem:[%s14758_s12 + $0x360] sm:$0xff] %v10546_v58  ;;  %v20331_v17 = vmul.f32 0.0009765625, %v20218_v63  ;;  %v9823_v51 = vadd.f32 %v9655_v7, %v22007_v0  ;;  %v22021_v58 = vld [vmem:[#allocation153_spill] sm:$0xff]  ;;  %v22022_v34 = vld [vmem:[#allocation154_spill] sm:$0xff] }
 0x535   : > { %v10787_v5 = vmax.f32 %v10739_v14, 0.0  ;;  %12645 = vst [vmem:[%s14758_s12 + $0x368] sm:$0xff] %v10547_v26  ;;  %12646 = vst.msk [vmem:[%s14758_s12 + $0x370] sm:$0xff] %vm670_vm3, %v10548_v11  ;;  %v10021_v29 = vmul.f32 %v13899_v57, %v22008_v10  ;;  %v22009_v59 = vsub.f32 %v21967_v61, %v20106_v22  ;;  %v22010_v47 = vsub.f32 %v20163_v18, %v20106_v22  ;;  %v13945_v11 = vld [vmem:[%s14758_s12 + $0x520] sm:$0xff] }
 0x536   : > { %v10788_v12 = vmax.f32 %v10740_v20, 0.0  ;;  %12740 = vst [vmem:[%s14758_s12 + $0x4e0] sm:$0xff] %v10786_v48  ;;  %v22011_v30 = vsub.f32 %v21968_v31, %v20106_v22  ;;  %v10262_v42 = vmul.f32 %v13899_v57, %v22012_v50  ;;  %v22013_v61 = vsub.f32 %v20172_v27, %v20106_v22  ;;  %v22024_v0 = vld [vmem:[#allocation79_spill] sm:$0xff] }
 0x537   : > { %12741 = vst [vmem:[%s14758_s12 + $0x4e8] sm:$0xff] %v10787_v5  ;;  %v10022_v49 = vmul.f32 %v13899_v57, %v22009_v59  ;;  %v10023_v63 = vmul.f32 %v13899_v57, %v22010_v47  ;;  %v22014_v18 = vsub.f32 %v21970_v16, %v20106_v22  ;;  %v22015_v31 = vsub.f32 %v21971_v23, %v20106_v22  ;;  %v22023_v5 = vld [vmem:[#allocation38_spill] sm:$0xff]  ;;  %v20609_v59 = vld [vmem:[%s14758_s12 + $0x400] sm:$0xff] }
 0x538   : > { %v10261_v39 = vmul.f32 %v13899_v57, %v22011_v30  ;;  %12742 = vst.msk [vmem:[%s14758_s12 + $0x4f0] sm:$0xff] %vm670_vm3, %v10788_v12  ;;  %v10263_v21 = vmul.f32 %v13899_v57, %v22013_v61  ;;  %v10069_v32 = vmax.f32 %v10021_v29, 0.0  ;;  %v10310_v41 = vmax.f32 %v10262_v42, 0.0  ;;  %v22025_v29 = vld [vmem:[#allocation39_spill] sm:$0xff]  ;;  %v22027_v42 = vld [vmem:[#allocation49_spill] sm:$0xff]  ;;  %22063 = vst [vmem:[#allocation77_spill] sm:$0xff] %v20609_v59 }
 0x539   : > { %v10501_v37 = vmul.f32 %v13899_v57, %v22014_v18  ;;  %v10502_v36 = vmul.f32 %v13899_v57, %v22015_v31  ;;  %v10070_v6 = vmax.f32 %v10022_v49, 0.0  ;;  %v10071_v2 = vmax.f32 %v10023_v63, 0.0  ;;  %v20418_v49 = vld [vmem:[%s14758_s12 + $0xb8] sm:$0xff]  ;;  %v13901_v31 = vpop.eup %13900  ;;  %v22069_v59 = vld [vmem:[#allocation73_spill] sm:$0xff] }
 0x53a   : > { %v10309_v53 = vmax.f32 %v10261_v39, 0.0  ;;  %v10311_v28 = vmax.f32 %v10263_v21, 0.0  ;;  %v22016_v27 = vsub.f32 %v20181_v54, %v20106_v22  ;;  %10117 = vst [vmem:[%s14758_s12 + $0x78] sm:$0xff] %v10069_v32  ;;  %v22017_v16 = vsub.f32 %v21972_v62, %v20106_v22  ;;  %12552 = vst [vmem:[%s14758_s12 + $0x200] sm:$0xff] %v10310_v41  ;;  %v22026_v39 = vld [vmem:[#allocation50_spill] sm:$0xff]  ;;  %v22057_v32 = vld [vmem:[#allocation8_spill] sm:$0xff] }
 0x53b   : > { %v10549_v33 = vmax.f32 %v10501_v37, 0.0  ;;  %10118 = vst [vmem:[%s14758_s12 + $0x80] sm:$0xff] %v10070_v6  ;;  %10119 = vst.msk [vmem:[%s14758_s12 + $0x88] sm:$0xff] %vm670_vm3, %v10071_v2  ;;  %v10550_v23 = vmax.f32 %v10502_v36, 0.0  ;;  %v22018_v44 = vsub.f32 %v21973_v52, %v20106_v22  ;;  %v22019_v54 = vsub.f32 %v20190_v35, %v20106_v22  ;;  %v13944_v22 = vld [vmem:[%s14758_s12 + $0x3a0] sm:$0xff]  ;;  %v20427_v61 = vld [vmem:[%s14758_s12 + $0x238] sm:$0xff] }
 0x53c   : > { %v10503_v60 = vmul.f32 %v13899_v57, %v22016_v27  ;;  %12551 = vst [vmem:[%s14758_s12 + $0x1f8] sm:$0xff] %v10309_v53  ;;  %v10741_v24 = vmul.f32 %v13899_v57, %v22017_v16  ;;  %v10457_v15 = vsub.f32 %v22020_v43, %v20109_v9  ;;  %12553 = vst.msk [vmem:[%s14758_s12 + $0x208] sm:$0xff] %vm670_vm3, %v10311_v28  ;;  %v9869_v62 = vmul.f32 0.0009765625, %v20223_v45  ;;  %v22028_v18 = vld [vmem:[#allocation98_spill] sm:$0xff]  ;;  %v22029_v36 = vld [vmem:[#allocation99_spill] sm:$0xff]  ;;  %v20440_v28 = vpop.xlane.xlu0 %9782  ;;  %v20442_v27 = vpop.xlane.xlu1 %9787 }
 0x53d   : > { %v10742_v1 = vmul.f32 %v13899_v57, %v22018_v44  ;;  %v10743_v4 = vmul.f32 %v13899_v57, %v22019_v54  ;;  %12647 = vst [vmem:[%s14758_s12 + $0x378] sm:$0xff] %v10549_v33  ;;  %v9870_v52 = vmul.f32 0.0009765625, %v20226_v8  ;;  %v10458_v35 = vsub.f32 %v13944_v22, %v20109_v9  ;;  %12648 = vst [vmem:[%s14758_s12 + $0x380] sm:$0xff] %v10550_v23  ;;  %v20436_v6 = vld [vmem:[%s14758_s12 + $0x3b8] sm:$0xff]  ;;  %v22064_v57 = vld [vmem:[#allocation132_spill] sm:$0xff] }
 0x53e   : > { %v10551_v19 = vmax.f32 %v10503_v60, 0.0  ;;  %v10789_v14 = vmax.f32 %v10741_v24, 0.0  ;;  %v10696_v26 = vsub.f32 %v22021_v58, %v20109_v9  ;;  %v10697_v45 = vsub.f32 %v22022_v34, %v20109_v9  ;;  %v22067_v47 = vld [vmem:[#allocation82_spill] sm:$0xff]  ;;  %v22068_v37 = vld [vmem:[#allocation141_spill] sm:$0xff] }
 0x53f   : > { %v10790_v7 = vmax.f32 %v10742_v1, 0.0  ;;  %v10791_v40 = vmax.f32 %v10743_v4, 0.0  ;;  %v9885_v8 = vmul.f32 %v20328_v38, %v20328_v38  ;;  %v9886_v20 = vmul.f32 %v20331_v17, %v20331_v17  ;;  %v22034_v4 = vld [vmem:[#allocation48_spill] sm:$0xff] }
 0x540   : > { %12649 = vst.msk [vmem:[%s14758_s12 + $0x388] sm:$0xff] %vm670_vm3, %v10551_v19  ;;  %v10698_v48 = vsub.f32 %v13945_v11, %v20109_v9  ;;  %12743 = vst [vmem:[%s14758_s12 + $0x4f8] sm:$0xff] %v10789_v14  ;;  %v20410_v12 = vmul.f32 0.0009765625, %v9823_v51  ;;  %v20413_v10 = vadd.f32 %v9660_v56, %v22024_v0  ;;  %v22030_v60 = vsub.f32 %v21974_v55, %v20109_v9  ;;  %v22056_v0 = vld [vmem:[#allocation9_spill] sm:$0xff]  ;;  %v20600_v51 = vld [vmem:[%s14758_s12 + $0x280] sm:$0xff] }
 0x541   : > { %12744 = vst [vmem:[%s14758_s12 + $0x500] sm:$0xff] %v10790_v7  ;;  %12745 = vst.msk [vmem:[%s14758_s12 + $0x508] sm:$0xff] %vm670_vm3, %v10791_v40  ;;  %v9901_v63 = vsub.f32 %v9869_v62, %v9885_v8  ;;  %v9902_v30 = vsub.f32 %v9870_v52, %v9886_v20  ;;  %v22031_v23 = vsub.f32 %v21975_v46, %v20109_v9  ;;  %v22037_v62 = vld [vmem:[#allocation95_spill] sm:$0xff] }
 0x542   : > { %v10024_v33 = vmul.f32 %v13901_v31, %v22030_v60  ;;  %v22032_v24 = vsub.f32 %v20199_v25, %v20109_v9  ;;  %v22033_v1 = vsub.f32 %v21976_v3, %v20109_v9  ;;  %v22035_v43 = vsub.f32 %v22034_v4, %v20109_v9  ;;  %22060 = vst [vmem:[#allocation148_spill] sm:$0xff] %v20600_v51  ;;  %v22066_v51 = vld [vmem:[#allocation129_spill] sm:$0xff] }
 0x543   : > { %v9917_v53 = vmax.f32 %v9901_v63, 0.0  ;;  %v9918_v41 = vmax.f32 %v9902_v30, 0.0  ;;  %v10025_v16 = vmul.f32 %v13901_v31, %v22031_v23  ;;  %v22036_v46 = vsub.f32 %v20208_v13, %v20109_v9  ;;  %v22040_v63 = vld [vmem:[#allocation155_spill] sm:$0xff] }
 0x544   : > { %v10026_v44 = vmul.f32 %v13901_v31, %v22032_v24  ;;  %v10264_v54 = vmul.f32 %v13901_v31, %v22033_v1  ;;  %v10265_v55 = vmul.f32 %v13901_v31, %v22035_v43  ;;  %v22038_v52 = vsub.f32 %v22037_v62, %v20109_v9  ;;  %v22041_v24 = vld [vmem:[#allocation16_spill] sm:$0xff]  ;;  %v20508_v62 = vld [vmem:[%s14758_s12 + $0x250] sm:$0xff] }
 0x545   : > { %v10266_v19 = vmul.f32 %v13901_v31, %v22036_v46  ;;  %v10505_v56 = vmul.f32 %v13901_v31, %v10457_v15  ;;  %v10072_v22 = vmax.f32 %v10024_v33, 0.0  ;;  %v10073_v14 = vmax.f32 %v10025_v16, 0.0  ;;  %v20486_v16 = vld [vmem:[%s14758_s12 + $0x538] sm:$0xff]  ;;  %v22042_v1 = vld [vmem:[#allocation40_spill] sm:$0xff] }
 0x546   : > { %v10504_v25 = vmul.f32 %v13901_v31, %v22038_v52  ;;  %v10074_v3 = vmax.f32 %v10026_v44, 0.0  ;;  %v10312_v7 = vmax.f32 %v10264_v54, 0.0  ;;  %v10313_v40 = vmax.f32 %v10265_v55, 0.0  ;;  %v22043_v43 = vld [vmem:[#allocation52_spill] sm:$0xff]  ;;  %v22044_v46 = vld [vmem:[#allocation51_spill] sm:$0xff] }
 0x547   : > { %v10314_v58 = vmax.f32 %v10266_v19, 0.0  ;;  %v10506_v34 = vmul.f32 %v13901_v31, %v10458_v35  ;;  %10120 = vst [vmem:[%s14758_s12 + $0x90] sm:$0xff] %v10072_v22  ;;  %10121 = vst [vmem:[%s14758_s12 + $0x98] sm:$0xff] %v10073_v14  ;;  %v10553_v13 = vmax.f32 %v10505_v56, 0.0  ;;  %v10744_v9 = vmul.f32 %v13901_v31, %v10696_v26  ;;  %v22039_v35 = vld [vmem:[#allocation156_spill] sm:$0xff]  ;;  %v20478_v26 = vpop.xlane.xlu0 %9664  ;;  %v22046_v22 = vld [vmem:[#allocation101_spill] sm:$0xff] }
 0x548   : > { %v10552_v8 = vmax.f32 %v10504_v25, 0.0  ;;  %10122 = vst.msk [vmem:[%s14758_s12 + $0xa0] sm:$0xff] %vm670_vm3, %v10074_v3  ;;  %12554 = vst [vmem:[%s14758_s12 + $0x210] sm:$0xff] %v10312_v7  ;;  %v10745_v15 = vmul.f32 %v13901_v31, %v10697_v45  ;;  %v10746_v20 = vmul.f32 %v13901_v31, %v10698_v48  ;;  %v9933_v60 = vadd.f32 1e-05, %v9917_v53  ;;  %v20480_v45 = vpop.xlane.xlu1 %9669  ;;  %v22045_v25 = vld [vmem:[#allocation100_spill] sm:$0xff] }
 0x549   : > { %12555 = vst [vmem:[%s14758_s12 + $0x218] sm:$0xff] %v10313_v40  ;;  %12556 = vst.msk [vmem:[%s14758_s12 + $0x220] sm:$0xff] %vm670_vm3, %v10314_v58  ;;  %v10554_v11 = vmax.f32 %v10506_v34, 0.0  ;;  %v10792_v48 = vmax.f32 %v10744_v9, 0.0  ;;  %v9934_v23 = vadd.f32 1e-05, %v9918_v41  ;;  %v20615_v21 = vadd.f32 %v20478_v26, %v22064_v57 }
 0x54a   : > { %12650 = vst [vmem:[%s14758_s12 + $0x390] sm:$0xff] %v10552_v8  ;;  %12651 = vst [vmem:[%s14758_s12 + $0x398] sm:$0xff] %v10553_v13  ;;  %v10793_v31 = vmax.f32 %v10745_v15, 0.0  ;;  %v10794_v33 = vmax.f32 %v10746_v20, 0.0  ;;  %13902 = vrsqrt.f32 %v9933_v60  ;;  %v20499_v41 = vld [vmem:[%s14758_s12 + $0xd0] sm:$0xff]  ;;  %v20522_v40 = vmul.f32 0.0009765625, %v20413_v10 }
 0x54b   : > { %12652 = vst.msk [vmem:[%s14758_s12 + $0x3a0] sm:$0xff] %vm670_vm3, %v10554_v11  ;;  %12746 = vst [vmem:[%s14758_s12 + $0x510] sm:$0xff] %v10792_v48  ;;  %v20517_v3 = vld [vmem:[%s14758_s12 + $0x3d0] sm:$0xff]  ;;  %13904 = vrsqrt.f32 %v9934_v23  ;;  %v20536_v60 = vld [vmem:[%s14758_s12 + $0xd8] sm:$0xff]  ;;  %v22070_v26 = vsub.f32 %v22023_v5, %v20328_v38 }
 0x54c   : > { %12747 = vst [vmem:[%s14758_s12 + $0x518] sm:$0xff] %v10793_v31  ;;  %12748 = vst.msk [vmem:[%s14758_s12 + $0x520] sm:$0xff] %vm670_vm3, %v10794_v33  ;;  %v22047_v58 = vld [vmem:[#allocation158_spill] sm:$0xff]  ;;  %v22048_v8 = vld [vmem:[#allocation157_spill] sm:$0xff]  ;;  %v9887_v31 = vmul.f32 %v20410_v12, %v20410_v12  ;;  %v9888_v11 = vmul.f32 %v20522_v40, %v20522_v40 }
 0x54d   : > { %v22049_v9 = vld [vmem:[#allocation138_spill] sm:$0xff]  ;;  %v20541_v48 = vld [vmem:[%s14758_s12 + $0xe0] sm:$0xff]  ;;  %v20548_v13 = vld [vmem:[%s14758_s12 + $0xe8] sm:$0xff] }
 0x54e   : > { %v9839_v15 = vadd.f32 %v20440_v28, %v22049_v9  ;;  %v20531_v20 = vld [vmem:[%s14758_s12 + $0x550] sm:$0xff]  ;;  %v22050_v33 = vld [vmem:[#allocation72_spill] sm:$0xff]  ;;  %v9793_v28 = vpop.xlane.xlu0 %9792  ;;  %v9798_v9 = vpop.xlane.xlu1 %9797  ;;  %v20553_v34 = vld [vmem:[%s14758_s12 + $0x258] sm:$0xff] }
 0x54f   : > { %v9840_v23 = vadd.f32 %v20442_v27, %v22050_v33  ;;  %v22051_v27 = vld [vmem:[#allocation53_spill] sm:$0xff]  ;;  %v22052_v19 = vld [vmem:[#allocation106_spill] sm:$0xff]  ;;  %v22053_v55 = vld [vmem:[#allocation107_spill] sm:$0xff]  ;;  %v20622_v30 = vadd.f32 %v9793_v28, %v22066_v51  ;;  %v20625_v50 = vadd.f32 %v9798_v9, %v22067_v47  ;;  %v22071_v51 = vsub.f32 %v22025_v29, %v20328_v38 }
 0x550   : > { %v9871_v7 = vmul.f32 0.0009765625, %v9839_v15  ;;  %v20562_v14 = vld [vmem:[%s14758_s12 + $0x268] sm:$0xff]  ;;  %v22055_v53 = vld [vmem:[#allocation159_spill] sm:$0xff]  ;;  %v22072_v47 = vsub.f32 %v20418_v49, %v20328_v38  ;;  %v22075_v9 = vsub.f32 %v20427_v61, %v20328_v38  ;;  %v22076_v49 = vsub.f32 %v22028_v18, %v20328_v38 }
 0x551   : > { %v9872_v52 = vmul.f32 0.0009765625, %v9840_v23  ;;  %v20573_v15 = vld [vmem:[%s14758_s12 + $0x3e8] sm:$0xff] }
 0x552   : > { %v9903_v54 = vsub.f32 %v9871_v7, %v9887_v31  ;;  %v22054_v44 = vld [vmem:[#allocation160_spill] sm:$0xff]  ;;  %v9675_v2 = vpop.xlane.xlu0 %9674  ;;  %v9680_v33 = vpop.xlane.xlu1 %9679 }
 0x553   : > { %v20582_v23 = vld [vmem:[%s14758_s12 + $0x568] sm:$0xff]  ;;  %v9904_v4 = vsub.f32 %v9872_v52, %v9888_v11  ;;  %v20591_v7 = vld [vmem:[%s14758_s12 + $0x100] sm:$0xff]  ;;  %v20633_v57 = vadd.f32 %v9680_v33, %v22069_v59  ;;  %v22074_v59 = vsub.f32 %v22027_v42, %v20328_v38 }
 0x554   : > { %v9919_v56 = vmax.f32 %v9903_v54, 0.0  ;;  %v22065_v52 = vld [vmem:[#allocation69_spill] sm:$0xff] }
 0x555   : > { %v9920_v11 = vmax.f32 %v9904_v4, 0.0  ;;  %v20619_v4 = vadd.f32 %v20480_v45, %v22065_v52  ;;  %v22077_v52 = vsub.f32 %v22029_v36, %v20328_v38 }
 0x556   : > { %v9935_v10 = vadd.f32 1e-05, %v9919_v56  ;;  %v20630_v56 = vadd.f32 %v9675_v2, %v22068_v37  ;;  %v22073_v37 = vsub.f32 %v22026_v39, %v20328_v38 }
 0x557   : > { %v13903_v54 = vpop.eup %13902  ;;  %v20627_v31 = vadd.f32 1e-05, %v9920_v11 }
 0x558   : > { %13906 = vrsqrt.f32 %v9935_v10  ;;  %v10027_v45 = vmul.f32 %v13903_v54, %v22070_v26  ;;  %v10028_v28 = vmul.f32 %v13903_v54, %v22071_v51  ;;  %v10029_v10 = vmul.f32 %v13903_v54, %v22072_v47  ;;  %v13905_v11 = vpop.eup %13904 }
 0x559   : > { %v10267_v2 = vmul.f32 %v13903_v54, %v22073_v37  ;;  %v10268_v5 = vmul.f32 %v13903_v54, %v22074_v59  ;;  %v10269_v29 = vmul.f32 %v13903_v54, %v22075_v9  ;;  %v10507_v33 = vmul.f32 %v13903_v54, %v22076_v49 }
 0x55a   : > { %v10508_v39 = vmul.f32 %v13903_v54, %v22077_v52  ;;  %v10075_v26 = vmax.f32 %v10027_v45, 0.0  ;;  %v10076_v51 = vmax.f32 %v10028_v28, 0.0  ;;  %v10077_v42 = vmax.f32 %v10029_v10, 0.0 }
 0x55b   : > { %v10315_v47 = vmax.f32 %v10267_v2, 0.0  ;;  %v10316_v37 = vmax.f32 %v10268_v5, 0.0  ;;  %v10317_v61 = vmax.f32 %v10269_v29, 0.0  ;;  %v22078_v59 = vsub.f32 %v20436_v6, %v20328_v38 }
 0x55c   : > { %v10555_v18 = vmax.f32 %v10507_v33, 0.0  ;;  %10123 = vst [vmem:[%s14758_s12 + $0xa8] sm:$0xff] %v10075_v26  ;;  %10124 = vst [vmem:[%s14758_s12 + $0xb0] sm:$0xff] %v10076_v51  ;;  %v10556_v36 = vmax.f32 %v10508_v39, 0.0  ;;  %v22079_v45 = vsub.f32 %v22039_v35, %v20328_v38  ;;  %v22080_v10 = vsub.f32 %v22040_v63, %v20328_v38 }
 0x55d   : > { %v10509_v9 = vmul.f32 %v13903_v54, %v22078_v59  ;;  %10125 = vst.msk [vmem:[%s14758_s12 + $0xb8] sm:$0xff] %vm670_vm3, %v10077_v42  ;;  %12557 = vst [vmem:[%s14758_s12 + $0x228] sm:$0xff] %v10315_v47  ;;  %v22081_v6 = vsub.f32 %v20486_v16, %v20328_v38  ;;  %v22082_v35 = vsub.f32 %v22041_v24, %v20331_v17  ;;  %13908 = vrsqrt.f32 %v20627_v31 }
 0x55e   : > { %v10747_v28 = vmul.f32 %v13903_v54, %v22079_v45  ;;  %v10748_v2 = vmul.f32 %v13903_v54, %v22080_v10  ;;  %12558 = vst [vmem:[%s14758_s12 + $0x230] sm:$0xff] %v10316_v37  ;;  %12559 = vst.msk [vmem:[%s14758_s12 + $0x238] sm:$0xff] %vm670_vm3, %v10317_v61  ;;  %v22083_v63 = vsub.f32 %v22042_v1, %v20331_v17 }
 0x55f   : > { %v10749_v5 = vmul.f32 %v13903_v54, %v22081_v6  ;;  %v10557_v29 = vmax.f32 %v10509_v9, 0.0  ;;  %12653 = vst [vmem:[%s14758_s12 + $0x3a8] sm:$0xff] %v10555_v18  ;;  %v10030_v49 = vmul.f32 %v13905_v11, %v22082_v35  ;;  %v22084_v38 = vsub.f32 %v20499_v41, %v20331_v17  ;;  %12654 = vst [vmem:[%s14758_s12 + $0x3b0] sm:$0xff] %v10556_v36 }
 0x560   : > { %v10031_v33 = vmul.f32 %v13905_v11, %v22083_v63  ;;  %v10795_v54 = vmax.f32 %v10747_v28, 0.0  ;;  %v10796_v52 = vmax.f32 %v10748_v2, 0.0  ;;  %v22085_v26 = vsub.f32 %v22043_v43, %v20331_v17 }
 0x561   : > { %v10032_v16 = vmul.f32 %v13905_v11, %v22084_v38  ;;  %v10797_v39 = vmax.f32 %v10749_v5, 0.0  ;;  %12655 = vst.msk [vmem:[%s14758_s12 + $0x3b8] sm:$0xff] %vm670_vm3, %v10557_v29  ;;  %v10078_v51 = vmax.f32 %v10030_v49, 0.0  ;;  %v22086_v41 = vsub.f32 %v22044_v46, %v20331_v17 }
 0x562   : > { %v10270_v24 = vmul.f32 %v13905_v11, %v22085_v26  ;;  %v10079_v1 = vmax.f32 %v10031_v33, 0.0  ;;  %12749 = vst [vmem:[%s14758_s12 + $0x528] sm:$0xff] %v10795_v54  ;;  %12750 = vst [vmem:[%s14758_s12 + $0x530] sm:$0xff] %v10796_v52  ;;  %v22087_v37 = vsub.f32 %v20508_v62, %v20331_v17  ;;  %v22088_v59 = vsub.f32 %v22045_v25, %v20331_v17 }
 0x563   : > { %v10080_v42 = vmax.f32 %v10032_v16, 0.0  ;;  %v10271_v47 = vmul.f32 %v13905_v11, %v22086_v41  ;;  %12751 = vst.msk [vmem:[%s14758_s12 + $0x538] sm:$0xff] %vm670_vm3, %v10797_v39  ;;  %v22089_v18 = vsub.f32 %v22046_v22, %v20331_v17  ;;  %10126 = vst [vmem:[%s14758_s12 + $0xc0] sm:$0xff] %v10078_v51  ;;  %v22090_v62 = vsub.f32 %v20517_v3, %v20331_v17 }
 0x564   : > { %v10272_v43 = vmul.f32 %v13905_v11, %v22087_v37  ;;  %v10318_v61 = vmax.f32 %v10270_v24, 0.0  ;;  %v10510_v9 = vmul.f32 %v13905_v11, %v22088_v59  ;;  %10127 = vst [vmem:[%s14758_s12 + $0xc8] sm:$0xff] %v10079_v1  ;;  %v22091_v28 = vsub.f32 %v22047_v58, %v20331_v17 }
 0x565   : > { %v10511_v46 = vmul.f32 %v13905_v11, %v22089_v18  ;;  %10128 = vst.msk [vmem:[%s14758_s12 + $0xd0] sm:$0xff] %vm670_vm3, %v10080_v42  ;;  %v10319_v36 = vmax.f32 %v10271_v47, 0.0  ;;  %v10512_v45 = vmul.f32 %v13905_v11, %v22090_v62  ;;  %v22092_v22 = vsub.f32 %v22048_v8, %v20331_v17  ;;  %v13907_v8 = vpop.eup %13906  ;;  %v22107_v62 = vld [vmem:[#allocation162_spill] sm:$0xff] }
 0x566   : > { %v10750_v25 = vmul.f32 %v13905_v11, %v22091_v28  ;;  %v10320_v2 = vmax.f32 %v10272_v43, 0.0  ;;  %12560 = vst [vmem:[%s14758_s12 + $0x240] sm:$0xff] %v10318_v61  ;;  %v10558_v6 = vmax.f32 %v10510_v9, 0.0  ;;  %v22093_v29 = vsub.f32 %v20531_v20, %v20331_v17 }
 0x567   : > { %v10751_v10 = vmul.f32 %v13905_v11, %v22092_v22  ;;  %v10559_v5 = vmax.f32 %v10511_v46, 0.0  ;;  %12561 = vst [vmem:[%s14758_s12 + $0x248] sm:$0xff] %v10319_v36  ;;  %v10560_v35 = vmax.f32 %v10512_v45, 0.0  ;;  %v20735_v33 = vmul.f32 0.0009765625, %v20615_v21  ;;  %v22106_v46 = vld [vmem:[#allocation161_spill] sm:$0xff]  ;;  %v13964_v22 = vld [vmem:[%s14758_s12 + $0x580] sm:$0xff] }
 0x568   : > { %v10752_v3 = vmul.f32 %v13905_v11, %v22093_v29  ;;  %v10798_v58 = vmax.f32 %v10750_v25, 0.0  ;;  %12562 = vst.msk [vmem:[%s14758_s12 + $0x250] sm:$0xff] %vm670_vm3, %v10320_v2  ;;  %12656 = vst [vmem:[%s14758_s12 + $0x3c0] sm:$0xff] %v10558_v6  ;;  %v20738_v17 = vmul.f32 0.0009765625, %v20619_v4  ;;  %v20741_v20 = vmul.f32 0.0009765625, %v20622_v30 }
 0x569   : > { %v10799_v49 = vmax.f32 %v10751_v10, 0.0  ;;  %12657 = vst [vmem:[%s14758_s12 + $0x3c8] sm:$0xff] %v10559_v5  ;;  %12658 = vst.msk [vmem:[%s14758_s12 + $0x3d0] sm:$0xff] %vm670_vm3, %v10560_v35  ;;  %v22094_v31 = vsub.f32 %v20536_v60, %v20410_v12  ;;  %v22095_v38 = vsub.f32 %v20541_v48, %v20410_v12  ;;  %v22096_v21 = vsub.f32 %v20548_v13, %v20410_v12  ;;  %v22108_v5 = vld [vmem:[#allocation11_spill] sm:$0xff] }
 0x56a   : > { %v10800_v63 = vmax.f32 %v10752_v3, 0.0  ;;  %12752 = vst [vmem:[%s14758_s12 + $0x540] sm:$0xff] %v10798_v58  ;;  %v22097_v30 = vsub.f32 %v20553_v34, %v20410_v12  ;;  %v22098_v60 = vsub.f32 %v22051_v27, %v20410_v12  ;;  %v22099_v48 = vsub.f32 %v20562_v14, %v20410_v12  ;;  %v22109_v3 = vld [vmem:[#allocation10_spill] sm:$0xff] }
 0x56b   : > { %12753 = vst [vmem:[%s14758_s12 + $0x548] sm:$0xff] %v10799_v49  ;;  %v10033_v11 = vmul.f32 %v13907_v8, %v22094_v31  ;;  %v10034_v16 = vmul.f32 %v13907_v8, %v22095_v38  ;;  %v10035_v4 = vmul.f32 %v13907_v8, %v22096_v21  ;;  %v22100_v13 = vsub.f32 %v22052_v19, %v20410_v12  ;;  %v20823_v58 = vld [vmem:[%s14758_s12 + $0x118] sm:$0xff]  ;;  %v22110_v49 = vld [vmem:[#allocation56_spill] sm:$0xff]  ;;  %v20837_v21 = vpop.xlane.xlu0 %9802 }
 0x56c   : > { %v10273_v54 = vmul.f32 %v13907_v8, %v22097_v30  ;;  %12754 = vst.msk [vmem:[%s14758_s12 + $0x550] sm:$0xff] %vm670_vm3, %v10800_v63  ;;  %v10274_v52 = vmul.f32 %v13907_v8, %v22098_v60  ;;  %v10275_v39 = vmul.f32 %v13907_v8, %v22099_v48  ;;  %v22101_v34 = vsub.f32 %v22053_v55, %v20410_v12  ;;  %v22111_v63 = vld [vmem:[#allocation57_spill] sm:$0xff]  ;;  %v20844_v60 = vld [vmem:[%s14758_s12 + $0x418] sm:$0xff]  ;;  %v22114_v48 = vld [vmem:[#allocation164_spill] sm:$0xff] }
 0x56d   : > { %v10513_v26 = vmul.f32 %v13907_v8, %v22100_v13  ;;  %v10081_v51 = vmax.f32 %v10033_v11, 0.0  ;;  %v10082_v1 = vmax.f32 %v10034_v16, 0.0  ;;  %v10083_v42 = vmax.f32 %v10035_v4, 0.0  ;;  %v20833_v11 = vld [vmem:[%s14758_s12 + $0x298] sm:$0xff]  ;;  %v22112_v4 = vld [vmem:[#allocation112_spill] sm:$0xff]  ;;  %v13909_v13 = vpop.eup %13908 }
 0x56e   : > { %v10514_v24 = vmul.f32 %v13907_v8, %v22101_v34  ;;  %v10321_v41 = vmax.f32 %v10273_v54, 0.0  ;;  %v10322_v27 = vmax.f32 %v10274_v52, 0.0  ;;  %v10323_v47 = vmax.f32 %v10275_v39, 0.0  ;;  %v22113_v54 = vld [vmem:[#allocation113_spill] sm:$0xff]  ;;  %v22151_v39 = vld [vmem:[#allocation62_spill] sm:$0xff]  ;;  %v21027_v31 = vld [vmem:[%s14758_s12 + $0x460] sm:$0xff] }
 0x56f   : > { %v22102_v14 = vsub.f32 %v20573_v15, %v20410_v12  ;;  %v10561_v43 = vmax.f32 %v10513_v26, 0.0  ;;  %10129 = vst [vmem:[%s14758_s12 + $0xd8] sm:$0xff] %v10081_v51  ;;  %10130 = vst [vmem:[%s14758_s12 + $0xe0] sm:$0xff] %v10082_v1  ;;  %v22103_v19 = vsub.f32 %v22054_v44, %v20410_v12  ;;  %v22104_v59 = vsub.f32 %v22055_v53, %v20410_v12  ;;  %v22115_v26 = vld [vmem:[#allocation163_spill] sm:$0xff]  ;;  %v20994_v51 = vld [vmem:[%s14758_s12 + $0x5c8] sm:$0xff] }
 0x570   : > { %10131 = vst.msk [vmem:[%s14758_s12 + $0xe8] sm:$0xff] %vm670_vm3, %v10083_v42  ;;  %12563 = vst [vmem:[%s14758_s12 + $0x258] sm:$0xff] %v10321_v41  ;;  %v10562_v55 = vmax.f32 %v10514_v24, 0.0  ;;  %v22105_v15 = vsub.f32 %v20582_v23, %v20410_v12  ;;  %v10708_v36 = vsub.f32 %v22106_v46, %v20522_v40  ;;  %v10709_v45 = vsub.f32 %v22107_v62, %v20522_v40  ;;  %v20853_v24 = vld [vmem:[%s14758_s12 + $0x598] sm:$0xff]  ;;  %v22131_v46 = vld [vmem:[#allocation12_spill] sm:$0xff] }
 0x571   : > { %v10515_v37 = vmul.f32 %v13907_v8, %v22102_v14  ;;  %v10753_v61 = vmul.f32 %v13907_v8, %v22103_v19  ;;  %v10754_v9 = vmul.f32 %v13907_v8, %v22104_v59  ;;  %12564 = vst [vmem:[%s14758_s12 + $0x260] sm:$0xff] %v10322_v27  ;;  %12565 = vst.msk [vmem:[%s14758_s12 + $0x268] sm:$0xff] %vm670_vm3, %v10323_v47  ;;  %v9874_v53 = vmul.f32 0.0009765625, %v20625_v50  ;;  %v22121_v59 = vld [vmem:[#allocation55_spill] sm:$0xff]  ;;  %v22154_v38 = vld [vmem:[#allocation122_spill] sm:$0xff] }
 0x572   : > { %v10755_v18 = vmul.f32 %v13907_v8, %v22105_v15  ;;  %12659 = vst [vmem:[%s14758_s12 + $0x3d8] sm:$0xff] %v10561_v43  ;;  %12660 = vst [vmem:[%s14758_s12 + $0x3e0] sm:$0xff] %v10562_v55  ;;  %v9889_v25 = vmul.f32 %v20735_v33, %v20735_v33  ;;  %v10710_v10 = vsub.f32 %v13964_v22, %v20522_v40  ;;  %v20809_v6 = vmul.f32 0.0009765625, %v20630_v56  ;;  %v22119_v55 = vld [vmem:[#allocation54_spill] sm:$0xff]  ;;  %v22123_v15 = vld [vmem:[#allocation148_spill] sm:$0xff] }
 0x573   : > { %v10563_v44 = vmax.f32 %v10515_v37, 0.0  ;;  %v10801_v12 = vmax.f32 %v10753_v61, 0.0  ;;  %v10802_v23 = vmax.f32 %v10754_v9, 0.0  ;;  %v9890_v2 = vmul.f32 %v20738_v17, %v20738_v17  ;;  %22155 = vst [vmem:[#allocation97_spill] sm:$0xff] %v21027_v31  ;;  %v21036_v56 = vld [vmem:[%s14758_s12 + $0x5e0] sm:$0xff] }
 0x574   : > { %v10803_v28 = vmax.f32 %v10755_v18, 0.0  ;;  %v20812_v50 = vmul.f32 0.0009765625, %v20633_v57  ;;  %v9991_v29 = vsub.f32 %v22108_v5, %v20735_v33  ;;  %v9905_v57 = vsub.f32 %v20741_v20, %v9889_v25  ;;  %22158 = vst [vmem:[#allocation91_spill] sm:$0xff] %v21036_v56 }
 0x575   : > { %12661 = vst.msk [vmem:[%s14758_s12 + $0x3e8] sm:$0xff] %vm670_vm3, %v10563_v44  ;;  %12755 = vst [vmem:[%s14758_s12 + $0x558] sm:$0xff] %v10801_v12  ;;  %v9906_v16 = vsub.f32 %v9874_v53, %v9890_v2  ;;  %v22116_v41 = vsub.f32 %v22056_v0, %v20522_v40  ;;  %v22117_v47 = vsub.f32 %v22057_v32, %v20522_v40  ;;  %v22125_v44 = vld [vmem:[#allocation108_spill] sm:$0xff]  ;;  %v22127_v12 = vld [vmem:[#allocation109_spill] sm:$0xff] }
 0x576   : > { %12756 = vst [vmem:[%s14758_s12 + $0x560] sm:$0xff] %v10802_v23  ;;  %12757 = vst.msk [vmem:[%s14758_s12 + $0x568] sm:$0xff] %vm670_vm3, %v10803_v28  ;;  %v9921_v1 = vmax.f32 %v9905_v57, 0.0  ;;  %v22118_v37 = vsub.f32 %v20591_v7, %v20522_v40  ;;  %v22120_v19 = vsub.f32 %v22119_v55, %v20522_v40  ;;  %v22122_v9 = vsub.f32 %v22121_v59, %v20522_v40  ;;  %v9685_v59 = vpop.xlane.xlu0 %9684 }
 0x577   : > { %v9922_v42 = vmax.f32 %v9906_v16, 0.0  ;;  %v10036_v27 = vmul.f32 %v13909_v13, %v22116_v41  ;;  %v10037_v14 = vmul.f32 %v13909_v13, %v22117_v47  ;;  %v22124_v18 = vsub.f32 %v22123_v15, %v20522_v40  ;;  %v22129_v47 = vld [vmem:[#allocation77_spill] sm:$0xff]  ;;  %v22148_v15 = vld [vmem:[#allocation167_spill] sm:$0xff] }
 0x578   : > { %v10038_v43 = vmul.f32 %v13909_v13, %v22118_v37  ;;  %v10276_v61 = vmul.f32 %v13909_v13, %v22120_v19  ;;  %v10277_v0 = vmul.f32 %v13909_v13, %v22122_v9  ;;  %v22126_v7 = vsub.f32 %v22125_v44, %v20522_v40  ;;  %v22132_v44 = vld [vmem:[#allocation58_spill] sm:$0xff] }
 0x579   : > { %v10278_v32 = vmul.f32 %v13909_v13, %v22124_v18  ;;  %v22128_v23 = vsub.f32 %v22127_v12, %v20522_v40  ;;  %v10084_v25 = vmax.f32 %v10036_v27, 0.0  ;;  %v10085_v22 = vmax.f32 %v10037_v14, 0.0  ;;  %v20910_v18 = vld [vmem:[%s14758_s12 + $0x130] sm:$0xff]  ;;  %v9808_v12 = vpop.xlane.xlu1 %9807 }
 0x57a   : > { %v10516_v53 = vmul.f32 %v13909_v13, %v22126_v7  ;;  %v10086_v2 = vmax.f32 %v10038_v43, 0.0  ;;  %v10324_v57 = vmax.f32 %v10276_v61, 0.0  ;;  %v10325_v16 = vmax.f32 %v10277_v0, 0.0  ;;  %v20900_v0 = vld [vmem:[%s14758_s12 + $0x120] sm:$0xff] }
 0x57b   : > { %v10517_v28 = vmul.f32 %v13909_v13, %v22128_v23  ;;  %v10326_v41 = vmax.f32 %v10278_v32, 0.0  ;;  %v22130_v37 = vsub.f32 %v22129_v47, %v20522_v40  ;;  %10132 = vst [vmem:[%s14758_s12 + $0xf0] sm:$0xff] %v10084_v25  ;;  %10133 = vst [vmem:[%s14758_s12 + $0xf8] sm:$0xff] %v10085_v22  ;;  %v10756_v14 = vmul.f32 %v13909_v13, %v10708_v36  ;;  %v22135_v22 = vld [vmem:[#allocation116_spill] sm:$0xff]  ;;  %v22149_v32 = vld [vmem:[#allocation41_spill] sm:$0xff] }
 0x57c   : > { %v10564_v19 = vmax.f32 %v10516_v53, 0.0  ;;  %10134 = vst.msk [vmem:[%s14758_s12 + $0x100] sm:$0xff] %vm670_vm3, %v10086_v2  ;;  %12566 = vst [vmem:[%s14758_s12 + $0x270] sm:$0xff] %v10324_v57  ;;  %v10757_v43 = vmul.f32 %v13909_v13, %v10709_v45  ;;  %v10758_v61 = vmul.f32 %v13909_v13, %v10710_v10  ;;  %v9937_v40 = vadd.f32 1e-05, %v9921_v1  ;;  %v22133_v1 = vld [vmem:[#allocation59_spill] sm:$0xff] }
 0x57d   : > { %v10518_v55 = vmul.f32 %v13909_v13, %v22130_v37  ;;  %v10565_v27 = vmax.f32 %v10517_v28, 0.0  ;;  %12567 = vst [vmem:[%s14758_s12 + $0x278] sm:$0xff] %v10325_v16  ;;  %12568 = vst.msk [vmem:[%s14758_s12 + $0x280] sm:$0xff] %vm670_vm3, %v10326_v41  ;;  %v10804_v62 = vmax.f32 %v10756_v14, 0.0  ;;  %v9938_v13 = vadd.f32 1e-05, %v9922_v42 }
 0x57e   : > { %12662 = vst [vmem:[%s14758_s12 + $0x3f0] sm:$0xff] %v10564_v19  ;;  %v10805_v45 = vmax.f32 %v10757_v43, 0.0  ;;  %v10806_v10 = vmax.f32 %v10758_v61, 0.0  ;;  %13910 = vrsqrt.f32 %v9937_v40  ;;  %v20923_v42 = vld [vmem:[%s14758_s12 + $0x2b0] sm:$0xff]  ;;  %v22134_v28 = vld [vmem:[#allocation115_spill] sm:$0xff]  ;;  %v9813_v61 = vpop.xlane.xlu0 %9812  ;;  %v20960_v16 = vld [vmem:[%s14758_s12 + $0x148] sm:$0xff]  ;;  %v22161_v35 = vsub.f32 %v22110_v49, %v20735_v33 }
 0x57f   : > { %v10566_v9 = vmax.f32 %v10518_v55, 0.0  ;;  %12663 = vst [vmem:[%s14758_s12 + $0x3f8] sm:$0xff] %v10565_v27  ;;  %12758 = vst [vmem:[%s14758_s12 + $0x570] sm:$0xff] %v10804_v62  ;;  %v20932_v57 = vld [vmem:[%s14758_s12 + $0x430] sm:$0xff]  ;;  %13912 = vrsqrt.f32 %v9938_v13  ;;  %v20955_v47 = vld [vmem:[%s14758_s12 + $0x140] sm:$0xff]  ;;  %v9891_v13 = vmul.f32 %v20809_v6, %v20809_v6 }
 0x580   : > { %12759 = vst [vmem:[%s14758_s12 + $0x578] sm:$0xff] %v10805_v45  ;;  %12760 = vst.msk [vmem:[%s14758_s12 + $0x580] sm:$0xff] %vm670_vm3, %v10806_v10  ;;  %v22136_v41 = vld [vmem:[#allocation166_spill] sm:$0xff]  ;;  %v22137_v37 = vld [vmem:[#allocation165_spill] sm:$0xff] }
 0x581   : > { %12664 = vst.msk [vmem:[%s14758_s12 + $0x400] sm:$0xff] %vm670_vm3, %v10566_v9  ;;  %v20941_v19 = vld [vmem:[%s14758_s12 + $0x5b0] sm:$0xff]  ;;  %v20948_v9 = vld [vmem:[%s14758_s12 + $0x138] sm:$0xff]  ;;  %v22141_v40 = vld [vmem:[#allocation60_spill] sm:$0xff] }
 0x582   : > { %v22138_v14 = vld [vmem:[#allocation133_spill] sm:$0xff]  ;;  %v22139_v62 = vld [vmem:[#allocation70_spill] sm:$0xff]  ;;  %v22145_v7 = vld [vmem:[#allocation120_spill] sm:$0xff] }
 0x583   : > { %v9843_v43 = vadd.f32 %v20837_v21, %v22138_v14  ;;  %v9844_v45 = vadd.f32 %v9808_v12, %v22139_v62  ;;  %v22140_v10 = vld [vmem:[#allocation130_spill] sm:$0xff]  ;;  %v22143_v27 = vld [vmem:[#allocation61_spill] sm:$0xff]  ;;  %v22147_v25 = vld [vmem:[#allocation168_spill] sm:$0xff] }
 0x584   : > { %v9829_v55 = vadd.f32 %v9685_v59, %v22140_v10  ;;  %v9892_v59 = vmul.f32 %v20812_v50, %v20812_v50  ;;  %v22142_v10 = vld [vmem:[#allocation88_spill] sm:$0xff] }
 0x585   : > { %v9875_v14 = vmul.f32 0.0009765625, %v9843_v43  ;;  %v9876_v62 = vmul.f32 0.0009765625, %v9844_v45  ;;  %v9845_v2 = vadd.f32 %v9813_v61, %v22142_v10  ;;  %v20974_v23 = vld [vmem:[%s14758_s12 + $0x2c8] sm:$0xff]  ;;  %v22144_v43 = vld [vmem:[#allocation119_spill] sm:$0xff] }
 0x586   : > { %v20983_v36 = vld [vmem:[%s14758_s12 + $0x448] sm:$0xff]  ;;  %v20987_v10 = vmul.f32 0.0009765625, %v9829_v55  ;;  %v21005_v21 = vld [vmem:[%s14758_s12 + $0x160] sm:$0xff] }
 0x587   : > { %v9907_v12 = vsub.f32 %v9875_v14, %v9891_v13  ;;  %v9908_v45 = vsub.f32 %v9876_v62, %v9892_v59  ;;  %v22150_v59 = vld [vmem:[#allocation42_spill] sm:$0xff]  ;;  %v21002_v34 = vmul.f32 0.0009765625, %v9845_v2  ;;  %v21014_v61 = vld [vmem:[%s14758_s12 + $0x2e0] sm:$0xff]  ;;  %v22153_v2 = vld [vmem:[#allocation121_spill] sm:$0xff]  ;;  %v22162_v13 = vsub.f32 %v22111_v63, %v20735_v33 }
 0x588   : > { %22146 = vst [vmem:[#allocation136_spill] sm:$0xff] %v20987_v10  ;;  %v21022_v53 = vmul.f32 %v20987_v10, %v20987_v10 }
 0x589   : > { %v9923_v14 = vmax.f32 %v9907_v12, 0.0  ;;  %v9924_v62 = vmax.f32 %v9908_v45, 0.0  ;;  %v22152_v12 = vld [vmem:[#allocation63_spill] sm:$0xff] }
 0x58b   : > { %v9939_v20 = vadd.f32 1e-05, %v9923_v14  ;;  %v9940_v30 = vadd.f32 1e-05, %v9924_v62  ;;  %v13911_v45 = vpop.eup %13910  ;;  %v22160_v62 = vsub.f32 %v20823_v58, %v20735_v33  ;;  %v22164_v58 = vsub.f32 %v22112_v4, %v20735_v33 }
 0x58c   : > { %v10039_v14 = vmul.f32 %v13911_v45, %v9991_v29  ;;  %v10280_v5 = vmul.f32 %v13911_v45, %v22162_v13  ;;  %v22163_v29 = vsub.f32 %v20833_v11, %v20735_v33  ;;  %v13913_v56 = vpop.eup %13912 }
 0x58d   : > { %13914 = vrsqrt.f32 %v9939_v20  ;;  %v22159_v20 = vsub.f32 %v22109_v3, %v20735_v33  ;;  %v10041_v10 = vmul.f32 %v13911_v45, %v22160_v62  ;;  %v22165_v62 = vsub.f32 %v22113_v54, %v20735_v33 }
 0x58e   : > { %13916 = vrsqrt.f32 %v9940_v30  ;;  %v10279_v30 = vmul.f32 %v13911_v45, %v22161_v35  ;;  %v10281_v3 = vmul.f32 %v13911_v45, %v22163_v29  ;;  %v10087_v35 = vmax.f32 %v10039_v14, 0.0 }
 0x58f   : > { %v10040_v8 = vmul.f32 %v13911_v45, %v22159_v20  ;;  %v10519_v20 = vmul.f32 %v13911_v45, %v22164_v58  ;;  %v10520_v49 = vmul.f32 %v13911_v45, %v22165_v62  ;;  %v10089_v63 = vmax.f32 %v10041_v10, 0.0 }
 0x590   : > { %v10327_v13 = vmax.f32 %v10279_v30, 0.0  ;;  %v10328_v52 = vmax.f32 %v10280_v5, 0.0  ;;  %v10329_v11 = vmax.f32 %v10281_v3, 0.0  ;;  %v22166_v29 = vsub.f32 %v20844_v60, %v20735_v33  ;;  %10135 = vst [vmem:[%s14758_s12 + $0x108] sm:$0xff] %v10087_v35 }
 0x591   : > { %v10088_v55 = vmax.f32 %v10040_v8, 0.0  ;;  %v10567_v4 = vmax.f32 %v10519_v20, 0.0  ;;  %10137 = vst.msk [vmem:[%s14758_s12 + $0x118] sm:$0xff] %vm670_vm3, %v10089_v63  ;;  %v10568_v54 = vmax.f32 %v10520_v49, 0.0  ;;  %v22167_v8 = vsub.f32 %v22114_v48, %v20735_v33 }
 0x592   : > { %v10521_v31 = vmul.f32 %v13911_v45, %v22166_v29  ;;  %12569 = vst [vmem:[%s14758_s12 + $0x288] sm:$0xff] %v10327_v13  ;;  %v22168_v14 = vsub.f32 %v22115_v26, %v20735_v33  ;;  %v22169_v60 = vsub.f32 %v20853_v24, %v20735_v33  ;;  %12570 = vst [vmem:[%s14758_s12 + $0x290] sm:$0xff] %v10328_v52 }
 0x593   : > { %10136 = vst [vmem:[%s14758_s12 + $0x110] sm:$0xff] %v10088_v55  ;;  %v10759_v10 = vmul.f32 %v13911_v45, %v22167_v8  ;;  %12571 = vst.msk [vmem:[%s14758_s12 + $0x298] sm:$0xff] %vm670_vm3, %v10329_v11  ;;  %v22170_v48 = vsub.f32 %v20900_v0, %v20738_v17  ;;  %v22171_v26 = vsub.f32 %v22131_v46, %v20738_v17 }
 0x594   : > { %v10760_v30 = vmul.f32 %v13911_v45, %v22168_v14  ;;  %v10761_v5 = vmul.f32 %v13911_v45, %v22169_v60  ;;  %v10569_v55 = vmax.f32 %v10521_v31, 0.0  ;;  %12665 = vst [vmem:[%s14758_s12 + $0x408] sm:$0xff] %v10567_v4  ;;  %v22172_v33 = vsub.f32 %v20910_v18, %v20738_v17  ;;  %12666 = vst [vmem:[%s14758_s12 + $0x410] sm:$0xff] %v10568_v54 }
 0x595   : > { %v10042_v3 = vmul.f32 %v13913_v56, %v22170_v48  ;;  %v10043_v58 = vmul.f32 %v13913_v56, %v22171_v26  ;;  %v10807_v52 = vmax.f32 %v10759_v10, 0.0  ;;  %v22173_v20 = vsub.f32 %v22132_v44, %v20738_v17 }
 0x596   : > { %v10044_v24 = vmul.f32 %v13913_v56, %v22172_v33  ;;  %v10808_v45 = vmax.f32 %v10760_v30, 0.0  ;;  %v10809_v31 = vmax.f32 %v10761_v5, 0.0  ;;  %12667 = vst.msk [vmem:[%s14758_s12 + $0x418] sm:$0xff] %vm670_vm3, %v10569_v55  ;;  %v22174_v18 = vsub.f32 %v22133_v1, %v20738_v17 }
 0x597   : > { %v10282_v0 = vmul.f32 %v13913_v56, %v22173_v20  ;;  %v10090_v62 = vmax.f32 %v10042_v3, 0.0  ;;  %v10091_v46 = vmax.f32 %v10043_v58, 0.0  ;;  %12761 = vst [vmem:[%s14758_s12 + $0x588] sm:$0xff] %v10807_v52  ;;  %v22175_v63 = vsub.f32 %v20923_v42, %v20738_v17 }
 0x598   : > { %v10092_v49 = vmax.f32 %v10044_v24, 0.0  ;;  %v10283_v35 = vmul.f32 %v13913_v56, %v22174_v18  ;;  %12762 = vst [vmem:[%s14758_s12 + $0x590] sm:$0xff] %v10808_v45  ;;  %12763 = vst.msk [vmem:[%s14758_s12 + $0x598] sm:$0xff] %vm670_vm3, %v10809_v31  ;;  %v22176_v11 = vsub.f32 %v22134_v28, %v20738_v17  ;;  %v22177_v4 = vsub.f32 %v22135_v22, %v20738_v17 }
 0x599   : > { %v10284_v44 = vmul.f32 %v13913_v56, %v22175_v63  ;;  %v10330_v13 = vmax.f32 %v10282_v0, 0.0  ;;  %10138 = vst [vmem:[%s14758_s12 + $0x120] sm:$0xff] %v10090_v62  ;;  %10139 = vst [vmem:[%s14758_s12 + $0x128] sm:$0xff] %v10091_v46  ;;  %v22178_v8 = vsub.f32 %v20932_v57, %v20738_v17  ;;  %v22179_v10 = vsub.f32 %v22136_v41, %v20738_v17 }
 0x59a   : > { %v10522_v29 = vmul.f32 %v13913_v56, %v22176_v11  ;;  %v10523_v1 = vmul.f32 %v13913_v56, %v22177_v4  ;;  %10140 = vst.msk [vmem:[%s14758_s12 + $0x130] sm:$0xff] %vm670_vm3, %v10092_v49  ;;  %v10331_v54 = vmax.f32 %v10283_v35, 0.0  ;;  %v22180_v14 = vsub.f32 %v22137_v37, %v20738_v17  ;;  %v13915_v48 = vpop.eup %13914 }
 0x59b   : > { %v10524_v42 = vmul.f32 %v13913_v56, %v22178_v8  ;;  %v10762_v28 = vmul.f32 %v13913_v56, %v22179_v10  ;;  %v10332_v30 = vmax.f32 %v10284_v44, 0.0  ;;  %12572 = vst [vmem:[%s14758_s12 + $0x2a0] sm:$0xff] %v10330_v13  ;;  %v22181_v55 = vsub.f32 %v20941_v19, %v20738_v17  ;;  %v21141_v33 = vpop.eup %13916 }
 0x59c   : > { %v10763_v22 = vmul.f32 %v13913_v56, %v22180_v14  ;;  %v10570_v60 = vmax.f32 %v10522_v29, 0.0  ;;  %v10571_v5 = vmax.f32 %v10523_v1, 0.0  ;;  %12573 = vst [vmem:[%s14758_s12 + $0x2a8] sm:$0xff] %v10331_v54  ;;  %v22182_v37 = vsub.f32 %v21002_v34, %v21022_v53 }
 0x59d   : > { %v10764_v57 = vmul.f32 %v13913_v56, %v22181_v55  ;;  %v10572_v41 = vmax.f32 %v10524_v42, 0.0  ;;  %v10810_v3 = vmax.f32 %v10762_v28, 0.0  ;;  %12574 = vst.msk [vmem:[%s14758_s12 + $0x2b0] sm:$0xff] %vm670_vm3, %v10332_v30  ;;  %v22183_v56 = vsub.f32 %v20948_v9, %v20809_v6 }
 0x59e   : > { %v10811_v26 = vmax.f32 %v10763_v22, 0.0  ;;  %v21139_v58 = vmax.f32 %v22182_v37, 0.0  ;;  %12668 = vst [vmem:[%s14758_s12 + $0x420] sm:$0xff] %v10570_v60  ;;  %12669 = vst [vmem:[%s14758_s12 + $0x428] sm:$0xff] %v10571_v5  ;;  %v22184_v24 = vsub.f32 %v20955_v47, %v20809_v6  ;;  %v22185_v34 = vsub.f32 %v20960_v16, %v20809_v6  ;;  %v22203_v37 = vld [vmem:[#allocation97_spill] sm:$0xff] }
 0x59f   : > { %v10812_v17 = vmax.f32 %v10764_v57, 0.0  ;;  %v10045_v19 = vmul.f32 %v13915_v48, %v22183_v56  ;;  %12670 = vst.msk [vmem:[%s14758_s12 + $0x430] sm:$0xff] %vm670_vm3, %v10572_v41  ;;  %12764 = vst [vmem:[%s14758_s12 + $0x5a0] sm:$0xff] %v10810_v3  ;;  %v22186_v45 = vsub.f32 %v22141_v40, %v20809_v6  ;;  %v22187_v31 = vsub.f32 %v22143_v27, %v20809_v6 }
 0x5a0   : > { %v10046_v52 = vmul.f32 %v13915_v48, %v22184_v24  ;;  %v10047_v53 = vmul.f32 %v13915_v48, %v22185_v34  ;;  %12765 = vst [vmem:[%s14758_s12 + $0x5a8] sm:$0xff] %v10811_v26  ;;  %v22188_v20 = vsub.f32 %v20974_v23, %v20809_v6  ;;  %v22189_v0 = vsub.f32 %v22144_v43, %v20809_v6  ;;  %v22207_v34 = vld [vmem:[#allocation169_spill] sm:$0xff] }
 0x5a1   : > { %v10285_v9 = vmul.f32 %v13915_v48, %v22186_v45  ;;  %v10286_v47 = vmul.f32 %v13915_v48, %v22187_v31  ;;  %12766 = vst.msk [vmem:[%s14758_s12 + $0x5b0] sm:$0xff] %vm670_vm3, %v10812_v17  ;;  %v10093_v46 = vmax.f32 %v10045_v19, 0.0  ;;  %v22190_v27 = vsub.f32 %v22145_v7, %v20809_v6 }
 0x5a2   : > { %v10287_v16 = vmul.f32 %v13915_v48, %v22188_v20  ;;  %v10525_v62 = vmul.f32 %v13915_v48, %v22189_v0  ;;  %v10094_v40 = vmax.f32 %v10046_v52, 0.0  ;;  %v10095_v49 = vmax.f32 %v10047_v53, 0.0 }
 0x5a3   : > { %v10526_v18 = vmul.f32 %v13915_v48, %v22190_v27  ;;  %v10333_v35 = vmax.f32 %v10285_v9, 0.0  ;;  %v10334_v63 = vmax.f32 %v10286_v47, 0.0  ;;  %v22191_v44 = vsub.f32 %v20983_v36, %v20809_v6  ;;  %10141 = vst [vmem:[%s14758_s12 + $0x138] sm:$0xff] %v10093_v46  ;;  %v22209_v9 = vld [vmem:[#allocation91_spill] sm:$0xff] }
 0x5a4   : > { %v10335_v23 = vmax.f32 %v10287_v16, 0.0  ;;  %10142 = vst [vmem:[%s14758_s12 + $0x140] sm:$0xff] %v10094_v40  ;;  %10143 = vst.msk [vmem:[%s14758_s12 + $0x148] sm:$0xff] %vm670_vm3, %v10095_v49  ;;  %v10573_v13 = vmax.f32 %v10525_v62, 0.0  ;;  %v22192_v29 = vsub.f32 %v22147_v25, %v20809_v6  ;;  %v22193_v4 = vsub.f32 %v22148_v15, %v20809_v6 }
 0x5a5   : > { %v10527_v43 = vmul.f32 %v13915_v48, %v22191_v44  ;;  %v10574_v11 = vmax.f32 %v10526_v18, 0.0  ;;  %12575 = vst [vmem:[%s14758_s12 + $0x2b8] sm:$0xff] %v10333_v35  ;;  %12576 = vst [vmem:[%s14758_s12 + $0x2c0] sm:$0xff] %v10334_v63  ;;  %v22194_v54 = vsub.f32 %v20994_v51, %v20809_v6  ;;  %v22195_v25 = vsub.f32 %v22149_v32, %v20812_v50  ;;  %v13984_v18 = vld [vmem:[%s14758_s12 + $0x178] sm:$0xff]  ;;  %v22214_v63 = vld [vmem:[#allocation64_spill] sm:$0xff] }
 0x5a6   : > { %v10765_v7 = vmul.f32 %v13915_v48, %v22192_v29  ;;  %v10766_v1 = vmul.f32 %v13915_v48, %v22193_v4  ;;  %12577 = vst.msk [vmem:[%s14758_s12 + $0x2c8] sm:$0xff] %vm670_vm3, %v10335_v23  ;;  %v22196_v15 = vsub.f32 %v22150_v59, %v20812_v50  ;;  %12671 = vst [vmem:[%s14758_s12 + $0x438] sm:$0xff] %v10573_v13  ;;  %v9941_v62 = vadd.f32 1e-05, %v21139_v58  ;;  %v22213_v58 = vld [vmem:[#allocation43_spill] sm:$0xff]  ;;  %v22215_v44 = vld [vmem:[#allocation65_spill] sm:$0xff] }
 0x5a7   : > { %v10575_v36 = vmax.f32 %v10527_v43, 0.0  ;;  %v10767_v8 = vmul.f32 %v13915_v48, %v22194_v54  ;;  %v10048_v42 = vmul.f32 %v21141_v33, %v22195_v25  ;;  %12672 = vst [vmem:[%s14758_s12 + $0x440] sm:$0xff] %v10574_v11  ;;  %v22197_v6 = vsub.f32 %v21005_v21, %v20812_v50  ;;  %v13985_v13 = vld [vmem:[%s14758_s12 + $0x2f8] sm:$0xff]  ;;  %v22216_v29 = vld [vmem:[#allocation124_spill] sm:$0xff]  ;;  %v22217_v4 = vld [vmem:[#allocation125_spill] sm:$0xff] }
 0x5a8   : > { %v10049_v10 = vmul.f32 %v21141_v33, %v22196_v15  ;;  %v10813_v28 = vmax.f32 %v10765_v7, 0.0  ;;  %v10814_v14 = vmax.f32 %v10766_v1, 0.0  ;;  %v22198_v32 = vsub.f32 %v22151_v39, %v20812_v50  ;;  %v13986_v54 = vld [vmem:[%s14758_s12 + $0x478] sm:$0xff]  ;;  %v22218_v25 = vld [vmem:[#allocation172_spill] sm:$0xff] }
 0x5a9   : > { %v10050_v51 = vmul.f32 %v21141_v33, %v22197_v6  ;;  %12673 = vst.msk [vmem:[%s14758_s12 + $0x448] sm:$0xff] %vm670_vm3, %v10575_v36  ;;  %v10815_v59 = vmax.f32 %v10767_v8, 0.0  ;;  %v10096_v30 = vmax.f32 %v10048_v42, 0.0  ;;  %v22199_v5 = vsub.f32 %v22152_v12, %v20812_v50  ;;  %v22219_v15 = vld [vmem:[#allocation171_spill] sm:$0xff] }
 0x5aa   : > { %v10288_v22 = vmul.f32 %v21141_v33, %v22198_v32  ;;  %v10097_v60 = vmax.f32 %v10049_v10, 0.0  ;;  %12767 = vst [vmem:[%s14758_s12 + $0x5b8] sm:$0xff] %v10813_v28  ;;  %12768 = vst [vmem:[%s14758_s12 + $0x5c0] sm:$0xff] %v10814_v14  ;;  %v22200_v39 = vsub.f32 %v21014_v61, %v20812_v50  ;;  %v22201_v41 = vsub.f32 %v22153_v2, %v20812_v50  ;;  %v22205_v2 = vld [vmem:[#allocation170_spill] sm:$0xff] }
 0x5ab   : > { %v10289_v55 = vmul.f32 %v21141_v33, %v22199_v5  ;;  %v10098_v21 = vmax.f32 %v10050_v51, 0.0  ;;  %12769 = vst.msk [vmem:[%s14758_s12 + $0x5c8] sm:$0xff] %vm670_vm3, %v10815_v59  ;;  %10144 = vst [vmem:[%s14758_s12 + $0x150] sm:$0xff] %v10096_v30  ;;  %v22202_v26 = vsub.f32 %v22154_v38, %v20812_v50  ;;  %v22204_v17 = vsub.f32 %v22203_v37, %v20812_v50  ;;  %v13987_v28 = vld [vmem:[%s14758_s12 + $0x5f8] sm:$0xff] }
 0x5ac   : > { %v10290_v57 = vmul.f32 %v21141_v33, %v22200_v39  ;;  %v10336_v48 = vmax.f32 %v10288_v22, 0.0  ;;  %v10528_v3 = vmul.f32 %v21141_v33, %v22201_v41  ;;  %10145 = vst [vmem:[%s14758_s12 + $0x158] sm:$0xff] %v10097_v60  ;;  %v22206_v19 = vsub.f32 %v22205_v2, %v20812_v50 }
 0x5ad   : > { %v10337_v12 = vmax.f32 %v10289_v55, 0.0  ;;  %v10529_v61 = vmul.f32 %v21141_v33, %v22202_v26  ;;  %v10530_v56 = vmul.f32 %v21141_v33, %v22204_v17  ;;  %10146 = vst.msk [vmem:[%s14758_s12 + $0x160] sm:$0xff] %vm670_vm3, %v10098_v21  ;;  %v22208_v53 = vsub.f32 %v22207_v34, %v20812_v50 }
 0x5ae   : > { %v10768_v24 = vmul.f32 %v21141_v33, %v22206_v19  ;;  %v10338_v52 = vmax.f32 %v10290_v57, 0.0  ;;  %12578 = vst [vmem:[%s14758_s12 + $0x2d0] sm:$0xff] %v10336_v48  ;;  %v10576_v38 = vmax.f32 %v10528_v3, 0.0  ;;  %v22210_v31 = vsub.f32 %v22209_v9, %v20812_v50  ;;  %v22211_v50 = vld [vmem:[#allocation136_spill] sm:$0xff] }
 0x5af   : > { %v10769_v45 = vmul.f32 %v21141_v33, %v22208_v53  ;;  %12579 = vst [vmem:[%s14758_s12 + $0x2d8] sm:$0xff] %v10337_v12  ;;  %v10577_v20 = vmax.f32 %v10529_v61, 0.0  ;;  %v10578_v16 = vmax.f32 %v10530_v56, 0.0  ;;  %13918 = vrsqrt.f32 %v9941_v62 }
 0x5b0   : > { %v10770_v47 = vmul.f32 %v21141_v33, %v22210_v31  ;;  %v10816_v0 = vmax.f32 %v10768_v24, 0.0  ;;  %12580 = vst.msk [vmem:[%s14758_s12 + $0x2e0] sm:$0xff] %vm670_vm3, %v10338_v52  ;;  %12674 = vst [vmem:[%s14758_s12 + $0x450] sm:$0xff] %v10576_v38  ;;  %v22212_v33 = vld [vmem:[#allocation19_spill] sm:$0xff]  ;;  %v10004_v27 = vsub.f32 %v22213_v58, %v22211_v50  ;;  %v10005_v35 = vsub.f32 %v13984_v18, %v22211_v50 }
 0x5b1   : > { %v10817_v46 = vmax.f32 %v10769_v45, 0.0  ;;  %12675 = vst [vmem:[%s14758_s12 + $0x458] sm:$0xff] %v10577_v20  ;;  %12676 = vst.msk [vmem:[%s14758_s12 + $0x460] sm:$0xff] %vm670_vm3, %v10578_v16  ;;  %v10003_v49 = vsub.f32 %v22212_v33, %v22211_v50  ;;  %v10243_v23 = vsub.f32 %v22214_v63, %v22211_v50  ;;  %v10244_v43 = vsub.f32 %v22215_v44, %v22211_v50 }
 0x5b2   : > { %v10818_v40 = vmax.f32 %v10770_v47, 0.0  ;;  %12770 = vst [vmem:[%s14758_s12 + $0x5d0] sm:$0xff] %v10816_v0  ;;  %v10245_v11 = vsub.f32 %v13985_v13, %v22211_v50  ;;  %v10483_v7 = vsub.f32 %v22216_v29, %v22211_v50  ;;  %v10484_v1 = vsub.f32 %v22217_v4, %v22211_v50 }
 0x5b3   : > { %12771 = vst [vmem:[%s14758_s12 + $0x5d8] sm:$0xff] %v10817_v46  ;;  %v10485_v8 = vsub.f32 %v13986_v54, %v22211_v50  ;;  %v10723_v42 = vsub.f32 %v22218_v25, %v22211_v50  ;;  %v10724_v10 = vsub.f32 %v22219_v15, %v22211_v50  ;;  %v10725_v14 = vsub.f32 %v13987_v28, %v22211_v50 }
 0x5b4   : > { %12772 = vst.msk [vmem:[%s14758_s12 + $0x5e0] sm:$0xff] %vm670_vm3, %v10818_v40 }
 0x5bc   : > { %v13919_v36 = vpop.eup %13918 }
 0x5bd   : > { %v10051_v6 = vmul.f32 %v13919_v36, %v10003_v49  ;;  %v10052_v51 = vmul.f32 %v13919_v36, %v10004_v27  ;;  %v10053_v32 = vmul.f32 %v13919_v36, %v10005_v35  ;;  %v10291_v22 = vmul.f32 %v13919_v36, %v10243_v23 }
 0x5be   : > { %v10292_v59 = vmul.f32 %v13919_v36, %v10244_v43  ;;  %v10293_v30 = vmul.f32 %v13919_v36, %v10245_v11  ;;  %v10531_v60 = vmul.f32 %v13919_v36, %v10483_v7  ;;  %v10532_v5 = vmul.f32 %v13919_v36, %v10484_v1 }
 0x5bf   : > { %v10099_v55 = vmax.f32 %v10051_v6, 0.0  ;;  %v10100_v21 = vmax.f32 %v10052_v51, 0.0  ;;  %v10101_v39 = vmax.f32 %v10053_v32, 0.0  ;;  %v10339_v57 = vmax.f32 %v10291_v22, 0.0 }
 0x5c0   : > { %v10340_v48 = vmax.f32 %v10292_v59, 0.0  ;;  %v10341_v41 = vmax.f32 %v10293_v30, 0.0  ;;  %v10533_v3 = vmul.f32 %v13919_v36, %v10485_v8  ;;  %v10579_v12 = vmax.f32 %v10531_v60, 0.0 }
 0x5c1   : > { %10147 = vst [vmem:[%s14758_s12 + $0x168] sm:$0xff] %v10099_v55  ;;  %10148 = vst [vmem:[%s14758_s12 + $0x170] sm:$0xff] %v10100_v21  ;;  %v10580_v26 = vmax.f32 %v10532_v5, 0.0  ;;  %v10771_v61 = vmul.f32 %v13919_v36, %v10723_v42  ;;  %v10772_v37 = vmul.f32 %v13919_v36, %v10724_v10  ;;  %v10773_v17 = vmul.f32 %v13919_v36, %v10725_v14 }
 0x5c2   : > { %10149 = vst.msk [vmem:[%s14758_s12 + $0x178] sm:$0xff] %vm670_vm3, %v10101_v39  ;;  %12581 = vst [vmem:[%s14758_s12 + $0x2e8] sm:$0xff] %v10339_v57  ;;  %v10581_v56 = vmax.f32 %v10533_v3, 0.0 }
 0x5c3   : > { %12582 = vst [vmem:[%s14758_s12 + $0x2f0] sm:$0xff] %v10340_v48  ;;  %12583 = vst.msk [vmem:[%s14758_s12 + $0x2f8] sm:$0xff] %vm670_vm3, %v10341_v41  ;;  %v10819_v2 = vmax.f32 %v10771_v61, 0.0  ;;  %v10820_v19 = vmax.f32 %v10772_v37, 0.0  ;;  %v10821_v24 = vmax.f32 %v10773_v17, 0.0 }
 0x5c4   : > { %12677 = vst [vmem:[%s14758_s12 + $0x468] sm:$0xff] %v10579_v12  ;;  %12678 = vst [vmem:[%s14758_s12 + $0x470] sm:$0xff] %v10580_v26 }
 0x5c5   : > { %12679 = vst.msk [vmem:[%s14758_s12 + $0x478] sm:$0xff] %vm670_vm3, %v10581_v56  ;;  %12773 = vst [vmem:[%s14758_s12 + $0x5e8] sm:$0xff] %v10819_v2 }
 0x5c6   : > { %12774 = vst [vmem:[%s14758_s12 + $0x5f0] sm:$0xff] %v10820_v19  ;;  %12775 = vst.msk [vmem:[%s14758_s12 + $0x5f8] sm:$0xff] %vm670_vm3, %v10821_v24 }
 0x5c7 PF: > { %s15_s14 = sadd.s32 1, %s14070_s14   ;;  %s22220_s12 = smov %s14066_s13 }
 0x5c8   : > { %p12_p3 = scmp.ge.s32.totalorder %s15_s14, 4   ;;  %s22221_s13 = smov %s22223_s16 }
 0x5ca   :  { %14 = sbr.rel (!%p12_p3) target bundleno = 3 (0x3), region = 90 }
 0x5cf   :  { %10902 = vsyncpa [#allocation3], 1 }
 0x5d0   :  { %10904 = vsyncpa [#allocation3 + $0x1], 1 }
 0x5d1   :  { %10905 = vsyncpa [#allocation5], 1 }

</bundles_post_ra>
